<compile_context>
chip_gen: v7x
topology: tpu7x:2x2x1
jax: 0.10.0
libtpu: 0.0.40
codegen_flags: <defaults>
</compile_context>

<pallas_src>
import functools
import math
from collections import defaultdict

import jax
import jax.numpy as jnp
from jax.experimental import pallas as pl
from jax.experimental.pallas import tpu as pltpu


# ----------------------------- config helpers (no torch) -----------------------------

def get_width_settings(width, s):
    mapping = defaultdict(lambda: width)
    if s:
        s = s.split(',')
        for ss in s:
            k, v = ss.split(':')
            mapping[int(k)] = int(v)
    return mapping


def parse_layer_string(s):
    layers = []
    for ss in s.split(','):
        if 'x' in ss:
            res, num = ss.split('x')
            layers += [(int(res), None) for _ in range(int(num))]
        elif 'm' in ss:
            res, mixin = [int(a) for a in ss.split('m')]
            layers.append((res, mixin))
        elif 'd' in ss:
            res, down_rate = [int(a) for a in ss.split('d')]
            layers.append((res, down_rate))
        else:
            layers.append((int(ss), None))
    return layers


# ----------------------------------- Pallas kernels -----------------------------------

_INV_SQRT2 = 0.7071067811865476


def _gelu(x):
    # exact (erf) GELU, matching torch.nn.functional.gelu default
    return 0.5 * x * (1.0 + jax.lax.erf(x * _INV_SQRT2))


def _zero_index_map(ndim):
    return lambda n: (0,) * ndim


# ---- fused mapping MLP + all per-block style projections (1 launch per forward) ----

def _map_style_kernel(z_ref, mw_ref, mb_ref, sw_ref, sb_ref, o_ref, *, n_mlp, do_mapping):
    w = z_ref[...].astype(jnp.float32)                                  # (B, D)
    if do_mapping:
        # PixelNorm on the latent, then n_mlp x (Linear + LeakyReLU(0.2))
        w = w * jax.lax.rsqrt(jnp.mean(w * w, axis=-1, keepdims=True) + 1e-8)
        for i in range(n_mlp):
            w = jnp.dot(w, mw_ref[i], preferred_element_type=jnp.float32) + mb_ref[i]
            w = jnp.where(w >= 0.0, w, 0.2 * w)
    # all blocks' AdaIN style projections batched into one matmul
    styles = jnp.dot(w, sw_ref[...], preferred_element_type=jnp.float32) + sb_ref[...]
    o_ref[...] = styles.astype(o_ref.dtype)


def map_style_op(latent, mapping_params, style_w_all, style_b_all, *, do_mapping):
    B, D = latent.shape
    mw = jnp.stack([w for (w, _) in mapping_params])                    # (n_mlp, D, D)
    mb = jnp.stack([b for (_, b) in mapping_params])[:, None, :]        # (n_mlp, 1, D)
    sb = style_b_all[None, :]                                           # (1, T)
    T = style_w_all.shape[1]
    kernel = functools.partial(_map_style_kernel, n_mlp=len(mapping_params),
                               do_mapping=do_mapping)
    return pl.pallas_call(
        kernel,
        out_shape=jax.ShapeDtypeStruct((B, T), jnp.float32),
        grid=(1,),
        in_specs=[pl.BlockSpec((B, D), lambda i: (0, 0)),
                  pl.BlockSpec(mw.shape, lambda i: (0, 0, 0)),
                  pl.BlockSpec(mb.shape, lambda i: (0, 0, 0)),
                  pl.BlockSpec(style_w_all.shape, lambda i: (0, 0)),
                  pl.BlockSpec(sb.shape, lambda i: (0, 0))],
        out_specs=pl.BlockSpec((B, T), lambda i: (0, 0)),
    )(latent, mw, mb, style_w_all, sb)


# ---- fused decoder block: [upsample] -> AdaIN -> c1 -> c2(3x3) -> c3(3x3) -> c4 ----
# ---- -> residual -> [final 1x1 output projection]                              ----

def _dec_block_kernel(*refs, H, W, Wp, C, cw, has_mixin, has_proj):
    o_ref, pad_ref, cmp_ref = refs[-3], refs[-2], refs[-1]
    ins = refs[:-3]
    x_ref, g_ref, b_ref = ins[0], ins[1], ins[2]
    k = 3
    up_ref = None
    if has_mixin:
        up_ref = ins[k]
        k += 1
    c1w, c1b, c2w, c2b, c3w, c3b, c4w, c4b = ins[k:k + 8]
    k += 8
    if has_proj:
        ow, ob = ins[k], ins[k + 1]

    M = H * Wp                                # "wide" row count (W..Wp-1 cols are unused)

    x = x_ref[0].astype(jnp.float32)                                    # (HW_in, C)
    if has_mixin:
        # nearest-neighbour upsample as an exact one-hot matmul, kept in VMEM
        x = jnp.dot(up_ref[...], x, preferred_element_type=jnp.float32)  # (HW, C)

    # NoiseInjection skipped: noise is None and its weight is zero-init => exact identity.

    # --- AdaIN: InstanceNorm2d (biased var, eps=1e-5) + per-(sample, channel) affine ---
    mean = jnp.mean(x, axis=0, keepdims=True)
    var = jnp.mean(jnp.square(x - mean), axis=0, keepdims=True)
    xs = g_ref[0] * ((x - mean) * jax.lax.rsqrt(var + 1e-5)) + b_ref[0]  # (HW, C)

    # --- c1: gelu -> 1x1 ---
    h = jnp.dot(_gelu(xs), c1w[...], preferred_element_type=jnp.float32) + c1b[...]  # (HW, cw)

    def conv3x3(row_fn, w_ref, bias_ref):
        """3x3 'same' conv.  row_fn(r) -> (W, cw) gelu'd valid row r.  Returns the
        'wide' (H*Wp, cw) output; columns >= W of each row are wrap-around garbage
        that is never consumed and never leaves VMEM."""
        # zero-padding built in VMEM scratch (no jnp.pad / HBM copy)
        pad_ref[...] = jnp.zeros_like(pad_ref)
        for r in range(H):
            pad_ref[pl.ds((r + 1) * Wp + 1, W), :] = row_fn(r)
        xp = pad_ref[...]
        acc = jnp.dot(xp[0:M, :], w_ref[0, 0], preferred_element_type=jnp.float32)
        for dy in range(3):
            for dx in range(3):
                if dy == 0 and dx == 0:
                    continue
                off = dy * Wp + dx
                acc = acc + jnp.dot(xp[off:off + M, :], w_ref[dy, dx],
                                    preferred_element_type=jnp.float32)
        return acc + bias_ref[...]

    h1g = _gelu(h)
    h2 = conv3x3(lambda r: h1g[r * W:(r + 1) * W, :], c2w, c2b)          # wide (M, cw)
    h2g = _gelu(h2)
    h3 = conv3x3(lambda r: h2g[r * Wp:r * Wp + W, :], c3w, c3b)          # wide (M, cw)

    # compact the valid columns (drop wrap-around columns inside VMEM)
    for r in range(H):
        cmp_ref[pl.ds(r * W, W), :] = h3[r * Wp:r * Wp + W, :]
    h3c = cmp_ref[...]                                                   # (HW, cw)

    # --- c4: gelu -> 1x1, then residual around the AdaIN output ---
    h4 = jnp.dot(_gelu(h3c), c4w[...], preferred_element_type=jnp.float32) + c4b[...]
    out = xs + h4                                                        # (HW, C)

    if has_proj:
        # final 1x1 conv with gain/bias folded into (ow, ob)
        out = jnp.dot(out, ow[...], preferred_element_type=jnp.float32) + ob[...]

    o_ref[0] = out.astype(o_ref.dtype)


def _nearest_upsample_matrix(hin, win, f):
    """One-hot (hout*wout, hin*win) matrix for F.interpolate(mode='nearest', scale=f)."""
    hout, wout = hin * f, win * f
    rows = jnp.arange(hout * wout)
    src = (rows // wout // f) * win + (rows % wout) // f
    return (src[:, None] == jnp.arange(hin * win)[None, :]).astype(jnp.float32)


def dec_block_op(x, gamma, beta, bp, *, res, mixin, cur_res, out_w=None, out_b=None):
    """x: (B, HW_in, C) channels-last flattened activation.  Returns (B, res*res, C)
    or (B, res*res, image_channels) when the final output projection is fused."""
    B, HWin, C = x.shape
    assert res > 2, "use_3x3=False (res<=2) Block variant not implemented"  # TODO(synk)
    assert HWin == cur_res * cur_res and gamma.shape[-1] == C
    Hh = Ww = res
    HW = Hh * Ww
    cw = bp['c1_w'].shape[1]
    Wp = ((Ww + 2 + 7) // 8) * 8            # padded row stride, rounded to 8 sublanes
    Lp = (Hh + 3) * Wp
    has_mixin = mixin is not None
    has_proj = out_w is not None
    Cout = out_w.shape[1] if has_proj else C

    inputs = [x, gamma, beta]
    in_specs = [pl.BlockSpec((1, HWin, C), lambda n: (n, 0, 0)),
                pl.BlockSpec((1, 1, C), lambda n: (n, 0, 0)),
                pl.BlockSpec((1, 1, C), lambda n: (n, 0, 0))]
    if has_mixin:
        f = res // mixin
        assert cur_res * f == res
        U = _nearest_upsample_matrix(cur_res, cur_res, f)               # (HW, HW_in)
        inputs.append(U)
        in_specs.append(pl.BlockSpec(U.shape, lambda n: (0, 0)))

    weights = [bp['c1_w'], bp['c1_b'][None, :],
               bp['c2_w'], bp['c2_b'][None, :],
               bp['c3_w'], bp['c3_b'][None, :],
               bp['c4_w'], bp['c4_b'][None, :]]
    if has_proj:
        weights += [out_w, out_b[None, :]]
    for a in weights:
        inputs.append(a)
        in_specs.append(pl.BlockSpec(a.shape, _zero_index_map(a.ndim)))

    kernel = functools.partial(_dec_block_kernel, H=Hh, W=Ww, Wp=Wp, C=C, cw=cw,
                               has_mixin=has_mixin, has_proj=has_proj)
    # TODO(synk): for much larger widths/resolutions, tile the per-sample block over
    # spatial rows (v7x has 64 MiB VMEM); at this config everything fits trivially.
    return pl.pallas_call(
        kernel,
        out_shape=jax.ShapeDtypeStruct((B, HW, Cout), x.dtype),
        grid=(B,),
        in_specs=in_specs,
        out_specs=pl.BlockSpec((1, HW, Cout), lambda n: (n, 0, 0)),
        scratch_shapes=[pltpu.VMEM((Lp, cw), jnp.float32),
                        pltpu.VMEM((HW, cw), jnp.float32)],
        compiler_params=pltpu.CompilerParams(dimension_semantics=("parallel",)),
    )(*inputs)


# --------------------------------- parameters & model ---------------------------------

H_CFG = dict(
    latent_dim=32,
    n_mpl=2,
    width=16,
    custom_width_str='',
    bottleneck_multiple=0.25,
    dec_blocks='4x1,8m4,8x1',
    max_hierarchy=8,
    image_channels=3,
)


def init_params(key, H):
    widths = get_width_settings(H['width'], H['custom_width_str'])
    blocks = parse_layer_string(H['dec_blocks'])
    n_blocks = len(blocks)
    keys = iter(jax.random.split(key, 512))

    def nrm(shape, scale):
        return (scale * jax.random.normal(next(keys), shape)).astype(jnp.float32)

    D = H['latent_dim']
    params = {}
    # mapping network: n_mpl x (Linear + LeakyReLU), pixelnorm fused into the kernel
    params['mapping'] = [(nrm((D, D), 1.0 / math.sqrt(D)), jnp.zeros((D,), jnp.float32))
                         for _ in range(H['n_mpl'])]
    first_res = sorted({r for r, _ in blocks})[0]
    params['constant'] = jax.random.normal(next(keys),
                                           (1, widths[first_res], first_res, first_res)
                                           ).astype(jnp.float32)
    cw = int(H['width'] * H['bottleneck_multiple'])
    bps = []
    for (res, mixin) in blocks:
        Cw = widths[res]
        bp = dict(
            # NoiseInjection weight kept for fidelity; zero-init + noise=None => identity,
            # so the forward pass skips it entirely.
            noise_w=jnp.zeros((Cw,), jnp.float32),
            style_w=nrm((D, 2 * Cw), 1.0 / math.sqrt(D)),
            style_b=jnp.concatenate([jnp.ones((Cw,)), jnp.zeros((Cw,))]).astype(jnp.float32),
            c1_w=nrm((Cw, cw), 1.0 / math.sqrt(Cw)),      c1_b=jnp.zeros((cw,), jnp.float32),
            c2_w=nrm((3, 3, cw, cw), 1.0 / math.sqrt(9 * cw)), c2_b=jnp.zeros((cw,), jnp.float32),
            c3_w=nrm((3, 3, cw, cw), 1.0 / math.sqrt(9 * cw)), c3_b=jnp.zeros((cw,), jnp.float32),
            c4_w=nrm((cw, Cw), 1.0 / math.sqrt(cw)) * math.sqrt(1.0 / n_blocks),
            c4_b=jnp.zeros((Cw,), jnp.float32),
        )
        bps.append(bp)
    params['blocks'] = bps
    params['out_w'] = nrm((H['width'], H['image_channels']), 1.0 / math.sqrt(H['width']))
    params['out_b'] = jnp.zeros((H['image_channels'],), jnp.float32)
    params['gain'] = jnp.ones((H['image_channels'],), jnp.float32)
    params['bias'] = jnp.zeros((H['image_channels'],), jnp.float32)
    return params


def decoder_forward(params, H, latent_code, spatial_noise=None, input_is_w=False):
    B = latent_code.shape[0]
    blocks = parse_layer_string(H['dec_blocks'])
    widths = get_width_settings(H['width'], H['custom_width_str'])
    n_blocks = len(blocks)

    # one fused launch: mapping MLP (pixelnorm + n_mlp Linear/LeakyReLU) + every
    # block's AdaIN style projection (gamma|beta), concatenated along the output dim
    sw_all = jnp.concatenate([bp['style_w'] for bp in params['blocks']], axis=1)
    sb_all = jnp.concatenate([bp['style_b'] for bp in params['blocks']])
    styles = map_style_op(latent_code, params['mapping'], sw_all, sb_all,
                          do_mapping=not input_is_w)                    # (B, sum 2*C_b)

    # constant.repeat(B,1,1,1), NCHW -> channels-last flattened (B, HW, C)
    const = params['constant']
    first_res = const.shape[-1]
    C0 = const.shape[1]
    x = jnp.broadcast_to(const, (B,) + const.shape[1:])
    x = jnp.transpose(x, (0, 2, 3, 1)).reshape(B, first_res * first_res, C0)

    cur_res = first_res
    soff = 0
    for idx, (res, mixin) in enumerate(blocks):
        bp = params['blocks'][idx]
        Cw = widths[res]
        gamma = styles[:, soff:soff + Cw].reshape(B, 1, Cw)
        beta = styles[:, soff + Cw:soff + 2 * Cw].reshape(B, 1, Cw)
        soff += 2 * Cw
        if idx == n_blocks - 1:
            # final 1x1 conv; per-channel gain/bias folded exactly into its weights
            ow = params['out_w'] * params['gain'][None, :]
            ob = params['out_b'] * params['gain'] + params['bias']
        else:
            ow = ob = None
        x = dec_block_op(x, gamma, beta, bp, res=res, mixin=mixin,
                         cur_res=cur_res, out_w=ow, out_b=ob)
        cur_res = res

    y = x.reshape(B, cur_res, cur_res, x.shape[-1])
    return jnp.transpose(y, (0, 3, 1, 2))                               # back to NCHW


# ----------------------------------------- main -----------------------------------------

if __name__ == "__main__":
    key = jax.random.PRNGKey(0)
    k_params, k_latent = jax.random.split(key)
    params = init_params(k_params, H_CFG)
    latent = jax.random.normal(k_latent, (2, H_CFG['latent_dim'])).astype(jnp.float32)

    fwd = jax.jit(lambda p, z: decoder_forward(p, H_CFG, z, spatial_noise=None,
                                               input_is_w=False))
    out = jax.block_until_ready(fwd(params, latent))

    final_res = parse_layer_string(H_CFG['dec_blocks'])[-1][0]
    assert out.shape == (2, H_CFG['image_channels'], final_res, final_res), out.shape
    assert bool(jnp.all(jnp.isfinite(out)))
    print("KERNEL_OK")
</pallas_src>

<mosaic_0001>
module attributes {stable_mosaic.version = 11 : i64} {
  func.func @_map_style_kernel(%arg0: i32, %arg1: memref<2x32xf32, #tpu.memory_space<vmem>>, %arg2: memref<2x32x32xf32, #tpu.memory_space<vmem>>, %arg3: memref<2x1x32xf32, #tpu.memory_space<vmem>>, %arg4: memref<32x96xf32, #tpu.memory_space<vmem>>, %arg5: memref<1x96xf32, #tpu.memory_space<vmem>>, %arg6: memref<2x96xf32, #tpu.memory_space<vmem>>) attributes {dimension_semantics = [#tpu.dimension_semantics<arbitrary>], iteration_bounds = array<i64: 1>, scalar_prefetch = 0 : i64, scratch_operands = 0 : i64, tpu.core_type = #tpu.core_type<tc>, window_params = [{pipeline_mode = #tpu.pipeline_mode<synchronous>, transform_indices = @transform_0, window_bounds = array<i64: 2, 32>}, {pipeline_mode = #tpu.pipeline_mode<synchronous>, transform_indices = @transform_1, window_bounds = array<i64: 2, 32, 32>}, {pipeline_mode = #tpu.pipeline_mode<synchronous>, transform_indices = @transform_2, window_bounds = array<i64: 2, 1, 32>}, {pipeline_mode = #tpu.pipeline_mode<synchronous>, transform_indices = @transform_3, window_bounds = array<i64: 32, 96>}, {pipeline_mode = #tpu.pipeline_mode<synchronous>, transform_indices = @transform_4, window_bounds = array<i64: 1, 96>}, {pipeline_mode = #tpu.pipeline_mode<synchronous>, transform_indices = @transform_5, window_bounds = array<i64: 2, 96>}]} {
    %c0 = arith.constant 0 : index
    %c0_0 = arith.constant 0 : index
    %0 = vector.load %arg1[%c0, %c0_0] : memref<2x32xf32, #tpu.memory_space<vmem>>, vector<2x32xf32>
    %1 = arith.mulf %0, %0 : vector<2x32xf32>
    %cst = arith.constant dense<0.000000e+00> : vector<2xf32>
    %2 = vector.multi_reduction <add>, %1, %cst [1] : vector<2x32xf32> to vector<2xf32>
    %3 = vector.shape_cast %2 : vector<2xf32> to vector<2x1xf32>
    %cst_1 = arith.constant 3.200000e+01 : f32
    %4 = vector.broadcast %cst_1 : f32 to vector<2x1xf32>
    %5 = arith.divf %3, %4 : vector<2x1xf32>
    %cst_2 = arith.constant 9.99999993E-9 : f32
    %6 = vector.broadcast %cst_2 : f32 to vector<2x1xf32>
    %7 = arith.addf %5, %6 : vector<2x1xf32>
    %8 = math.rsqrt %7 : vector<2x1xf32>
    %9 = vector.broadcast %8 : vector<2x1xf32> to vector<2x32xf32>
    %10 = arith.mulf %0, %9 : vector<2x32xf32>
    %c0_3 = arith.constant 0 : index
    %c0_4 = arith.constant 0 : index
    %c0_5 = arith.constant 0 : index
    %11 = vector.load %arg2[%c0_3, %c0_4, %c0_5] : memref<2x32x32xf32, #tpu.memory_space<vmem>>, vector<1x32x32xf32>
    %12 = vector.shape_cast %11 : vector<1x32x32xf32> to vector<32x32xf32>
    %cst_6 = arith.constant dense<0.000000e+00> : vector<2x32xf32>
    %13 = tpu.matmul %10, %12, %cst_6 {dimension_numbers = #tpu.dot_dimension_numbers<[1], [0], [0], [1], [0, 0, 1, 1], [], []>} : vector<2x32xf32>, vector<32x32xf32>, vector<2x32xf32> -> vector<2x32xf32>
    %c0_7 = arith.constant 0 : index
    %c0_8 = arith.constant 0 : index
    %c0_9 = arith.constant 0 : index
    %14 = vector.load %arg3[%c0_7, %c0_8, %c0_9] : memref<2x1x32xf32, #tpu.memory_space<vmem>>, vector<1x1x32xf32>
    %15 = vector.shape_cast %14 : vector<1x1x32xf32> to vector<1x32xf32>
    %16 = vector.broadcast %15 : vector<1x32xf32> to vector<2x32xf32>
    %17 = arith.addf %13, %16 : vector<2x32xf32>
    %cst_10 = arith.constant 0.000000e+00 : f32
    %18 = vector.broadcast %cst_10 : f32 to vector<2x32xf32>
    %19 = arith.cmpf oge, %17, %18 : vector<2x32xf32>
    %cst_11 = arith.constant 2.000000e-01 : f32
    %20 = vector.broadcast %cst_11 : f32 to vector<2x32xf32>
    %21 = arith.mulf %20, %17 : vector<2x32xf32>
    %22 = arith.select %19, %17, %21 : vector<2x32xi1>, vector<2x32xf32>
    %c1 = arith.constant 1 : index
    %c0_12 = arith.constant 0 : index
    %c0_13 = arith.constant 0 : index
    %23 = vector.load %arg2[%c1, %c0_12, %c0_13] : memref<2x32x32xf32, #tpu.memory_space<vmem>>, vector<1x32x32xf32>
    %24 = vector.shape_cast %23 : vector<1x32x32xf32> to vector<32x32xf32>
    %cst_14 = arith.constant dense<0.000000e+00> : vector<2x32xf32>
    %25 = tpu.matmul %22, %24, %cst_14 {dimension_numbers = #tpu.dot_dimension_numbers<[1], [0], [0], [1], [0, 0, 1, 1], [], []>} : vector<2x32xf32>, vector<32x32xf32>, vector<2x32xf32> -> vector<2x32xf32>
    %c1_15 = arith.constant 1 : index
    %c0_16 = arith.constant 0 : index
    %c0_17 = arith.constant 0 : index
    %26 = vector.load %arg3[%c1_15, %c0_16, %c0_17] : memref<2x1x32xf32, #tpu.memory_space<vmem>>, vector<1x1x32xf32>
    %27 = vector.shape_cast %26 : vector<1x1x32xf32> to vector<1x32xf32>
    %28 = vector.broadcast %27 : vector<1x32xf32> to vector<2x32xf32>
    %29 = arith.addf %25, %28 : vector<2x32xf32>
    %cst_18 = arith.constant 0.000000e+00 : f32
    %30 = vector.broadcast %cst_18 : f32 to vector<2x32xf32>
    %31 = arith.cmpf oge, %29, %30 : vector<2x32xf32>
    %cst_19 = arith.constant 2.000000e-01 : f32
    %32 = vector.broadcast %cst_19 : f32 to vector<2x32xf32>
    %33 = arith.mulf %32, %29 : vector<2x32xf32>
    %34 = arith.select %31, %29, %33 : vector<2x32xi1>, vector<2x32xf32>
    %c0_20 = arith.constant 0 : index
    %c0_21 = arith.constant 0 : index
    %35 = vector.load %arg4[%c0_20, %c0_21] : memref<32x96xf32, #tpu.memory_space<vmem>>, vector<32x96xf32>
    %cst_22 = arith.constant dense<0.000000e+00> : vector<2x96xf32>
    %36 = tpu.matmul %34, %35, %cst_22 {dimension_numbers = #tpu.dot_dimension_numbers<[1], [0], [0], [1], [0, 0, 1, 1], [], []>} : vector<2x32xf32>, vector<32x96xf32>, vector<2x96xf32> -> vector<2x96xf32>
    %c0_23 = arith.constant 0 : index
    %c0_24 = arith.constant 0 : index
    %37 = vector.load %arg5[%c0_23, %c0_24] : memref<1x96xf32, #tpu.memory_space<vmem>>, vector<1x96xf32>
    %38 = vector.broadcast %37 : vector<1x96xf32> to vector<2x96xf32>
    %39 = arith.addf %36, %38 : vector<2x96xf32>
    %c0_25 = arith.constant 0 : index
    %c0_26 = arith.constant 0 : index
    %40 = vector.load %arg6[%c0_25, %c0_26] : memref<2x96xf32, #tpu.memory_space<vmem>>, vector<2x96xf32>
    tpu.vector_store %arg6[%c0_25, %c0_26], %39 {strides = array<i32>} : memref<2x96xf32, #tpu.memory_space<vmem>>, vector<2x96xf32>,
    return
  }
  func.func @transform_0(%arg0: i32) -> (i32, i32) {
    %c0_i32 = arith.constant 0 : i32
    %c0_i32_0 = arith.constant 0 : i32
    %c0_i32_1 = arith.constant 0 : i32
    return %c0_i32, %c0_i32_0 : i32, i32
  }
  func.func @transform_1(%arg0: i32) -> (i32, i32, i32) {
    %c0_i32 = arith.constant 0 : i32
    %c0_i32_0 = arith.constant 0 : i32
    %c0_i32_1 = arith.constant 0 : i32
    %c0_i32_2 = arith.constant 0 : i32
    return %c0_i32, %c0_i32_0, %c0_i32_1 : i32, i32, i32
  }
  func.func @transform_2(%arg0: i32) -> (i32, i32, i32) {
    %c0_i32 = arith.constant 0 : i32
    %c0_i32_0 = arith.constant 0 : i32
    %c0_i32_1 = arith.constant 0 : i32
    %c0_i32_2 = arith.constant 0 : i32
    return %c0_i32, %c0_i32_0, %c0_i32_1 : i32, i32, i32
  }
  func.func @transform_3(%arg0: i32) -> (i32, i32) {
    %c0_i32 = arith.constant 0 : i32
    %c0_i32_0 = arith.constant 0 : i32
    %c0_i32_1 = arith.constant 0 : i32
    return %c0_i32, %c0_i32_0 : i32, i32
  }
  func.func @transform_4(%arg0: i32) -> (i32, i32) {
    %c0_i32 = arith.constant 0 : i32
    %c0_i32_0 = arith.constant 0 : i32
    %c0_i32_1 = arith.constant 0 : i32
    return %c0_i32, %c0_i32_0 : i32, i32
  }
  func.func @transform_5(%arg0: i32) -> (i32, i32) {
    %c0_i32 = arith.constant 0 : i32
    %c0_i32_0 = arith.constant 0 : i32
    %c0_i32_1 = arith.constant 0 : i32
    return %c0_i32, %c0_i32_0 : i32, i32
  }
}

module attributes {stable_mosaic.version = 11 : i64} {
  func.func @_dec_block_kernel(%arg0: i32, %arg1: memref<1x16x16xf32, #tpu.memory_space<vmem>>, %arg2: memref<1x1x16xf32, #tpu.memory_space<vmem>>, %arg3: memref<1x1x16xf32, #tpu.memory_space<vmem>>, %arg4: memref<16x4xf32, #tpu.memory_space<vmem>>, %arg5: memref<1x4xf32, #tpu.memory_space<vmem>>, %arg6: memref<3x3x4x4xf32, #tpu.memory_space<vmem>>, %arg7: memref<1x4xf32, #tpu.memory_space<vmem>>, %arg8: memref<3x3x4x4xf32, #tpu.memory_space<vmem>>, %arg9: memref<1x4xf32, #tpu.memory_space<vmem>>, %arg10: memref<4x16xf32, #tpu.memory_space<vmem>>, %arg11: memref<1x16xf32, #tpu.memory_space<vmem>>, %arg12: memref<1x16x16xf32, #tpu.memory_space<vmem>>, %arg13: memref<56x4xf32, #tpu.memory_space<vmem>>, %arg14: memref<16x4xf32, #tpu.memory_space<vmem>>) attributes {dimension_semantics = [#tpu.dimension_semantics<parallel>], iteration_bounds = array<i64: 2>, scalar_prefetch = 0 : i64, scratch_operands = 2 : i64, tpu.core_type = #tpu.core_type<tc>, window_params = [{transform_indices = @transform_0, window_bounds = array<i64: 1, 16, 16>}, {transform_indices = @transform_1, window_bounds = array<i64: 1, 1, 16>}, {transform_indices = @transform_2, window_bounds = array<i64: 1, 1, 16>}, {pipeline_mode = #tpu.pipeline_mode<synchronous>, transform_indices = @transform_3, window_bounds = array<i64: 16, 4>}, {pipeline_mode = #tpu.pipeline_mode<synchronous>, transform_indices = @transform_4, window_bounds = array<i64: 1, 4>}, {pipeline_mode = #tpu.pipeline_mode<synchronous>, transform_indices = @transform_5, window_bounds = array<i64: 3, 3, 4, 4>}, {pipeline_mode = #tpu.pipeline_mode<synchronous>, transform_indices = @transform_6, window_bounds = array<i64: 1, 4>}, {pipeline_mode = #tpu.pipeline_mode<synchronous>, transform_indices = @transform_7, window_bounds = array<i64: 3, 3, 4, 4>}, {pipeline_mode = #tpu.pipeline_mode<synchronous>, transform_indices = @transform_8, window_bounds = array<i64: 1, 4>}, {pipeline_mode = #tpu.pipeline_mode<synchronous>, transform_indices = @transform_9, window_bounds = array<i64: 4, 16>}, {pipeline_mode = #tpu.pipeline_mode<synchronous>, transform_indices = @transform_10, window_bounds = array<i64: 1, 16>}, {transform_indices = @transform_11, window_bounds = array<i64: 1, 16, 16>}]} {
    %c0 = arith.constant 0 : index
    %c0_0 = arith.constant 0 : index
    %c0_1 = arith.constant 0 : index
    %0 = vector.load %arg1[%c0, %c0_0, %c0_1] : memref<1x16x16xf32, #tpu.memory_space<vmem>>, vector<1x16x16xf32>
    %1 = vector.shape_cast %0 : vector<1x16x16xf32> to vector<16x16xf32>
    %cst = arith.constant dense<0.000000e+00> : vector<16xf32>
    %2 = vector.multi_reduction <add>, %1, %cst [0] : vector<16x16xf32> to vector<16xf32>
    %3 = vector.shape_cast %2 : vector<16xf32> to vector<1x16xf32>
    %cst_2 = arith.constant 1.600000e+01 : f32
    %4 = vector.broadcast %cst_2 : f32 to vector<1x16xf32>
    %5 = arith.divf %3, %4 : vector<1x16xf32>
    %6 = vector.broadcast %5 : vector<1x16xf32> to vector<16x16xf32>
    %7 = arith.subf %1, %6 : vector<16x16xf32>
    %8 = arith.mulf %7, %7 : vector<16x16xf32>
    %cst_3 = arith.constant dense<0.000000e+00> : vector<16xf32>
    %9 = vector.multi_reduction <add>, %8, %cst_3 [0] : vector<16x16xf32> to vector<16xf32>
    %10 = vector.shape_cast %9 : vector<16xf32> to vector<1x16xf32>
    %cst_4 = arith.constant 1.600000e+01 : f32
    %11 = vector.broadcast %cst_4 : f32 to vector<1x16xf32>
    %12 = arith.divf %10, %11 : vector<1x16xf32>
    %c0_5 = arith.constant 0 : index
    %c0_6 = arith.constant 0 : index
    %c0_7 = arith.constant 0 : index
    %13 = vector.load %arg2[%c0_5, %c0_6, %c0_7] : memref<1x1x16xf32, #tpu.memory_space<vmem>>, vector<1x1x16xf32>
    %14 = vector.shape_cast %13 : vector<1x1x16xf32> to vector<1x16xf32>
    %15 = vector.broadcast %5 : vector<1x16xf32> to vector<16x16xf32>
    %16 = arith.subf %1, %15 : vector<16x16xf32>
    %cst_8 = arith.constant 9.99999974E-6 : f32
    %17 = vector.broadcast %cst_8 : f32 to vector<1x16xf32>
    %18 = arith.addf %12, %17 : vector<1x16xf32>
    %19 = math.rsqrt %18 : vector<1x16xf32>
    %20 = vector.broadcast %19 : vector<1x16xf32> to vector<16x16xf32>
    %21 = arith.mulf %16, %20 : vector<16x16xf32>
    %22 = vector.broadcast %14 : vector<1x16xf32> to vector<16x16xf32>
    %23 = arith.mulf %22, %21 : vector<16x16xf32>
    %c0_9 = arith.constant 0 : index
    %c0_10 = arith.constant 0 : index
    %c0_11 = arith.constant 0 : index
    %24 = vector.load %arg3[%c0_9, %c0_10, %c0_11] : memref<1x1x16xf32, #tpu.memory_space<vmem>>, vector<1x1x16xf32>
    %25 = vector.shape_cast %24 : vector<1x1x16xf32> to vector<1x16xf32>
    %26 = vector.broadcast %25 : vector<1x16xf32> to vector<16x16xf32>
    %27 = arith.addf %23, %26 : vector<16x16xf32>
    %cst_12 = arith.constant 5.000000e-01 : f32
    %28 = vector.broadcast %cst_12 : f32 to vector<16x16xf32>
    %29 = arith.mulf %28, %27 : vector<16x16xf32>
    %cst_13 = arith.constant 0.707106769 : f32
    %30 = vector.broadcast %cst_13 : f32 to vector<16x16xf32>
    %31 = arith.mulf %27, %30 : vector<16x16xf32>
    %32 = math.erf %31 : vector<16x16xf32>
    %cst_14 = arith.constant 1.000000e+00 : f32
    %33 = vector.broadcast %cst_14 : f32 to vector<16x16xf32>
    %34 = arith.addf %33, %32 : vector<16x16xf32>
    %35 = arith.mulf %29, %34 : vector<16x16xf32>
    %c0_15 = arith.constant 0 : index
    %c0_16 = arith.constant 0 : index
    %36 = vector.load %arg4[%c0_15, %c0_16] : memref<16x4xf32, #tpu.memory_space<vmem>>, vector<16x4xf32>
    %cst_17 = arith.constant dense<0.000000e+00> : vector<16x4xf32>
    %37 = tpu.matmul %35, %36, %cst_17 {dimension_numbers = #tpu.dot_dimension_numbers<[1], [0], [0], [1], [0, 0, 1, 1], [], []>} : vector<16x16xf32>, vector<16x4xf32>, vector<16x4xf32> -> vector<16x4xf32>
    %c0_18 = arith.constant 0 : index
    %c0_19 = arith.constant 0 : index
    %38 = vector.load %arg5[%c0_18, %c0_19] : memref<1x4xf32, #tpu.memory_space<vmem>>, vector<1x4xf32>
    %39 = vector.broadcast %38 : vector<1x4xf32> to vector<16x4xf32>
    %40 = arith.addf %37, %39 : vector<16x4xf32>
    %cst_20 = arith.constant 5.000000e-01 : f32
    %41 = vector.broadcast %cst_20 : f32 to vector<16x4xf32>
    %42 = arith.mulf %41, %40 : vector<16x4xf32>
    %cst_21 = arith.constant 0.707106769 : f32
    %43 = vector.broadcast %cst_21 : f32 to vector<16x4xf32>
    %44 = arith.mulf %40, %43 : vector<16x4xf32>
    %45 = math.erf %44 : vector<16x4xf32>
    %cst_22 = arith.constant 1.000000e+00 : f32
    %46 = vector.broadcast %cst_22 : f32 to vector<16x4xf32>
    %47 = arith.addf %46, %45 : vector<16x4xf32>
    %48 = arith.mulf %42, %47 : vector<16x4xf32>
    %cst_23 = arith.constant 0.000000e+00 : f32
    %49 = vector.broadcast %cst_23 : f32 to vector<56x4xf32>
    %c0_24 = arith.constant 0 : index
    %c0_25 = arith.constant 0 : index
    %50 = vector.load %arg13[%c0_24, %c0_25] : memref<56x4xf32, #tpu.memory_space<vmem>>, vector<56x4xf32>
    tpu.vector_store %arg13[%c0_24, %c0_25], %49 {strides = array<i32>} : memref<56x4xf32, #tpu.memory_space<vmem>>, vector<56x4xf32>,
    %51 = vector.extract_strided_slice %48 {offsets = [0, 0], sizes = [4, 4], strides = [1, 1]} : vector<16x4xf32> to vector<4x4xf32>
    %c9 = arith.constant 9 : index
    %c0_26 = arith.constant 0 : index
    %52 = vector.load %arg13[%c9, %c0_26] : memref<56x4xf32, #tpu.memory_space<vmem>>, vector<4x4xf32>
    tpu.vector_store %arg13[%c9, %c0_26], %51 {strides = array<i32>} : memref<56x4xf32, #tpu.memory_space<vmem>>, vector<4x4xf32>,
    %53 = vector.extract_strided_slice %48 {offsets = [4, 0], sizes = [4, 4], strides = [1, 1]} : vector<16x4xf32> to vector<4x4xf32>
    %c17 = arith.constant 17 : index
    %c0_27 = arith.constant 0 : index
    %54 = vector.load %arg13[%c17, %c0_27] : memref<56x4xf32, #tpu.memory_space<vmem>>, vector<4x4xf32>
    tpu.vector_store %arg13[%c17, %c0_27], %53 {strides = array<i32>} : memref<56x4xf32, #tpu.memory_space<vmem>>, vector<4x4xf32>,
    %55 = vector.extract_strided_slice %48 {offsets = [8, 0], sizes = [4, 4], strides = [1, 1]} : vector<16x4xf32> to vector<4x4xf32>
    %c25 = arith.constant 25 : index
    %c0_28 = arith.constant 0 : index
    %56 = vector.load %arg13[%c25, %c0_28] : memref<56x4xf32, #tpu.memory_space<vmem>>, vector<4x4xf32>
    tpu.vector_store %arg13[%c25, %c0_28], %55 {strides = array<i32>} : memref<56x4xf32, #tpu.memory_space<vmem>>, vector<4x4xf32>,
    %57 = vector.extract_strided_slice %48 {offsets = [12, 0], sizes = [4, 4], strides = [1, 1]} : vector<16x4xf32> to vector<4x4xf32>
    %c33 = arith.constant 33 : index
    %c0_29 = arith.constant 0 : index
    %58 = vector.load %arg13[%c33, %c0_29] : memref<56x4xf32, #tpu.memory_space<vmem>>, vector<4x4xf32>
    tpu.vector_store %arg13[%c33, %c0_29], %57 {strides = array<i32>} : memref<56x4xf32, #tpu.memory_space<vmem>>, vector<4x4xf32>,
    %c0_30 = arith.constant 0 : index
    %c0_31 = arith.constant 0 : index
    %59 = vector.load %arg13[%c0_30, %c0_31] : memref<56x4xf32, #tpu.memory_space<vmem>>, vector<56x4xf32>
    %60 = vector.extract_strided_slice %59 {offsets = [0, 0], sizes = [32, 4], strides = [1, 1]} : vector<56x4xf32> to vector<32x4xf32>
    %c0_32 = arith.constant 0 : index
    %c0_33 = arith.constant 0 : index
    %c0_34 = arith.constant 0 : index
    %c0_35 = arith.constant 0 : index
    %61 = vector.load %arg6[%c0_32, %c0_33, %c0_34, %c0_35] : memref<3x3x4x4xf32, #tpu.memory_space<vmem>>, vector<1x1x4x4xf32>
    %62 = vector.shape_cast %61 : vector<1x1x4x4xf32> to vector<4x4xf32>
    %cst_36 = arith.constant dense<0.000000e+00> : vector<32x4xf32>
    %63 = tpu.matmul %60, %62, %cst_36 {dimension_numbers = #tpu.dot_dimension_numbers<[1], [0], [0], [1], [0, 0, 1, 1], [], []>} : vector<32x4xf32>, vector<4x4xf32>, vector<32x4xf32> -> vector<32x4xf32>
    %64 = vector.extract_strided_slice %59 {offsets = [1, 0], sizes = [32, 4], strides = [1, 1]} : vector<56x4xf32> to vector<32x4xf32>
    %c0_37 = arith.constant 0 : index
    %c1 = arith.constant 1 : index
    %c0_38 = arith.constant 0 : index
    %c0_39 = arith.constant 0 : index
    %65 = vector.load %arg6[%c0_37, %c1, %c0_38, %c0_39] : memref<3x3x4x4xf32, #tpu.memory_space<vmem>>, vector<1x1x4x4xf32>
    %66 = vector.shape_cast %65 : vector<1x1x4x4xf32> to vector<4x4xf32>
    %cst_40 = arith.constant dense<0.000000e+00> : vector<32x4xf32>
    %67 = tpu.matmul %64, %66, %cst_40 {dimension_numbers = #tpu.dot_dimension_numbers<[1], [0], [0], [1], [0, 0, 1, 1], [], []>} : vector<32x4xf32>, vector<4x4xf32>, vector<32x4xf32> -> vector<32x4xf32>
    %68 = arith.addf %63, %67 : vector<32x4xf32>
    %69 = vector.extract_strided_slice %59 {offsets = [2, 0], sizes = [32, 4], strides = [1, 1]} : vector<56x4xf32> to vector<32x4xf32>
    %c0_41 = arith.constant 0 : index
    %c2 = arith.constant 2 : index
    %c0_42 = arith.constant 0 : index
    %c0_43 = arith.constant 0 : index
    %70 = vector.load %arg6[%c0_41, %c2, %c0_42, %c0_43] : memref<3x3x4x4xf32, #tpu.memory_space<vmem>>, vector<1x1x4x4xf32>
    %71 = vector.shape_cast %70 : vector<1x1x4x4xf32> to vector<4x4xf32>
    %cst_44 = arith.constant dense<0.000000e+00> : vector<32x4xf32>
    %72 = tpu.matmul %69, %71, %cst_44 {dimension_numbers = #tpu.dot_dimension_numbers<[1], [0], [0], [1], [0, 0, 1, 1], [], []>} : vector<32x4xf32>, vector<4x4xf32>, vector<32x4xf32> -> vector<32x4xf32>
    %73 = arith.addf %68, %72 : vector<32x4xf32>
    %74 = vector.extract_strided_slice %59 {offsets = [8, 0], sizes = [32, 4], strides = [1, 1]} : vector<56x4xf32> to vector<32x4xf32>
    %c1_45 = arith.constant 1 : index
    %c0_46 = arith.constant 0 : index
    %c0_47 = arith.constant 0 : index
    %c0_48 = arith.constant 0 : index
    %75 = vector.load %arg6[%c1_45, %c0_46, %c0_47, %c0_48] : memref<3x3x4x4xf32, #tpu.memory_space<vmem>>, vector<1x1x4x4xf32>
    %76 = vector.shape_cast %75 : vector<1x1x4x4xf32> to vector<4x4xf32>
    %cst_49 = arith.constant dense<0.000000e+00> : vector<32x4xf32>
    %77 = tpu.matmul %74, %76, %cst_49 {dimension_numbers = #tpu.dot_dimension_numbers<[1], [0], [0], [1], [0, 0, 1, 1], [], []>} : vector<32x4xf32>, vector<4x4xf32>, vector<32x4xf32> -> vector<32x4xf32>
    %78 = arith.addf %73, %77 : vector<32x4xf32>
    %79 = vector.extract_strided_slice %59 {offsets = [9, 0], sizes = [32, 4], strides = [1, 1]} : vector<56x4xf32> to vector<32x4xf32>
    %c1_50 = arith.constant 1 : index
    %c1_51 = arith.constant 1 : index
    %c0_52 = arith.constant 0 : index
    %c0_53 = arith.constant 0 : index
    %80 = vector.load %arg6[%c1_50, %c1_51, %c0_52, %c0_53] : memref<3x3x4x4xf32, #tpu.memory_space<vmem>>, vector<1x1x4x4xf32>
    %81 = vector.shape_cast %80 : vector<1x1x4x4xf32> to vector<4x4xf32>
    %cst_54 = arith.constant dense<0.000000e+00> : vector<32x4xf32>
    %82 = tpu.matmul %79, %81, %cst_54 {dimension_numbers = #tpu.dot_dimension_numbers<[1], [0], [0], [1], [0, 0, 1, 1], [], []>} : vector<32x4xf32>, vector<4x4xf32>, vector<32x4xf32> -> vector<32x4xf32>
    %83 = arith.addf %78, %82 : vector<32x4xf32>
    %84 = vector.extract_strided_slice %59 {offsets = [10, 0], sizes = [32, 4], strides = [1, 1]} : vector<56x4xf32> to vector<32x4xf32>
    %c1_55 = arith.constant 1 : index
    %c2_56 = arith.constant 2 : index
    %c0_57 = arith.constant 0 : index
    %c0_58 = arith.constant 0 : index
    %85 = vector.load %arg6[%c1_55, %c2_56, %c0_57, %c0_58] : memref<3x3x4x4xf32, #tpu.memory_space<vmem>>, vector<1x1x4x4xf32>
    %86 = vector.shape_cast %85 : vector<1x1x4x4xf32> to vector<4x4xf32>
    %cst_59 = arith.constant dense<0.000000e+00> : vector<32x4xf32>
    %87 = tpu.matmul %84, %86, %cst_59 {dimension_numbers = #tpu.dot_dimension_numbers<[1], [0], [0], [1], [0, 0, 1, 1], [], []>} : vector<32x4xf32>, vector<4x4xf32>, vector<32x4xf32> -> vector<32x4xf32>
    %88 = arith.addf %83, %87 : vector<32x4xf32>
    %89 = vector.extract_strided_slice %59 {offsets = [16, 0], sizes = [32, 4], strides = [1, 1]} : vector<56x4xf32> to vector<32x4xf32>
    %c2_60 = arith.constant 2 : index
    %c0_61 = arith.constant 0 : index
    %c0_62 = arith.constant 0 : index
    %c0_63 = arith.constant 0 : index
    %90 = vector.load %arg6[%c2_60, %c0_61, %c0_62, %c0_63] : memref<3x3x4x4xf32, #tpu.memory_space<vmem>>, vector<1x1x4x4xf32>
    %91 = vector.shape_cast %90 : vector<1x1x4x4xf32> to vector<4x4xf32>
    %cst_64 = arith.constant dense<0.000000e+00> : vector<32x4xf32>
    %92 = tpu.matmul %89, %91, %cst_64 {dimension_numbers = #tpu.dot_dimension_numbers<[1], [0], [0], [1], [0, 0, 1, 1], [], []>} : vector<32x4xf32>, vector<4x4xf32>, vector<32x4xf32> -> vector<32x4xf32>
    %93 = arith.addf %88, %92 : vector<32x4xf32>
    %94 = vector.extract_strided_slice %59 {offsets = [17, 0], sizes = [32, 4], strides = [1, 1]} : vector<56x4xf32> to vector<32x4xf32>
    %c2_65 = arith.constant 2 : index
    %c1_66 = arith.constant 1 : index
    %c0_67 = arith.constant 0 : index
    %c0_68 = arith.constant 0 : index
    %95 = vector.load %arg6[%c2_65, %c1_66, %c0_67, %c0_68] : memref<3x3x4x4xf32, #tpu.memory_space<vmem>>, vector<1x1x4x4xf32>
    %96 = vector.shape_cast %95 : vector<1x1x4x4xf32> to vector<4x4xf32>
    %cst_69 = arith.constant dense<0.000000e+00> : vector<32x4xf32>
    %97 = tpu.matmul %94, %96, %cst_69 {dimension_numbers = #tpu.dot_dimension_numbers<[1], [0], [0], [1], [0, 0, 1, 1], [], []>} : vector<32x4xf32>, vector<4x4xf32>, vector<32x4xf32> -> vector<32x4xf32>
    %98 = arith.addf %93, %97 : vector<32x4xf32>
    %99 = vector.extract_strided_slice %59 {offsets = [18, 0], sizes = [32, 4], strides = [1, 1]} : vector<56x4xf32> to vector<32x4xf32>
    %c2_70 = arith.constant 2 : index
    %c2_71 = arith.constant 2 : index
    %c0_72 = arith.constant 0 : index
    %c0_73 = arith.constant 0 : index
    %100 = vector.load %arg6[%c2_70, %c2_71, %c0_72, %c0_73] : memref<3x3x4x4xf32, #tpu.memory_space<vmem>>, vector<1x1x4x4xf32>
    %101 = vector.shape_cast %100 : vector<1x1x4x4xf32> to vector<4x4xf32>
    %cst_74 = arith.constant dense<0.000000e+00> : vector<32x4xf32>
    %102 = tpu.matmul %99, %101, %cst_74 {dimension_numbers = #tpu.dot_dimension_numbers<[1], [0], [0], [1], [0, 0, 1, 1], [], []>} : vector<32x4xf32>, vector<4x4xf32>, vector<32x4xf32> -> vector<32x4xf32>
    %103 = arith.addf %98, %102 : vector<32x4xf32>
    %c0_75 = arith.constant 0 : index
    %c0_76 = arith.constant 0 : index
    %104 = vector.load %arg7[%c0_75, %c0_76] : memref<1x4xf32, #tpu.memory_space<vmem>>, vector<1x4xf32>
    %105 = vector.broadcast %104 : vector<1x4xf32> to vector<32x4xf32>
    %106 = arith.addf %103, %105 : vector<32x4xf32>
    %cst_77 = arith.constant 5.000000e-01 : f32
    %107 = vector.broadcast %cst_77 : f32 to vector<32x4xf32>
    %108 = arith.mulf %107, %106 : vector<32x4xf32>
    %cst_78 = arith.constant 0.707106769 : f32
    %109 = vector.broadcast %cst_78 : f32 to vector<32x4xf32>
    %110 = arith.mulf %106, %109 : vector<32x4xf32>
    %111 = math.erf %110 : vector<32x4xf32>
    %cst_79 = arith.constant 1.000000e+00 : f32
    %112 = vector.broadcast %cst_79 : f32 to vector<32x4xf32>
    %113 = arith.addf %112, %111 : vector<32x4xf32>
    %114 = arith.mulf %108, %113 : vector<32x4xf32>
    %cst_80 = arith.constant 0.000000e+00 : f32
    %115 = vector.broadcast %cst_80 : f32 to vector<56x4xf32>
    %c0_81 = arith.constant 0 : index
    %c0_82 = arith.constant 0 : index
    %116 = vector.load %arg13[%c0_81, %c0_82] : memref<56x4xf32, #tpu.memory_space<vmem>>, vector<56x4xf32>
    tpu.vector_store %arg13[%c0_81, %c0_82], %115 {strides = array<i32>} : memref<56x4xf32, #tpu.memory_space<vmem>>, vector<56x4xf32>,
    %117 = vector.extract_strided_slice %114 {offsets = [0, 0], sizes = [4, 4], strides = [1, 1]} : vector<32x4xf32> to vector<4x4xf32>
    %c9_83 = arith.constant 9 : index
    %c0_84 = arith.constant 0 : index
    %118 = vector.load %arg13[%c9_83, %c0_84] : memref<56x4xf32, #tpu.memory_space<vmem>>, vector<4x4xf32>
    tpu.vector_store %arg13[%c9_83, %c0_84], %117 {strides = array<i32>} : memref<56x4xf32, #tpu.memory_space<vmem>>, vector<4x4xf32>,
    %119 = vector.extract_strided_slice %114 {offsets = [8, 0], sizes = [4, 4], strides = [1, 1]} : vector<32x4xf32> to vector<4x4xf32>
    %c17_85 = arith.constant 17 : index
    %c0_86 = arith.constant 0 : index
    %120 = vector.load %arg13[%c17_85, %c0_86] : memref<56x4xf32, #tpu.memory_space<vmem>>, vector<4x4xf32>
    tpu.vector_store %arg13[%c17_85, %c0_86], %119 {strides = array<i32>} : memref<56x4xf32, #tpu.memory_space<vmem>>, vector<4x4xf32>,
    %121 = vector.extract_strided_slice %114 {offsets = [16, 0], sizes = [4, 4], strides = [1, 1]} : vector<32x4xf32> to vector<4x4xf32>
    %c25_87 = arith.constant 25 : index
    %c0_88 = arith.constant 0 : index
    %122 = vector.load %arg13[%c25_87, %c0_88] : memref<56x4xf32, #tpu.memory_space<vmem>>, vector<4x4xf32>
    tpu.vector_store %arg13[%c25_87, %c0_88], %121 {strides = array<i32>} : memref<56x4xf32, #tpu.memory_space<vmem>>, vector<4x4xf32>,
    %123 = vector.extract_strided_slice %114 {offsets = [24, 0], sizes = [4, 4], strides = [1, 1]} : vector<32x4xf32> to vector<4x4xf32>
    %c33_89 = arith.constant 33 : index
    %c0_90 = arith.constant 0 : index
    %124 = vector.load %arg13[%c33_89, %c0_90] : memref<56x4xf32, #tpu.memory_space<vmem>>, vector<4x4xf32>
    tpu.vector_store %arg13[%c33_89, %c0_90], %123 {strides = array<i32>} : memref<56x4xf32, #tpu.memory_space<vmem>>, vector<4x4xf32>,
    %c0_91 = arith.constant 0 : index
    %c0_92 = arith.constant 0 : index
    %125 = vector.load %arg13[%c0_91, %c0_92] : memref<56x4xf32, #tpu.memory_space<vmem>>, vector<56x4xf32>
    %126 = vector.extract_strided_slice %125 {offsets = [0, 0], sizes = [32, 4], strides = [1, 1]} : vector<56x4xf32> to vector<32x4xf32>
    %c0_93 = arith.constant 0 : index
    %c0_94 = arith.constant 0 : index
    %c0_95 = arith.constant 0 : index
    %c0_96 = arith.constant 0 : index
    %127 = vector.load %arg8[%c0_93, %c0_94, %c0_95, %c0_96] : memref<3x3x4x4xf32, #tpu.memory_space<vmem>>, vector<1x1x4x4xf32>
    %128 = vector.shape_cast %127 : vector<1x1x4x4xf32> to vector<4x4xf32>
    %cst_97 = arith.constant dense<0.000000e+00> : vector<32x4xf32>
    %129 = tpu.matmul %126, %128, %cst_97 {dimension_numbers = #tpu.dot_dimension_numbers<[1], [0], [0], [1], [0, 0, 1, 1], [], []>} : vector<32x4xf32>, vector<4x4xf32>, vector<32x4xf32> -> vector<32x4xf32>
    %130 = vector.extract_strided_slice %125 {offsets = [1, 0], sizes = [32, 4], strides = [1, 1]} : vector<56x4xf32> to vector<32x4xf32>
    %c0_98 = arith.constant 0 : index
    %c1_99 = arith.constant 1 : index
    %c0_100 = arith.constant 0 : index
    %c0_101 = arith.constant 0 : index
    %131 = vector.load %arg8[%c0_98, %c1_99, %c0_100, %c0_101] : memref<3x3x4x4xf32, #tpu.memory_space<vmem>>, vector<1x1x4x4xf32>
    %132 = vector.shape_cast %131 : vector<1x1x4x4xf32> to vector<4x4xf32>
    %cst_102 = arith.constant dense<0.000000e+00> : vector<32x4xf32>
    %133 = tpu.matmul %130, %132, %cst_102 {dimension_numbers = #tpu.dot_dimension_numbers<[1], [0], [0], [1], [0, 0, 1, 1], [], []>} : vector<32x4xf32>, vector<4x4xf32>, vector<32x4xf32> -> vector<32x4xf32>
    %134 = arith.addf %129, %133 : vector<32x4xf32>
    %135 = vector.extract_strided_slice %125 {offsets = [2, 0], sizes = [32, 4], strides = [1, 1]} : vector<56x4xf32> to vector<32x4xf32>
    %c0_103 = arith.constant 0 : index
    %c2_104 = arith.constant 2 : index
    %c0_105 = arith.constant 0 : index
    %c0_106 = arith.constant 0 : index
    %136 = vector.load %arg8[%c0_103, %c2_104, %c0_105, %c0_106] : memref<3x3x4x4xf32, #tpu.memory_space<vmem>>, vector<1x1x4x4xf32>
    %137 = vector.shape_cast %136 : vector<1x1x4x4xf32> to vector<4x4xf32>
    %cst_107 = arith.constant dense<0.000000e+00> : vector<32x4xf32>
    %138 = tpu.matmul %135, %137, %cst_107 {dimension_numbers = #tpu.dot_dimension_numbers<[1], [0], [0], [1], [0, 0, 1, 1], [], []>} : vector<32x4xf32>, vector<4x4xf32>, vector<32x4xf32> -> vector<32x4xf32>
    %139 = arith.addf %134, %138 : vector<32x4xf32>
    %140 = vector.extract_strided_slice %125 {offsets = [8, 0], sizes = [32, 4], strides = [1, 1]} : vector<56x4xf32> to vector<32x4xf32>
    %c1_108 = arith.constant 1 : index
    %c0_109 = arith.constant 0 : index
    %c0_110 = arith.constant 0 : index
    %c0_111 = arith.constant 0 : index
    %141 = vector.load %arg8[%c1_108, %c0_109, %c0_110, %c0_111] : memref<3x3x4x4xf32, #tpu.memory_space<vmem>>, vector<1x1x4x4xf32>
    %142 = vector.shape_cast %141 : vector<1x1x4x4xf32> to vector<4x4xf32>
    %cst_112 = arith.constant dense<0.000000e+00> : vector<32x4xf32>
    %143 = tpu.matmul %140, %142, %cst_112 {dimension_numbers = #tpu.dot_dimension_numbers<[1], [0], [0], [1], [0, 0, 1, 1], [], []>} : vector<32x4xf32>, vector<4x4xf32>, vector<32x4xf32> -> vector<32x4xf32>
    %144 = arith.addf %139, %143 : vector<32x4xf32>
    %145 = vector.extract_strided_slice %125 {offsets = [9, 0], sizes = [32, 4], strides = [1, 1]} : vector<56x4xf32> to vector<32x4xf32>
    %c1_113 = arith.constant 1 : index
    %c1_114 = arith.constant 1 : index
    %c0_115 = arith.constant 0 : index
    %c0_116 = arith.constant 0 : index
    %146 = vector.load %arg8[%c1_113, %c1_114, %c0_115, %c0_116] : memref<3x3x4x4xf32, #tpu.memory_space<vmem>>, vector<1x1x4x4xf32>
    %147 = vector.shape_cast %146 : vector<1x1x4x4xf32> to vector<4x4xf32>
    %cst_117 = arith.constant dense<0.000000e+00> : vector<32x4xf32>
    %148 = tpu.matmul %145, %147, %cst_117 {dimension_numbers = #tpu.dot_dimension_numbers<[1], [0], [0], [1], [0, 0, 1, 1], [], []>} : vector<32x4xf32>, vector<4x4xf32>, vector<32x4xf32> -> vector<32x4xf32>
    %149 = arith.addf %144, %148 : vector<32x4xf32>
    %150 = vector.extract_strided_slice %125 {offsets = [10, 0], sizes = [32, 4], strides = [1, 1]} : vector<56x4xf32> to vector<32x4xf32>
    %c1_118 = arith.constant 1 : index
    %c2_119 = arith.constant 2 : index
    %c0_120 = arith.constant 0 : index
    %c0_121 = arith.constant 0 : index
    %151 = vector.load %arg8[%c1_118, %c2_119, %c0_120, %c0_121] : memref<3x3x4x4xf32, #tpu.memory_space<vmem>>, vector<1x1x4x4xf32>
    %152 = vector.shape_cast %151 : vector<1x1x4x4xf32> to vector<4x4xf32>
    %cst_122 = arith.constant dense<0.000000e+00> : vector<32x4xf32>
    %153 = tpu.matmul %150, %152, %cst_122 {dimension_numbers = #tpu.dot_dimension_numbers<[1], [0], [0], [1], [0, 0, 1, 1], [], []>} : vector<32x4xf32>, vector<4x4xf32>, vector<32x4xf32> -> vector<32x4xf32>
    %154 = arith.addf %149, %153 : vector<32x4xf32>
    %155 = vector.extract_strided_slice %125 {offsets = [16, 0], sizes = [32, 4], strides = [1, 1]} : vector<56x4xf32> to vector<32x4xf32>
    %c2_123 = arith.constant 2 : index
    %c0_124 = arith.constant 0 : index
    %c0_125 = arith.constant 0 : index
    %c0_126 = arith.constant 0 : index
    %156 = vector.load %arg8[%c2_123, %c0_124, %c0_125, %c0_126] : memref<3x3x4x4xf32, #tpu.memory_space<vmem>>, vector<1x1x4x4xf32>
    %157 = vector.shape_cast %156 : vector<1x1x4x4xf32> to vector<4x4xf32>
    %cst_127 = arith.constant dense<0.000000e+00> : vector<32x4xf32>
    %158 = tpu.matmul %155, %157, %cst_127 {dimension_numbers = #tpu.dot_dimension_numbers<[1], [0], [0], [1], [0, 0, 1, 1], [], []>} : vector<32x4xf32>, vector<4x4xf32>, vector<32x4xf32> -> vector<32x4xf32>
    %159 = arith.addf %154, %158 : vector<32x4xf32>
    %160 = vector.extract_strided_slice %125 {offsets = [17, 0], sizes = [32, 4], strides = [1, 1]} : vector<56x4xf32> to vector<32x4xf32>
    %c2_128 = arith.constant 2 : index
    %c1_129 = arith.constant 1 : index
    %c0_130 = arith.constant 0 : index
    %c0_131 = arith.constant 0 : index
    %161 = vector.load %arg8[%c2_128, %c1_129, %c0_130, %c0_131] : memref<3x3x4x4xf32, #tpu.memory_space<vmem>>, vector<1x1x4x4xf32>
    %162 = vector.shape_cast %161 : vector<1x1x4x4xf32> to vector<4x4xf32>
    %cst_132 = arith.constant dense<0.000000e+00> : vector<32x4xf32>
    %163 = tpu.matmul %160, %162, %cst_132 {dimension_numbers = #tpu.dot_dimension_numbers<[1], [0], [0], [1], [0, 0, 1, 1], [], []>} : vector<32x4xf32>, vector<4x4xf32>, vector<32x4xf32> -> vector<32x4xf32>
    %164 = arith.addf %159, %163 : vector<32x4xf32>
    %165 = vector.extract_strided_slice %125 {offsets = [18, 0], sizes = [32, 4], strides = [1, 1]} : vector<56x4xf32> to vector<32x4xf32>
    %c2_133 = arith.constant 2 : index
    %c2_134 = arith.constant 2 : index
    %c0_135 = arith.constant 0 : index
    %c0_136 = arith.constant 0 : index
    %166 = vector.load %arg8[%c2_133, %c2_134, %c0_135, %c0_136] : memref<3x3x4x4xf32, #tpu.memory_space<vmem>>, vector<1x1x4x4xf32>
    %167 = vector.shape_cast %166 : vector<1x1x4x4xf32> to vector<4x4xf32>
    %cst_137 = arith.constant dense<0.000000e+00> : vector<32x4xf32>
    %168 = tpu.matmul %165, %167, %cst_137 {dimension_numbers = #tpu.dot_dimension_numbers<[1], [0], [0], [1], [0, 0, 1, 1], [], []>} : vector<32x4xf32>, vector<4x4xf32>, vector<32x4xf32> -> vector<32x4xf32>
    %169 = arith.addf %164, %168 : vector<32x4xf32>
    %c0_138 = arith.constant 0 : index
    %c0_139 = arith.constant 0 : index
    %170 = vector.load %arg9[%c0_138, %c0_139] : memref<1x4xf32, #tpu.memory_space<vmem>>, vector<1x4xf32>
    %171 = vector.broadcast %170 : vector<1x4xf32> to vector<32x4xf32>
    %172 = arith.addf %169, %171 : vector<32x4xf32>
    %173 = vector.extract_strided_slice %172 {offsets = [0, 0], sizes = [4, 4], strides = [1, 1]} : vector<32x4xf32> to vector<4x4xf32>
    %c0_140 = arith.constant 0 : index
    %c0_141 = arith.constant 0 : index
    %174 = vector.load %arg14[%c0_140, %c0_141] : memref<16x4xf32, #tpu.memory_space<vmem>>, vector<4x4xf32>
    tpu.vector_store %arg14[%c0_140, %c0_141], %173 {strides = array<i32>} : memref<16x4xf32, #tpu.memory_space<vmem>>, vector<4x4xf32>,
    %175 = vector.extract_strided_slice %172 {offsets = [8, 0], sizes = [4, 4], strides = [1, 1]} : vector<32x4xf32> to vector<4x4xf32>
    %c4 = arith.constant 4 : index
    %c0_142 = arith.constant 0 : index
    %176 = vector.load %arg14[%c4, %c0_142] : memref<16x4xf32, #tpu.memory_space<vmem>>, vector<4x4xf32>
    tpu.vector_store %arg14[%c4, %c0_142], %175 {strides = array<i32>} : memref<16x4xf32, #tpu.memory_space<vmem>>, vector<4x4xf32>,
    %177 = vector.extract_strided_slice %172 {offsets = [16, 0], sizes = [4, 4], strides = [1, 1]} : vector<32x4xf32> to vector<4x4xf32>
    %c8 = arith.constant 8 : index
    %c0_143 = arith.constant 0 : index
    %178 = vector.load %arg14[%c8, %c0_143] : memref<16x4xf32, #tpu.memory_space<vmem>>, vector<4x4xf32>
    tpu.vector_store %arg14[%c8, %c0_143], %177 {strides = array<i32>} : memref<16x4xf32, #tpu.memory_space<vmem>>, vector<4x4xf32>,
    %179 = vector.extract_strided_slice %172 {offsets = [24, 0], sizes = [4, 4], strides = [1, 1]} : vector<32x4xf32> to vector<4x4xf32>
    %c12 = arith.constant 12 : index
    %c0_144 = arith.constant 0 : index
    %180 = vector.load %arg14[%c12, %c0_144] : memref<16x4xf32, #tpu.memory_space<vmem>>, vector<4x4xf32>
    tpu.vector_store %arg14[%c12, %c0_144], %179 {strides = array<i32>} : memref<16x4xf32, #tpu.memory_space<vmem>>, vector<4x4xf32>,
    %c0_145 = arith.constant 0 : index
    %c0_146 = arith.constant 0 : index
    %181 = vector.load %arg14[%c0_145, %c0_146] : memref<16x4xf32, #tpu.memory_space<vmem>>, vector<16x4xf32>
    %cst_147 = arith.constant 5.000000e-01 : f32
    %182 = vector.broadcast %cst_147 : f32 to vector<16x4xf32>
    %183 = arith.mulf %182, %181 : vector<16x4xf32>
    %cst_148 = arith.constant 0.707106769 : f32
    %184 = vector.broadcast %cst_148 : f32 to vector<16x4xf32>
    %185 = arith.mulf %181, %184 : vector<16x4xf32>
    %186 = math.erf %185 : vector<16x4xf32>
    %cst_149 = arith.constant 1.000000e+00 : f32
    %187 = vector.broadcast %cst_149 : f32 to vector<16x4xf32>
    %188 = arith.addf %187, %186 : vector<16x4xf32>
    %189 = arith.mulf %183, %188 : vector<16x4xf32>
    %c0_150 = arith.constant 0 : index
    %c0_151 = arith.constant 0 : index
    %190 = vector.load %arg10[%c0_150, %c0_151] : memref<4x16xf32, #tpu.memory_space<vmem>>, vector<4x16xf32>
    %cst_152 = arith.constant dense<0.000000e+00> : vector<16x16xf32>
    %191 = tpu.matmul %189, %190, %cst_152 {dimension_numbers = #tpu.dot_dimension_numbers<[1], [0], [0], [1], [0, 0, 1, 1], [], []>} : vector<16x4xf32>, vector<4x16xf32>, vector<16x16xf32> -> vector<16x16xf32>
    %c0_153 = arith.constant 0 : index
    %c0_154 = arith.constant 0 : index
    %192 = vector.load %arg11[%c0_153, %c0_154] : memref<1x16xf32, #tpu.memory_space<vmem>>, vector<1x16xf32>
    %193 = vector.broadcast %192 : vector<1x16xf32> to vector<16x16xf32>
    %194 = arith.addf %191, %193 : vector<16x16xf32>
    %195 = arith.addf %27, %194 : vector<16x16xf32>
    %c0_155 = arith.constant 0 : index
    %c0_156 = arith.constant 0 : index
    %c0_157 = arith.constant 0 : index
    %196 = vector.load %arg12[%c0_155, %c0_156, %c0_157] : memref<1x16x16xf32, #tpu.memory_space<vmem>>, vector<1x16x16xf32>
    %197 = vector.shape_cast %196 : vector<1x16x16xf32> to vector<16x16xf32>
    %198 = vector.shape_cast %195 : vector<16x16xf32> to vector<1x16x16xf32>
    tpu.vector_store %arg12[%c0_155, %c0_156, %c0_157], %198 {strides = array<i32>} : memref<1x16x16xf32, #tpu.memory_space<vmem>>, vector<1x16x16xf32>,
    return
  }
  func.func @transform_0(%arg0: i32) -> (i32, i32, i32) {
    %c0_i32 = arith.constant 0 : i32
    %c0_i32_0 = arith.constant 0 : i32
    %c0_i32_1 = arith.constant 0 : i32
    return %arg0, %c0_i32, %c0_i32_0 : i32, i32, i32
  }
  func.func @transform_1(%arg0: i32) -> (i32, i32, i32) {
    %c0_i32 = arith.constant 0 : i32
    %c0_i32_0 = arith.constant 0 : i32
    %c0_i32_1 = arith.constant 0 : i32
    return %arg0, %c0_i32, %c0_i32_0 : i32, i32, i32
  }
  func.func @transform_2(%arg0: i32) -> (i32, i32, i32) {
    %c0_i32 = arith.constant 0 : i32
    %c0_i32_0 = arith.constant 0 : i32
    %c0_i32_1 = arith.constant 0 : i32
    return %arg0, %c0_i32, %c0_i32_0 : i32, i32, i32
  }
  func.func @transform_3(%arg0: i32) -> (i32, i32) {
    %c0_i32 = arith.constant 0 : i32
    %c0_i32_0 = arith.constant 0 : i32
    %c0_i32_1 = arith.constant 0 : i32
    return %c0_i32, %c0_i32_0 : i32, i32
  }
  func.func @transform_4(%arg0: i32) -> (i32, i32) {
    %c0_i32 = arith.constant 0 : i32
    %c0_i32_0 = arith.constant 0 : i32
    %c0_i32_1 = arith.constant 0 : i32
    return %c0_i32, %c0_i32_0 : i32, i32
  }
  func.func @transform_5(%arg0: i32) -> (i32, i32, i32, i32) {
    %c0_i32 = arith.constant 0 : i32
    %c0_i32_0 = arith.constant 0 : i32
    %c0_i32_1 = arith.constant 0 : i32
    %c0_i32_2 = arith.constant 0 : i32
    %c0_i32_3 = arith.constant 0 : i32
    return %c0_i32, %c0_i32_0, %c0_i32_1, %c0_i32_2 : i32, i32, i32, i32
  }
  func.func @transform_6(%arg0: i32) -> (i32, i32) {
    %c0_i32 = arith.constant 0 : i32
    %c0_i32_0 = arith.constant 0 : i32
    %c0_i32_1 = arith.constant 0 : i32
    return %c0_i32, %c0_i32_0 : i32, i32
  }
  func.func @transform_7(%arg0: i32) -> (i32, i32, i32, i32) {
    %c0_i32 = arith.constant 0 : i32
    %c0_i32_0 = arith.constant 0 : i32
    %c0_i32_1 = arith.constant 0 : i32
    %c0_i32_2 = arith.constant 0 : i32
    %c0_i32_3 = arith.constant 0 : i32
    return %c0_i32, %c0_i32_0, %c0_i32_1, %c0_i32_2 : i32, i32, i32, i32
  }
  func.func @transform_8(%arg0: i32) -> (i32, i32) {
    %c0_i32 = arith.constant 0 : i32
    %c0_i32_0 = arith.constant 0 : i32
    %c0_i32_1 = arith.constant 0 : i32
    return %c0_i32, %c0_i32_0 : i32, i32
  }
  func.func @transform_9(%arg0: i32) -> (i32, i32) {
    %c0_i32 = arith.constant 0 : i32
    %c0_i32_0 = arith.constant 0 : i32
    %c0_i32_1 = arith.constant 0 : i32
    return %c0_i32, %c0_i32_0 : i32, i32
  }
  func.func @transform_10(%arg0: i32) -> (i32, i32) {
    %c0_i32 = arith.constant 0 : i32
    %c0_i32_0 = arith.constant 0 : i32
    %c0_i32_1 = arith.constant 0 : i32
    return %c0_i32, %c0_i32_0 : i32, i32
  }
  func.func @transform_11(%arg0: i32) -> (i32, i32, i32) {
    %c0_i32 = arith.constant 0 : i32
    %c0_i32_0 = arith.constant 0 : i32
    %c0_i32_1 = arith.constant 0 : i32
    return %arg0, %c0_i32, %c0_i32_0 : i32, i32, i32
  }
}

module attributes {stable_mosaic.version = 11 : i64} {
  func.func @_dec_block_kernel(%arg0: i32, %arg1: memref<1x16x16xf32, #tpu.memory_space<vmem>>, %arg2: memref<1x1x16xf32, #tpu.memory_space<vmem>>, %arg3: memref<1x1x16xf32, #tpu.memory_space<vmem>>, %arg4: memref<64x16xf32, #tpu.memory_space<vmem>>, %arg5: memref<16x4xf32, #tpu.memory_space<vmem>>, %arg6: memref<1x4xf32, #tpu.memory_space<vmem>>, %arg7: memref<3x3x4x4xf32, #tpu.memory_space<vmem>>, %arg8: memref<1x4xf32, #tpu.memory_space<vmem>>, %arg9: memref<3x3x4x4xf32, #tpu.memory_space<vmem>>, %arg10: memref<1x4xf32, #tpu.memory_space<vmem>>, %arg11: memref<4x16xf32, #tpu.memory_space<vmem>>, %arg12: memref<1x16xf32, #tpu.memory_space<vmem>>, %arg13: memref<1x64x16xf32, #tpu.memory_space<vmem>>, %arg14: memref<176x4xf32, #tpu.memory_space<vmem>>, %arg15: memref<64x4xf32, #tpu.memory_space<vmem>>) attributes {dimension_semantics = [#tpu.dimension_semantics<parallel>], iteration_bounds = array<i64: 2>, scalar_prefetch = 0 : i64, scratch_operands = 2 : i64, tpu.core_type = #tpu.core_type<tc>, window_params = [{transform_indices = @transform_0, window_bounds = array<i64: 1, 16, 16>}, {transform_indices = @transform_1, window_bounds = array<i64: 1, 1, 16>}, {transform_indices = @transform_2, window_bounds = array<i64: 1, 1, 16>}, {pipeline_mode = #tpu.pipeline_mode<synchronous>, transform_indices = @transform_3, window_bounds = array<i64: 64, 16>}, {pipeline_mode = #tpu.pipeline_mode<synchronous>, transform_indices = @transform_4, window_bounds = array<i64: 16, 4>}, {pipeline_mode = #tpu.pipeline_mode<synchronous>, transform_indices = @transform_5, window_bounds = array<i64: 1, 4>}, {pipeline_mode = #tpu.pipeline_mode<synchronous>, transform_indices = @transform_6, window_bounds = array<i64: 3, 3, 4, 4>}, {pipeline_mode = #tpu.pipeline_mode<synchronous>, transform_indices = @transform_7, window_bounds = array<i64: 1, 4>}, {pipeline_mode = #tpu.pipeline_mode<synchronous>, transform_indices = @transform_8, window_bounds = array<i64: 3, 3, 4, 4>}, {pipeline_mode = #tpu.pipeline_mode<synchronous>, transform_indices = @transform_9, window_bounds = array<i64: 1, 4>}, {pipeline_mode = #tpu.pipeline_mode<synchronous>, transform_indices = @transform_10, window_bounds = array<i64: 4, 16>}, {pipeline_mode = #tpu.pipeline_mode<synchronous>, transform_indices = @transform_11, window_bounds = array<i64: 1, 16>}, {transform_indices = @transform_12, window_bounds = array<i64: 1, 64, 16>}]} {
    %c0 = arith.constant 0 : index
    %c0_0 = arith.constant 0 : index
    %c0_1 = arith.constant 0 : index
    %0 = vector.load %arg1[%c0, %c0_0, %c0_1] : memref<1x16x16xf32, #tpu.memory_space<vmem>>, vector<1x16x16xf32>
    %1 = vector.shape_cast %0 : vector<1x16x16xf32> to vector<16x16xf32>
    %c0_2 = arith.constant 0 : index
    %c0_3 = arith.constant 0 : index
    %2 = vector.load %arg4[%c0_2, %c0_3] : memref<64x16xf32, #tpu.memory_space<vmem>>, vector<64x16xf32>
    %cst = arith.constant dense<0.000000e+00> : vector<64x16xf32>
    %3 = tpu.matmul %2, %1, %cst {dimension_numbers = #tpu.dot_dimension_numbers<[1], [0], [0], [1], [0, 0, 1, 1], [], []>} : vector<64x16xf32>, vector<16x16xf32>, vector<64x16xf32> -> vector<64x16xf32>
    %cst_4 = arith.constant dense<0.000000e+00> : vector<16xf32>
    %4 = vector.multi_reduction <add>, %3, %cst_4 [0] : vector<64x16xf32> to vector<16xf32>
    %5 = vector.shape_cast %4 : vector<16xf32> to vector<1x16xf32>
    %cst_5 = arith.constant 6.400000e+01 : f32
    %6 = vector.broadcast %cst_5 : f32 to vector<1x16xf32>
    %7 = arith.divf %5, %6 : vector<1x16xf32>
    %8 = vector.broadcast %7 : vector<1x16xf32> to vector<64x16xf32>
    %9 = arith.subf %3, %8 : vector<64x16xf32>
    %10 = arith.mulf %9, %9 : vector<64x16xf32>
    %cst_6 = arith.constant dense<0.000000e+00> : vector<16xf32>
    %11 = vector.multi_reduction <add>, %10, %cst_6 [0] : vector<64x16xf32> to vector<16xf32>
    %12 = vector.shape_cast %11 : vector<16xf32> to vector<1x16xf32>
    %cst_7 = arith.constant 6.400000e+01 : f32
    %13 = vector.broadcast %cst_7 : f32 to vector<1x16xf32>
    %14 = arith.divf %12, %13 : vector<1x16xf32>
    %c0_8 = arith.constant 0 : index
    %c0_9 = arith.constant 0 : index
    %c0_10 = arith.constant 0 : index
    %15 = vector.load %arg2[%c0_8, %c0_9, %c0_10] : memref<1x1x16xf32, #tpu.memory_space<vmem>>, vector<1x1x16xf32>
    %16 = vector.shape_cast %15 : vector<1x1x16xf32> to vector<1x16xf32>
    %17 = vector.broadcast %7 : vector<1x16xf32> to vector<64x16xf32>
    %18 = arith.subf %3, %17 : vector<64x16xf32>
    %cst_11 = arith.constant 9.99999974E-6 : f32
    %19 = vector.broadcast %cst_11 : f32 to vector<1x16xf32>
    %20 = arith.addf %14, %19 : vector<1x16xf32>
    %21 = math.rsqrt %20 : vector<1x16xf32>
    %22 = vector.broadcast %21 : vector<1x16xf32> to vector<64x16xf32>
    %23 = arith.mulf %18, %22 : vector<64x16xf32>
    %24 = vector.broadcast %16 : vector<1x16xf32> to vector<64x16xf32>
    %25 = arith.mulf %24, %23 : vector<64x16xf32>
    %c0_12 = arith.constant 0 : index
    %c0_13 = arith.constant 0 : index
    %c0_14 = arith.constant 0 : index
    %26 = vector.load %arg3[%c0_12, %c0_13, %c0_14] : memref<1x1x16xf32, #tpu.memory_space<vmem>>, vector<1x1x16xf32>
    %27 = vector.shape_cast %26 : vector<1x1x16xf32> to vector<1x16xf32>
    %28 = vector.broadcast %27 : vector<1x16xf32> to vector<64x16xf32>
    %29 = arith.addf %25, %28 : vector<64x16xf32>
    %cst_15 = arith.constant 5.000000e-01 : f32
    %30 = vector.broadcast %cst_15 : f32 to vector<64x16xf32>
    %31 = arith.mulf %30, %29 : vector<64x16xf32>
    %cst_16 = arith.constant 0.707106769 : f32
    %32 = vector.broadcast %cst_16 : f32 to vector<64x16xf32>
    %33 = arith.mulf %29, %32 : vector<64x16xf32>
    %34 = math.erf %33 : vector<64x16xf32>
    %cst_17 = arith.constant 1.000000e+00 : f32
    %35 = vector.broadcast %cst_17 : f32 to vector<64x16xf32>
    %36 = arith.addf %35, %34 : vector<64x16xf32>
    %37 = arith.mulf %31, %36 : vector<64x16xf32>
    %c0_18 = arith.constant 0 : index
    %c0_19 = arith.constant 0 : index
    %38 = vector.load %arg5[%c0_18, %c0_19] : memref<16x4xf32, #tpu.memory_space<vmem>>, vector<16x4xf32>
    %cst_20 = arith.constant dense<0.000000e+00> : vector<64x4xf32>
    %39 = tpu.matmul %37, %38, %cst_20 {dimension_numbers = #tpu.dot_dimension_numbers<[1], [0], [0], [1], [0, 0, 1, 1], [], []>} : vector<64x16xf32>, vector<16x4xf32>, vector<64x4xf32> -> vector<64x4xf32>
    %c0_21 = arith.constant 0 : index
    %c0_22 = arith.constant 0 : index
    %40 = vector.load %arg6[%c0_21, %c0_22] : memref<1x4xf32, #tpu.memory_space<vmem>>, vector<1x4xf32>
    %41 = vector.broadcast %40 : vector<1x4xf32> to vector<64x4xf32>
    %42 = arith.addf %39, %41 : vector<64x4xf32>
    %cst_23 = arith.constant 5.000000e-01 : f32
    %43 = vector.broadcast %cst_23 : f32 to vector<64x4xf32>
    %44 = arith.mulf %43, %42 : vector<64x4xf32>
    %cst_24 = arith.constant 0.707106769 : f32
    %45 = vector.broadcast %cst_24 : f32 to vector<64x4xf32>
    %46 = arith.mulf %42, %45 : vector<64x4xf32>
    %47 = math.erf %46 : vector<64x4xf32>
    %cst_25 = arith.constant 1.000000e+00 : f32
    %48 = vector.broadcast %cst_25 : f32 to vector<64x4xf32>
    %49 = arith.addf %48, %47 : vector<64x4xf32>
    %50 = arith.mulf %44, %49 : vector<64x4xf32>
    %cst_26 = arith.constant 0.000000e+00 : f32
    %51 = vector.broadcast %cst_26 : f32 to vector<176x4xf32>
    %c0_27 = arith.constant 0 : index
    %c0_28 = arith.constant 0 : index
    %52 = vector.load %arg14[%c0_27, %c0_28] : memref<176x4xf32, #tpu.memory_space<vmem>>, vector<176x4xf32>
    tpu.vector_store %arg14[%c0_27, %c0_28], %51 {strides = array<i32>} : memref<176x4xf32, #tpu.memory_space<vmem>>, vector<176x4xf32>,
    %53 = vector.extract_strided_slice %50 {offsets = [0, 0], sizes = [8, 4], strides = [1, 1]} : vector<64x4xf32> to vector<8x4xf32>
    %c17 = arith.constant 17 : index
    %c0_29 = arith.constant 0 : index
    %54 = vector.load %arg14[%c17, %c0_29] : memref<176x4xf32, #tpu.memory_space<vmem>>, vector<8x4xf32>
    tpu.vector_store %arg14[%c17, %c0_29], %53 {strides = array<i32>} : memref<176x4xf32, #tpu.memory_space<vmem>>, vector<8x4xf32>,
    %55 = vector.extract_strided_slice %50 {offsets = [8, 0], sizes = [8, 4], strides = [1, 1]} : vector<64x4xf32> to vector<8x4xf32>
    %c33 = arith.constant 33 : index
    %c0_30 = arith.constant 0 : index
    %56 = vector.load %arg14[%c33, %c0_30] : memref<176x4xf32, #tpu.memory_space<vmem>>, vector<8x4xf32>
    tpu.vector_store %arg14[%c33, %c0_30], %55 {strides = array<i32>} : memref<176x4xf32, #tpu.memory_space<vmem>>, vector<8x4xf32>,
    %57 = vector.extract_strided_slice %50 {offsets = [16, 0], sizes = [8, 4], strides = [1, 1]} : vector<64x4xf32> to vector<8x4xf32>
    %c49 = arith.constant 49 : index
    %c0_31 = arith.constant 0 : index
    %58 = vector.load %arg14[%c49, %c0_31] : memref<176x4xf32, #tpu.memory_space<vmem>>, vector<8x4xf32>
    tpu.vector_store %arg14[%c49, %c0_31], %57 {strides = array<i32>} : memref<176x4xf32, #tpu.memory_space<vmem>>, vector<8x4xf32>,
    %59 = vector.extract_strided_slice %50 {offsets = [24, 0], sizes = [8, 4], strides = [1, 1]} : vector<64x4xf32> to vector<8x4xf32>
    %c65 = arith.constant 65 : index
    %c0_32 = arith.constant 0 : index
    %60 = vector.load %arg14[%c65, %c0_32] : memref<176x4xf32, #tpu.memory_space<vmem>>, vector<8x4xf32>
    tpu.vector_store %arg14[%c65, %c0_32], %59 {strides = array<i32>} : memref<176x4xf32, #tpu.memory_space<vmem>>, vector<8x4xf32>,
    %61 = vector.extract_strided_slice %50 {offsets = [32, 0], sizes = [8, 4], strides = [1, 1]} : vector<64x4xf32> to vector<8x4xf32>
    %c81 = arith.constant 81 : index
    %c0_33 = arith.constant 0 : index
    %62 = vector.load %arg14[%c81, %c0_33] : memref<176x4xf32, #tpu.memory_space<vmem>>, vector<8x4xf32>
    tpu.vector_store %arg14[%c81, %c0_33], %61 {strides = array<i32>} : memref<176x4xf32, #tpu.memory_space<vmem>>, vector<8x4xf32>,
    %63 = vector.extract_strided_slice %50 {offsets = [40, 0], sizes = [8, 4], strides = [1, 1]} : vector<64x4xf32> to vector<8x4xf32>
    %c97 = arith.constant 97 : index
    %c0_34 = arith.constant 0 : index
    %64 = vector.load %arg14[%c97, %c0_34] : memref<176x4xf32, #tpu.memory_space<vmem>>, vector<8x4xf32>
    tpu.vector_store %arg14[%c97, %c0_34], %63 {strides = array<i32>} : memref<176x4xf32, #tpu.memory_space<vmem>>, vector<8x4xf32>,
    %65 = vector.extract_strided_slice %50 {offsets = [48, 0], sizes = [8, 4], strides = [1, 1]} : vector<64x4xf32> to vector<8x4xf32>
    %c113 = arith.constant 113 : index
    %c0_35 = arith.constant 0 : index
    %66 = vector.load %arg14[%c113, %c0_35] : memref<176x4xf32, #tpu.memory_space<vmem>>, vector<8x4xf32>
    tpu.vector_store %arg14[%c113, %c0_35], %65 {strides = array<i32>} : memref<176x4xf32, #tpu.memory_space<vmem>>, vector<8x4xf32>,
    %67 = vector.extract_strided_slice %50 {offsets = [56, 0], sizes = [8, 4], strides = [1, 1]} : vector<64x4xf32> to vector<8x4xf32>
    %c129 = arith.constant 129 : index
    %c0_36 = arith.constant 0 : index
    %68 = vector.load %arg14[%c129, %c0_36] : memref<176x4xf32, #tpu.memory_space<vmem>>, vector<8x4xf32>
    tpu.vector_store %arg14[%c129, %c0_36], %67 {strides = array<i32>} : memref<176x4xf32, #tpu.memory_space<vmem>>, vector<8x4xf32>,
    %c0_37 = arith.constant 0 : index
    %c0_38 = arith.constant 0 : index
    %69 = vector.load %arg14[%c0_37, %c0_38] : memref<176x4xf32, #tpu.memory_space<vmem>>, vector<176x4xf32>
    %70 = vector.extract_strided_slice %69 {offsets = [0, 0], sizes = [128, 4], strides = [1, 1]} : vector<176x4xf32> to vector<128x4xf32>
    %c0_39 = arith.constant 0 : index
    %c0_40 = arith.constant 0 : index
    %c0_41 = arith.constant 0 : index
    %c0_42 = arith.constant 0 : index
    %71 = vector.load %arg7[%c0_39, %c0_40, %c0_41, %c0_42] : memref<3x3x4x4xf32, #tpu.memory_space<vmem>>, vector<1x1x4x4xf32>
    %72 = vector.shape_cast %71 : vector<1x1x4x4xf32> to vector<4x4xf32>
    %cst_43 = arith.constant dense<0.000000e+00> : vector<128x4xf32>
    %73 = tpu.matmul %70, %72, %cst_43 {dimension_numbers = #tpu.dot_dimension_numbers<[1], [0], [0], [1], [0, 0, 1, 1], [], []>} : vector<128x4xf32>, vector<4x4xf32>, vector<128x4xf32> -> vector<128x4xf32>
    %74 = vector.extract_strided_slice %69 {offsets = [1, 0], sizes = [128, 4], strides = [1, 1]} : vector<176x4xf32> to vector<128x4xf32>
    %c0_44 = arith.constant 0 : index
    %c1 = arith.constant 1 : index
    %c0_45 = arith.constant 0 : index
    %c0_46 = arith.constant 0 : index
    %75 = vector.load %arg7[%c0_44, %c1, %c0_45, %c0_46] : memref<3x3x4x4xf32, #tpu.memory_space<vmem>>, vector<1x1x4x4xf32>
    %76 = vector.shape_cast %75 : vector<1x1x4x4xf32> to vector<4x4xf32>
    %cst_47 = arith.constant dense<0.000000e+00> : vector<128x4xf32>
    %77 = tpu.matmul %74, %76, %cst_47 {dimension_numbers = #tpu.dot_dimension_numbers<[1], [0], [0], [1], [0, 0, 1, 1], [], []>} : vector<128x4xf32>, vector<4x4xf32>, vector<128x4xf32> -> vector<128x4xf32>
    %78 = arith.addf %73, %77 : vector<128x4xf32>
    %79 = vector.extract_strided_slice %69 {offsets = [2, 0], sizes = [128, 4], strides = [1, 1]} : vector<176x4xf32> to vector<128x4xf32>
    %c0_48 = arith.constant 0 : index
    %c2 = arith.constant 2 : index
    %c0_49 = arith.constant 0 : index
    %c0_50 = arith.constant 0 : index
    %80 = vector.load %arg7[%c0_48, %c2, %c0_49, %c0_50] : memref<3x3x4x4xf32, #tpu.memory_space<vmem>>, vector<1x1x4x4xf32>
    %81 = vector.shape_cast %80 : vector<1x1x4x4xf32> to vector<4x4xf32>
    %cst_51 = arith.constant dense<0.000000e+00> : vector<128x4xf32>
    %82 = tpu.matmul %79, %81, %cst_51 {dimension_numbers = #tpu.dot_dimension_numbers<[1], [0], [0], [1], [0, 0, 1, 1], [], []>} : vector<128x4xf32>, vector<4x4xf32>, vector<128x4xf32> -> vector<128x4xf32>
    %83 = arith.addf %78, %82 : vector<128x4xf32>
    %84 = vector.extract_strided_slice %69 {offsets = [16, 0], sizes = [128, 4], strides = [1, 1]} : vector<176x4xf32> to vector<128x4xf32>
    %c1_52 = arith.constant 1 : index
    %c0_53 = arith.constant 0 : index
    %c0_54 = arith.constant 0 : index
    %c0_55 = arith.constant 0 : index
    %85 = vector.load %arg7[%c1_52, %c0_53, %c0_54, %c0_55] : memref<3x3x4x4xf32, #tpu.memory_space<vmem>>, vector<1x1x4x4xf32>
    %86 = vector.shape_cast %85 : vector<1x1x4x4xf32> to vector<4x4xf32>
    %cst_56 = arith.constant dense<0.000000e+00> : vector<128x4xf32>
    %87 = tpu.matmul %84, %86, %cst_56 {dimension_numbers = #tpu.dot_dimension_numbers<[1], [0], [0], [1], [0, 0, 1, 1], [], []>} : vector<128x4xf32>, vector<4x4xf32>, vector<128x4xf32> -> vector<128x4xf32>
    %88 = arith.addf %83, %87 : vector<128x4xf32>
    %89 = vector.extract_strided_slice %69 {offsets = [17, 0], sizes = [128, 4], strides = [1, 1]} : vector<176x4xf32> to vector<128x4xf32>
    %c1_57 = arith.constant 1 : index
    %c1_58 = arith.constant 1 : index
    %c0_59 = arith.constant 0 : index
    %c0_60 = arith.constant 0 : index
    %90 = vector.load %arg7[%c1_57, %c1_58, %c0_59, %c0_60] : memref<3x3x4x4xf32, #tpu.memory_space<vmem>>, vector<1x1x4x4xf32>
    %91 = vector.shape_cast %90 : vector<1x1x4x4xf32> to vector<4x4xf32>
    %cst_61 = arith.constant dense<0.000000e+00> : vector<128x4xf32>
    %92 = tpu.matmul %89, %91, %cst_61 {dimension_numbers = #tpu.dot_dimension_numbers<[1], [0], [0], [1], [0, 0, 1, 1], [], []>} : vector<128x4xf32>, vector<4x4xf32>, vector<128x4xf32> -> vector<128x4xf32>
    %93 = arith.addf %88, %92 : vector<128x4xf32>
    %94 = vector.extract_strided_slice %69 {offsets = [18, 0], sizes = [128, 4], strides = [1, 1]} : vector<176x4xf32> to vector<128x4xf32>
    %c1_62 = arith.constant 1 : index
    %c2_63 = arith.constant 2 : index
    %c0_64 = arith.constant 0 : index
    %c0_65 = arith.constant 0 : index
    %95 = vector.load %arg7[%c1_62, %c2_63, %c0_64, %c0_65] : memref<3x3x4x4xf32, #tpu.memory_space<vmem>>, vector<1x1x4x4xf32>
    %96 = vector.shape_cast %95 : vector<1x1x4x4xf32> to vector<4x4xf32>
    %cst_66 = arith.constant dense<0.000000e+00> : vector<128x4xf32>
    %97 = tpu.matmul %94, %96, %cst_66 {dimension_numbers = #tpu.dot_dimension_numbers<[1], [0], [0], [1], [0, 0, 1, 1], [], []>} : vector<128x4xf32>, vector<4x4xf32>, vector<128x4xf32> -> vector<128x4xf32>
    %98 = arith.addf %93, %97 : vector<128x4xf32>
    %99 = vector.extract_strided_slice %69 {offsets = [32, 0], sizes = [128, 4], strides = [1, 1]} : vector<176x4xf32> to vector<128x4xf32>
    %c2_67 = arith.constant 2 : index
    %c0_68 = arith.constant 0 : index
    %c0_69 = arith.constant 0 : index
    %c0_70 = arith.constant 0 : index
    %100 = vector.load %arg7[%c2_67, %c0_68, %c0_69, %c0_70] : memref<3x3x4x4xf32, #tpu.memory_space<vmem>>, vector<1x1x4x4xf32>
    %101 = vector.shape_cast %100 : vector<1x1x4x4xf32> to vector<4x4xf32>
    %cst_71 = arith.constant dense<0.000000e+00> : vector<128x4xf32>
    %102 = tpu.matmul %99, %101, %cst_71 {dimension_numbers = #tpu.dot_dimension_numbers<[1], [0], [0], [1], [0, 0, 1, 1], [], []>} : vector<128x4xf32>, vector<4x4xf32>, vector<128x4xf32> -> vector<128x4xf32>
    %103 = arith.addf %98, %102 : vector<128x4xf32>
    %104 = vector.extract_strided_slice %69 {offsets = [33, 0], sizes = [128, 4], strides = [1, 1]} : vector<176x4xf32> to vector<128x4xf32>
    %c2_72 = arith.constant 2 : index
    %c1_73 = arith.constant 1 : index
    %c0_74 = arith.constant 0 : index
    %c0_75 = arith.constant 0 : index
    %105 = vector.load %arg7[%c2_72, %c1_73, %c0_74, %c0_75] : memref<3x3x4x4xf32, #tpu.memory_space<vmem>>, vector<1x1x4x4xf32>
    %106 = vector.shape_cast %105 : vector<1x1x4x4xf32> to vector<4x4xf32>
    %cst_76 = arith.constant dense<0.000000e+00> : vector<128x4xf32>
    %107 = tpu.matmul %104, %106, %cst_76 {dimension_numbers = #tpu.dot_dimension_numbers<[1], [0], [0], [1], [0, 0, 1, 1], [], []>} : vector<128x4xf32>, vector<4x4xf32>, vector<128x4xf32> -> vector<128x4xf32>
    %108 = arith.addf %103, %107 : vector<128x4xf32>
    %109 = vector.extract_strided_slice %69 {offsets = [34, 0], sizes = [128, 4], strides = [1, 1]} : vector<176x4xf32> to vector<128x4xf32>
    %c2_77 = arith.constant 2 : index
    %c2_78 = arith.constant 2 : index
    %c0_79 = arith.constant 0 : index
    %c0_80 = arith.constant 0 : index
    %110 = vector.load %arg7[%c2_77, %c2_78, %c0_79, %c0_80] : memref<3x3x4x4xf32, #tpu.memory_space<vmem>>, vector<1x1x4x4xf32>
    %111 = vector.shape_cast %110 : vector<1x1x4x4xf32> to vector<4x4xf32>
    %cst_81 = arith.constant dense<0.000000e+00> : vector<128x4xf32>
    %112 = tpu.matmul %109, %111, %cst_81 {dimension_numbers = #tpu.dot_dimension_numbers<[1], [0], [0], [1], [0, 0, 1, 1], [], []>} : vector<128x4xf32>, vector<4x4xf32>, vector<128x4xf32> -> vector<128x4xf32>
    %113 = arith.addf %108, %112 : vector<128x4xf32>
    %c0_82 = arith.constant 0 : index
    %c0_83 = arith.constant 0 : index
    %114 = vector.load %arg8[%c0_82, %c0_83] : memref<1x4xf32, #tpu.memory_space<vmem>>, vector<1x4xf32>
    %115 = vector.broadcast %114 : vector<1x4xf32> to vector<128x4xf32>
    %116 = arith.addf %113, %115 : vector<128x4xf32>
    %cst_84 = arith.constant 5.000000e-01 : f32
    %117 = vector.broadcast %cst_84 : f32 to vector<128x4xf32>
    %118 = arith.mulf %117, %116 : vector<128x4xf32>
    %cst_85 = arith.constant 0.707106769 : f32
    %119 = vector.broadcast %cst_85 : f32 to vector<128x4xf32>
    %120 = arith.mulf %116, %119 : vector<128x4xf32>
    %121 = math.erf %120 : vector<128x4xf32>
    %cst_86 = arith.constant 1.000000e+00 : f32
    %122 = vector.broadcast %cst_86 : f32 to vector<128x4xf32>
    %123 = arith.addf %122, %121 : vector<128x4xf32>
    %124 = arith.mulf %118, %123 : vector<128x4xf32>
    %cst_87 = arith.constant 0.000000e+00 : f32
    %125 = vector.broadcast %cst_87 : f32 to vector<176x4xf32>
    %c0_88 = arith.constant 0 : index
    %c0_89 = arith.constant 0 : index
    %126 = vector.load %arg14[%c0_88, %c0_89] : memref<176x4xf32, #tpu.memory_space<vmem>>, vector<176x4xf32>
    tpu.vector_store %arg14[%c0_88, %c0_89], %125 {strides = array<i32>} : memref<176x4xf32, #tpu.memory_space<vmem>>, vector<176x4xf32>,
    %127 = vector.extract_strided_slice %124 {offsets = [0, 0], sizes = [8, 4], strides = [1, 1]} : vector<128x4xf32> to vector<8x4xf32>
    %c17_90 = arith.constant 17 : index
    %c0_91 = arith.constant 0 : index
    %128 = vector.load %arg14[%c17_90, %c0_91] : memref<176x4xf32, #tpu.memory_space<vmem>>, vector<8x4xf32>
    tpu.vector_store %arg14[%c17_90, %c0_91], %127 {strides = array<i32>} : memref<176x4xf32, #tpu.memory_space<vmem>>, vector<8x4xf32>,
    %129 = vector.extract_strided_slice %124 {offsets = [16, 0], sizes = [8, 4], strides = [1, 1]} : vector<128x4xf32> to vector<8x4xf32>
    %c33_92 = arith.constant 33 : index
    %c0_93 = arith.constant 0 : index
    %130 = vector.load %arg14[%c33_92, %c0_93] : memref<176x4xf32, #tpu.memory_space<vmem>>, vector<8x4xf32>
    tpu.vector_store %arg14[%c33_92, %c0_93], %129 {strides = array<i32>} : memref<176x4xf32, #tpu.memory_space<vmem>>, vector<8x4xf32>,
    %131 = vector.extract_strided_slice %124 {offsets = [32, 0], sizes = [8, 4], strides = [1, 1]} : vector<128x4xf32> to vector<8x4xf32>
    %c49_94 = arith.constant 49 : index
    %c0_95 = arith.constant 0 : index
    %132 = vector.load %arg14[%c49_94, %c0_95] : memref<176x4xf32, #tpu.memory_space<vmem>>, vector<8x4xf32>
    tpu.vector_store %arg14[%c49_94, %c0_95], %131 {strides = array<i32>} : memref<176x4xf32, #tpu.memory_space<vmem>>, vector<8x4xf32>,
    %133 = vector.extract_strided_slice %124 {offsets = [48, 0], sizes = [8, 4], strides = [1, 1]} : vector<128x4xf32> to vector<8x4xf32>
    %c65_96 = arith.constant 65 : index
    %c0_97 = arith.constant 0 : index
    %134 = vector.load %arg14[%c65_96, %c0_97] : memref<176x4xf32, #tpu.memory_space<vmem>>, vector<8x4xf32>
    tpu.vector_store %arg14[%c65_96, %c0_97], %133 {strides = array<i32>} : memref<176x4xf32, #tpu.memory_space<vmem>>, vector<8x4xf32>,
    %135 = vector.extract_strided_slice %124 {offsets = [64, 0], sizes = [8, 4], strides = [1, 1]} : vector<128x4xf32> to vector<8x4xf32>
    %c81_98 = arith.constant 81 : index
    %c0_99 = arith.constant 0 : index
    %136 = vector.load %arg14[%c81_98, %c0_99] : memref<176x4xf32, #tpu.memory_space<vmem>>, vector<8x4xf32>
    tpu.vector_store %arg14[%c81_98, %c0_99], %135 {strides = array<i32>} : memref<176x4xf32, #tpu.memory_space<vmem>>, vector<8x4xf32>,
    %137 = vector.extract_strided_slice %124 {offsets = [80, 0], sizes = [8, 4], strides = [1, 1]} : vector<128x4xf32> to vector<8x4xf32>
    %c97_100 = arith.constant 97 : index
    %c0_101 = arith.constant 0 : index
    %138 = vector.load %arg14[%c97_100, %c0_101] : memref<176x4xf32, #tpu.memory_space<vmem>>, vector<8x4xf32>
    tpu.vector_store %arg14[%c97_100, %c0_101], %137 {strides = array<i32>} : memref<176x4xf32, #tpu.memory_space<vmem>>, vector<8x4xf32>,
    %139 = vector.extract_strided_slice %124 {offsets = [96, 0], sizes = [8, 4], strides = [1, 1]} : vector<128x4xf32> to vector<8x4xf32>
    %c113_102 = arith.constant 113 : index
    %c0_103 = arith.constant 0 : index
    %140 = vector.load %arg14[%c113_102, %c0_103] : memref<176x4xf32, #tpu.memory_space<vmem>>, vector<8x4xf32>
    tpu.vector_store %arg14[%c113_102, %c0_103], %139 {strides = array<i32>} : memref<176x4xf32, #tpu.memory_space<vmem>>, vector<8x4xf32>,
    %141 = vector.extract_strided_slice %124 {offsets = [112, 0], sizes = [8, 4], strides = [1, 1]} : vector<128x4xf32> to vector<8x4xf32>
    %c129_104 = arith.constant 129 : index
    %c0_105 = arith.constant 0 : index
    %142 = vector.load %arg14[%c129_104, %c0_105] : memref<176x4xf32, #tpu.memory_space<vmem>>, vector<8x4xf32>
    tpu.vector_store %arg14[%c129_104, %c0_105], %141 {strides = array<i32>} : memref<176x4xf32, #tpu.memory_space<vmem>>, vector<8x4xf32>,
    %c0_106 = arith.constant 0 : index
    %c0_107 = arith.constant 0 : index
    %143 = vector.load %arg14[%c0_106, %c0_107] : memref<176x4xf32, #tpu.memory_space<vmem>>, vector<176x4xf32>
    %144 = vector.extract_strided_slice %143 {offsets = [0, 0], sizes = [128, 4], strides = [1, 1]} : vector<176x4xf32> to vector<128x4xf32>
    %c0_108 = arith.constant 0 : index
    %c0_109 = arith.constant 0 : index
    %c0_110 = arith.constant 0 : index
    %c0_111 = arith.constant 0 : index
    %145 = vector.load %arg9[%c0_108, %c0_109, %c0_110, %c0_111] : memref<3x3x4x4xf32, #tpu.memory_space<vmem>>, vector<1x1x4x4xf32>
    %146 = vector.shape_cast %145 : vector<1x1x4x4xf32> to vector<4x4xf32>
    %cst_112 = arith.constant dense<0.000000e+00> : vector<128x4xf32>
    %147 = tpu.matmul %144, %146, %cst_112 {dimension_numbers = #tpu.dot_dimension_numbers<[1], [0], [0], [1], [0, 0, 1, 1], [], []>} : vector<128x4xf32>, vector<4x4xf32>, vector<128x4xf32> -> vector<128x4xf32>
    %148 = vector.extract_strided_slice %143 {offsets = [1, 0], sizes = [128, 4], strides = [1, 1]} : vector<176x4xf32> to vector<128x4xf32>
    %c0_113 = arith.constant 0 : index
    %c1_114 = arith.constant 1 : index
    %c0_115 = arith.constant 0 : index
    %c0_116 = arith.constant 0 : index
    %149 = vector.load %arg9[%c0_113, %c1_114, %c0_115, %c0_116] : memref<3x3x4x4xf32, #tpu.memory_space<vmem>>, vector<1x1x4x4xf32>
    %150 = vector.shape_cast %149 : vector<1x1x4x4xf32> to vector<4x4xf32>
    %cst_117 = arith.constant dense<0.000000e+00> : vector<128x4xf32>
    %151 = tpu.matmul %148, %150, %cst_117 {dimension_numbers = #tpu.dot_dimension_numbers<[1], [0], [0], [1], [0, 0, 1, 1], [], []>} : vector<128x4xf32>, vector<4x4xf32>, vector<128x4xf32> -> vector<128x4xf32>
    %152 = arith.addf %147, %151 : vector<128x4xf32>
    %153 = vector.extract_strided_slice %143 {offsets = [2, 0], sizes = [128, 4], strides = [1, 1]} : vector<176x4xf32> to vector<128x4xf32>
    %c0_118 = arith.constant 0 : index
    %c2_119 = arith.constant 2 : index
    %c0_120 = arith.constant 0 : index
    %c0_121 = arith.constant 0 : index
    %154 = vector.load %arg9[%c0_118, %c2_119, %c0_120, %c0_121] : memref<3x3x4x4xf32, #tpu.memory_space<vmem>>, vector<1x1x4x4xf32>
    %155 = vector.shape_cast %154 : vector<1x1x4x4xf32> to vector<4x4xf32>
    %cst_122 = arith.constant dense<0.000000e+00> : vector<128x4xf32>
    %156 = tpu.matmul %153, %155, %cst_122 {dimension_numbers = #tpu.dot_dimension_numbers<[1], [0], [0], [1], [0, 0, 1, 1], [], []>} : vector<128x4xf32>, vector<4x4xf32>, vector<128x4xf32> -> vector<128x4xf32>
    %157 = arith.addf %152, %156 : vector<128x4xf32>
    %158 = vector.extract_strided_slice %143 {offsets = [16, 0], sizes = [128, 4], strides = [1, 1]} : vector<176x4xf32> to vector<128x4xf32>
    %c1_123 = arith.constant 1 : index
    %c0_124 = arith.constant 0 : index
    %c0_125 = arith.constant 0 : index
    %c0_126 = arith.constant 0 : index
    %159 = vector.load %arg9[%c1_123, %c0_124, %c0_125, %c0_126] : memref<3x3x4x4xf32, #tpu.memory_space<vmem>>, vector<1x1x4x4xf32>
    %160 = vector.shape_cast %159 : vector<1x1x4x4xf32> to vector<4x4xf32>
    %cst_127 = arith.constant dense<0.000000e+00> : vector<128x4xf32>
    %161 = tpu.matmul %158, %160, %cst_127 {dimension_numbers = #tpu.dot_dimension_numbers<[1], [0], [0], [1], [0, 0, 1, 1], [], []>} : vector<128x4xf32>, vector<4x4xf32>, vector<128x4xf32> -> vector<128x4xf32>
    %162 = arith.addf %157, %161 : vector<128x4xf32>
    %163 = vector.extract_strided_slice %143 {offsets = [17, 0], sizes = [128, 4], strides = [1, 1]} : vector<176x4xf32> to vector<128x4xf32>
    %c1_128 = arith.constant 1 : index
    %c1_129 = arith.constant 1 : index
    %c0_130 = arith.constant 0 : index
    %c0_131 = arith.constant 0 : index
    %164 = vector.load %arg9[%c1_128, %c1_129, %c0_130, %c0_131] : memref<3x3x4x4xf32, #tpu.memory_space<vmem>>, vector<1x1x4x4xf32>
    %165 = vector.shape_cast %164 : vector<1x1x4x4xf32> to vector<4x4xf32>
    %cst_132 = arith.constant dense<0.000000e+00> : vector<128x4xf32>
    %166 = tpu.matmul %163, %165, %cst_132 {dimension_numbers = #tpu.dot_dimension_numbers<[1], [0], [0], [1], [0, 0, 1, 1], [], []>} : vector<128x4xf32>, vector<4x4xf32>, vector<128x4xf32> -> vector<128x4xf32>
    %167 = arith.addf %162, %166 : vector<128x4xf32>
    %168 = vector.extract_strided_slice %143 {offsets = [18, 0], sizes = [128, 4], strides = [1, 1]} : vector<176x4xf32> to vector<128x4xf32>
    %c1_133 = arith.constant 1 : index
    %c2_134 = arith.constant 2 : index
    %c0_135 = arith.constant 0 : index
    %c0_136 = arith.constant 0 : index
    %169 = vector.load %arg9[%c1_133, %c2_134, %c0_135, %c0_136] : memref<3x3x4x4xf32, #tpu.memory_space<vmem>>, vector<1x1x4x4xf32>
    %170 = vector.shape_cast %169 : vector<1x1x4x4xf32> to vector<4x4xf32>
    %cst_137 = arith.constant dense<0.000000e+00> : vector<128x4xf32>
    %171 = tpu.matmul %168, %170, %cst_137 {dimension_numbers = #tpu.dot_dimension_numbers<[1], [0], [0], [1], [0, 0, 1, 1], [], []>} : vector<128x4xf32>, vector<4x4xf32>, vector<128x4xf32> -> vector<128x4xf32>
    %172 = arith.addf %167, %171 : vector<128x4xf32>
    %173 = vector.extract_strided_slice %143 {offsets = [32, 0], sizes = [128, 4], strides = [1, 1]} : vector<176x4xf32> to vector<128x4xf32>
    %c2_138 = arith.constant 2 : index
    %c0_139 = arith.constant 0 : index
    %c0_140 = arith.constant 0 : index
    %c0_141 = arith.constant 0 : index
    %174 = vector.load %arg9[%c2_138, %c0_139, %c0_140, %c0_141] : memref<3x3x4x4xf32, #tpu.memory_space<vmem>>, vector<1x1x4x4xf32>
    %175 = vector.shape_cast %174 : vector<1x1x4x4xf32> to vector<4x4xf32>
    %cst_142 = arith.constant dense<0.000000e+00> : vector<128x4xf32>
    %176 = tpu.matmul %173, %175, %cst_142 {dimension_numbers = #tpu.dot_dimension_numbers<[1], [0], [0], [1], [0, 0, 1, 1], [], []>} : vector<128x4xf32>, vector<4x4xf32>, vector<128x4xf32> -> vector<128x4xf32>
    %177 = arith.addf %172, %176 : vector<128x4xf32>
    %178 = vector.extract_strided_slice %143 {offsets = [33, 0], sizes = [128, 4], strides = [1, 1]} : vector<176x4xf32> to vector<128x4xf32>
    %c2_143 = arith.constant 2 : index
    %c1_144 = arith.constant 1 : index
    %c0_145 = arith.constant 0 : index
    %c0_146 = arith.constant 0 : index
    %179 = vector.load %arg9[%c2_143, %c1_144, %c0_145, %c0_146] : memref<3x3x4x4xf32, #tpu.memory_space<vmem>>, vector<1x1x4x4xf32>
    %180 = vector.shape_cast %179 : vector<1x1x4x4xf32> to vector<4x4xf32>
    %cst_147 = arith.constant dense<0.000000e+00> : vector<128x4xf32>
    %181 = tpu.matmul %178, %180, %cst_147 {dimension_numbers = #tpu.dot_dimension_numbers<[1], [0], [0], [1], [0, 0, 1, 1], [], []>} : vector<128x4xf32>, vector<4x4xf32>, vector<128x4xf32> -> vector<128x4xf32>
    %182 = arith.addf %177, %181 : vector<128x4xf32>
    %183 = vector.extract_strided_slice %143 {offsets = [34, 0], sizes = [128, 4], strides = [1, 1]} : vector<176x4xf32> to vector<128x4xf32>
    %c2_148 = arith.constant 2 : index
    %c2_149 = arith.constant 2 : index
    %c0_150 = arith.constant 0 : index
    %c0_151 = arith.constant 0 : index
    %184 = vector.load %arg9[%c2_148, %c2_149, %c0_150, %c0_151] : memref<3x3x4x4xf32, #tpu.memory_space<vmem>>, vector<1x1x4x4xf32>
    %185 = vector.shape_cast %184 : vector<1x1x4x4xf32> to vector<4x4xf32>
    %cst_152 = arith.constant dense<0.000000e+00> : vector<128x4xf32>
    %186 = tpu.matmul %183, %185, %cst_152 {dimension_numbers = #tpu.dot_dimension_numbers<[1], [0], [0], [1], [0, 0, 1, 1], [], []>} : vector<128x4xf32>, vector<4x4xf32>, vector<128x4xf32> -> vector<128x4xf32>
    %187 = arith.addf %182, %186 : vector<128x4xf32>
    %c0_153 = arith.constant 0 : index
    %c0_154 = arith.constant 0 : index
    %188 = vector.load %arg10[%c0_153, %c0_154] : memref<1x4xf32, #tpu.memory_space<vmem>>, vector<1x4xf32>
    %189 = vector.broadcast %188 : vector<1x4xf32> to vector<128x4xf32>
    %190 = arith.addf %187, %189 : vector<128x4xf32>
    %191 = vector.extract_strided_slice %190 {offsets = [0, 0], sizes = [8, 4], strides = [1, 1]} : vector<128x4xf32> to vector<8x4xf32>
    %c0_155 = arith.constant 0 : index
    %c0_156 = arith.constant 0 : index
    %192 = vector.load %arg15[%c0_155, %c0_156] : memref<64x4xf32, #tpu.memory_space<vmem>>, vector<8x4xf32>
    tpu.vector_store %arg15[%c0_155, %c0_156], %191 {strides = array<i32>} : memref<64x4xf32, #tpu.memory_space<vmem>>, vector<8x4xf32>,
    %193 = vector.extract_strided_slice %190 {offsets = [16, 0], sizes = [8, 4], strides = [1, 1]} : vector<128x4xf32> to vector<8x4xf32>
    %c8 = arith.constant 8 : index
    %c0_157 = arith.constant 0 : index
    %194 = vector.load %arg15[%c8, %c0_157] : memref<64x4xf32, #tpu.memory_space<vmem>>, vector<8x4xf32>
    tpu.vector_store %arg15[%c8, %c0_157], %193 {strides = array<i32>} : memref<64x4xf32, #tpu.memory_space<vmem>>, vector<8x4xf32>,
    %195 = vector.extract_strided_slice %190 {offsets = [32, 0], sizes = [8, 4], strides = [1, 1]} : vector<128x4xf32> to vector<8x4xf32>
    %c16 = arith.constant 16 : index
    %c0_158 = arith.constant 0 : index
    %196 = vector.load %arg15[%c16, %c0_158] : memref<64x4xf32, #tpu.memory_space<vmem>>, vector<8x4xf32>
    tpu.vector_store %arg15[%c16, %c0_158], %195 {strides = array<i32>} : memref<64x4xf32, #tpu.memory_space<vmem>>, vector<8x4xf32>,
    %197 = vector.extract_strided_slice %190 {offsets = [48, 0], sizes = [8, 4], strides = [1, 1]} : vector<128x4xf32> to vector<8x4xf32>
    %c24 = arith.constant 24 : index
    %c0_159 = arith.constant 0 : index
    %198 = vector.load %arg15[%c24, %c0_159] : memref<64x4xf32, #tpu.memory_space<vmem>>, vector<8x4xf32>
    tpu.vector_store %arg15[%c24, %c0_159], %197 {strides = array<i32>} : memref<64x4xf32, #tpu.memory_space<vmem>>, vector<8x4xf32>,
    %199 = vector.extract_strided_slice %190 {offsets = [64, 0], sizes = [8, 4], strides = [1, 1]} : vector<128x4xf32> to vector<8x4xf32>
    %c32 = arith.constant 32 : index
    %c0_160 = arith.constant 0 : index
    %200 = vector.load %arg15[%c32, %c0_160] : memref<64x4xf32, #tpu.memory_space<vmem>>, vector<8x4xf32>
    tpu.vector_store %arg15[%c32, %c0_160], %199 {strides = array<i32>} : memref<64x4xf32, #tpu.memory_space<vmem>>, vector<8x4xf32>,
    %201 = vector.extract_strided_slice %190 {offsets = [80, 0], sizes = [8, 4], strides = [1, 1]} : vector<128x4xf32> to vector<8x4xf32>
    %c40 = arith.constant 40 : index
    %c0_161 = arith.constant 0 : index
    %202 = vector.load %arg15[%c40, %c0_161] : memref<64x4xf32, #tpu.memory_space<vmem>>, vector<8x4xf32>
    tpu.vector_store %arg15[%c40, %c0_161], %201 {strides = array<i32>} : memref<64x4xf32, #tpu.memory_space<vmem>>, vector<8x4xf32>,
    %203 = vector.extract_strided_slice %190 {offsets = [96, 0], sizes = [8, 4], strides = [1, 1]} : vector<128x4xf32> to vector<8x4xf32>
    %c48 = arith.constant 48 : index
    %c0_162 = arith.constant 0 : index
    %204 = vector.load %arg15[%c48, %c0_162] : memref<64x4xf32, #tpu.memory_space<vmem>>, vector<8x4xf32>
    tpu.vector_store %arg15[%c48, %c0_162], %203 {strides = array<i32>} : memref<64x4xf32, #tpu.memory_space<vmem>>, vector<8x4xf32>,
    %205 = vector.extract_strided_slice %190 {offsets = [112, 0], sizes = [8, 4], strides = [1, 1]} : vector<128x4xf32> to vector<8x4xf32>
    %c56 = arith.constant 56 : index
    %c0_163 = arith.constant 0 : index
    %206 = vector.load %arg15[%c56, %c0_163] : memref<64x4xf32, #tpu.memory_space<vmem>>, vector<8x4xf32>
    tpu.vector_store %arg15[%c56, %c0_163], %205 {strides = array<i32>} : memref<64x4xf32, #tpu.memory_space<vmem>>, vector<8x4xf32>,
    %c0_164 = arith.constant 0 : index
    %c0_165 = arith.constant 0 : index
    %207 = vector.load %arg15[%c0_164, %c0_165] : memref<64x4xf32, #tpu.memory_space<vmem>>, vector<64x4xf32>
    %cst_166 = arith.constant 5.000000e-01 : f32
    %208 = vector.broadcast %cst_166 : f32 to vector<64x4xf32>
    %209 = arith.mulf %208, %207 : vector<64x4xf32>
    %cst_167 = arith.constant 0.707106769 : f32
    %210 = vector.broadcast %cst_167 : f32 to vector<64x4xf32>
    %211 = arith.mulf %207, %210 : vector<64x4xf32>
    %212 = math.erf %211 : vector<64x4xf32>
    %cst_168 = arith.constant 1.000000e+00 : f32
    %213 = vector.broadcast %cst_168 : f32 to vector<64x4xf32>
    %214 = arith.addf %213, %212 : vector<64x4xf32>
    %215 = arith.mulf %209, %214 : vector<64x4xf32>
    %c0_169 = arith.constant 0 : index
    %c0_170 = arith.constant 0 : index
    %216 = vector.load %arg11[%c0_169, %c0_170] : memref<4x16xf32, #tpu.memory_space<vmem>>, vector<4x16xf32>
    %cst_171 = arith.constant dense<0.000000e+00> : vector<64x16xf32>
    %217 = tpu.matmul %215, %216, %cst_171 {dimension_numbers = #tpu.dot_dimension_numbers<[1], [0], [0], [1], [0, 0, 1, 1], [], []>} : vector<64x4xf32>, vector<4x16xf32>, vector<64x16xf32> -> vector<64x16xf32>
    %c0_172 = arith.constant 0 : index
    %c0_173 = arith.constant 0 : index
    %218 = vector.load %arg12[%c0_172, %c0_173] : memref<1x16xf32, #tpu.memory_space<vmem>>, vector<1x16xf32>
    %219 = vector.broadcast %218 : vector<1x16xf32> to vector<64x16xf32>
    %220 = arith.addf %217, %219 : vector<64x16xf32>
    %221 = arith.addf %29, %220 : vector<64x16xf32>
    %c0_174 = arith.constant 0 : index
    %c0_175 = arith.constant 0 : index
    %c0_176 = arith.constant 0 : index
    %222 = vector.load %arg13[%c0_174, %c0_175, %c0_176] : memref<1x64x16xf32, #tpu.memory_space<vmem>>, vector<1x64x16xf32>
    %223 = vector.shape_cast %222 : vector<1x64x16xf32> to vector<64x16xf32>
    %224 = vector.shape_cast %221 : vector<64x16xf32> to vector<1x64x16xf32>
    tpu.vector_store %arg13[%c0_174, %c0_175, %c0_176], %224 {strides = array<i32>} : memref<1x64x16xf32, #tpu.memory_space<vmem>>, vector<1x64x16xf32>,
    return
  }
  func.func @transform_0(%arg0: i32) -> (i32, i32, i32) {
    %c0_i32 = arith.constant 0 : i32
    %c0_i32_0 = arith.constant 0 : i32
    %c0_i32_1 = arith.constant 0 : i32
    return %arg0, %c0_i32, %c0_i32_0 : i32, i32, i32
  }
  func.func @transform_1(%arg0: i32) -> (i32, i32, i32) {
    %c0_i32 = arith.constant 0 : i32
    %c0_i32_0 = arith.constant 0 : i32
    %c0_i32_1 = arith.constant 0 : i32
    return %arg0, %c0_i32, %c0_i32_0 : i32, i32, i32
  }
  func.func @transform_2(%arg0: i32) -> (i32, i32, i32) {
    %c0_i32 = arith.constant 0 : i32
    %c0_i32_0 = arith.constant 0 : i32
    %c0_i32_1 = arith.constant 0 : i32
    return %arg0, %c0_i32, %c0_i32_0 : i32, i32, i32
  }
  func.func @transform_3(%arg0: i32) -> (i32, i32) {
    %c0_i32 = arith.constant 0 : i32
    %c0_i32_0 = arith.constant 0 : i32
    %c0_i32_1 = arith.constant 0 : i32
    return %c0_i32, %c0_i32_0 : i32, i32
  }
  func.func @transform_4(%arg0: i32) -> (i32, i32) {
    %c0_i32 = arith.constant 0 : i32
    %c0_i32_0 = arith.constant 0 : i32
    %c0_i32_1 = arith.constant 0 : i32
    return %c0_i32, %c0_i32_0 : i32, i32
  }
  func.func @transform_5(%arg0: i32) -> (i32, i32) {
    %c0_i32 = arith.constant 0 : i32
    %c0_i32_0 = arith.constant 0 : i32
    %c0_i32_1 = arith.constant 0 : i32
    return %c0_i32, %c0_i32_0 : i32, i32
  }
  func.func @transform_6(%arg0: i32) -> (i32, i32, i32, i32) {
    %c0_i32 = arith.constant 0 : i32
    %c0_i32_0 = arith.constant 0 : i32
    %c0_i32_1 = arith.constant 0 : i32
    %c0_i32_2 = arith.constant 0 : i32
    %c0_i32_3 = arith.constant 0 : i32
    return %c0_i32, %c0_i32_0, %c0_i32_1, %c0_i32_2 : i32, i32, i32, i32
  }
  func.func @transform_7(%arg0: i32) -> (i32, i32) {
    %c0_i32 = arith.constant 0 : i32
    %c0_i32_0 = arith.constant 0 : i32
    %c0_i32_1 = arith.constant 0 : i32
    return %c0_i32, %c0_i32_0 : i32, i32
  }
  func.func @transform_8(%arg0: i32) -> (i32, i32, i32, i32) {
    %c0_i32 = arith.constant 0 : i32
    %c0_i32_0 = arith.constant 0 : i32
    %c0_i32_1 = arith.constant 0 : i32
    %c0_i32_2 = arith.constant 0 : i32
    %c0_i32_3 = arith.constant 0 : i32
    return %c0_i32, %c0_i32_0, %c0_i32_1, %c0_i32_2 : i32, i32, i32, i32
  }
  func.func @transform_9(%arg0: i32) -> (i32, i32) {
    %c0_i32 = arith.constant 0 : i32
    %c0_i32_0 = arith.constant 0 : i32
    %c0_i32_1 = arith.constant 0 : i32
    return %c0_i32, %c0_i32_0 : i32, i32
  }
  func.func @transform_10(%arg0: i32) -> (i32, i32) {
    %c0_i32 = arith.constant 0 : i32
    %c0_i32_0 = arith.constant 0 : i32
    %c0_i32_1 = arith.constant 0 : i32
    return %c0_i32, %c0_i32_0 : i32, i32
  }
  func.func @transform_11(%arg0: i32) -> (i32, i32) {
    %c0_i32 = arith.constant 0 : i32
    %c0_i32_0 = arith.constant 0 : i32
    %c0_i32_1 = arith.constant 0 : i32
    return %c0_i32, %c0_i32_0 : i32, i32
  }
  func.func @transform_12(%arg0: i32) -> (i32, i32, i32) {
    %c0_i32 = arith.constant 0 : i32
    %c0_i32_0 = arith.constant 0 : i32
    %c0_i32_1 = arith.constant 0 : i32
    return %arg0, %c0_i32, %c0_i32_0 : i32, i32, i32
  }
}

module attributes {stable_mosaic.version = 11 : i64} {
  func.func @_dec_block_kernel(%arg0: i32, %arg1: memref<1x64x16xf32, #tpu.memory_space<vmem>>, %arg2: memref<1x1x16xf32, #tpu.memory_space<vmem>>, %arg3: memref<1x1x16xf32, #tpu.memory_space<vmem>>, %arg4: memref<16x4xf32, #tpu.memory_space<vmem>>, %arg5: memref<1x4xf32, #tpu.memory_space<vmem>>, %arg6: memref<3x3x4x4xf32, #tpu.memory_space<vmem>>, %arg7: memref<1x4xf32, #tpu.memory_space<vmem>>, %arg8: memref<3x3x4x4xf32, #tpu.memory_space<vmem>>, %arg9: memref<1x4xf32, #tpu.memory_space<vmem>>, %arg10: memref<4x16xf32, #tpu.memory_space<vmem>>, %arg11: memref<1x16xf32, #tpu.memory_space<vmem>>, %arg12: memref<16x3xf32, #tpu.memory_space<vmem>>, %arg13: memref<1x3xf32, #tpu.memory_space<vmem>>, %arg14: memref<1x64x3xf32, #tpu.memory_space<vmem>>, %arg15: memref<176x4xf32, #tpu.memory_space<vmem>>, %arg16: memref<64x4xf32, #tpu.memory_space<vmem>>) attributes {dimension_semantics = [#tpu.dimension_semantics<parallel>], iteration_bounds = array<i64: 2>, scalar_prefetch = 0 : i64, scratch_operands = 2 : i64, tpu.core_type = #tpu.core_type<tc>, window_params = [{transform_indices = @transform_0, window_bounds = array<i64: 1, 64, 16>}, {transform_indices = @transform_1, window_bounds = array<i64: 1, 1, 16>}, {transform_indices = @transform_2, window_bounds = array<i64: 1, 1, 16>}, {pipeline_mode = #tpu.pipeline_mode<synchronous>, transform_indices = @transform_3, window_bounds = array<i64: 16, 4>}, {pipeline_mode = #tpu.pipeline_mode<synchronous>, transform_indices = @transform_4, window_bounds = array<i64: 1, 4>}, {pipeline_mode = #tpu.pipeline_mode<synchronous>, transform_indices = @transform_5, window_bounds = array<i64: 3, 3, 4, 4>}, {pipeline_mode = #tpu.pipeline_mode<synchronous>, transform_indices = @transform_6, window_bounds = array<i64: 1, 4>}, {pipeline_mode = #tpu.pipeline_mode<synchronous>, transform_indices = @transform_7, window_bounds = array<i64: 3, 3, 4, 4>}, {pipeline_mode = #tpu.pipeline_mode<synchronous>, transform_indices = @transform_8, window_bounds = array<i64: 1, 4>}, {pipeline_mode = #tpu.pipeline_mode<synchronous>, transform_indices = @transform_9, window_bounds = array<i64: 4, 16>}, {pipeline_mode = #tpu.pipeline_mode<synchronous>, transform_indices = @transform_10, window_bounds = array<i64: 1, 16>}, {pipeline_mode = #tpu.pipeline_mode<synchronous>, transform_indices = @transform_11, window_bounds = array<i64: 16, 3>}, {pipeline_mode = #tpu.pipeline_mode<synchronous>, transform_indices = @transform_12, window_bounds = array<i64: 1, 3>}, {transform_indices = @transform_13, window_bounds = array<i64: 1, 64, 3>}]} {
    %c0 = arith.constant 0 : index
    %c0_0 = arith.constant 0 : index
    %c0_1 = arith.constant 0 : index
    %0 = vector.load %arg1[%c0, %c0_0, %c0_1] : memref<1x64x16xf32, #tpu.memory_space<vmem>>, vector<1x64x16xf32>
    %1 = vector.shape_cast %0 : vector<1x64x16xf32> to vector<64x16xf32>
    %cst = arith.constant dense<0.000000e+00> : vector<16xf32>
    %2 = vector.multi_reduction <add>, %1, %cst [0] : vector<64x16xf32> to vector<16xf32>
    %3 = vector.shape_cast %2 : vector<16xf32> to vector<1x16xf32>
    %cst_2 = arith.constant 6.400000e+01 : f32
    %4 = vector.broadcast %cst_2 : f32 to vector<1x16xf32>
    %5 = arith.divf %3, %4 : vector<1x16xf32>
    %6 = vector.broadcast %5 : vector<1x16xf32> to vector<64x16xf32>
    %7 = arith.subf %1, %6 : vector<64x16xf32>
    %8 = arith.mulf %7, %7 : vector<64x16xf32>
    %cst_3 = arith.constant dense<0.000000e+00> : vector<16xf32>
    %9 = vector.multi_reduction <add>, %8, %cst_3 [0] : vector<64x16xf32> to vector<16xf32>
    %10 = vector.shape_cast %9 : vector<16xf32> to vector<1x16xf32>
    %cst_4 = arith.constant 6.400000e+01 : f32
    %11 = vector.broadcast %cst_4 : f32 to vector<1x16xf32>
    %12 = arith.divf %10, %11 : vector<1x16xf32>
    %c0_5 = arith.constant 0 : index
    %c0_6 = arith.constant 0 : index
    %c0_7 = arith.constant 0 : index
    %13 = vector.load %arg2[%c0_5, %c0_6, %c0_7] : memref<1x1x16xf32, #tpu.memory_space<vmem>>, vector<1x1x16xf32>
    %14 = vector.shape_cast %13 : vector<1x1x16xf32> to vector<1x16xf32>
    %15 = vector.broadcast %5 : vector<1x16xf32> to vector<64x16xf32>
    %16 = arith.subf %1, %15 : vector<64x16xf32>
    %cst_8 = arith.constant 9.99999974E-6 : f32
    %17 = vector.broadcast %cst_8 : f32 to vector<1x16xf32>
    %18 = arith.addf %12, %17 : vector<1x16xf32>
    %19 = math.rsqrt %18 : vector<1x16xf32>
    %20 = vector.broadcast %19 : vector<1x16xf32> to vector<64x16xf32>
    %21 = arith.mulf %16, %20 : vector<64x16xf32>
    %22 = vector.broadcast %14 : vector<1x16xf32> to vector<64x16xf32>
    %23 = arith.mulf %22, %21 : vector<64x16xf32>
    %c0_9 = arith.constant 0 : index
    %c0_10 = arith.constant 0 : index
    %c0_11 = arith.constant 0 : index
    %24 = vector.load %arg3[%c0_9, %c0_10, %c0_11] : memref<1x1x16xf32, #tpu.memory_space<vmem>>, vector<1x1x16xf32>
    %25 = vector.shape_cast %24 : vector<1x1x16xf32> to vector<1x16xf32>
    %26 = vector.broadcast %25 : vector<1x16xf32> to vector<64x16xf32>
    %27 = arith.addf %23, %26 : vector<64x16xf32>
    %cst_12 = arith.constant 5.000000e-01 : f32
    %28 = vector.broadcast %cst_12 : f32 to vector<64x16xf32>
    %29 = arith.mulf %28, %27 : vector<64x16xf32>
    %cst_13 = arith.constant 0.707106769 : f32
    %30 = vector.broadcast %cst_13 : f32 to vector<64x16xf32>
    %31 = arith.mulf %27, %30 : vector<64x16xf32>
    %32 = math.erf %31 : vector<64x16xf32>
    %cst_14 = arith.constant 1.000000e+00 : f32
    %33 = vector.broadcast %cst_14 : f32 to vector<64x16xf32>
    %34 = arith.addf %33, %32 : vector<64x16xf32>
    %35 = arith.mulf %29, %34 : vector<64x16xf32>
    %c0_15 = arith.constant 0 : index
    %c0_16 = arith.constant 0 : index
    %36 = vector.load %arg4[%c0_15, %c0_16] : memref<16x4xf32, #tpu.memory_space<vmem>>, vector<16x4xf32>
    %cst_17 = arith.constant dense<0.000000e+00> : vector<64x4xf32>
    %37 = tpu.matmul %35, %36, %cst_17 {dimension_numbers = #tpu.dot_dimension_numbers<[1], [0], [0], [1], [0, 0, 1, 1], [], []>} : vector<64x16xf32>, vector<16x4xf32>, vector<64x4xf32> -> vector<64x4xf32>
    %c0_18 = arith.constant 0 : index
    %c0_19 = arith.constant 0 : index
    %38 = vector.load %arg5[%c0_18, %c0_19] : memref<1x4xf32, #tpu.memory_space<vmem>>, vector<1x4xf32>
    %39 = vector.broadcast %38 : vector<1x4xf32> to vector<64x4xf32>
    %40 = arith.addf %37, %39 : vector<64x4xf32>
    %cst_20 = arith.constant 5.000000e-01 : f32
    %41 = vector.broadcast %cst_20 : f32 to vector<64x4xf32>
    %42 = arith.mulf %41, %40 : vector<64x4xf32>
    %cst_21 = arith.constant 0.707106769 : f32
    %43 = vector.broadcast %cst_21 : f32 to vector<64x4xf32>
    %44 = arith.mulf %40, %43 : vector<64x4xf32>
    %45 = math.erf %44 : vector<64x4xf32>
    %cst_22 = arith.constant 1.000000e+00 : f32
    %46 = vector.broadcast %cst_22 : f32 to vector<64x4xf32>
    %47 = arith.addf %46, %45 : vector<64x4xf32>
    %48 = arith.mulf %42, %47 : vector<64x4xf32>
    %cst_23 = arith.constant 0.000000e+00 : f32
    %49 = vector.broadcast %cst_23 : f32 to vector<176x4xf32>
    %c0_24 = arith.constant 0 : index
    %c0_25 = arith.constant 0 : index
    %50 = vector.load %arg15[%c0_24, %c0_25] : memref<176x4xf32, #tpu.memory_space<vmem>>, vector<176x4xf32>
    tpu.vector_store %arg15[%c0_24, %c0_25], %49 {strides = array<i32>} : memref<176x4xf32, #tpu.memory_space<vmem>>, vector<176x4xf32>,
    %51 = vector.extract_strided_slice %48 {offsets = [0, 0], sizes = [8, 4], strides = [1, 1]} : vector<64x4xf32> to vector<8x4xf32>
    %c17 = arith.constant 17 : index
    %c0_26 = arith.constant 0 : index
    %52 = vector.load %arg15[%c17, %c0_26] : memref<176x4xf32, #tpu.memory_space<vmem>>, vector<8x4xf32>
    tpu.vector_store %arg15[%c17, %c0_26], %51 {strides = array<i32>} : memref<176x4xf32, #tpu.memory_space<vmem>>, vector<8x4xf32>,
    %53 = vector.extract_strided_slice %48 {offsets = [8, 0], sizes = [8, 4], strides = [1, 1]} : vector<64x4xf32> to vector<8x4xf32>
    %c33 = arith.constant 33 : index
    %c0_27 = arith.constant 0 : index
    %54 = vector.load %arg15[%c33, %c0_27] : memref<176x4xf32, #tpu.memory_space<vmem>>, vector<8x4xf32>
    tpu.vector_store %arg15[%c33, %c0_27], %53 {strides = array<i32>} : memref<176x4xf32, #tpu.memory_space<vmem>>, vector<8x4xf32>,
    %55 = vector.extract_strided_slice %48 {offsets = [16, 0], sizes = [8, 4], strides = [1, 1]} : vector<64x4xf32> to vector<8x4xf32>
    %c49 = arith.constant 49 : index
    %c0_28 = arith.constant 0 : index
    %56 = vector.load %arg15[%c49, %c0_28] : memref<176x4xf32, #tpu.memory_space<vmem>>, vector<8x4xf32>
    tpu.vector_store %arg15[%c49, %c0_28], %55 {strides = array<i32>} : memref<176x4xf32, #tpu.memory_space<vmem>>, vector<8x4xf32>,
    %57 = vector.extract_strided_slice %48 {offsets = [24, 0], sizes = [8, 4], strides = [1, 1]} : vector<64x4xf32> to vector<8x4xf32>
    %c65 = arith.constant 65 : index
    %c0_29 = arith.constant 0 : index
    %58 = vector.load %arg15[%c65, %c0_29] : memref<176x4xf32, #tpu.memory_space<vmem>>, vector<8x4xf32>
    tpu.vector_store %arg15[%c65, %c0_29], %57 {strides = array<i32>} : memref<176x4xf32, #tpu.memory_space<vmem>>, vector<8x4xf32>,
    %59 = vector.extract_strided_slice %48 {offsets = [32, 0], sizes = [8, 4], strides = [1, 1]} : vector<64x4xf32> to vector<8x4xf32>
    %c81 = arith.constant 81 : index
    %c0_30 = arith.constant 0 : index
    %60 = vector.load %arg15[%c81, %c0_30] : memref<176x4xf32, #tpu.memory_space<vmem>>, vector<8x4xf32>
    tpu.vector_store %arg15[%c81, %c0_30], %59 {strides = array<i32>} : memref<176x4xf32, #tpu.memory_space<vmem>>, vector<8x4xf32>,
    %61 = vector.extract_strided_slice %48 {offsets = [40, 0], sizes = [8, 4], strides = [1, 1]} : vector<64x4xf32> to vector<8x4xf32>
    %c97 = arith.constant 97 : index
    %c0_31 = arith.constant 0 : index
    %62 = vector.load %arg15[%c97, %c0_31] : memref<176x4xf32, #tpu.memory_space<vmem>>, vector<8x4xf32>
    tpu.vector_store %arg15[%c97, %c0_31], %61 {strides = array<i32>} : memref<176x4xf32, #tpu.memory_space<vmem>>, vector<8x4xf32>,
    %63 = vector.extract_strided_slice %48 {offsets = [48, 0], sizes = [8, 4], strides = [1, 1]} : vector<64x4xf32> to vector<8x4xf32>
    %c113 = arith.constant 113 : index
    %c0_32 = arith.constant 0 : index
    %64 = vector.load %arg15[%c113, %c0_32] : memref<176x4xf32, #tpu.memory_space<vmem>>, vector<8x4xf32>
    tpu.vector_store %arg15[%c113, %c0_32], %63 {strides = array<i32>} : memref<176x4xf32, #tpu.memory_space<vmem>>, vector<8x4xf32>,
    %65 = vector.extract_strided_slice %48 {offsets = [56, 0], sizes = [8, 4], strides = [1, 1]} : vector<64x4xf32> to vector<8x4xf32>
    %c129 = arith.constant 129 : index
    %c0_33 = arith.constant 0 : index
    %66 = vector.load %arg15[%c129, %c0_33] : memref<176x4xf32, #tpu.memory_space<vmem>>, vector<8x4xf32>
    tpu.vector_store %arg15[%c129, %c0_33], %65 {strides = array<i32>} : memref<176x4xf32, #tpu.memory_space<vmem>>, vector<8x4xf32>,
    %c0_34 = arith.constant 0 : index
    %c0_35 = arith.constant 0 : index
    %67 = vector.load %arg15[%c0_34, %c0_35] : memref<176x4xf32, #tpu.memory_space<vmem>>, vector<176x4xf32>
    %68 = vector.extract_strided_slice %67 {offsets = [0, 0], sizes = [128, 4], strides = [1, 1]} : vector<176x4xf32> to vector<128x4xf32>
    %c0_36 = arith.constant 0 : index
    %c0_37 = arith.constant 0 : index
    %c0_38 = arith.constant 0 : index
    %c0_39 = arith.constant 0 : index
    %69 = vector.load %arg6[%c0_36, %c0_37, %c0_38, %c0_39] : memref<3x3x4x4xf32, #tpu.memory_space<vmem>>, vector<1x1x4x4xf32>
    %70 = vector.shape_cast %69 : vector<1x1x4x4xf32> to vector<4x4xf32>
    %cst_40 = arith.constant dense<0.000000e+00> : vector<128x4xf32>
    %71 = tpu.matmul %68, %70, %cst_40 {dimension_numbers = #tpu.dot_dimension_numbers<[1], [0], [0], [1], [0, 0, 1, 1], [], []>} : vector<128x4xf32>, vector<4x4xf32>, vector<128x4xf32> -> vector<128x4xf32>
    %72 = vector.extract_strided_slice %67 {offsets = [1, 0], sizes = [128, 4], strides = [1, 1]} : vector<176x4xf32> to vector<128x4xf32>
    %c0_41 = arith.constant 0 : index
    %c1 = arith.constant 1 : index
    %c0_42 = arith.constant 0 : index
    %c0_43 = arith.constant 0 : index
    %73 = vector.load %arg6[%c0_41, %c1, %c0_42, %c0_43] : memref<3x3x4x4xf32, #tpu.memory_space<vmem>>, vector<1x1x4x4xf32>
    %74 = vector.shape_cast %73 : vector<1x1x4x4xf32> to vector<4x4xf32>
    %cst_44 = arith.constant dense<0.000000e+00> : vector<128x4xf32>
    %75 = tpu.matmul %72, %74, %cst_44 {dimension_numbers = #tpu.dot_dimension_numbers<[1], [0], [0], [1], [0, 0, 1, 1], [], []>} : vector<128x4xf32>, vector<4x4xf32>, vector<128x4xf32> -> vector<128x4xf32>
    %76 = arith.addf %71, %75 : vector<128x4xf32>
    %77 = vector.extract_strided_slice %67 {offsets = [2, 0], sizes = [128, 4], strides = [1, 1]} : vector<176x4xf32> to vector<128x4xf32>
    %c0_45 = arith.constant 0 : index
    %c2 = arith.constant 2 : index
    %c0_46 = arith.constant 0 : index
    %c0_47 = arith.constant 0 : index
    %78 = vector.load %arg6[%c0_45, %c2, %c0_46, %c0_47] : memref<3x3x4x4xf32, #tpu.memory_space<vmem>>, vector<1x1x4x4xf32>
    %79 = vector.shape_cast %78 : vector<1x1x4x4xf32> to vector<4x4xf32>
    %cst_48 = arith.constant dense<0.000000e+00> : vector<128x4xf32>
    %80 = tpu.matmul %77, %79, %cst_48 {dimension_numbers = #tpu.dot_dimension_numbers<[1], [0], [0], [1], [0, 0, 1, 1], [], []>} : vector<128x4xf32>, vector<4x4xf32>, vector<128x4xf32> -> vector<128x4xf32>
    %81 = arith.addf %76, %80 : vector<128x4xf32>
    %82 = vector.extract_strided_slice %67 {offsets = [16, 0], sizes = [128, 4], strides = [1, 1]} : vector<176x4xf32> to vector<128x4xf32>
    %c1_49 = arith.constant 1 : index
    %c0_50 = arith.constant 0 : index
    %c0_51 = arith.constant 0 : index
    %c0_52 = arith.constant 0 : index
    %83 = vector.load %arg6[%c1_49, %c0_50, %c0_51, %c0_52] : memref<3x3x4x4xf32, #tpu.memory_space<vmem>>, vector<1x1x4x4xf32>
    %84 = vector.shape_cast %83 : vector<1x1x4x4xf32> to vector<4x4xf32>
    %cst_53 = arith.constant dense<0.000000e+00> : vector<128x4xf32>
    %85 = tpu.matmul %82, %84, %cst_53 {dimension_numbers = #tpu.dot_dimension_numbers<[1], [0], [0], [1], [0, 0, 1, 1], [], []>} : vector<128x4xf32>, vector<4x4xf32>, vector<128x4xf32> -> vector<128x4xf32>
    %86 = arith.addf %81, %85 : vector<128x4xf32>
    %87 = vector.extract_strided_slice %67 {offsets = [17, 0], sizes = [128, 4], strides = [1, 1]} : vector<176x4xf32> to vector<128x4xf32>
    %c1_54 = arith.constant 1 : index
    %c1_55 = arith.constant 1 : index
    %c0_56 = arith.constant 0 : index
    %c0_57 = arith.constant 0 : index
    %88 = vector.load %arg6[%c1_54, %c1_55, %c0_56, %c0_57] : memref<3x3x4x4xf32, #tpu.memory_space<vmem>>, vector<1x1x4x4xf32>
    %89 = vector.shape_cast %88 : vector<1x1x4x4xf32> to vector<4x4xf32>
    %cst_58 = arith.constant dense<0.000000e+00> : vector<128x4xf32>
    %90 = tpu.matmul %87, %89, %cst_58 {dimension_numbers = #tpu.dot_dimension_numbers<[1], [0], [0], [1], [0, 0, 1, 1], [], []>} : vector<128x4xf32>, vector<4x4xf32>, vector<128x4xf32> -> vector<128x4xf32>
    %91 = arith.addf %86, %90 : vector<128x4xf32>
    %92 = vector.extract_strided_slice %67 {offsets = [18, 0], sizes = [128, 4], strides = [1, 1]} : vector<176x4xf32> to vector<128x4xf32>
    %c1_59 = arith.constant 1 : index
    %c2_60 = arith.constant 2 : index
    %c0_61 = arith.constant 0 : index
    %c0_62 = arith.constant 0 : index
    %93 = vector.load %arg6[%c1_59, %c2_60, %c0_61, %c0_62] : memref<3x3x4x4xf32, #tpu.memory_space<vmem>>, vector<1x1x4x4xf32>
    %94 = vector.shape_cast %93 : vector<1x1x4x4xf32> to vector<4x4xf32>
    %cst_63 = arith.constant dense<0.000000e+00> : vector<128x4xf32>
    %95 = tpu.matmul %92, %94, %cst_63 {dimension_numbers = #tpu.dot_dimension_numbers<[1], [0], [0], [1], [0, 0, 1, 1], [], []>} : vector<128x4xf32>, vector<4x4xf32>, vector<128x4xf32> -> vector<128x4xf32>
    %96 = arith.addf %91, %95 : vector<128x4xf32>
    %97 = vector.extract_strided_slice %67 {offsets = [32, 0], sizes = [128, 4], strides = [1, 1]} : vector<176x4xf32> to vector<128x4xf32>
    %c2_64 = arith.constant 2 : index
    %c0_65 = arith.constant 0 : index
    %c0_66 = arith.constant 0 : index
    %c0_67 = arith.constant 0 : index
    %98 = vector.load %arg6[%c2_64, %c0_65, %c0_66, %c0_67] : memref<3x3x4x4xf32, #tpu.memory_space<vmem>>, vector<1x1x4x4xf32>
    %99 = vector.shape_cast %98 : vector<1x1x4x4xf32> to vector<4x4xf32>
    %cst_68 = arith.constant dense<0.000000e+00> : vector<128x4xf32>
    %100 = tpu.matmul %97, %99, %cst_68 {dimension_numbers = #tpu.dot_dimension_numbers<[1], [0], [0], [1], [0, 0, 1, 1], [], []>} : vector<128x4xf32>, vector<4x4xf32>, vector<128x4xf32> -> vector<128x4xf32>
    %101 = arith.addf %96, %100 : vector<128x4xf32>
    %102 = vector.extract_strided_slice %67 {offsets = [33, 0], sizes = [128, 4], strides = [1, 1]} : vector<176x4xf32> to vector<128x4xf32>
    %c2_69 = arith.constant 2 : index
    %c1_70 = arith.constant 1 : index
    %c0_71 = arith.constant 0 : index
    %c0_72 = arith.constant 0 : index
    %103 = vector.load %arg6[%c2_69, %c1_70, %c0_71, %c0_72] : memref<3x3x4x4xf32, #tpu.memory_space<vmem>>, vector<1x1x4x4xf32>
    %104 = vector.shape_cast %103 : vector<1x1x4x4xf32> to vector<4x4xf32>
    %cst_73 = arith.constant dense<0.000000e+00> : vector<128x4xf32>
    %105 = tpu.matmul %102, %104, %cst_73 {dimension_numbers = #tpu.dot_dimension_numbers<[1], [0], [0], [1], [0, 0, 1, 1], [], []>} : vector<128x4xf32>, vector<4x4xf32>, vector<128x4xf32> -> vector<128x4xf32>
    %106 = arith.addf %101, %105 : vector<128x4xf32>
    %107 = vector.extract_strided_slice %67 {offsets = [34, 0], sizes = [128, 4], strides = [1, 1]} : vector<176x4xf32> to vector<128x4xf32>
    %c2_74 = arith.constant 2 : index
    %c2_75 = arith.constant 2 : index
    %c0_76 = arith.constant 0 : index
    %c0_77 = arith.constant 0 : index
    %108 = vector.load %arg6[%c2_74, %c2_75, %c0_76, %c0_77] : memref<3x3x4x4xf32, #tpu.memory_space<vmem>>, vector<1x1x4x4xf32>
    %109 = vector.shape_cast %108 : vector<1x1x4x4xf32> to vector<4x4xf32>
    %cst_78 = arith.constant dense<0.000000e+00> : vector<128x4xf32>
    %110 = tpu.matmul %107, %109, %cst_78 {dimension_numbers = #tpu.dot_dimension_numbers<[1], [0], [0], [1], [0, 0, 1, 1], [], []>} : vector<128x4xf32>, vector<4x4xf32>, vector<128x4xf32> -> vector<128x4xf32>
    %111 = arith.addf %106, %110 : vector<128x4xf32>
    %c0_79 = arith.constant 0 : index
    %c0_80 = arith.constant 0 : index
    %112 = vector.load %arg7[%c0_79, %c0_80] : memref<1x4xf32, #tpu.memory_space<vmem>>, vector<1x4xf32>
    %113 = vector.broadcast %112 : vector<1x4xf32> to vector<128x4xf32>
    %114 = arith.addf %111, %113 : vector<128x4xf32>
    %cst_81 = arith.constant 5.000000e-01 : f32
    %115 = vector.broadcast %cst_81 : f32 to vector<128x4xf32>
    %116 = arith.mulf %115, %114 : vector<128x4xf32>
    %cst_82 = arith.constant 0.707106769 : f32
    %117 = vector.broadcast %cst_82 : f32 to vector<128x4xf32>
    %118 = arith.mulf %114, %117 : vector<128x4xf32>
    %119 = math.erf %118 : vector<128x4xf32>
    %cst_83 = arith.constant 1.000000e+00 : f32
    %120 = vector.broadcast %cst_83 : f32 to vector<128x4xf32>
    %121 = arith.addf %120, %119 : vector<128x4xf32>
    %122 = arith.mulf %116, %121 : vector<128x4xf32>
    %cst_84 = arith.constant 0.000000e+00 : f32
    %123 = vector.broadcast %cst_84 : f32 to vector<176x4xf32>
    %c0_85 = arith.constant 0 : index
    %c0_86 = arith.constant 0 : index
    %124 = vector.load %arg15[%c0_85, %c0_86] : memref<176x4xf32, #tpu.memory_space<vmem>>, vector<176x4xf32>
    tpu.vector_store %arg15[%c0_85, %c0_86], %123 {strides = array<i32>} : memref<176x4xf32, #tpu.memory_space<vmem>>, vector<176x4xf32>,
    %125 = vector.extract_strided_slice %122 {offsets = [0, 0], sizes = [8, 4], strides = [1, 1]} : vector<128x4xf32> to vector<8x4xf32>
    %c17_87 = arith.constant 17 : index
    %c0_88 = arith.constant 0 : index
    %126 = vector.load %arg15[%c17_87, %c0_88] : memref<176x4xf32, #tpu.memory_space<vmem>>, vector<8x4xf32>
    tpu.vector_store %arg15[%c17_87, %c0_88], %125 {strides = array<i32>} : memref<176x4xf32, #tpu.memory_space<vmem>>, vector<8x4xf32>,
    %127 = vector.extract_strided_slice %122 {offsets = [16, 0], sizes = [8, 4], strides = [1, 1]} : vector<128x4xf32> to vector<8x4xf32>
    %c33_89 = arith.constant 33 : index
    %c0_90 = arith.constant 0 : index
    %128 = vector.load %arg15[%c33_89, %c0_90] : memref<176x4xf32, #tpu.memory_space<vmem>>, vector<8x4xf32>
    tpu.vector_store %arg15[%c33_89, %c0_90], %127 {strides = array<i32>} : memref<176x4xf32, #tpu.memory_space<vmem>>, vector<8x4xf32>,
    %129 = vector.extract_strided_slice %122 {offsets = [32, 0], sizes = [8, 4], strides = [1, 1]} : vector<128x4xf32> to vector<8x4xf32>
    %c49_91 = arith.constant 49 : index
    %c0_92 = arith.constant 0 : index
    %130 = vector.load %arg15[%c49_91, %c0_92] : memref<176x4xf32, #tpu.memory_space<vmem>>, vector<8x4xf32>
    tpu.vector_store %arg15[%c49_91, %c0_92], %129 {strides = array<i32>} : memref<176x4xf32, #tpu.memory_space<vmem>>, vector<8x4xf32>,
    %131 = vector.extract_strided_slice %122 {offsets = [48, 0], sizes = [8, 4], strides = [1, 1]} : vector<128x4xf32> to vector<8x4xf32>
    %c65_93 = arith.constant 65 : index
    %c0_94 = arith.constant 0 : index
    %132 = vector.load %arg15[%c65_93, %c0_94] : memref<176x4xf32, #tpu.memory_space<vmem>>, vector<8x4xf32>
    tpu.vector_store %arg15[%c65_93, %c0_94], %131 {strides = array<i32>} : memref<176x4xf32, #tpu.memory_space<vmem>>, vector<8x4xf32>,
    %133 = vector.extract_strided_slice %122 {offsets = [64, 0], sizes = [8, 4], strides = [1, 1]} : vector<128x4xf32> to vector<8x4xf32>
    %c81_95 = arith.constant 81 : index
    %c0_96 = arith.constant 0 : index
    %134 = vector.load %arg15[%c81_95, %c0_96] : memref<176x4xf32, #tpu.memory_space<vmem>>, vector<8x4xf32>
    tpu.vector_store %arg15[%c81_95, %c0_96], %133 {strides = array<i32>} : memref<176x4xf32, #tpu.memory_space<vmem>>, vector<8x4xf32>,
    %135 = vector.extract_strided_slice %122 {offsets = [80, 0], sizes = [8, 4], strides = [1, 1]} : vector<128x4xf32> to vector<8x4xf32>
    %c97_97 = arith.constant 97 : index
    %c0_98 = arith.constant 0 : index
    %136 = vector.load %arg15[%c97_97, %c0_98] : memref<176x4xf32, #tpu.memory_space<vmem>>, vector<8x4xf32>
    tpu.vector_store %arg15[%c97_97, %c0_98], %135 {strides = array<i32>} : memref<176x4xf32, #tpu.memory_space<vmem>>, vector<8x4xf32>,
    %137 = vector.extract_strided_slice %122 {offsets = [96, 0], sizes = [8, 4], strides = [1, 1]} : vector<128x4xf32> to vector<8x4xf32>
    %c113_99 = arith.constant 113 : index
    %c0_100 = arith.constant 0 : index
    %138 = vector.load %arg15[%c113_99, %c0_100] : memref<176x4xf32, #tpu.memory_space<vmem>>, vector<8x4xf32>
    tpu.vector_store %arg15[%c113_99, %c0_100], %137 {strides = array<i32>} : memref<176x4xf32, #tpu.memory_space<vmem>>, vector<8x4xf32>,
    %139 = vector.extract_strided_slice %122 {offsets = [112, 0], sizes = [8, 4], strides = [1, 1]} : vector<128x4xf32> to vector<8x4xf32>
    %c129_101 = arith.constant 129 : index
    %c0_102 = arith.constant 0 : index
    %140 = vector.load %arg15[%c129_101, %c0_102] : memref<176x4xf32, #tpu.memory_space<vmem>>, vector<8x4xf32>
    tpu.vector_store %arg15[%c129_101, %c0_102], %139 {strides = array<i32>} : memref<176x4xf32, #tpu.memory_space<vmem>>, vector<8x4xf32>,
    %c0_103 = arith.constant 0 : index
    %c0_104 = arith.constant 0 : index
    %141 = vector.load %arg15[%c0_103, %c0_104] : memref<176x4xf32, #tpu.memory_space<vmem>>, vector<176x4xf32>
    %142 = vector.extract_strided_slice %141 {offsets = [0, 0], sizes = [128, 4], strides = [1, 1]} : vector<176x4xf32> to vector<128x4xf32>
    %c0_105 = arith.constant 0 : index
    %c0_106 = arith.constant 0 : index
    %c0_107 = arith.constant 0 : index
    %c0_108 = arith.constant 0 : index
    %143 = vector.load %arg8[%c0_105, %c0_106, %c0_107, %c0_108] : memref<3x3x4x4xf32, #tpu.memory_space<vmem>>, vector<1x1x4x4xf32>
    %144 = vector.shape_cast %143 : vector<1x1x4x4xf32> to vector<4x4xf32>
    %cst_109 = arith.constant dense<0.000000e+00> : vector<128x4xf32>
    %145 = tpu.matmul %142, %144, %cst_109 {dimension_numbers = #tpu.dot_dimension_numbers<[1], [0], [0], [1], [0, 0, 1, 1], [], []>} : vector<128x4xf32>, vector<4x4xf32>, vector<128x4xf32> -> vector<128x4xf32>
    %146 = vector.extract_strided_slice %141 {offsets = [1, 0], sizes = [128, 4], strides = [1, 1]} : vector<176x4xf32> to vector<128x4xf32>
    %c0_110 = arith.constant 0 : index
    %c1_111 = arith.constant 1 : index
    %c0_112 = arith.constant 0 : index
    %c0_113 = arith.constant 0 : index
    %147 = vector.load %arg8[%c0_110, %c1_111, %c0_112, %c0_113] : memref<3x3x4x4xf32, #tpu.memory_space<vmem>>, vector<1x1x4x4xf32>
    %148 = vector.shape_cast %147 : vector<1x1x4x4xf32> to vector<4x4xf32>
    %cst_114 = arith.constant dense<0.000000e+00> : vector<128x4xf32>
    %149 = tpu.matmul %146, %148, %cst_114 {dimension_numbers = #tpu.dot_dimension_numbers<[1], [0], [0], [1], [0, 0, 1, 1], [], []>} : vector<128x4xf32>, vector<4x4xf32>, vector<128x4xf32> -> vector<128x4xf32>
    %150 = arith.addf %145, %149 : vector<128x4xf32>
    %151 = vector.extract_strided_slice %141 {offsets = [2, 0], sizes = [128, 4], strides = [1, 1]} : vector<176x4xf32> to vector<128x4xf32>
    %c0_115 = arith.constant 0 : index
    %c2_116 = arith.constant 2 : index
    %c0_117 = arith.constant 0 : index
    %c0_118 = arith.constant 0 : index
    %152 = vector.load %arg8[%c0_115, %c2_116, %c0_117, %c0_118] : memref<3x3x4x4xf32, #tpu.memory_space<vmem>>, vector<1x1x4x4xf32>
    %153 = vector.shape_cast %152 : vector<1x1x4x4xf32> to vector<4x4xf32>
    %cst_119 = arith.constant dense<0.000000e+00> : vector<128x4xf32>
    %154 = tpu.matmul %151, %153, %cst_119 {dimension_numbers = #tpu.dot_dimension_numbers<[1], [0], [0], [1], [0, 0, 1, 1], [], []>} : vector<128x4xf32>, vector<4x4xf32>, vector<128x4xf32> -> vector<128x4xf32>
    %155 = arith.addf %150, %154 : vector<128x4xf32>
    %156 = vector.extract_strided_slice %141 {offsets = [16, 0], sizes = [128, 4], strides = [1, 1]} : vector<176x4xf32> to vector<128x4xf32>
    %c1_120 = arith.constant 1 : index
    %c0_121 = arith.constant 0 : index
    %c0_122 = arith.constant 0 : index
    %c0_123 = arith.constant 0 : index
    %157 = vector.load %arg8[%c1_120, %c0_121, %c0_122, %c0_123] : memref<3x3x4x4xf32, #tpu.memory_space<vmem>>, vector<1x1x4x4xf32>
    %158 = vector.shape_cast %157 : vector<1x1x4x4xf32> to vector<4x4xf32>
    %cst_124 = arith.constant dense<0.000000e+00> : vector<128x4xf32>
    %159 = tpu.matmul %156, %158, %cst_124 {dimension_numbers = #tpu.dot_dimension_numbers<[1], [0], [0], [1], [0, 0, 1, 1], [], []>} : vector<128x4xf32>, vector<4x4xf32>, vector<128x4xf32> -> vector<128x4xf32>
    %160 = arith.addf %155, %159 : vector<128x4xf32>
    %161 = vector.extract_strided_slice %141 {offsets = [17, 0], sizes = [128, 4], strides = [1, 1]} : vector<176x4xf32> to vector<128x4xf32>
    %c1_125 = arith.constant 1 : index
    %c1_126 = arith.constant 1 : index
    %c0_127 = arith.constant 0 : index
    %c0_128 = arith.constant 0 : index
    %162 = vector.load %arg8[%c1_125, %c1_126, %c0_127, %c0_128] : memref<3x3x4x4xf32, #tpu.memory_space<vmem>>, vector<1x1x4x4xf32>
    %163 = vector.shape_cast %162 : vector<1x1x4x4xf32> to vector<4x4xf32>
    %cst_129 = arith.constant dense<0.000000e+00> : vector<128x4xf32>
    %164 = tpu.matmul %161, %163, %cst_129 {dimension_numbers = #tpu.dot_dimension_numbers<[1], [0], [0], [1], [0, 0, 1, 1], [], []>} : vector<128x4xf32>, vector<4x4xf32>, vector<128x4xf32> -> vector<128x4xf32>
    %165 = arith.addf %160, %164 : vector<128x4xf32>
    %166 = vector.extract_strided_slice %141 {offsets = [18, 0], sizes = [128, 4], strides = [1, 1]} : vector<176x4xf32> to vector<128x4xf32>
    %c1_130 = arith.constant 1 : index
    %c2_131 = arith.constant 2 : index
    %c0_132 = arith.constant 0 : index
    %c0_133 = arith.constant 0 : index
    %167 = vector.load %arg8[%c1_130, %c2_131, %c0_132, %c0_133] : memref<3x3x4x4xf32, #tpu.memory_space<vmem>>, vector<1x1x4x4xf32>
    %168 = vector.shape_cast %167 : vector<1x1x4x4xf32> to vector<4x4xf32>
    %cst_134 = arith.constant dense<0.000000e+00> : vector<128x4xf32>
    %169 = tpu.matmul %166, %168, %cst_134 {dimension_numbers = #tpu.dot_dimension_numbers<[1], [0], [0], [1], [0, 0, 1, 1], [], []>} : vector<128x4xf32>, vector<4x4xf32>, vector<128x4xf32> -> vector<128x4xf32>
    %170 = arith.addf %165, %169 : vector<128x4xf32>
    %171 = vector.extract_strided_slice %141 {offsets = [32, 0], sizes = [128, 4], strides = [1, 1]} : vector<176x4xf32> to vector<128x4xf32>
    %c2_135 = arith.constant 2 : index
    %c0_136 = arith.constant 0 : index
    %c0_137 = arith.constant 0 : index
    %c0_138 = arith.constant 0 : index
    %172 = vector.load %arg8[%c2_135, %c0_136, %c0_137, %c0_138] : memref<3x3x4x4xf32, #tpu.memory_space<vmem>>, vector<1x1x4x4xf32>
    %173 = vector.shape_cast %172 : vector<1x1x4x4xf32> to vector<4x4xf32>
    %cst_139 = arith.constant dense<0.000000e+00> : vector<128x4xf32>
    %174 = tpu.matmul %171, %173, %cst_139 {dimension_numbers = #tpu.dot_dimension_numbers<[1], [0], [0], [1], [0, 0, 1, 1], [], []>} : vector<128x4xf32>, vector<4x4xf32>, vector<128x4xf32> -> vector<128x4xf32>
    %175 = arith.addf %170, %174 : vector<128x4xf32>
    %176 = vector.extract_strided_slice %141 {offsets = [33, 0], sizes = [128, 4], strides = [1, 1]} : vector<176x4xf32> to vector<128x4xf32>
    %c2_140 = arith.constant 2 : index
    %c1_141 = arith.constant 1 : index
    %c0_142 = arith.constant 0 : index
    %c0_143 = arith.constant 0 : index
    %177 = vector.load %arg8[%c2_140, %c1_141, %c0_142, %c0_143] : memref<3x3x4x4xf32, #tpu.memory_space<vmem>>, vector<1x1x4x4xf32>
    %178 = vector.shape_cast %177 : vector<1x1x4x4xf32> to vector<4x4xf32>
    %cst_144 = arith.constant dense<0.000000e+00> : vector<128x4xf32>
    %179 = tpu.matmul %176, %178, %cst_144 {dimension_numbers = #tpu.dot_dimension_numbers<[1], [0], [0], [1], [0, 0, 1, 1], [], []>} : vector<128x4xf32>, vector<4x4xf32>, vector<128x4xf32> -> vector<128x4xf32>
    %180 = arith.addf %175, %179 : vector<128x4xf32>
    %181 = vector.extract_strided_slice %141 {offsets = [34, 0], sizes = [128, 4], strides = [1, 1]} : vector<176x4xf32> to vector<128x4xf32>
    %c2_145 = arith.constant 2 : index
    %c2_146 = arith.constant 2 : index
    %c0_147 = arith.constant 0 : index
    %c0_148 = arith.constant 0 : index
    %182 = vector.load %arg8[%c2_145, %c2_146, %c0_147, %c0_148] : memref<3x3x4x4xf32, #tpu.memory_space<vmem>>, vector<1x1x4x4xf32>
    %183 = vector.shape_cast %182 : vector<1x1x4x4xf32> to vector<4x4xf32>
    %cst_149 = arith.constant dense<0.000000e+00> : vector<128x4xf32>
    %184 = tpu.matmul %181, %183, %cst_149 {dimension_numbers = #tpu.dot_dimension_numbers<[1], [0], [0], [1], [0, 0, 1, 1], [], []>} : vector<128x4xf32>, vector<4x4xf32>, vector<128x4xf32> -> vector<128x4xf32>
    %185 = arith.addf %180, %184 : vector<128x4xf32>
    %c0_150 = arith.constant 0 : index
    %c0_151 = arith.constant 0 : index
    %186 = vector.load %arg9[%c0_150, %c0_151] : memref<1x4xf32, #tpu.memory_space<vmem>>, vector<1x4xf32>
    %187 = vector.broadcast %186 : vector<1x4xf32> to vector<128x4xf32>
    %188 = arith.addf %185, %187 : vector<128x4xf32>
    %189 = vector.extract_strided_slice %188 {offsets = [0, 0], sizes = [8, 4], strides = [1, 1]} : vector<128x4xf32> to vector<8x4xf32>
    %c0_152 = arith.constant 0 : index
    %c0_153 = arith.constant 0 : index
    %190 = vector.load %arg16[%c0_152, %c0_153] : memref<64x4xf32, #tpu.memory_space<vmem>>, vector<8x4xf32>
    tpu.vector_store %arg16[%c0_152, %c0_153], %189 {strides = array<i32>} : memref<64x4xf32, #tpu.memory_space<vmem>>, vector<8x4xf32>,
    %191 = vector.extract_strided_slice %188 {offsets = [16, 0], sizes = [8, 4], strides = [1, 1]} : vector<128x4xf32> to vector<8x4xf32>
    %c8 = arith.constant 8 : index
    %c0_154 = arith.constant 0 : index
    %192 = vector.load %arg16[%c8, %c0_154] : memref<64x4xf32, #tpu.memory_space<vmem>>, vector<8x4xf32>
    tpu.vector_store %arg16[%c8, %c0_154], %191 {strides = array<i32>} : memref<64x4xf32, #tpu.memory_space<vmem>>, vector<8x4xf32>,
    %193 = vector.extract_strided_slice %188 {offsets = [32, 0], sizes = [8, 4], strides = [1, 1]} : vector<128x4xf32> to vector<8x4xf32>
    %c16 = arith.constant 16 : index
    %c0_155 = arith.constant 0 : index
    %194 = vector.load %arg16[%c16, %c0_155] : memref<64x4xf32, #tpu.memory_space<vmem>>, vector<8x4xf32>
    tpu.vector_store %arg16[%c16, %c0_155], %193 {strides = array<i32>} : memref<64x4xf32, #tpu.memory_space<vmem>>, vector<8x4xf32>,
    %195 = vector.extract_strided_slice %188 {offsets = [48, 0], sizes = [8, 4], strides = [1, 1]} : vector<128x4xf32> to vector<8x4xf32>
    %c24 = arith.constant 24 : index
    %c0_156 = arith.constant 0 : index
    %196 = vector.load %arg16[%c24, %c0_156] : memref<64x4xf32, #tpu.memory_space<vmem>>, vector<8x4xf32>
    tpu.vector_store %arg16[%c24, %c0_156], %195 {strides = array<i32>} : memref<64x4xf32, #tpu.memory_space<vmem>>, vector<8x4xf32>,
    %197 = vector.extract_strided_slice %188 {offsets = [64, 0], sizes = [8, 4], strides = [1, 1]} : vector<128x4xf32> to vector<8x4xf32>
    %c32 = arith.constant 32 : index
    %c0_157 = arith.constant 0 : index
    %198 = vector.load %arg16[%c32, %c0_157] : memref<64x4xf32, #tpu.memory_space<vmem>>, vector<8x4xf32>
    tpu.vector_store %arg16[%c32, %c0_157], %197 {strides = array<i32>} : memref<64x4xf32, #tpu.memory_space<vmem>>, vector<8x4xf32>,
    %199 = vector.extract_strided_slice %188 {offsets = [80, 0], sizes = [8, 4], strides = [1, 1]} : vector<128x4xf32> to vector<8x4xf32>
    %c40 = arith.constant 40 : index
    %c0_158 = arith.constant 0 : index
    %200 = vector.load %arg16[%c40, %c0_158] : memref<64x4xf32, #tpu.memory_space<vmem>>, vector<8x4xf32>
    tpu.vector_store %arg16[%c40, %c0_158], %199 {strides = array<i32>} : memref<64x4xf32, #tpu.memory_space<vmem>>, vector<8x4xf32>,
    %201 = vector.extract_strided_slice %188 {offsets = [96, 0], sizes = [8, 4], strides = [1, 1]} : vector<128x4xf32> to vector<8x4xf32>
    %c48 = arith.constant 48 : index
    %c0_159 = arith.constant 0 : index
    %202 = vector.load %arg16[%c48, %c0_159] : memref<64x4xf32, #tpu.memory_space<vmem>>, vector<8x4xf32>
    tpu.vector_store %arg16[%c48, %c0_159], %201 {strides = array<i32>} : memref<64x4xf32, #tpu.memory_space<vmem>>, vector<8x4xf32>,
    %203 = vector.extract_strided_slice %188 {offsets = [112, 0], sizes = [8, 4], strides = [1, 1]} : vector<128x4xf32> to vector<8x4xf32>
    %c56 = arith.constant 56 : index
    %c0_160 = arith.constant 0 : index
    %204 = vector.load %arg16[%c56, %c0_160] : memref<64x4xf32, #tpu.memory_space<vmem>>, vector<8x4xf32>
    tpu.vector_store %arg16[%c56, %c0_160], %203 {strides = array<i32>} : memref<64x4xf32, #tpu.memory_space<vmem>>, vector<8x4xf32>,
    %c0_161 = arith.constant 0 : index
    %c0_162 = arith.constant 0 : index
    %205 = vector.load %arg16[%c0_161, %c0_162] : memref<64x4xf32, #tpu.memory_space<vmem>>, vector<64x4xf32>
    %cst_163 = arith.constant 5.000000e-01 : f32
    %206 = vector.broadcast %cst_163 : f32 to vector<64x4xf32>
    %207 = arith.mulf %206, %205 : vector<64x4xf32>
    %cst_164 = arith.constant 0.707106769 : f32
    %208 = vector.broadcast %cst_164 : f32 to vector<64x4xf32>
    %209 = arith.mulf %205, %208 : vector<64x4xf32>
    %210 = math.erf %209 : vector<64x4xf32>
    %cst_165 = arith.constant 1.000000e+00 : f32
    %211 = vector.broadcast %cst_165 : f32 to vector<64x4xf32>
    %212 = arith.addf %211, %210 : vector<64x4xf32>
    %213 = arith.mulf %207, %212 : vector<64x4xf32>
    %c0_166 = arith.constant 0 : index
    %c0_167 = arith.constant 0 : index
    %214 = vector.load %arg10[%c0_166, %c0_167] : memref<4x16xf32, #tpu.memory_space<vmem>>, vector<4x16xf32>
    %cst_168 = arith.constant dense<0.000000e+00> : vector<64x16xf32>
    %215 = tpu.matmul %213, %214, %cst_168 {dimension_numbers = #tpu.dot_dimension_numbers<[1], [0], [0], [1], [0, 0, 1, 1], [], []>} : vector<64x4xf32>, vector<4x16xf32>, vector<64x16xf32> -> vector<64x16xf32>
    %c0_169 = arith.constant 0 : index
    %c0_170 = arith.constant 0 : index
    %216 = vector.load %arg11[%c0_169, %c0_170] : memref<1x16xf32, #tpu.memory_space<vmem>>, vector<1x16xf32>
    %217 = vector.broadcast %216 : vector<1x16xf32> to vector<64x16xf32>
    %218 = arith.addf %215, %217 : vector<64x16xf32>
    %219 = arith.addf %27, %218 : vector<64x16xf32>
    %c0_171 = arith.constant 0 : index
    %c0_172 = arith.constant 0 : index
    %220 = vector.load %arg12[%c0_171, %c0_172] : memref<16x3xf32, #tpu.memory_space<vmem>>, vector<16x3xf32>
    %cst_173 = arith.constant dense<0.000000e+00> : vector<64x3xf32>
    %221 = tpu.matmul %219, %220, %cst_173 {dimension_numbers = #tpu.dot_dimension_numbers<[1], [0], [0], [1], [0, 0, 1, 1], [], []>} : vector<64x16xf32>, vector<16x3xf32>, vector<64x3xf32> -> vector<64x3xf32>
    %c0_174 = arith.constant 0 : index
    %c0_175 = arith.constant 0 : index
    %222 = vector.load %arg13[%c0_174, %c0_175] : memref<1x3xf32, #tpu.memory_space<vmem>>, vector<1x3xf32>
    %223 = vector.broadcast %222 : vector<1x3xf32> to vector<64x3xf32>
    %224 = arith.addf %221, %223 : vector<64x3xf32>
    %c0_176 = arith.constant 0 : index
    %c0_177 = arith.constant 0 : index
    %c0_178 = arith.constant 0 : index
    %225 = vector.load %arg14[%c0_176, %c0_177, %c0_178] : memref<1x64x3xf32, #tpu.memory_space<vmem>>, vector<1x64x3xf32>
    %226 = vector.shape_cast %225 : vector<1x64x3xf32> to vector<64x3xf32>
    %227 = vector.shape_cast %224 : vector<64x3xf32> to vector<1x64x3xf32>
    tpu.vector_store %arg14[%c0_176, %c0_177, %c0_178], %227 {strides = array<i32>} : memref<1x64x3xf32, #tpu.memory_space<vmem>>, vector<1x64x3xf32>,
    return
  }
  func.func @transform_0(%arg0: i32) -> (i32, i32, i32) {
    %c0_i32 = arith.constant 0 : i32
    %c0_i32_0 = arith.constant 0 : i32
    %c0_i32_1 = arith.constant 0 : i32
    return %arg0, %c0_i32, %c0_i32_0 : i32, i32, i32
  }
  func.func @transform_1(%arg0: i32) -> (i32, i32, i32) {
    %c0_i32 = arith.constant 0 : i32
    %c0_i32_0 = arith.constant 0 : i32
    %c0_i32_1 = arith.constant 0 : i32
    return %arg0, %c0_i32, %c0_i32_0 : i32, i32, i32
  }
  func.func @transform_2(%arg0: i32) -> (i32, i32, i32) {
    %c0_i32 = arith.constant 0 : i32
    %c0_i32_0 = arith.constant 0 : i32
    %c0_i32_1 = arith.constant 0 : i32
    return %arg0, %c0_i32, %c0_i32_0 : i32, i32, i32
  }
  func.func @transform_3(%arg0: i32) -> (i32, i32) {
    %c0_i32 = arith.constant 0 : i32
    %c0_i32_0 = arith.constant 0 : i32
    %c0_i32_1 = arith.constant 0 : i32
    return %c0_i32, %c0_i32_0 : i32, i32
  }
  func.func @transform_4(%arg0: i32) -> (i32, i32) {
    %c0_i32 = arith.constant 0 : i32
    %c0_i32_0 = arith.constant 0 : i32
    %c0_i32_1 = arith.constant 0 : i32
    return %c0_i32, %c0_i32_0 : i32, i32
  }
  func.func @transform_5(%arg0: i32) -> (i32, i32, i32, i32) {
    %c0_i32 = arith.constant 0 : i32
    %c0_i32_0 = arith.constant 0 : i32
    %c0_i32_1 = arith.constant 0 : i32
    %c0_i32_2 = arith.constant 0 : i32
    %c0_i32_3 = arith.constant 0 : i32
    return %c0_i32, %c0_i32_0, %c0_i32_1, %c0_i32_2 : i32, i32, i32, i32
  }
  func.func @transform_6(%arg0: i32) -> (i32, i32) {
    %c0_i32 = arith.constant 0 : i32
    %c0_i32_0 = arith.constant 0 : i32
    %c0_i32_1 = arith.constant 0 : i32
    return %c0_i32, %c0_i32_0 : i32, i32
  }
  func.func @transform_7(%arg0: i32) -> (i32, i32, i32, i32) {
    %c0_i32 = arith.constant 0 : i32
    %c0_i32_0 = arith.constant 0 : i32
    %c0_i32_1 = arith.constant 0 : i32
    %c0_i32_2 = arith.constant 0 : i32
    %c0_i32_3 = arith.constant 0 : i32
    return %c0_i32, %c0_i32_0, %c0_i32_1, %c0_i32_2 : i32, i32, i32, i32
  }
  func.func @transform_8(%arg0: i32) -> (i32, i32) {
    %c0_i32 = arith.constant 0 : i32
    %c0_i32_0 = arith.constant 0 : i32
    %c0_i32_1 = arith.constant 0 : i32
    return %c0_i32, %c0_i32_0 : i32, i32
  }
  func.func @transform_9(%arg0: i32) -> (i32, i32) {
    %c0_i32 = arith.constant 0 : i32
    %c0_i32_0 = arith.constant 0 : i32
    %c0_i32_1 = arith.constant 0 : i32
    return %c0_i32, %c0_i32_0 : i32, i32
  }
  func.func @transform_10(%arg0: i32) -> (i32, i32) {
    %c0_i32 = arith.constant 0 : i32
    %c0_i32_0 = arith.constant 0 : i32
    %c0_i32_1 = arith.constant 0 : i32
    return %c0_i32, %c0_i32_0 : i32, i32
  }
  func.func @transform_11(%arg0: i32) -> (i32, i32) {
    %c0_i32 = arith.constant 0 : i32
    %c0_i32_0 = arith.constant 0 : i32
    %c0_i32_1 = arith.constant 0 : i32
    return %c0_i32, %c0_i32_0 : i32, i32
  }
  func.func @transform_12(%arg0: i32) -> (i32, i32) {
    %c0_i32 = arith.constant 0 : i32
    %c0_i32_0 = arith.constant 0 : i32
    %c0_i32_1 = arith.constant 0 : i32
    return %c0_i32, %c0_i32_0 : i32, i32
  }
  func.func @transform_13(%arg0: i32) -> (i32, i32, i32) {
    %c0_i32 = arith.constant 0 : i32
    %c0_i32_0 = arith.constant 0 : i32
    %c0_i32_1 = arith.constant 0 : i32
    return %arg0, %c0_i32, %c0_i32_0 : i32, i32, i32
  }
}

</mosaic_0001>

<bundles_post_ra>
// kernel: _lambda_.4
= control target key start
LH: loop header
LB: loop body
LE: loop exit
PB: predicated region body
PF: predicated region fallthrough
CT: control target
= control target key end

     0   :  { %vm22_vm0 = vcmask 254976   ;;  %v380_v3 = vmov 0.0|0.0   ;;  %vm381_vm1 = vmmov 0   ;;  %v382_v7 = vmov 0.0   ;;  %s470_s0 = inlined_call_operand.vmem [shape: f32[2,32], index: 0, kind: input, shape index: {}]   ;;  %s471_s1 = inlined_call_operand.vmem [shape: f32[2,32,32], index: 1, kind: input, shape index: {}]   ;;  %s472_s3 = inlined_call_operand.vmem [shape: f32[32,96], index: 3, kind: input, shape index: {}]   ;;  %s473_s2 = inlined_call_operand.vmem [shape: f32[2,1,32], index: 2, kind: input, shape index: {}]   ;;  %s474_s4 = inlined_call_operand.vmem [shape: f32[1,96], index: 4, kind: input, shape index: {}]   ;;  %s475_s5 = inlined_call_operand.vmem [shape: f32[2,96], index: 5, kind: output, shape index: {}]  }
   0x1   :  { %v20_v0 = vld [vmem:[%s470_s0] sm:$0x3]  ;;  %357 = vmatprep.subr.bf16.mxu0 %v380_v3  ;;  %v32_v5 = vld [vmem:[%s471_s1 + $0x8] sm:$0xff]  ;;  %v33_v6 = vld [vmem:[%s471_s1 + $0x10] sm:$0xff]  ;;  %332 = vmatprep.mubr.msk.f32.mxu0 %vm381_vm1, %v382_v7  ;;  %vm42_vm2 = vcmask 261120   ;;  %vm292_vm5 = vcmask 779264  }
   0x2   :  { %v21_v1 = vmul.f32 %v20_v0, %v20_v0  ;;  %v31_v4 = vld [vmem:[%s471_s1] sm:$0xff]  ;;  %v34_v9 = vld [vmem:[%s471_s1 + $0x18] sm:$0xff]  ;;  %363 = vmatprep.subr.bf16.mxu1 %v380_v3  ;;  %343 = vmatprep.mubr.msk.f32.mxu1 %vm381_vm1, %v382_v7  ;;  %v301_v12 = vld [vmem:[%s471_s1 + $0x28] sm:$0xff] }
   0x3   :  { %v358_v8 = vpack.c.bf16 %v32_v5, %v31_v4  ;;  %v361_v10 = vpack.c.bf16 %v34_v9, %v33_v6  ;;  %v300_v11 = vld [vmem:[%s471_s1 + $0x20] sm:$0xff]  ;;  %v302_v19 = vld [vmem:[%s471_s1 + $0x30] sm:$0xff]  ;;  %v303_v20 = vld [vmem:[%s471_s1 + $0x38] sm:$0xff] }
   0x4   :  { %v23_v2 = vsel %vm22_vm0, %v21_v1, 0.0  ;;  %v364_v13 = vpack.c.bf16 %v301_v12, %v300_v11  ;;  %v367_v21 = vpack.c.bf16 %v303_v20, %v302_v19  ;;  %v208_v22 = vld [vmem:[%s472_s3] sm:$0xff]  ;;  %v209_v23 = vld [vmem:[%s472_s3 + $0x8] sm:$0xff]  ;;  %v210_v31 = vld [vmem:[%s472_s3 + $0x10] sm:$0xff] }
   0x5   :  { %24 = vadd.xlane.f32.xlu0 %v23_v2  ;;  %359 = vmatpush3.bf16.msra.mxu0 %v358_v8  ;;  %v370_v24 = vpack.c.bf16 %v209_v23, %v208_v22  ;;  %v298_v25 = vld [vmem:[%s473_s2] ss:$0 sm:$0xff]  ;;  %v211_v32 = vld [vmem:[%s472_s3 + $0x18] sm:$0xff]  ;;  %v305_v34 = vld [vmem:[%s473_s2 + $0x1] ss:$0 sm:$0xff] }
   0x6   :  { %360 = vmatprep.subr.bf16.mxu0 %v380_v3  ;;  %365 = vmatpush3.bf16.msra.mxu1 %v364_v13  ;;  %v373_v33 = vpack.c.bf16 %v211_v32, %v210_v31  ;;  %v307_v40 = vld [vmem:[%s474_s4] ss:$0 sm:$0xff] }
   0x7   :  { %366 = vmatprep.subr.bf16.mxu1 %v380_v3 }
   0x9   :  { %362 = vmatpush3.bf16.msra.mxu0 %v361_v10 }
   0xa   :  { %369 = vmatprep.subr.bf16.mxu0 %v380_v3  ;;  %368 = vmatpush3.bf16.msra.mxu1 %v367_v21 }
  0x92   :  { %v25_v14 = vpop.xlane.xlu0 %24 }
  0x93   :  { %v27_v15 = vmul.f32 0.03125, %v25_v14 }
  0x95   :  { %v28_v16 = vadd.f32 1e-08, %v27_v15 }
  0x97   :  { %378 = vrsqrt.f32 %v28_v16 }
  0xa1   :  { %v379_v17 = vpop.eup %378 }
  0xa2   :  { %v30_v18 = vmul.f32 %v379_v17, %v20_v0 }
  0xa4   :  { %333 = vmatmul.mubr.msk.f32.vlgmr.msra.gmra.mrb[0].mxu0 %vm42_vm2, %v30_v18 }
  0xa5   :  { %354 = vmatprep.mubr.msk.f32.mxu0 %vm381_vm1, %v382_v7  ;;  %371 = vmatpush3.bf16.msra.mxu0 %v370_v24 }
  0xa6   :  { %372 = vmatprep.subr.bf16.mxu0 %v380_v3 }
  0xa9   :  { %374 = vmatpush3.bf16.msra.mxu0 %v373_v33 }
 0x177   :  { %v112_v26 = vpop.f32.mrb[0].mxu0 }
 0x178   :  { %v113_v27 = vadd.f32 %v298_v25, %v112_v26  ;;  %v334_v28 = vpop.f32.mrb[1].mxu0 }
 0x17a   :  { %vm116_vm3 = vcmp.ge.f32.partialorder %v113_v27, 0.0  ;;  %v117_v29 = vmul.f32 0.2, %v113_v27 }
 0x17c   :  { %v118_v30 = vsel %vm116_vm3, %v113_v27, %v117_v29 }
 0x17d   :  { %344 = vmatmul.mubr.msk.f32.vlgmr.msra.gmra.mrb[0].mxu1 %vm42_vm2, %v118_v30 }
 0x250   :  { %v201_v35 = vpop.f32.mrb[0].mxu1 }
 0x251   :  { %v202_v36 = vadd.f32 %v305_v34, %v201_v35  ;;  %v345_v37 = vpop.f32.mrb[1].mxu1 }
 0x253   :  { %vm205_vm4 = vcmp.ge.f32.partialorder %v202_v36, 0.0  ;;  %v206_v38 = vmul.f32 0.2, %v202_v36 }
 0x255   :  { %v207_v39 = vsel %vm205_vm4, %v202_v36, %v206_v38 }
 0x256   :  { %355 = vmatmul.mubr.msk.f32.vlgmr.msra.gmra.mrb[2].mxu0 %vm42_vm2, %v207_v39 }
 0x329   :  { %v288_v41 = vpop.f32.mrb[2].mxu0 }
 0x32a   :  { %v289_v42 = vadd.f32 %v307_v40, %v288_v41  ;;  %v356_v43 = vpop.f32.mrb[3].mxu0 }
 0x32c   :  { %293 = vst.msk [vmem:[%s475_s5] sm:$0x3] %vm292_vm5, %v289_v42 }

// kernel: _lambda_.5
= control target key start
LH: loop header
LB: loop body
LE: loop exit
PB: predicated region body
PF: predicated region fallthrough
CT: control target
= control target key end

     0   :  { %s3207_s17 = smov 0   ;;  %s3544_s0 = inlined_call_operand.vmem [shape: f32[2,16,16], index: 0, kind: input, shape index: {}]   ;;  %s3545_s1 = inlined_call_operand.vmem [shape: f32[2,1,16], index: 1, kind: input, shape index: {}]   ;;  %s3546_s2 = inlined_call_operand.vmem [shape: f32[2,1,16], index: 2, kind: input, shape index: {}]   ;;  %s3547_s3 = inlined_call_operand.vmem [shape: f32[16,4], index: 3, kind: input, shape index: {}]   ;;  %s3548_s4 = inlined_call_operand.vmem [shape: f32[1,4], index: 4, kind: input, shape index: {}]   ;;  %s3549_s5 = inlined_call_operand.vmem [shape: f32[3,3,4,4], index: 5, kind: input, shape index: {}]   ;;  %s3550_s6 = inlined_call_operand.vmem [shape: f32[1,4], index: 6, kind: input, shape index: {}]   ;;  %s3551_s7 = inlined_call_operand.vmem [shape: f32[3,3,4,4], index: 7, kind: input, shape index: {}]   ;;  %s3552_s8 = inlined_call_operand.vmem [shape: f32[1,4], index: 8, kind: input, shape index: {}]   ;;  %s3553_s9 = inlined_call_operand.vmem [shape: f32[4,16], index: 9, kind: input, shape index: {}]   ;;  %s3554_s10 = inlined_call_operand.vmem [shape: f32[1,16], index: 10, kind: input, shape index: {}]   ;;  %s3555_s11 = inlined_call_operand.vmem [shape: f32[2,16,16], index: 11, kind: output, shape index: {}]  }
   0x1 LB: > { %s2656_s18 = sadd.s32 4294967295, %s3144_s17   ;;  %p2660_p0 = scmp.ge.s32.totalorder %s3144_s17, 1  ;;  %s3144_s17 = sphi %s3207_s17, %s21_s17  }
   0x2   : > { %p353_p1 = scmp.lt.s32.totalorder %s3144_s17, 3 }
   0x4   : > { %p354_p2 = pnand %p2660_p0, %p353_p1 }
   0x5   : > { %v475_v0 = vld [vmem:[%s3547_s3] sm:$0xff] (!%p354_p2)  ;;  %v476_v1 = vld [vmem:[%s3547_s3 + $0x8] sm:$0xff] (!%p354_p2)  ;;  %p399_p3 = scmp.lt.s32.totalorder (!%p354_p2), %s2656_s18, 1  ;;  %vm417_vm0 = vcmask (!%p354_p2), 130048   ;;  %vm575_vm1 = vcmask (!%p354_p2), 31744   ;;  %v3146_v49 = vmov (!%p354_p2), 0.0  }
   0x6   : > { %357 = sbr.rel (%p354_p2) target bundleno = 1171 (0x493), region = 64  ;;  %v3039_v2 = vpack.c.bf16 (!%p354_p2), %v476_v1, %v475_v0  ;;  %579 = vst.msk [vmem:[#allocation2 + $0x18] sm:$0xff] (!%p354_p2), %vm575_vm1, %v3146_v49  ;;  %580 = vst.msk [vmem:[#allocation2 + $0x20] sm:$0xff] (!%p354_p2), %vm575_vm1, %v3146_v49  ;;  %v2670_v50 = vld [vmem:[%s3549_s5 + $0x4] sm:$0xf] (!%p354_p2)  ;;  %vm622_vm2 = vcmask (!%p354_p2), 1043456  }
   0x7   : > { %576 = vst.msk [vmem:[#allocation2] sm:$0xff] (!%p354_p2), %vm575_vm1, %v3146_v49  ;;  %577 = vst.msk [vmem:[#allocation2 + $0x8] sm:$0xff] (!%p354_p2), %vm575_vm1, %v3146_v49  ;;  %2890 = vmatprep.subr.msk.mxu1 (!%p354_p2), %vm622_vm2, %v2670_v50  ;;  %v596_v53 = vld [vmem:[%s3549_s5] sm:$0xf] (!%p354_p2)  ;;  %vm583_vm3 = vcmask (!%p354_p2), 27648   ;;  %vm585_vm4 = vcmask (!%p354_p2), 31748  }
   0x8   : > { %3040 = vmatprep.subr.bf16.mxu0 (!%p354_p2), %v3039_v2  ;;  %578 = vst.msk [vmem:[#allocation2 + $0x10] sm:$0xff] (!%p354_p2), %vm575_vm1, %v3146_v49  ;;  %581 = vst.msk [vmem:[#allocation2 + $0x28] sm:$0xff] (!%p354_p2), %vm575_vm1, %v3146_v49  ;;  %2891 = vmatpush3.msk.msra.mxu1 (!%p354_p2), %vm622_vm2, %v2670_v50  ;;  %v2667_v55 = vld [vmem:[%s3548_s4] ss:$0 sm:$0xff] (!%p354_p2)  ;;  %vm604_vm5 = vcmask (!%p354_p2), 1046528   ;;  %vm809_vm6 = vcmask (!%p354_p2), 1045504  }
   0x9   : > { %3042 = vmatpush3.bf16.msra.mxu0 (!%p354_p2), %v3039_v2  ;;  %582 = vst.msk [vmem:[#allocation2 + $0x30] sm:$0xff] (!%p354_p2), %vm575_vm1, %v3146_v49  ;;  %2898 = vmatprep.subr.msk.mxu1 (!%p354_p2), %vm622_vm2, %v596_v53 }
   0xd   : > { %s3557_s18 = smov (!%p399_p3, %s2656_s18), 1 }
   0xe   : > { %s2784_s23 = sshll.u32 %s3557_s18, 4  ;;  %s406_s29 = scalar_lea.vmem %s3545_s1, %s3557_s18  ;;  %v3263_v51 = vld [vmem:[#allocation2] sm:$0xff] }
   0xf   : > { %s403_s26 = scalar_lea.vmem %s3544_s0, %s2784_s23  ;;  %s409_s13 = scalar_lea.vmem %s3546_s2, %s3557_s18  ;;  %v2665_v31 = vld [vmem:[%s406_s29] ss:$0 sm:$0xff]  ;;  %1536 = vst.msk [vmem:[#allocation2] sm:$0xff] %vm575_vm1, %v3146_v49  ;;  %v3266_v52 = vld [vmem:[#allocation2 + $0x28] sm:$0xff] }
  0x10   : > { %v415_v3 = vld [vmem:[%s403_s26] sm:$0xff]  ;;  %v416_v4 = vld [vmem:[%s403_s26 + $0x8] sm:$0xff]  ;;  %1541 = vst.msk [vmem:[#allocation2 + $0x28] sm:$0xff] %vm575_vm1, %v3146_v49  ;;  %v3273_v54 = vld [vmem:[#allocation2 + $0x30] sm:$0xff]  ;;  %s414_s14 = scalar_lea.vmem %s3555_s11, %s2784_s23 }
  0x11   : > { %v418_v5 = vsel %vm417_vm0, %v415_v3, 0.0  ;;  %v419_v6 = vsel %vm417_vm0, %v416_v4, 0.0  ;;  %v2666_v34 = vld [vmem:[%s409_s13] ss:$0 sm:$0xff]  ;;  %1542 = vst.msk [vmem:[#allocation2 + $0x30] sm:$0xff] %vm575_vm1, %v3146_v49 }
  0x12   : > { %v420_v7 = vadd.f32 %v419_v6, %v418_v5  ;;  %v605_v6 = vrot.slane %v3263_v51, 1 }
  0x14   : > { %v421_v8 = vrot.slane %v420_v7, 4 }
  0x16   : > { %v422_v9 = vadd.f32 %v421_v8, %v420_v7 }
  0x18   : > { %v423_v10 = vrot.slane %v422_v9, 2 }
  0x1a   : > { %v424_v11 = vadd.f32 %v423_v10, %v422_v9 }
  0x1c   : > { %v425_v12 = vrot.slane %v424_v11, 1 }
  0x1e   : > { %v426_v13 = vadd.f32 %v425_v12, %v424_v11 }
  0x20   : > { %v428_v14 = vmul.f32 0.0625, %v426_v13 }
  0x22   : > { %v429_v15 = vsub.f32 %v415_v3, %v428_v14  ;;  %v430_v16 = vsub.f32 %v416_v4, %v428_v14 }
  0x24   : > { %v431_v17 = vmul.f32 %v429_v15, %v429_v15  ;;  %v432_v18 = vmul.f32 %v430_v16, %v430_v16 }
  0x26   : > { %v433_v19 = vsel %vm417_vm0, %v431_v17, 0.0  ;;  %v434_v20 = vsel %vm417_vm0, %v432_v18, 0.0  ;;  %v2681_v17 = vld [vmem:[%s3549_s5 + $0x8] sm:$0xf] }
  0x27   : > { %v435_v21 = vadd.f32 %v434_v20, %v433_v19  ;;  %v2687_v20 = vld [vmem:[%s3549_s5 + $0xc] sm:$0xf] }
  0x29   : > { %v436_v22 = vrot.slane %v435_v21, 4 }
  0x2b   : > { %v437_v23 = vadd.f32 %v436_v22, %v435_v21  ;;  %v810_v21 = vrot.slane %v3263_v51, 2 }
  0x2d   : > { %v438_v24 = vrot.slane %v437_v23, 2 }
  0x2f   : > { %v439_v25 = vadd.f32 %v438_v24, %v437_v23 }
  0x31   : > { %v440_v26 = vrot.slane %v439_v25, 1 }
  0x33   : > { %v441_v27 = vadd.f32 %v440_v26, %v439_v25 }
  0x35   : > { %v442_v28 = vmul.f32 0.0625, %v441_v27 }
  0x37   : > { %v444_v29 = vadd.f32 1e-05, %v442_v28  ;;  %v2693_v28 = vld [vmem:[%s3549_s5 + $0x10] sm:$0xf] }
  0x39   : > { %3116 = vrsqrt.f32 %v444_v29 }
  0x43   : > { %v3117_v30 = vpop.eup %3116 }
  0x44   : > { %v446_v32 = vmul.f32 %v3117_v30, %v429_v15  ;;  %v447_v33 = vmul.f32 %v3117_v30, %v430_v16 }
  0x46   : > { %v454_v35 = vmul.f32 %v2665_v31, %v446_v32  ;;  %v455_v36 = vmul.f32 %v2665_v31, %v447_v33  ;;  %v2699_v31 = vld [vmem:[%s3549_s5 + $0x14] sm:$0xf]  ;;  %v1018_v32 = vrot.slane %v3266_v52, 1  ;;  %v2705_v33 = vld [vmem:[%s3549_s5 + $0x18] sm:$0xf] }
  0x48   : > { %v3241_v37 = vadd.f32 %v2666_v34, %v454_v35  ;;  %v3243_v38 = vadd.f32 %v2666_v34, %v455_v36  ;;  %v1116_v35 = vrot.slane %v3266_v52, 2  ;;  %v2711_v36 = vld [vmem:[%s3549_s5 + $0x1c] sm:$0xf] }
  0x4a   : > { %v467_v39 = vmul.f32 0.70710677, %v3241_v37  ;;  %v468_v40 = vmul.f32 0.70710677, %v3243_v38  ;;  %v465_v41 = vmul.f32 0.5, %v3241_v37  ;;  %v466_v43 = vmul.f32 0.5, %v3243_v38 }
  0x4c   : > { %3118 = verf.f32 %v467_v39 }
  0x4d   : > { %3120 = verf.f32 %v468_v40  ;;  %v2717_v40 = vld [vmem:[%s3549_s5 + $0x20] sm:$0xf] }
  0x56   : > { %v3119_v42 = vpop.eup %3118 }
  0x57   : > { %v3121_v44 = vpop.eup %3120  ;;  %v471_v45 = vadd.f32 1.0, %v3119_v42 }
  0x58   : > { %v472_v46 = vadd.f32 1.0, %v3121_v44 }
  0x59   : > { %v473_v47 = vmul.f32 %v471_v45, %v465_v41  ;;  %v1311_v41 = vrot.slane %v3273_v54, 1  ;;  %v2724_v45 = vld [vmem:[%s3551_s7 + $0x4] sm:$0xf] }
  0x5a   : > { %v474_v48 = vmul.f32 %v472_v46, %v466_v43  ;;  %v1409_v43 = vrot.slane %v3273_v54, 2  ;;  %2962 = vmatprep.subr.msk.mxu0 %vm622_vm2, %v2724_v45  ;;  %v1554_v46 = vld [vmem:[%s3551_s7] sm:$0xf] }
  0x5b   : > { %2887 = vmatprep.mubr.msk.f32.mxu0 %vm417_vm0, %v473_v47  ;;  %v1312_v42 = vsel %vm604_vm5, %v1018_v32, %v1311_v41  ;;  %v2723_v47 = vld [vmem:[%s3550_s6] ss:$0 sm:$0xff]  ;;  %v1552_v41 = vld [vmem:[#allocation2 + $0x28] sm:$0xff] }
  0x5c   : > { %2888 = vmatmul.mubr.msk.f32.vlgmr.msra.gmra.mrb[0].mxu0 %vm417_vm0, %v474_v48  ;;  %v1410_v44 = vsel %vm809_vm6, %v1116_v35, %v1409_v43  ;;  %v2759_v43 = vld [vmem:[%s3551_s7 + $0x18] sm:$0xf] }
  0x5d   : > { %2963 = vmatpush3.msk.msra.mxu0 %vm622_vm2, %v2724_v45  ;;  %v2071_v45 = vrot.slane %v1552_v41, 2 }
  0x5e   : > { %2970 = vmatprep.subr.msk.mxu0 %vm622_vm2, %v1554_v46 }
 0x12f   : > { %v2889_v56 = vpop.f32.mrb[0].mxu0 }
 0x130   : > { %v562_v57 = vadd.f32 %v2889_v56, %v2667_v55  ;;  %v556_v58 = vpop.f32.mrb[1].mxu0 }
 0x131   : > { %v557_v59 = vadd.f32 %v2667_v55, %v556_v58 }
 0x132   : > { %v568_v60 = vmul.f32 0.70710677, %v562_v57  ;;  %v566_v0 = vmul.f32 0.5, %v562_v57 }
 0x133   : > { %v567_v61 = vmul.f32 0.70710677, %v557_v59  ;;  %v565_v2 = vmul.f32 0.5, %v557_v59 }
 0x134   : > { %3122 = verf.f32 %v568_v60 }
 0x135   : > { %3124 = verf.f32 %v567_v61 }
 0x13e   : > { %v3123_v62 = vpop.eup %3122 }
 0x13f   : > { %v3125_v63 = vpop.eup %3124  ;;  %v572_v1 = vadd.f32 1.0, %v3123_v62 }
 0x140   : > { %v571_v3 = vadd.f32 1.0, %v3125_v63 }
 0x141   : > { %v574_v4 = vmul.f32 %v572_v1, %v566_v0 }
 0x142   : > { %v573_v5 = vmul.f32 %v571_v3, %v565_v2 }
 0x143   : > { %587 = vst.msk [vmem:[#allocation2 + $0x19] sm:$0xf] %vm583_vm3, %v574_v4 }
 0x144   : > { %588 = vst.msk [vmem:[#allocation2 + $0x1d] sm:$0xf0] %vm585_vm4, %v574_v4  ;;  %586 = vst.msk [vmem:[#allocation2 + $0xd] sm:$0xf0] %vm585_vm4, %v573_v5 }
 0x145   : > { %584 = vst.msk [vmem:[#allocation2 + $0x9] sm:$0xf] %vm583_vm3, %v573_v5 }
 0x14a   : > { %v3282_v7 = vld [vmem:[#allocation2 + $0x18] sm:$0xff] }
 0x14b   : > { %v3284_v8 = vld [vmem:[#allocation2 + $0x20] sm:$0xff]  ;;  %v3286_v10 = vld [vmem:[#allocation2 + $0x10] sm:$0xff]  ;;  %1539 = vst.msk [vmem:[#allocation2 + $0x18] sm:$0xff] %vm575_vm1, %v3146_v49  ;;  %v610_v13 = vrot.slane %v3282_v7, 1  ;;  %v815_v25 = vrot.slane %v3282_v7, 2 }
 0x14c   : > { %v590_v9 = vld [vmem:[#allocation2 + $0x8] sm:$0xff]  ;;  %1540 = vst.msk [vmem:[#allocation2 + $0x20] sm:$0xff] %vm575_vm1, %v3146_v49  ;;  %v608_v12 = vrot.slane %v3286_v10, 1  ;;  %1538 = vst.msk [vmem:[#allocation2 + $0x10] sm:$0xff] %vm575_vm1, %v3146_v49  ;;  %v612_v16 = vrot.slane %v3284_v8, 1  ;;  %v813_v23 = vrot.slane %v3286_v10, 2 }
 0x14d   : > { %v606_v11 = vrot.slane %v590_v9, 1  ;;  %1537 = vst.msk [vmem:[#allocation2 + $0x8] sm:$0xff] %vm575_vm1, %v3146_v49  ;;  %v811_v22 = vrot.slane %v590_v9, 2  ;;  %v817_v27 = vrot.slane %v3284_v8, 2 }
 0x14e   : > { %v611_v18 = vsel %vm604_vm5, %v608_v12, %v610_v13  ;;  %v613_v19 = vsel %vm604_vm5, %v610_v13, %v612_v16  ;;  %v816_v29 = vsel %vm809_vm6, %v813_v23, %v815_v25  ;;  %v1019_v34 = vsel %vm604_vm5, %v612_v16, %v1018_v32 }
 0x14f   : > { %v607_v14 = vsel %vm604_vm5, %v605_v6, %v606_v11  ;;  %v609_v15 = vsel %vm604_vm5, %v606_v11, %v608_v12  ;;  %v812_v24 = vsel %vm809_vm6, %v810_v21, %v811_v22  ;;  %v814_v26 = vsel %vm809_vm6, %v811_v22, %v813_v23  ;;  %v1547_v12 = vld [vmem:[#allocation2] sm:$0xff]  ;;  %v2735_v23 = vld [vmem:[%s3551_s7 + $0x8] sm:$0xf] }
 0x150   : > { %2892 = vmatprep.mubr.msk.f32.mxu1 %vm575_vm1, %v607_v14  ;;  %v818_v30 = vsel %vm809_vm6, %v815_v25, %v817_v27  ;;  %v1117_v39 = vsel %vm809_vm6, %v817_v27, %v1116_v35  ;;  %v1562_v13 = vrot.slane %v1547_v12, 1  ;;  %v2741_v27 = vld [vmem:[%s3551_s7 + $0xc] sm:$0xf]  ;;  %v2747_v35 = vld [vmem:[%s3551_s7 + $0x10] sm:$0xf] }
 0x151   : > { %2893 = vmatmul.mubr.msk.f32.vlgmr.msra.gmra.mrb[0].mxu1 %vm575_vm1, %v609_v15 }
 0x152   : > { %2899 = vmatpush3.msk.msra.mxu1 %vm622_vm2, %v596_v53  ;;  %2895 = vmatprep.mubr.msk.f32.mxu1 %vm575_vm1, %v611_v18 }
 0x153   : > { %2906 = vmatprep.subr.msk.mxu1 %vm622_vm2, %v2681_v17 }
 0x155   : > { %2896 = vmatmul.mubr.msk.f32.gmra.mrb[2].mxu1 %vm575_vm1, %v613_v19 }
 0x156   : > { %2900 = vmatprep.mubr.msk.f32.mxu1 %vm575_vm1, %v3263_v51 }
 0x159   : > { %2901 = vmatmul.mubr.msk.f32.vlgmr.msra.gmra.mrb[0].mxu1 %vm575_vm1, %v590_v9 }
 0x15a   : > { %2907 = vmatpush3.msk.msra.mxu1 %vm622_vm2, %v2681_v17  ;;  %2903 = vmatprep.mubr.msk.f32.mxu1 %vm575_vm1, %v3286_v10 }
 0x15b   : > { %2914 = vmatprep.subr.msk.mxu1 %vm622_vm2, %v2687_v20 }
 0x15d   : > { %2904 = vmatmul.mubr.msk.f32.gmra.mrb[2].mxu1 %vm575_vm1, %v3282_v7 }
 0x15e   : > { %2908 = vmatprep.mubr.msk.f32.mxu1 %vm575_vm1, %v812_v24 }
 0x161   : > { %2909 = vmatmul.mubr.msk.f32.vlgmr.msra.gmra.mrb[0].mxu1 %vm575_vm1, %v814_v26 }
 0x162   : > { %2915 = vmatpush3.msk.msra.mxu1 %vm622_vm2, %v2687_v20  ;;  %2911 = vmatprep.mubr.msk.f32.mxu1 %vm575_vm1, %v816_v29 }
 0x163   : > { %2922 = vmatprep.subr.msk.mxu1 %vm622_vm2, %v2693_v28 }
 0x165   : > { %2912 = vmatmul.mubr.msk.f32.gmra.mrb[2].mxu1 %vm575_vm1, %v818_v30 }
 0x166   : > { %2916 = vmatprep.mubr.msk.f32.mxu1 %vm575_vm1, %v590_v9 }
 0x169   : > { %2917 = vmatmul.mubr.msk.f32.vlgmr.msra.gmra.mrb[0].mxu1 %vm575_vm1, %v3286_v10 }
 0x16a   : > { %2923 = vmatpush3.msk.msra.mxu1 %vm622_vm2, %v2693_v28  ;;  %2919 = vmatprep.mubr.msk.f32.mxu1 %vm575_vm1, %v3282_v7  ;;  %v1765_v28 = vrot.slane %v1547_v12, 2 }
 0x16b   : > { %2930 = vmatprep.subr.msk.mxu1 %vm622_vm2, %v2699_v31 }
 0x16d   : > { %2920 = vmatmul.mubr.msk.f32.gmra.mrb[2].mxu1 %vm575_vm1, %v3284_v8 }
 0x16e   : > { %2924 = vmatprep.mubr.msk.f32.mxu1 %vm575_vm1, %v609_v15 }
 0x171   : > { %2925 = vmatmul.mubr.msk.f32.vlgmr.msra.gmra.mrb[0].mxu1 %vm575_vm1, %v611_v18 }
 0x172   : > { %2931 = vmatpush3.msk.msra.mxu1 %vm622_vm2, %v2699_v31  ;;  %2927 = vmatprep.mubr.msk.f32.mxu1 %vm575_vm1, %v613_v19 }
 0x173   : > { %2938 = vmatprep.subr.msk.mxu1 %vm622_vm2, %v2705_v33 }
 0x175   : > { %2928 = vmatmul.mubr.msk.f32.gmra.mrb[2].mxu1 %vm575_vm1, %v1019_v34 }
 0x176   : > { %2932 = vmatprep.mubr.msk.f32.mxu1 %vm575_vm1, %v814_v26 }
 0x179   : > { %2933 = vmatmul.mubr.msk.f32.vlgmr.msra.gmra.mrb[0].mxu1 %vm575_vm1, %v816_v29 }
 0x17a   : > { %2939 = vmatpush3.msk.msra.mxu1 %vm622_vm2, %v2705_v33  ;;  %2935 = vmatprep.mubr.msk.f32.mxu1 %vm575_vm1, %v818_v30 }
 0x17b   : > { %2946 = vmatprep.subr.msk.mxu1 %vm622_vm2, %v2711_v36 }
 0x17d   : > { %2936 = vmatmul.mubr.msk.f32.gmra.mrb[2].mxu1 %vm575_vm1, %v1117_v39 }
 0x17e   : > { %2940 = vmatprep.mubr.msk.f32.mxu1 %vm575_vm1, %v3286_v10 }
 0x181   : > { %2941 = vmatmul.mubr.msk.f32.vlgmr.msra.gmra.mrb[0].mxu1 %vm575_vm1, %v3282_v7 }
 0x182   : > { %2947 = vmatpush3.msk.msra.mxu1 %vm622_vm2, %v2711_v36  ;;  %2943 = vmatprep.mubr.msk.f32.mxu1 %vm575_vm1, %v3284_v8 }
 0x183   : > { %2954 = vmatprep.subr.msk.mxu1 %vm622_vm2, %v2717_v40 }
 0x185   : > { %2944 = vmatmul.mubr.msk.f32.gmra.mrb[2].mxu1 %vm575_vm1, %v3266_v52 }
 0x186   : > { %2948 = vmatprep.mubr.msk.f32.mxu1 %vm575_vm1, %v611_v18 }
 0x189   : > { %2949 = vmatmul.mubr.msk.f32.vlgmr.msra.gmra.mrb[0].mxu1 %vm575_vm1, %v613_v19 }
 0x18a   : > { %2955 = vmatpush3.msk.msra.mxu1 %vm622_vm2, %v2717_v40  ;;  %2951 = vmatprep.mubr.msk.f32.mxu1 %vm575_vm1, %v1019_v34  ;;  %v2753_v40 = vld [vmem:[%s3551_s7 + $0x14] sm:$0xf] }
 0x18d   : > { %2952 = vmatmul.mubr.msk.f32.gmra.mrb[2].mxu1 %vm575_vm1, %v1312_v42  ;;  %v1973_v42 = vrot.slane %v1552_v41, 1 }
 0x18e   : > { %2956 = vmatprep.mubr.msk.f32.mxu1 %vm575_vm1, %v816_v29 }
 0x191   : > { %2957 = vmatmul.mubr.msk.f32.vlgmr.msra.gmra.mrb[0].mxu1 %vm575_vm1, %v818_v30 }
 0x192   : > { %2959 = vmatprep.mubr.msk.f32.mxu1 %vm575_vm1, %v1117_v39 }
 0x195   : > { %2960 = vmatmul.mubr.msk.f32.gmra.mrb[2].mxu1 %vm575_vm1, %v1410_v44 }
 0x264   : > { %v2958_v48 = vpop.f32.mrb[0].mxu1 }
 0x265   : > { %v1513_v49 = vadd.f32 %v2958_v48, %v2723_v47  ;;  %v1482_v50 = vpop.f32.mrb[1].mxu1  ;;  %v2771_v48 = vld [vmem:[%s3551_s7 + $0x20] sm:$0xf] }
 0x266   : > { %v1512_v51 = vadd.f32 %v2723_v47, %v1482_v50 }
 0x267   : > { %v1521_v52 = vmul.f32 0.70710677, %v1513_v49  ;;  %v1517_v62 = vmul.f32 0.5, %v1513_v49  ;;  %v1553_v49 = vld [vmem:[#allocation2 + $0x30] sm:$0xff] }
 0x268   : > { %v1520_v53 = vmul.f32 0.70710677, %v1512_v51  ;;  %v2961_v54 = vpop.f32.mrb[2].mxu1  ;;  %v1516_v0 = vmul.f32 0.5, %v1512_v51  ;;  %v2266_v50 = vrot.slane %v1553_v49, 1 }
 0x269   : > { %3126 = verf.f32 %v1521_v52  ;;  %v1515_v55 = vadd.f32 %v2961_v54, %v2723_v47  ;;  %v1492_v56 = vpop.f32.mrb[3].mxu1  ;;  %v2364_v52 = vrot.slane %v1553_v49, 2  ;;  %v2487_v54 = vld [vmem:[%s3553_s9] sm:$0xf] }
 0x26a   : > { %3128 = verf.f32 %v1520_v53  ;;  %v1514_v57 = vadd.f32 %v2723_v47, %v1492_v56  ;;  %v2267_v51 = vsel %vm604_vm5, %v1973_v42, %v2266_v50  ;;  %3034 = vmatprep.subr.msk.mxu1 %vm622_vm2, %v2487_v54 }
 0x26b   : > { %v1523_v58 = vmul.f32 0.70710677, %v1515_v55  ;;  %v1519_v6 = vmul.f32 0.5, %v1515_v55  ;;  %v2365_v53 = vsel %vm809_vm6, %v2071_v45, %v2364_v52  ;;  %3035 = vmatpush3.msk.msra.mxu1 %vm622_vm2, %v2487_v54  ;;  %v2777_v55 = vld [vmem:[%s3552_s8] ss:$0 sm:$0xff] }
 0x26c   : > { %v1522_v59 = vmul.f32 0.70710677, %v1514_v57  ;;  %v1518_v8 = vmul.f32 0.5, %v1514_v57 }
 0x26d   : > { %3130 = verf.f32 %v1523_v58 }
 0x26e   : > { %3132 = verf.f32 %v1522_v59 }
 0x273   : > { %v3127_v60 = vpop.eup %3126 }
 0x274   : > { %v3129_v61 = vpop.eup %3128  ;;  %v1529_v63 = vadd.f32 1.0, %v3127_v60 }
 0x275   : > { %v1528_v1 = vadd.f32 1.0, %v3129_v61 }
 0x276   : > { %v1533_v2 = vmul.f32 %v1529_v63, %v1517_v62 }
 0x277   : > { %v3131_v3 = vpop.eup %3130  ;;  %v1532_v4 = vmul.f32 %v1528_v1, %v1516_v0 }
 0x278   : > { %v3133_v5 = vpop.eup %3132  ;;  %1544 = vst.msk [vmem:[#allocation2 + $0x11] sm:$0xf] %vm583_vm3, %v1533_v2  ;;  %v1531_v7 = vadd.f32 1.0, %v3131_v3 }
 0x279   : > { %1543 = vst.msk [vmem:[#allocation2 + $0x9] sm:$0xf] %vm583_vm3, %v1532_v4  ;;  %v1530_v9 = vadd.f32 1.0, %v3133_v5 }
 0x27a   : > { %v1535_v10 = vmul.f32 %v1531_v7, %v1519_v6 }
 0x27b   : > { %v1534_v11 = vmul.f32 %v1530_v9, %v1518_v8 }
 0x27c   : > { %1546 = vst.msk [vmem:[#allocation2 + $0x21] sm:$0xf] %vm583_vm3, %v1535_v10 }
 0x27d   : > { %1545 = vst.msk [vmem:[#allocation2 + $0x19] sm:$0xf] %vm583_vm3, %v1534_v11 }
 0x27f   : > { %v3413_v14 = vld [vmem:[#allocation2 + $0x10] sm:$0xff] }
 0x280   : > { %v1548_v15 = vld [vmem:[#allocation2 + $0x8] sm:$0xff]  ;;  %v1565_v16 = vrot.slane %v3413_v14, 1  ;;  %v1768_v30 = vrot.slane %v3413_v14, 2 }
 0x281   : > { %v1563_v17 = vrot.slane %v1548_v15, 1  ;;  %v1766_v29 = vrot.slane %v1548_v15, 2 }
 0x283   : > { %v1564_v18 = vsel %vm604_vm5, %v1562_v13, %v1563_v17  ;;  %v1566_v19 = vsel %vm604_vm5, %v1563_v17, %v1565_v16  ;;  %v3418_v20 = vld [vmem:[#allocation2 + $0x20] sm:$0xff]  ;;  %v1767_v31 = vsel %vm809_vm6, %v1765_v28, %v1766_v29  ;;  %v1769_v33 = vsel %vm809_vm6, %v1766_v29, %v1768_v30 }
 0x284   : > { %2964 = vmatprep.mubr.msk.f32.mxu0 %vm575_vm1, %v1564_v18  ;;  %v1550_v21 = vld [vmem:[#allocation2 + $0x18] sm:$0xff]  ;;  %v1569_v22 = vrot.slane %v3418_v20, 1  ;;  %v1772_v34 = vrot.slane %v3418_v20, 2 }
 0x285   : > { %2965 = vmatmul.mubr.msk.f32.vlgmr.msra.gmra.mrb[2].mxu0 %vm575_vm1, %v1566_v19  ;;  %v1567_v24 = vrot.slane %v1550_v21, 1  ;;  %v1770_v32 = vrot.slane %v1550_v21, 2 }
 0x286   : > { %2971 = vmatpush3.msk.msra.mxu0 %vm622_vm2, %v1554_v46  ;;  %v1974_v44 = vsel %vm604_vm5, %v1569_v22, %v1973_v42  ;;  %v2765_v46 = vld [vmem:[%s3551_s7 + $0x1c] sm:$0xf]  ;;  %v2072_v47 = vsel %vm809_vm6, %v1772_v34, %v2071_v45 }
 0x287   : > { %v1568_v25 = vsel %vm604_vm5, %v1565_v16, %v1567_v24  ;;  %v3429_v26 = vsel %vm604_vm5, %v1567_v24, %v1569_v22  ;;  %2978 = vmatprep.subr.msk.mxu0 %vm622_vm2, %v2735_v23  ;;  %v1771_v36 = vsel %vm809_vm6, %v1768_v30, %v1770_v32  ;;  %v1773_v39 = vsel %vm809_vm6, %v1770_v32, %v1772_v34 }
 0x288   : > { %2967 = vmatprep.mubr.msk.f32.mxu0 %vm575_vm1, %v1568_v25 }
 0x289   : > { %2968 = vmatmul.mubr.msk.f32.gmra.mrb[4].mxu0 %vm575_vm1, %v3429_v26 }
 0x28a   : > { %2972 = vmatprep.mubr.msk.f32.mxu0 %vm575_vm1, %v1547_v12  ;;  %v2778_v12 = vld [vmem:[%s3554_s10] ss:$0 sm:$0xff] }
 0x28d   : > { %2973 = vmatmul.mubr.msk.f32.vlgmr.msra.gmra.mrb[2].mxu0 %vm575_vm1, %v1548_v15 }
 0x28e   : > { %2979 = vmatpush3.msk.msra.mxu0 %vm622_vm2, %v2735_v23  ;;  %2975 = vmatprep.mubr.msk.f32.mxu0 %vm575_vm1, %v3413_v14 }
 0x28f   : > { %2986 = vmatprep.subr.msk.mxu0 %vm622_vm2, %v2741_v27 }
 0x291   : > { %2976 = vmatmul.mubr.msk.f32.gmra.mrb[4].mxu0 %vm575_vm1, %v1550_v21 }
 0x292   : > { %2980 = vmatprep.mubr.msk.f32.mxu0 %vm575_vm1, %v1767_v31 }
 0x295   : > { %2981 = vmatmul.mubr.msk.f32.vlgmr.msra.gmra.mrb[2].mxu0 %vm575_vm1, %v1769_v33 }
 0x296   : > { %2987 = vmatpush3.msk.msra.mxu0 %vm622_vm2, %v2741_v27  ;;  %2983 = vmatprep.mubr.msk.f32.mxu0 %vm575_vm1, %v1771_v36 }
 0x297   : > { %2994 = vmatprep.subr.msk.mxu0 %vm622_vm2, %v2747_v35 }
 0x299   : > { %2984 = vmatmul.mubr.msk.f32.gmra.mrb[4].mxu0 %vm575_vm1, %v1773_v39 }
 0x29a   : > { %2988 = vmatprep.mubr.msk.f32.mxu0 %vm575_vm1, %v1548_v15 }
 0x29d   : > { %2989 = vmatmul.mubr.msk.f32.vlgmr.msra.gmra.mrb[2].mxu0 %vm575_vm1, %v3413_v14 }
 0x29e   : > { %2995 = vmatpush3.msk.msra.mxu0 %vm622_vm2, %v2747_v35  ;;  %2991 = vmatprep.mubr.msk.f32.mxu0 %vm575_vm1, %v1550_v21 }
 0x29f   : > { %3002 = vmatprep.subr.msk.mxu0 %vm622_vm2, %v2753_v40 }
 0x2a1   : > { %2992 = vmatmul.mubr.msk.f32.gmra.mrb[4].mxu0 %vm575_vm1, %v3418_v20 }
 0x2a2   : > { %2996 = vmatprep.mubr.msk.f32.mxu0 %vm575_vm1, %v1566_v19 }
 0x2a5   : > { %2997 = vmatmul.mubr.msk.f32.vlgmr.msra.gmra.mrb[2].mxu0 %vm575_vm1, %v1568_v25 }
 0x2a6   : > { %3003 = vmatpush3.msk.msra.mxu0 %vm622_vm2, %v2753_v40  ;;  %2999 = vmatprep.mubr.msk.f32.mxu0 %vm575_vm1, %v3429_v26 }
 0x2a7   : > { %3010 = vmatprep.subr.msk.mxu0 %vm622_vm2, %v2759_v43 }
 0x2a9   : > { %3000 = vmatmul.mubr.msk.f32.gmra.mrb[4].mxu0 %vm575_vm1, %v1974_v44 }
 0x2aa   : > { %3004 = vmatprep.mubr.msk.f32.mxu0 %vm575_vm1, %v1769_v33 }
 0x2ad   : > { %3005 = vmatmul.mubr.msk.f32.vlgmr.msra.gmra.mrb[2].mxu0 %vm575_vm1, %v1771_v36 }
 0x2ae   : > { %3011 = vmatpush3.msk.msra.mxu0 %vm622_vm2, %v2759_v43  ;;  %3007 = vmatprep.mubr.msk.f32.mxu0 %vm575_vm1, %v1773_v39 }
 0x2af   : > { %3018 = vmatprep.subr.msk.mxu0 %vm622_vm2, %v2765_v46 }
 0x2b1   : > { %3008 = vmatmul.mubr.msk.f32.gmra.mrb[4].mxu0 %vm575_vm1, %v2072_v47 }
 0x2b2   : > { %3012 = vmatprep.mubr.msk.f32.mxu0 %vm575_vm1, %v3413_v14 }
 0x2b5   : > { %3013 = vmatmul.mubr.msk.f32.vlgmr.msra.gmra.mrb[2].mxu0 %vm575_vm1, %v1550_v21 }
 0x2b6   : > { %3019 = vmatpush3.msk.msra.mxu0 %vm622_vm2, %v2765_v46  ;;  %3015 = vmatprep.mubr.msk.f32.mxu0 %vm575_vm1, %v3418_v20 }
 0x2b7   : > { %3026 = vmatprep.subr.msk.mxu0 %vm622_vm2, %v2771_v48 }
 0x2b9   : > { %3016 = vmatmul.mubr.msk.f32.gmra.mrb[4].mxu0 %vm575_vm1, %v1552_v41 }
 0x2ba   : > { %3020 = vmatprep.mubr.msk.f32.mxu0 %vm575_vm1, %v1568_v25 }
 0x2bd   : > { %3021 = vmatmul.mubr.msk.f32.vlgmr.msra.gmra.mrb[2].mxu0 %vm575_vm1, %v3429_v26 }
 0x2be   : > { %3027 = vmatpush3.msk.msra.mxu0 %vm622_vm2, %v2771_v48  ;;  %3023 = vmatprep.mubr.msk.f32.mxu0 %vm575_vm1, %v1974_v44 }
 0x2c1   : > { %3024 = vmatmul.mubr.msk.f32.gmra.mrb[4].mxu0 %vm575_vm1, %v2267_v51 }
 0x2c2   : > { %3028 = vmatprep.mubr.msk.f32.mxu0 %vm575_vm1, %v1771_v36 }
 0x2c5   : > { %3029 = vmatmul.mubr.msk.f32.vlgmr.msra.gmra.mrb[2].mxu0 %vm575_vm1, %v1773_v39 }
 0x2c6   : > { %3031 = vmatprep.mubr.msk.f32.mxu0 %vm575_vm1, %v2072_v47 }
 0x2c9   : > { %3032 = vmatmul.mubr.msk.f32.gmra.mrb[4].mxu0 %vm575_vm1, %v2365_v53 }
 0x398   : > { %v3030_v56 = vpop.f32.mrb[2].mxu0 }
 0x399   : > { %v2468_v57 = vadd.f32 %v3030_v56, %v2777_v55  ;;  %v2437_v58 = vpop.f32.mrb[3].mxu0 }
 0x39a   : > { %v2467_v59 = vadd.f32 %v2777_v55, %v2437_v58 }
 0x39b   : > { %2472 = vst.msk [vmem:[#allocation3 + $0x4] sm:$0xf] %vm583_vm3, %v2468_v57 }
 0x39c   : > { %2471 = vst.msk [vmem:[#allocation3] sm:$0xf] %vm583_vm3, %v2467_v59  ;;  %v3033_v60 = vpop.f32.mrb[4].mxu0 }
 0x39d   : > { %v2470_v61 = vadd.f32 %v3033_v60, %v2777_v55  ;;  %v2447_v62 = vpop.f32.mrb[5].mxu0 }
 0x39e   : > { %v2469_v63 = vadd.f32 %v2777_v55, %v2447_v62 }
 0x39f   : > { %2474 = vst.msk [vmem:[#allocation3 + $0xc] sm:$0xf] %vm583_vm3, %v2470_v61 }
 0x3a0   : > { %2473 = vst.msk [vmem:[#allocation3 + $0x8] sm:$0xf] %vm583_vm3, %v2469_v63 }
 0x3a3   : > { %v2475_v0 = vld [vmem:[#allocation3] sm:$0xff] }
 0x3a4   : > { %v2479_v1 = vmul.f32 0.70710677, %v2475_v0  ;;  %v2477_v5 = vmul.f32 0.5, %v2475_v0 }
 0x3a6   : > { %3134 = verf.f32 %v2479_v1 }
 0x3a7   : > { %v2476_v2 = vld [vmem:[#allocation3 + $0x8] sm:$0xff] }
 0x3a8   : > { %v2480_v3 = vmul.f32 0.70710677, %v2476_v2  ;;  %v2478_v9 = vmul.f32 0.5, %v2476_v2 }
 0x3aa   : > { %3136 = verf.f32 %v2480_v3 }
 0x3b0   : > { %v3135_v4 = vpop.eup %3134 }
 0x3b1   : > { %v2483_v6 = vadd.f32 1.0, %v3135_v4 }
 0x3b3   : > { %v2485_v7 = vmul.f32 %v2483_v6, %v2477_v5 }
 0x3b4   : > { %v3137_v8 = vpop.eup %3136 }
 0x3b5   : > { %3036 = vmatprep.mubr.msk.f32.mxu1 %vm575_vm1, %v2485_v7  ;;  %v2484_v10 = vadd.f32 1.0, %v3137_v8 }
 0x3b7   : > { %v2486_v11 = vmul.f32 %v2484_v10, %v2478_v9 }
 0x3b9   : > { %3037 = vmatmul.mubr.msk.f32.vlgmr.msra.gmra.mrb[4].mxu1 %vm575_vm1, %v2486_v11 }
 0x48c   : > { %v3038_v13 = vpop.f32.mrb[4].mxu1 }
 0x48d   : > { %v2576_v14 = vadd.f32 %v3038_v13, %v2778_v12  ;;  %v2570_v15 = vpop.f32.mrb[5].mxu1 }
 0x48e   : > { %v2571_v16 = vadd.f32 %v2778_v12, %v2570_v15 }
 0x48f   : > { %v2580_v17 = vadd.f32 %v2576_v14, %v3243_v38 }
 0x490   : > { %v2579_v18 = vadd.f32 %v2571_v16, %v3241_v37 }
 0x491   : > { %2582 = vst.msk [vmem:[%s414_s14 + $0x8] sm:$0xff] %vm417_vm0, %v2580_v17 }
 0x492   : > { %2581 = vst.msk [vmem:[%s414_s14] sm:$0xff] %vm417_vm0, %v2579_v18 }
 0x493 PF: > { %s21_s17 = sadd.s32 1, %s3144_s17  }
 0x494   : > { %p18_p4 = scmp.ge.s32.totalorder %s21_s17, 4  }
 0x496   :  { %20 = sbr.rel (!%p18_p4) target bundleno = 1 (0x1), region = 116 }

// kernel: _lambda_.7
= control target key start
LH: loop header
LB: loop body
LE: loop exit
PB: predicated region body
PF: predicated region fallthrough
CT: control target
= control target key end

     0   :  { %s5889_s25 = smov 0   ;;  %s7216_s0 = inlined_call_operand.vmem [shape: f32[2,64,16], index: 0, kind: input, shape index: {}]   ;;  %s7217_s1 = inlined_call_operand.vmem [shape: f32[2,1,16], index: 1, kind: input, shape index: {}]   ;;  %s7218_s2 = inlined_call_operand.vmem [shape: f32[2,1,16], index: 2, kind: input, shape index: {}]   ;;  %s7219_s3 = inlined_call_operand.vmem [shape: f32[16,4], index: 3, kind: input, shape index: {}]   ;;  %s7220_s4 = inlined_call_operand.vmem [shape: f32[1,4], index: 4, kind: input, shape index: {}]   ;;  %s7221_s5 = inlined_call_operand.vmem [shape: f32[3,3,4,4], index: 5, kind: input, shape index: {}]   ;;  %s7222_s6 = inlined_call_operand.vmem [shape: f32[1,4], index: 6, kind: input, shape index: {}]   ;;  %s7223_s7 = inlined_call_operand.vmem [shape: f32[3,3,4,4], index: 7, kind: input, shape index: {}]   ;;  %s7224_s8 = inlined_call_operand.vmem [shape: f32[1,4], index: 8, kind: input, shape index: {}]   ;;  %s7225_s9 = inlined_call_operand.vmem [shape: f32[4,16], index: 9, kind: input, shape index: {}]   ;;  %s7226_s10 = inlined_call_operand.vmem [shape: f32[1,16], index: 10, kind: input, shape index: {}]   ;;  %s7227_s11 = inlined_call_operand.vmem [shape: f32[16,3], index: 11, kind: input, shape index: {}]   ;;  %s7228_s12 = inlined_call_operand.vmem [shape: f32[1,3], index: 12, kind: input, shape index: {}]   ;;  %s7229_s13 = inlined_call_operand.vmem [shape: f32[2,64,3], index: 13, kind: output, shape index: {}]  }
   0x1 LB: > { %s4509_s26 = sadd.s32 4294967295, %s5816_s25   ;;  %p4513_p0 = scmp.ge.s32.totalorder %s5816_s25, 1  ;;  %s5816_s25 = sphi %s5889_s25, %s23_s25  }
   0x2   : > { %p403_p1 = scmp.lt.s32.totalorder %s5816_s25, 3 }
   0x4   : > { %p404_p2 = pnand %p4513_p0, %p403_p1 }
   0x5   : > { %v619_v0 = vld [vmem:[%s7219_s3] sm:$0xff] (!%p404_p2)  ;;  %v620_v1 = vld [vmem:[%s7219_s3 + $0x8] sm:$0xff] (!%p404_p2)  ;;  %p453_p3 = scmp.lt.s32.totalorder (!%p404_p2), %s4509_s26, 1  ;;  %vm477_vm0 = vcmask (!%p404_p2), 130048   ;;  %vm797_vm1 = vcmask (!%p404_p2), 31744   ;;  %vm935_vm2 = vcmask (!%p404_p2), 1043456  }
   0x6   : > { %407 = sbr.rel (%p404_p2) target bundleno = 1561 (0x619), region = 72  ;;  %v5725_v2 = vpack.c.bf16 (!%p404_p2), %v620_v1, %v619_v0  ;;  %vm869_vm3 = vcmask (!%p404_p2), 1046528   ;;  %vm1250_vm4 = vcmask (!%p404_p2), 1045504   ;;  %vm4427_vm5 = vcmask (!%p404_p2), 23552  }
   0x8   : > { %5726 = vmatprep.subr.bf16.mxu0 (!%p404_p2), %v5725_v2 }
   0x9   : > { %5728 = vmatpush3.bf16.msra.mxu0 (!%p404_p2), %v5725_v2 }
   0xd   : > { %s7231_s26 = smov (!%p453_p3, %s4509_s26), 1 }
   0xe   : > { %s4874_s14 = sshll.u32 %s7231_s26, 6  ;;  %s460_s20 = scalar_lea.vmem %s7217_s1, %s7231_s26 }
   0xf   : > { %s457_s17 = scalar_lea.vmem %s7216_s0, %s4874_s14  ;;  %s463_s23 = scalar_lea.vmem %s7218_s2, %s7231_s26 }
  0x10   : > { %v469_v3 = vld [vmem:[%s457_s17] sm:$0xff]  ;;  %v470_v4 = vld [vmem:[%s457_s17 + $0x8] sm:$0xff]  ;;  %v471_v5 = vld [vmem:[%s457_s17 + $0x10] sm:$0xff]  ;;  %s468_s22 = scalar_lea.vmem %s7229_s13, %s4874_s14 }
  0x11   : > { %v472_v6 = vld [vmem:[%s457_s17 + $0x18] sm:$0xff]  ;;  %v478_v7 = vsel %vm477_vm0, %v469_v3, 0.0  ;;  %v479_v8 = vsel %vm477_vm0, %v470_v4, 0.0  ;;  %v481_v9 = vsel %vm477_vm0, %v471_v5, 0.0  ;;  %v473_v10 = vld [vmem:[%s457_s17 + $0x20] sm:$0xff]  ;;  %v474_v13 = vld [vmem:[%s457_s17 + $0x28] sm:$0xff] }
  0x12   : > { %v480_v11 = vadd.f32 %v479_v8, %v478_v7  ;;  %v483_v12 = vsel %vm477_vm0, %v472_v6, 0.0  ;;  %v485_v15 = vsel %vm477_vm0, %v473_v10, 0.0  ;;  %v475_v16 = vld [vmem:[%s457_s17 + $0x30] sm:$0xff]  ;;  %v487_v18 = vsel %vm477_vm0, %v474_v13, 0.0  ;;  %v476_v19 = vld [vmem:[%s457_s17 + $0x38] sm:$0xff] }
  0x13   : > { %v489_v21 = vsel %vm477_vm0, %v475_v16, 0.0  ;;  %v491_v23 = vsel %vm477_vm0, %v476_v19, 0.0 }
  0x14   : > { %v482_v14 = vadd.f32 %v481_v9, %v480_v11  ;;  %v4518_v9 = vld [vmem:[%s460_s20] ss:$0 sm:$0xff] }
  0x16   : > { %v484_v17 = vadd.f32 %v483_v12, %v482_v14  ;;  %v4519_v14 = vld [vmem:[%s463_s23] ss:$0 sm:$0xff] }
  0x18   : > { %v486_v20 = vadd.f32 %v485_v15, %v484_v17 }
  0x1a   : > { %v488_v22 = vadd.f32 %v487_v18, %v486_v20 }
  0x1c   : > { %v490_v24 = vadd.f32 %v489_v21, %v488_v22 }
  0x1e   : > { %v492_v25 = vadd.f32 %v491_v23, %v490_v24 }
  0x20   : > { %v493_v26 = vrot.slane %v492_v25, 4 }
  0x22   : > { %v494_v27 = vadd.f32 %v493_v26, %v492_v25 }
  0x24   : > { %v495_v28 = vrot.slane %v494_v27, 2 }
  0x26   : > { %v496_v29 = vadd.f32 %v495_v28, %v494_v27 }
  0x28   : > { %v497_v30 = vrot.slane %v496_v29, 1 }
  0x2a   : > { %v498_v31 = vadd.f32 %v497_v30, %v496_v29 }
  0x2c   : > { %v500_v32 = vmul.f32 0.015625, %v498_v31 }
  0x2e   : > { %v501_v33 = vsub.f32 %v469_v3, %v500_v32  ;;  %v502_v34 = vsub.f32 %v470_v4, %v500_v32  ;;  %v503_v35 = vsub.f32 %v471_v5, %v500_v32  ;;  %v504_v36 = vsub.f32 %v472_v6, %v500_v32 }
  0x2f   : > { %v505_v37 = vsub.f32 %v473_v10, %v500_v32  ;;  %v506_v38 = vsub.f32 %v474_v13, %v500_v32  ;;  %v507_v43 = vsub.f32 %v475_v16, %v500_v32  ;;  %v508_v49 = vsub.f32 %v476_v19, %v500_v32 }
  0x30   : > { %v509_v39 = vmul.f32 %v501_v33, %v501_v33  ;;  %v510_v40 = vmul.f32 %v502_v34, %v502_v34  ;;  %v511_v41 = vmul.f32 %v503_v35, %v503_v35  ;;  %v512_v42 = vmul.f32 %v504_v36, %v504_v36 }
  0x31   : > { %v513_v44 = vmul.f32 %v505_v37, %v505_v37  ;;  %v514_v50 = vmul.f32 %v506_v38, %v506_v38  ;;  %v515_v53 = vmul.f32 %v507_v43, %v507_v43  ;;  %v516_v56 = vmul.f32 %v508_v49, %v508_v49 }
  0x32   : > { %v517_v45 = vsel %vm477_vm0, %v509_v39, 0.0  ;;  %v518_v46 = vsel %vm477_vm0, %v510_v40, 0.0  ;;  %v520_v47 = vsel %vm477_vm0, %v511_v41, 0.0  ;;  %v522_v51 = vsel %vm477_vm0, %v512_v42, 0.0 }
  0x33   : > { %v519_v48 = vadd.f32 %v518_v46, %v517_v45  ;;  %v524_v54 = vsel %vm477_vm0, %v513_v44, 0.0  ;;  %v526_v57 = vsel %vm477_vm0, %v514_v50, 0.0  ;;  %v528_v59 = vsel %vm477_vm0, %v515_v53, 0.0 }
  0x34   : > { %v530_v61 = vsel %vm477_vm0, %v516_v56, 0.0 }
  0x35   : > { %v521_v52 = vadd.f32 %v520_v47, %v519_v48 }
  0x37   : > { %v523_v55 = vadd.f32 %v522_v51, %v521_v52 }
  0x39   : > { %v525_v58 = vadd.f32 %v524_v54, %v523_v55 }
  0x3b   : > { %v527_v60 = vadd.f32 %v526_v57, %v525_v58 }
  0x3d   : > { %v529_v62 = vadd.f32 %v528_v59, %v527_v60 }
  0x3f   : > { %v531_v63 = vadd.f32 %v530_v61, %v529_v62 }
  0x41   : > { %v532_v0 = vrot.slane %v531_v63, 4 }
  0x43   : > { %v533_v1 = vadd.f32 %v532_v0, %v531_v63 }
  0x45   : > { %v534_v2 = vrot.slane %v533_v1, 2 }
  0x47   : > { %v535_v3 = vadd.f32 %v534_v2, %v533_v1 }
  0x49   : > { %v536_v4 = vrot.slane %v535_v3, 1 }
  0x4b   : > { %v537_v5 = vadd.f32 %v536_v4, %v535_v3 }
  0x4d   : > { %v538_v6 = vmul.f32 0.015625, %v537_v5 }
  0x4f   : > { %v540_v7 = vadd.f32 1e-05, %v538_v6 }
  0x51   : > { %5744 = vrsqrt.f32 %v540_v7 }
  0x5b   : > { %v5745_v8 = vpop.eup %5744 }
  0x5c   : > { %v542_v10 = vmul.f32 %v5745_v8, %v501_v33  ;;  %v543_v11 = vmul.f32 %v5745_v8, %v502_v34  ;;  %v544_v12 = vmul.f32 %v5745_v8, %v503_v35  ;;  %v545_v13 = vmul.f32 %v5745_v8, %v504_v36 }
  0x5d   : > { %v546_v15 = vmul.f32 %v5745_v8, %v505_v37  ;;  %v547_v16 = vmul.f32 %v5745_v8, %v506_v38  ;;  %v548_v17 = vmul.f32 %v5745_v8, %v507_v43  ;;  %v549_v18 = vmul.f32 %v5745_v8, %v508_v49 }
  0x5e   : > { %v556_v19 = vmul.f32 %v4518_v9, %v542_v10  ;;  %v557_v20 = vmul.f32 %v4518_v9, %v543_v11  ;;  %v558_v21 = vmul.f32 %v4518_v9, %v544_v12  ;;  %v559_v22 = vmul.f32 %v4518_v9, %v545_v13 }
  0x5f   : > { %v560_v23 = vmul.f32 %v4518_v9, %v546_v15  ;;  %v561_v24 = vmul.f32 %v4518_v9, %v547_v16  ;;  %v562_v25 = vmul.f32 %v4518_v9, %v548_v17  ;;  %v563_v26 = vmul.f32 %v4518_v9, %v549_v18  ;;  %v4529_v16 = vld [vmem:[%s7221_s5 + $0x4] sm:$0xf]  ;;  %v6041_v18 = vld [vmem:[%s7221_s5 + $0x8] sm:$0xf] }
  0x60   : > { %v5935_v27 = vadd.f32 %v4519_v14, %v556_v19  ;;  %v5937_v28 = vadd.f32 %v4519_v14, %v557_v20  ;;  %v5939_v29 = vadd.f32 %v4519_v14, %v558_v21  ;;  %v5941_v30 = vadd.f32 %v4519_v14, %v559_v22  ;;  %5227 = vmatprep.subr.msk.mxu0 %vm935_vm2, %v4529_v16  ;;  %v6046_v19 = vld [vmem:[%s7221_s5] sm:$0xf] }
  0x61   : > { %v5943_v31 = vadd.f32 %v4519_v14, %v560_v23  ;;  %v5945_v32 = vadd.f32 %v4519_v14, %v561_v24  ;;  %v5949_v35 = vadd.f32 %v4519_v14, %v562_v25  ;;  %v5953_v38 = vadd.f32 %v4519_v14, %v563_v26  ;;  %5733 = vmatprep.subr.msk.mxu1 %vm935_vm2, %v4529_v16  ;;  %v4520_v21 = vld [vmem:[%s7220_s4] ss:$0 sm:$0xff] }
  0x62   : > { %v587_v33 = vmul.f32 0.70710677, %v5935_v27  ;;  %v588_v34 = vmul.f32 0.70710677, %v5937_v28  ;;  %v589_v36 = vmul.f32 0.70710677, %v5939_v29  ;;  %5734 = vmatpush3.msk.msra.mxu1 %vm935_vm2, %v4529_v16 }
  0x63   : > { %v590_v37 = vmul.f32 0.70710677, %v5941_v30  ;;  %v591_v39 = vmul.f32 0.70710677, %v5943_v31  ;;  %v592_v40 = vmul.f32 0.70710677, %v5945_v32  ;;  %5279 = vmatprep.subr.msk.mxu1 %vm935_vm2, %v6041_v18 }
  0x64   : > { %5746 = verf.f32 %v587_v33  ;;  %v593_v41 = vmul.f32 0.70710677, %v5949_v35  ;;  %v594_v42 = vmul.f32 0.70710677, %v5953_v38  ;;  %v579_v43 = vmul.f32 0.5, %v5935_v27 }
  0x65   : > { %5748 = verf.f32 %v588_v34  ;;  %v580_v45 = vmul.f32 0.5, %v5937_v28  ;;  %v581_v48 = vmul.f32 0.5, %v5939_v29  ;;  %v582_v51 = vmul.f32 0.5, %v5941_v30 }
  0x66   : > { %5750 = verf.f32 %v589_v36  ;;  %v583_v55 = vmul.f32 0.5, %v5943_v31  ;;  %v584_v0 = vmul.f32 0.5, %v5945_v32  ;;  %v585_v4 = vmul.f32 0.5, %v5949_v35 }
  0x67   : > { %5752 = verf.f32 %v590_v37  ;;  %v586_v7 = vmul.f32 0.5, %v5953_v38  ;;  %v5818_v11 = vmov 0.0  }
  0x68   : > { %5754 = verf.f32 %v591_v39  ;;  %802 = vst.msk [vmem:[#allocation2 + $0x20] sm:$0xff] %vm797_vm1, %v5818_v11  ;;  %803 = vst.msk [vmem:[#allocation2 + $0x28] sm:$0xff] %vm797_vm1, %v5818_v11 }
  0x69   : > { %5756 = verf.f32 %v592_v40  ;;  %798 = vst.msk [vmem:[#allocation2] sm:$0xff] %vm797_vm1, %v5818_v11  ;;  %799 = vst.msk [vmem:[#allocation2 + $0x8] sm:$0xff] %vm797_vm1, %v5818_v11 }
  0x6a   : > { %5758 = verf.f32 %v593_v41  ;;  %800 = vst.msk [vmem:[#allocation2 + $0x10] sm:$0xff] %vm797_vm1, %v5818_v11  ;;  %801 = vst.msk [vmem:[#allocation2 + $0x18] sm:$0xff] %vm797_vm1, %v5818_v11 }
  0x6b   : > { %5760 = verf.f32 %v594_v42  ;;  %804 = vst.msk [vmem:[#allocation2 + $0x30] sm:$0xff] %vm797_vm1, %v5818_v11  ;;  %805 = vst.msk [vmem:[#allocation2 + $0x38] sm:$0xff] %vm797_vm1, %v5818_v11 }
  0x6c   : > { %806 = vst.msk [vmem:[#allocation2 + $0x40] sm:$0xff] %vm797_vm1, %v5818_v11  ;;  %807 = vst.msk [vmem:[#allocation2 + $0x48] sm:$0xff] %vm797_vm1, %v5818_v11 }
  0x6d   : > { %808 = vst.msk [vmem:[#allocation2 + $0x50] sm:$0xff] %vm797_vm1, %v5818_v11  ;;  %809 = vst.msk [vmem:[#allocation2 + $0x58] sm:$0xff] %vm797_vm1, %v5818_v11 }
  0x6e   : > { %v5747_v44 = vpop.eup %5746  ;;  %810 = vst.msk [vmem:[#allocation2 + $0x60] sm:$0xff] %vm797_vm1, %v5818_v11  ;;  %811 = vst.msk [vmem:[#allocation2 + $0x68] sm:$0xff] %vm797_vm1, %v5818_v11 }
  0x6f   : > { %v5749_v46 = vpop.eup %5748  ;;  %v603_v47 = vadd.f32 1.0, %v5747_v44  ;;  %812 = vst.msk [vmem:[#allocation2 + $0x70] sm:$0xff] %vm797_vm1, %v5818_v11  ;;  %813 = vst.msk [vmem:[#allocation2 + $0x78] sm:$0xff] %vm797_vm1, %v5818_v11 }
  0x70   : > { %v5751_v49 = vpop.eup %5750  ;;  %v604_v50 = vadd.f32 1.0, %v5749_v46  ;;  %814 = vst.msk [vmem:[#allocation2 + $0x80] sm:$0xff] %vm797_vm1, %v5818_v11  ;;  %815 = vst.msk [vmem:[#allocation2 + $0x88] sm:$0xff] %vm797_vm1, %v5818_v11  ;;  %v6017_v12 = vld [vmem:[#allocation2] sm:$0xff]  ;;  %v6019_v13 = vld [vmem:[#allocation2 + $0x8] sm:$0xff] }
  0x71   : > { %v5753_v52 = vpop.eup %5752  ;;  %v611_v53 = vmul.f32 %v603_v47, %v579_v43  ;;  %v605_v54 = vadd.f32 1.0, %v5751_v49  ;;  %816 = vst.msk [vmem:[#allocation2 + $0x90] sm:$0xff] %vm797_vm1, %v5818_v11  ;;  %817 = vst.msk [vmem:[#allocation2 + $0x98] sm:$0xff] %vm797_vm1, %v5818_v11  ;;  %v870_v14 = vrot.slane %v6017_v12, 1  ;;  %v871_v15 = vrot.slane %v6019_v13, 1 }
  0x72   : > { %v5755_v56 = vpop.eup %5754  ;;  %v612_v57 = vmul.f32 %v604_v50, %v580_v45  ;;  %v606_v58 = vadd.f32 1.0, %v5753_v52  ;;  %818 = vst.msk [vmem:[#allocation2 + $0xa0] sm:$0xff] %vm797_vm1, %v5818_v11  ;;  %2463 = vst.msk [vmem:[#allocation2] sm:$0xff] %vm797_vm1, %v5818_v11 }
  0x73   : > { %v5757_v59 = vpop.eup %5756  ;;  %5215 = vmatprep.mubr.msk.f32.mxu0 %vm477_vm0, %v611_v53  ;;  %v613_v60 = vmul.f32 %v605_v54, %v581_v48  ;;  %v607_v61 = vadd.f32 1.0, %v5755_v56  ;;  %2464 = vst.msk [vmem:[#allocation2 + $0x8] sm:$0xff] %vm797_vm1, %v5818_v11  ;;  %v872_v17 = vsel %vm869_vm3, %v870_v14, %v871_v15 }
  0x74   : > { %v5759_v62 = vpop.eup %5758  ;;  %5216 = vmatmul.mubr.msk.f32.vlgmr.msra.gmra.mrb[0].mxu0 %vm477_vm0, %v612_v57  ;;  %v614_v63 = vmul.f32 %v606_v58, %v582_v51  ;;  %v608_v1 = vadd.f32 1.0, %v5757_v59 }
  0x75   : > { %v5761_v2 = vpop.eup %5760  ;;  %5218 = vmatprep.mubr.msk.f32.mxu0 %vm477_vm0, %v613_v60  ;;  %v615_v3 = vmul.f32 %v607_v61, %v583_v55  ;;  %v609_v5 = vadd.f32 1.0, %v5759_v62  ;;  %5228 = vmatpush3.msk.msra.mxu0 %vm935_vm2, %v4529_v16 }
  0x76   : > { %v616_v6 = vmul.f32 %v608_v1, %v584_v0  ;;  %v610_v8 = vadd.f32 1.0, %v5761_v2  ;;  %5253 = vmatprep.subr.msk.mxu0 %vm935_vm2, %v6046_v19 }
  0x77   : > { %v617_v9 = vmul.f32 %v609_v5, %v585_v4 }
  0x78   : > { %5219 = vmatmul.mubr.msk.f32.gmra.mrb[2].mxu0 %vm477_vm0, %v614_v63  ;;  %v618_v10 = vmul.f32 %v610_v8, %v586_v7  ;;  %v6052_v20 = vld [vmem:[#allocation2 + $0x90] sm:$0xff] }
  0x79   : > { %5221 = vmatprep.mubr.msk.f32.mxu0 %vm477_vm0, %v615_v3  ;;  %2481 = vst.msk [vmem:[#allocation2 + $0x90] sm:$0xff] %vm797_vm1, %v5818_v11 }
  0x7c   : > { %5222 = vmatmul.mubr.msk.f32.gmra.mrb[4].mxu0 %vm477_vm0, %v616_v6 }
  0x7d   : > { %5224 = vmatprep.mubr.msk.f32.mxu0 %vm477_vm0, %v617_v9 }
  0x80   : > { %5225 = vmatmul.mubr.msk.f32.gmra.mrb[6].mxu0 %vm477_vm0, %v618_v10  ;;  %v6062_v10 = vld [vmem:[#allocation2 + $0x98] sm:$0xff] }
  0x81   : > { %5229 = vmatprep.mubr.msk.f32.mxu0 %vm797_vm1, %v872_v17  ;;  %2482 = vst.msk [vmem:[#allocation2 + $0x98] sm:$0xff] %vm797_vm1, %v5818_v11 }
 0x147   : > { %v5217_v22 = vpop.f32.mrb[0].mxu0 }
 0x148   : > { %v724_v23 = vadd.f32 %v5217_v22, %v4520_v21  ;;  %v718_v24 = vpop.f32.mrb[1].mxu0 }
 0x149   : > { %v719_v25 = vadd.f32 %v4520_v21, %v718_v24 }
 0x14a   : > { %v766_v26 = vmul.f32 0.70710677, %v724_v23  ;;  %v758_v55 = vmul.f32 0.5, %v724_v23 }
 0x14b   : > { %v765_v33 = vmul.f32 0.70710677, %v719_v25  ;;  %v5220_v34 = vpop.f32.mrb[2].mxu0  ;;  %v757_v58 = vmul.f32 0.5, %v719_v25 }
 0x14c   : > { %5762 = verf.f32 %v766_v26  ;;  %v734_v36 = vadd.f32 %v5220_v34, %v4520_v21  ;;  %v728_v37 = vpop.f32.mrb[3].mxu0 }
 0x14d   : > { %5764 = verf.f32 %v765_v33  ;;  %v729_v39 = vadd.f32 %v4520_v21, %v728_v37 }
 0x14e   : > { %v768_v40 = vmul.f32 0.70710677, %v734_v36  ;;  %v760_v0 = vmul.f32 0.5, %v734_v36 }
 0x14f   : > { %v767_v41 = vmul.f32 0.70710677, %v729_v39  ;;  %v5223_v42 = vpop.f32.mrb[4].mxu0  ;;  %v759_v2 = vmul.f32 0.5, %v729_v39 }
 0x150   : > { %5766 = verf.f32 %v768_v40  ;;  %v744_v43 = vadd.f32 %v5223_v42, %v4520_v21  ;;  %v738_v44 = vpop.f32.mrb[5].mxu0 }
 0x151   : > { %5768 = verf.f32 %v767_v41  ;;  %v739_v45 = vadd.f32 %v4520_v21, %v738_v44 }
 0x152   : > { %v770_v46 = vmul.f32 0.70710677, %v744_v43  ;;  %v762_v8 = vmul.f32 0.5, %v744_v43 }
 0x153   : > { %v769_v47 = vmul.f32 0.70710677, %v739_v45  ;;  %v5226_v48 = vpop.f32.mrb[6].mxu0  ;;  %v761_v14 = vmul.f32 0.5, %v739_v45  ;;  %v6089_v45 = vld [vmem:[#allocation2 + $0xa0] sm:$0xff] }
 0x154   : > { %5770 = verf.f32 %v770_v46  ;;  %v754_v49 = vadd.f32 %v5226_v48, %v4520_v21  ;;  %v748_v50 = vpop.f32.mrb[7].mxu0  ;;  %2483 = vst.msk [vmem:[#allocation2 + $0xa0] sm:$0xff] %vm797_vm1, %v5818_v11 }
 0x155   : > { %5772 = verf.f32 %v769_v47  ;;  %v749_v51 = vadd.f32 %v4520_v21, %v748_v50 }
 0x156   : > { %v5763_v52 = vpop.eup %5762  ;;  %v772_v53 = vmul.f32 0.70710677, %v754_v49  ;;  %v764_v26 = vmul.f32 0.5, %v754_v49 }
 0x157   : > { %v5765_v54 = vpop.eup %5764  ;;  %v782_v56 = vadd.f32 1.0, %v5763_v52  ;;  %v771_v57 = vmul.f32 0.70710677, %v749_v51  ;;  %v763_v34 = vmul.f32 0.5, %v749_v51 }
 0x158   : > { %v781_v59 = vadd.f32 1.0, %v5765_v54  ;;  %5774 = verf.f32 %v772_v53  ;;  %v4582_v53 = vld [vmem:[%s7221_s5 + $0xc] sm:$0xf] }
 0x159   : > { %v790_v60 = vmul.f32 %v782_v56, %v758_v55  ;;  %5776 = verf.f32 %v771_v57  ;;  %v6138_v57 = vld [vmem:[%s7221_s5 + $0x10] sm:$0xf] }
 0x15a   : > { %v5767_v61 = vpop.eup %5766  ;;  %v789_v62 = vmul.f32 %v781_v59, %v757_v58 }
 0x15b   : > { %v5769_v63 = vpop.eup %5768  ;;  %821 = vst.msk [vmem:[#allocation2 + $0x21] sm:$0xff] %vm797_vm1, %v790_v60  ;;  %v784_v1 = vadd.f32 1.0, %v5767_v61 }
 0x15c   : > { %820 = vst.msk [vmem:[#allocation2 + $0x11] sm:$0xff] %vm797_vm1, %v789_v62  ;;  %v783_v3 = vadd.f32 1.0, %v5769_v63  ;;  %v6170_v62 = vld [vmem:[%s7221_s5 + $0x14] sm:$0xf] }
 0x15d   : > { %v792_v4 = vmul.f32 %v784_v1, %v760_v0 }
 0x15e   : > { %v5771_v5 = vpop.eup %5770  ;;  %v791_v6 = vmul.f32 %v783_v3, %v759_v2 }
 0x15f   : > { %v5773_v7 = vpop.eup %5772  ;;  %823 = vst.msk [vmem:[#allocation2 + $0x41] sm:$0xff] %vm797_vm1, %v792_v4  ;;  %v786_v9 = vadd.f32 1.0, %v5771_v5 }
 0x160   : > { %822 = vst.msk [vmem:[#allocation2 + $0x31] sm:$0xff] %vm797_vm1, %v791_v6  ;;  %v785_v16 = vadd.f32 1.0, %v5773_v7 }
 0x161   : > { %v794_v17 = vmul.f32 %v786_v9, %v762_v8 }
 0x162   : > { %v5775_v21 = vpop.eup %5774  ;;  %v793_v22 = vmul.f32 %v785_v16, %v761_v14  ;;  %v6067_v23 = vld [vmem:[#allocation2 + $0x20] sm:$0xff]  ;;  %v6069_v24 = vld [vmem:[#allocation2 + $0x28] sm:$0xff] }
 0x163   : > { %v5777_v25 = vpop.eup %5776  ;;  %825 = vst.msk [vmem:[#allocation2 + $0x61] sm:$0xff] %vm797_vm1, %v794_v17  ;;  %v788_v33 = vadd.f32 1.0, %v5775_v21  ;;  %v6072_v36 = vld [vmem:[#allocation2 + $0x10] sm:$0xff]  ;;  %v6074_v37 = vld [vmem:[#allocation2 + $0x18] sm:$0xff]  ;;  %v877_v39 = vrot.slane %v6067_v23, 1  ;;  %2467 = vst.msk [vmem:[#allocation2 + $0x20] sm:$0xff] %vm797_vm1, %v5818_v11 }
 0x164   : > { %2468 = vst.msk [vmem:[#allocation2 + $0x28] sm:$0xff] %vm797_vm1, %v5818_v11  ;;  %824 = vst.msk [vmem:[#allocation2 + $0x51] sm:$0xff] %vm797_vm1, %v793_v22  ;;  %v787_v40 = vadd.f32 1.0, %v5777_v25  ;;  %v873_v41 = vrot.slane %v6072_v36, 1  ;;  %v875_v42 = vrot.slane %v6074_v37, 1  ;;  %v879_v43 = vrot.slane %v6069_v24, 1 }
 0x165   : > { %2465 = vst.msk [vmem:[#allocation2 + $0x10] sm:$0xff] %vm797_vm1, %v5818_v11  ;;  %2466 = vst.msk [vmem:[#allocation2 + $0x18] sm:$0xff] %vm797_vm1, %v5818_v11  ;;  %v796_v44 = vmul.f32 %v788_v33, %v764_v26  ;;  %v1251_v26 = vrot.slane %v6017_v12, 2 }
 0x166   : > { %v795_v46 = vmul.f32 %v787_v40, %v763_v34  ;;  %v874_v47 = vsel %vm869_vm3, %v871_v15, %v873_v41  ;;  %v6095_v48 = vsel %vm869_vm3, %v873_v41, %v875_v42  ;;  %v6098_v49 = vsel %vm869_vm3, %v875_v42, %v877_v39  ;;  %v6100_v50 = vld [vmem:[#allocation2 + $0x40] sm:$0xff]  ;;  %v6102_v51 = vld [vmem:[#allocation2 + $0x48] sm:$0xff] }
 0x167   : > { %827 = vst.msk [vmem:[#allocation2 + $0x81] sm:$0xff] %vm797_vm1, %v796_v44  ;;  %5230 = vmatmul.mubr.msk.f32.vlgmr.msra.gmra.mrb[8].mxu0 %vm797_vm1, %v874_v47  ;;  %5232 = vmatprep.mubr.msk.f32.mxu1 %vm797_vm1, %v6095_v48  ;;  %v6110_v15 = vld [vmem:[#allocation2 + $0x30] sm:$0xff]  ;;  %v6112_v52 = vld [vmem:[#allocation2 + $0x38] sm:$0xff]  ;;  %2471 = vst.msk [vmem:[#allocation2 + $0x40] sm:$0xff] %vm797_vm1, %v5818_v11  ;;  %v6125_v54 = vsel %vm869_vm3, %v877_v39, %v879_v43  ;;  %v887_v0 = vrot.slane %v6102_v51, 1  ;;  %v1252_v40 = vrot.slane %v6019_v13, 2 }
 0x168   : > { %2472 = vst.msk [vmem:[#allocation2 + $0x48] sm:$0xff] %vm797_vm1, %v5818_v11  ;;  %826 = vst.msk [vmem:[#allocation2 + $0x71] sm:$0xff] %vm797_vm1, %v795_v46  ;;  %5233 = vmatmul.mubr.msk.f32.vlgmr.msra.gmra.mrb[0].mxu1 %vm797_vm1, %v6098_v49  ;;  %5254 = vmatpush3.msk.msra.mxu0 %vm935_vm2, %v6046_v19  ;;  %v881_v55 = vrot.slane %v6110_v15, 1  ;;  %v883_v56 = vrot.slane %v6112_v52, 1  ;;  %v1254_v42 = vrot.slane %v6072_v36, 2  ;;  %v1258_v44 = vrot.slane %v6067_v23, 2 }
 0x169   : > { %2469 = vst.msk [vmem:[#allocation2 + $0x30] sm:$0xff] %vm797_vm1, %v5818_v11  ;;  %2470 = vst.msk [vmem:[#allocation2 + $0x38] sm:$0xff] %vm797_vm1, %v5818_v11  ;;  %5280 = vmatpush3.msk.msra.mxu1 %vm935_vm2, %v6041_v18  ;;  %5235 = vmatprep.mubr.msk.f32.mxu1 %vm797_vm1, %v6125_v54  ;;  %v885_v18 = vrot.slane %v6100_v50, 1  ;;  %v6292_v46 = vld [vmem:[%s7221_s5 + $0x18] sm:$0xf] }
 0x16a   : > { %5255 = vmatprep.mubr.msk.f32.mxu0 %vm797_vm1, %v6017_v12  ;;  %v6147_v19 = vsel %vm869_vm3, %v879_v43, %v881_v55  ;;  %v6149_v58 = vld [vmem:[#allocation2 + $0x60] sm:$0xff]  ;;  %v6151_v59 = vld [vmem:[#allocation2 + $0x68] sm:$0xff]  ;;  %5305 = vmatprep.subr.msk.mxu0 %vm935_vm2, %v4582_v53  ;;  %v6177_v63 = vsel %vm869_vm3, %v881_v55, %v883_v56  ;;  %v1253_v12 = vsel %vm1250_vm4, %v1251_v26, %v1252_v40 }
 0x16b   : > { %5256 = vmatmul.mubr.msk.f32.vlgmr.msra.gmra.mrb[10].mxu0 %vm797_vm1, %v6019_v13  ;;  %v6157_v60 = vld [vmem:[#allocation2 + $0x50] sm:$0xff]  ;;  %v6159_v61 = vld [vmem:[#allocation2 + $0x58] sm:$0xff]  ;;  %2475 = vst.msk [vmem:[#allocation2 + $0x60] sm:$0xff] %vm797_vm1, %v5818_v11  ;;  %2476 = vst.msk [vmem:[#allocation2 + $0x68] sm:$0xff] %vm797_vm1, %v5818_v11  ;;  %5331 = vmatprep.subr.msk.mxu1 %vm935_vm2, %v6138_v57  ;;  %v6196_v3 = vsel %vm869_vm3, %v883_v56, %v885_v18  ;;  %v6212_v7 = vsel %vm869_vm3, %v885_v18, %v887_v0  ;;  %v893_v14 = vrot.slane %v6149_v58, 1 }
 0x16c   : > { %5236 = vmatmul.mubr.msk.f32.gmra.mrb[2].mxu1 %vm797_vm1, %v6147_v19  ;;  %5258 = vmatprep.mubr.msk.f32.mxu0 %vm797_vm1, %v6072_v36  ;;  %2473 = vst.msk [vmem:[#allocation2 + $0x50] sm:$0xff] %vm797_vm1, %v5818_v11  ;;  %2474 = vst.msk [vmem:[#allocation2 + $0x58] sm:$0xff] %vm797_vm1, %v5818_v11  ;;  %v889_v4 = vrot.slane %v6157_v60, 1  ;;  %v891_v8 = vrot.slane %v6159_v61, 1  ;;  %v1256_v13 = vrot.slane %v6074_v37, 2  ;;  %v1255_v43 = vsel %vm1250_vm4, %v1252_v40, %v1254_v42 }
 0x16d   : > { %5238 = vmatprep.mubr.msk.f32.mxu1 %vm797_vm1, %v6177_v63  ;;  %5306 = vmatpush3.msk.msra.mxu0 %vm935_vm2, %v4582_v53  ;;  %v1260_v53 = vrot.slane %v6069_v24, 2  ;;  %v1262_v56 = vrot.slane %v6110_v15, 2  ;;  %v1264_v18 = vrot.slane %v6112_v52, 2  ;;  %v1274_v26 = vrot.slane %v6149_v58, 2 }
 0x16e   : > { %v6187_v1 = vld [vmem:[#allocation2 + $0x80] sm:$0xff]  ;;  %5357 = vmatprep.subr.msk.mxu0 %vm935_vm2, %v6170_v62  ;;  %v6191_v2 = vld [vmem:[#allocation2 + $0x88] sm:$0xff]  ;;  %v6224_v9 = vsel %vm869_vm3, %v887_v0, %v889_v4  ;;  %v6232_v16 = vsel %vm869_vm3, %v889_v4, %v891_v8  ;;  %v6240_v17 = vsel %vm869_vm3, %v891_v8, %v893_v14  ;;  %v6298_v47 = vsel %vm1250_vm4, %v1254_v42, %v1256_v13 }
 0x16f   : > { %5259 = vmatmul.mubr.msk.f32.gmra.mrb[12].mxu0 %vm797_vm1, %v6074_v37  ;;  %v6199_v5 = vld [vmem:[#allocation2 + $0x70] sm:$0xff]  ;;  %v6201_v6 = vld [vmem:[#allocation2 + $0x78] sm:$0xff]  ;;  %2479 = vst.msk [vmem:[#allocation2 + $0x80] sm:$0xff] %vm797_vm1, %v5818_v11  ;;  %2480 = vst.msk [vmem:[#allocation2 + $0x88] sm:$0xff] %vm797_vm1, %v5818_v11  ;;  %v901_v34 = vrot.slane %v6187_v1, 1  ;;  %v6310_v55 = vsel %vm1250_vm4, %v1256_v13, %v1258_v44  ;;  %v6326_v0 = vsel %vm1250_vm4, %v1260_v53, %v1262_v56  ;;  %v1266_v4 = vrot.slane %v6100_v50, 2 }
 0x170   : > { %5239 = vmatmul.mubr.msk.f32.gmra.mrb[4].mxu1 %vm797_vm1, %v6196_v3  ;;  %5261 = vmatprep.mubr.msk.f32.mxu0 %vm797_vm1, %v6067_v23  ;;  %2477 = vst.msk [vmem:[#allocation2 + $0x70] sm:$0xff] %vm797_vm1, %v5818_v11  ;;  %2478 = vst.msk [vmem:[#allocation2 + $0x78] sm:$0xff] %vm797_vm1, %v5818_v11  ;;  %v895_v11 = vrot.slane %v6151_v59, 1  ;;  %v897_v21 = vrot.slane %v6199_v5, 1  ;;  %v899_v25 = vrot.slane %v6201_v6, 1  ;;  %v6337_v8 = vsel %vm1250_vm4, %v1262_v56, %v1264_v18 }
 0x171   : > { %5241 = vmatprep.mubr.msk.f32.mxu1 %vm797_vm1, %v6212_v7  ;;  %v1278_v13 = vrot.slane %v6199_v5, 2  ;;  %v1282_v56 = vrot.slane %v6187_v1, 2 }
 0x172   : > { %v6248_v22 = vsel %vm869_vm3, %v893_v14, %v895_v11  ;;  %v6257_v33 = vsel %vm869_vm3, %v895_v11, %v897_v21  ;;  %v6265_v39 = vsel %vm869_vm3, %v897_v21, %v899_v25  ;;  %v6276_v41 = vsel %vm869_vm3, %v899_v25, %v901_v34 }
 0x173   : > { %5262 = vmatmul.mubr.msk.f32.gmra.mrb[14].mxu0 %vm797_vm1, %v6069_v24  ;;  %v6348_v14 = vsel %vm1250_vm4, %v1264_v18, %v1266_v4  ;;  %v1270_v11 = vrot.slane %v6157_v60, 2 }
 0x174   : > { %5242 = vmatmul.mubr.msk.f32.gmra.mrb[6].mxu1 %vm797_vm1, %v6224_v9  ;;  %5264 = vmatprep.mubr.msk.f32.mxu0 %vm797_vm1, %v6110_v15 }
 0x175   : > { %5244 = vmatprep.mubr.msk.f32.mxu1 %vm797_vm1, %v6232_v16 }
 0x177   : > { %5265 = vmatmul.mubr.msk.f32.gmra.mrb[16].mxu0 %vm797_vm1, %v6112_v52 }
 0x178   : > { %5245 = vmatmul.mubr.msk.f32.gmra.mrb[8].mxu1 %vm797_vm1, %v6240_v17  ;;  %5267 = vmatprep.mubr.msk.f32.mxu0 %vm797_vm1, %v6100_v50 }
 0x179   : > { %5247 = vmatprep.mubr.msk.f32.mxu1 %vm797_vm1, %v6248_v22 }
 0x17b   : > { %5268 = vmatmul.mubr.msk.f32.gmra.mrb[18].mxu0 %vm797_vm1, %v6102_v51 }
 0x17c   : > { %5248 = vmatmul.mubr.msk.f32.gmra.mrb[10].mxu1 %vm797_vm1, %v6257_v33  ;;  %5270 = vmatprep.mubr.msk.f32.mxu0 %vm797_vm1, %v6157_v60 }
 0x17d   : > { %5250 = vmatprep.mubr.msk.f32.mxu1 %vm797_vm1, %v6265_v39 }
 0x17f   : > { %5271 = vmatmul.mubr.msk.f32.gmra.mrb[20].mxu0 %vm797_vm1, %v6159_v61 }
 0x180   : > { %5251 = vmatmul.mubr.msk.f32.gmra.mrb[12].mxu1 %vm797_vm1, %v6276_v41  ;;  %5273 = vmatprep.mubr.msk.f32.mxu0 %vm797_vm1, %v6149_v58 }
 0x181   : > { %5281 = vmatprep.mubr.msk.f32.mxu1 %vm797_vm1, %v1253_v12  ;;  %v1276_v12 = vrot.slane %v6151_v59, 2 }
 0x183   : > { %5274 = vmatmul.mubr.msk.f32.gmra.mrb[22].mxu0 %vm797_vm1, %v6151_v59 }
 0x184   : > { %5276 = vmatprep.mubr.msk.f32.mxu0 %vm797_vm1, %v6199_v5  ;;  %5282 = vmatmul.mubr.msk.f32.vlgmr.msra.gmra.mrb[14].mxu1 %vm797_vm1, %v1255_v43  ;;  %v6388_v43 = vsel %vm1250_vm4, %v1274_v26, %v1276_v12 }
 0x185   : > { %5332 = vmatpush3.msk.msra.mxu1 %vm935_vm2, %v6138_v57  ;;  %5284 = vmatprep.mubr.msk.f32.mxu1 %vm797_vm1, %v6298_v47  ;;  %v6318_v57 = vsel %vm1250_vm4, %v1258_v44, %v1260_v53  ;;  %v1280_v44 = vrot.slane %v6201_v6, 2  ;;  %v6396_v53 = vsel %vm1250_vm4, %v1276_v12, %v1278_v13 }
 0x186   : > { %5383 = vmatprep.subr.msk.mxu1 %vm935_vm2, %v6292_v46 }
 0x187   : > { %5277 = vmatmul.mubr.msk.f32.gmra.mrb[24].mxu0 %vm797_vm1, %v6201_v6  ;;  %v6404_v18 = vsel %vm1250_vm4, %v1278_v13, %v1280_v44 }
 0x188   : > { %5285 = vmatmul.mubr.msk.f32.gmra.mrb[16].mxu1 %vm797_vm1, %v6310_v55  ;;  %5307 = vmatprep.mubr.msk.f32.mxu0 %vm797_vm1, %v6072_v36  ;;  %v4654_v36 = vld [vmem:[%s7221_s5 + $0x1c] sm:$0xf] }
 0x189   : > { %5287 = vmatprep.mubr.msk.f32.mxu1 %vm797_vm1, %v6318_v57 }
 0x18b   : > { %5308 = vmatmul.mubr.msk.f32.vlgmr.msra.gmra.mrb[26].mxu0 %vm797_vm1, %v6074_v37  ;;  %v1268_v37 = vrot.slane %v6102_v51, 2 }
 0x18c   : > { %5288 = vmatmul.mubr.msk.f32.gmra.mrb[18].mxu1 %vm797_vm1, %v6326_v0  ;;  %5310 = vmatprep.mubr.msk.f32.mxu0 %vm797_vm1, %v6067_v23 }
 0x18d   : > { %5290 = vmatprep.mubr.msk.f32.mxu1 %vm797_vm1, %v6337_v8  ;;  %5358 = vmatpush3.msk.msra.mxu0 %vm935_vm2, %v6170_v62  ;;  %v6356_v21 = vsel %vm1250_vm4, %v1266_v4, %v1268_v37  ;;  %v1272_v62 = vrot.slane %v6159_v61, 2  ;;  %v6364_v25 = vsel %vm1250_vm4, %v1268_v37, %v1270_v11  ;;  %v6411_v4 = vsel %vm1250_vm4, %v1280_v44, %v1282_v56  ;;  %v4672_v37 = vld [vmem:[%s7221_s5 + $0x20] sm:$0xf] }
 0x18e   : > { %5409 = vmatprep.subr.msk.mxu0 %vm935_vm2, %v4654_v36 }
 0x18f   : > { %5311 = vmatmul.mubr.msk.f32.gmra.mrb[28].mxu0 %vm797_vm1, %v6069_v24  ;;  %v6372_v40 = vsel %vm1250_vm4, %v1270_v11, %v1272_v62  ;;  %v6380_v42 = vsel %vm1250_vm4, %v1272_v62, %v1274_v26 }
 0x190   : > { %5291 = vmatmul.mubr.msk.f32.gmra.mrb[20].mxu1 %vm797_vm1, %v6348_v14  ;;  %5313 = vmatprep.mubr.msk.f32.mxu0 %vm797_vm1, %v6110_v15 }
 0x191   : > { %5293 = vmatprep.mubr.msk.f32.mxu1 %vm797_vm1, %v6356_v21 }
 0x193   : > { %5314 = vmatmul.mubr.msk.f32.gmra.mrb[30].mxu0 %vm797_vm1, %v6112_v52 }
 0x194   : > { %5294 = vmatmul.mubr.msk.f32.gmra.mrb[22].mxu1 %vm797_vm1, %v6364_v25  ;;  %5316 = vmatprep.mubr.msk.f32.mxu0 %vm797_vm1, %v6100_v50 }
 0x195   : > { %5296 = vmatprep.mubr.msk.f32.mxu1 %vm797_vm1, %v6372_v40 }
 0x197   : > { %5317 = vmatmul.mubr.msk.f32.gmra.mrb[32].mxu0 %vm797_vm1, %v6102_v51 }
 0x198   : > { %5297 = vmatmul.mubr.msk.f32.gmra.mrb[24].mxu1 %vm797_vm1, %v6380_v42  ;;  %5319 = vmatprep.mubr.msk.f32.mxu0 %vm797_vm1, %v6157_v60 }
 0x199   : > { %5299 = vmatprep.mubr.msk.f32.mxu1 %vm797_vm1, %v6388_v43 }
 0x19b   : > { %5320 = vmatmul.mubr.msk.f32.gmra.mrb[34].mxu0 %vm797_vm1, %v6159_v61 }
 0x19c   : > { %5300 = vmatmul.mubr.msk.f32.gmra.mrb[26].mxu1 %vm797_vm1, %v6396_v53  ;;  %5322 = vmatprep.mubr.msk.f32.mxu0 %vm797_vm1, %v6149_v58 }
 0x19d   : > { %5302 = vmatprep.mubr.msk.f32.mxu1 %vm797_vm1, %v6404_v18 }
 0x19f   : > { %5323 = vmatmul.mubr.msk.f32.gmra.mrb[36].mxu0 %vm797_vm1, %v6151_v59 }
 0x1a0   : > { %5303 = vmatmul.mubr.msk.f32.gmra.mrb[28].mxu1 %vm797_vm1, %v6411_v4  ;;  %5325 = vmatprep.mubr.msk.f32.mxu0 %vm797_vm1, %v6199_v5 }
 0x1a1   : > { %5333 = vmatprep.mubr.msk.f32.mxu1 %vm797_vm1, %v6095_v48  ;;  %v1622_v48 = vrot.slane %v6191_v2, 1 }
 0x1a3   : > { %5326 = vmatmul.mubr.msk.f32.gmra.mrb[38].mxu0 %vm797_vm1, %v6201_v6 }
 0x1a4   : > { %5328 = vmatprep.mubr.msk.f32.mxu0 %vm797_vm1, %v6187_v1  ;;  %5334 = vmatmul.mubr.msk.f32.vlgmr.msra.gmra.mrb[30].mxu1 %vm797_vm1, %v6098_v49  ;;  %v1624_v49 = vrot.slane %v6052_v20, 1 }
 0x1a5   : > { %5384 = vmatpush3.msk.msra.mxu1 %vm935_vm2, %v6292_v46  ;;  %5336 = vmatprep.mubr.msk.f32.mxu1 %vm797_vm1, %v6125_v54  ;;  %v1623_v46 = vsel %vm869_vm3, %v901_v34, %v1622_v48 }
 0x1a6   : > { %5435 = vmatprep.subr.msk.mxu1 %vm935_vm2, %v4672_v37 }
 0x1a7   : > { %5329 = vmatmul.mubr.msk.f32.gmra.mrb[40].mxu0 %vm797_vm1, %v6191_v2 }
 0x1a8   : > { %5337 = vmatmul.mubr.msk.f32.gmra.mrb[32].mxu1 %vm797_vm1, %v6147_v19  ;;  %5359 = vmatprep.mubr.msk.f32.mxu0 %vm797_vm1, %v6298_v47  ;;  %v1625_v47 = vsel %vm869_vm3, %v1622_v48, %v1624_v49 }
 0x1a9   : > { %5339 = vmatprep.mubr.msk.f32.mxu1 %vm797_vm1, %v6177_v63 }
 0x1ab   : > { %5360 = vmatmul.mubr.msk.f32.vlgmr.msra.gmra.mrb[42].mxu0 %vm797_vm1, %v6310_v55  ;;  %v1780_v55 = vrot.slane %v6191_v2, 2 }
 0x1ac   : > { %5340 = vmatmul.mubr.msk.f32.gmra.mrb[34].mxu1 %vm797_vm1, %v6196_v3  ;;  %5362 = vmatprep.mubr.msk.f32.mxu0 %vm797_vm1, %v6318_v57 }
 0x1ad   : > { %5342 = vmatprep.mubr.msk.f32.mxu1 %vm797_vm1, %v6212_v7  ;;  %5410 = vmatpush3.msk.msra.mxu0 %vm935_vm2, %v4654_v36  ;;  %v1782_v36 = vrot.slane %v6052_v20, 2  ;;  %v1781_v34 = vsel %vm1250_vm4, %v1282_v56, %v1780_v55  ;;  %v6606_v56 = vld [vmem:[#allocation2] sm:$0xff] }
 0x1af   : > { %5363 = vmatmul.mubr.msk.f32.gmra.mrb[44].mxu0 %vm797_vm1, %v6326_v0  ;;  %v1783_v11 = vsel %vm1250_vm4, %v1780_v55, %v1782_v36 }
 0x1b0   : > { %5343 = vmatmul.mubr.msk.f32.gmra.mrb[36].mxu1 %vm797_vm1, %v6224_v9  ;;  %5365 = vmatprep.mubr.msk.f32.mxu0 %vm797_vm1, %v6337_v8 }
 0x1b1   : > { %5345 = vmatprep.mubr.msk.f32.mxu1 %vm797_vm1, %v6232_v16 }
 0x1b3   : > { %5366 = vmatmul.mubr.msk.f32.gmra.mrb[46].mxu0 %vm797_vm1, %v6348_v14 }
 0x1b4   : > { %5346 = vmatmul.mubr.msk.f32.gmra.mrb[38].mxu1 %vm797_vm1, %v6240_v17  ;;  %5368 = vmatprep.mubr.msk.f32.mxu0 %vm797_vm1, %v6356_v21 }
 0x1b5   : > { %5348 = vmatprep.mubr.msk.f32.mxu1 %vm797_vm1, %v6248_v22 }
 0x1b7   : > { %5369 = vmatmul.mubr.msk.f32.gmra.mrb[48].mxu0 %vm797_vm1, %v6364_v25 }
 0x1b8   : > { %5349 = vmatmul.mubr.msk.f32.gmra.mrb[40].mxu1 %vm797_vm1, %v6257_v33  ;;  %5371 = vmatprep.mubr.msk.f32.mxu0 %vm797_vm1, %v6372_v40 }
 0x1b9   : > { %5351 = vmatprep.mubr.msk.f32.mxu1 %vm797_vm1, %v6265_v39 }
 0x1bb   : > { %5372 = vmatmul.mubr.msk.f32.gmra.mrb[50].mxu0 %vm797_vm1, %v6380_v42 }
 0x1bc   : > { %5352 = vmatmul.mubr.msk.f32.gmra.mrb[42].mxu1 %vm797_vm1, %v6276_v41  ;;  %5374 = vmatprep.mubr.msk.f32.mxu0 %vm797_vm1, %v6388_v43 }
 0x1bd   : > { %5354 = vmatprep.mubr.msk.f32.mxu1 %vm797_vm1, %v1623_v46 }
 0x1bf   : > { %5375 = vmatmul.mubr.msk.f32.gmra.mrb[52].mxu0 %vm797_vm1, %v6396_v53 }
 0x1c0   : > { %5355 = vmatmul.mubr.msk.f32.gmra.mrb[44].mxu1 %vm797_vm1, %v1625_v47  ;;  %5377 = vmatprep.mubr.msk.f32.mxu0 %vm797_vm1, %v6404_v18 }
 0x1c1   : > { %5385 = vmatprep.mubr.msk.f32.mxu1 %vm797_vm1, %v6067_v23  ;;  %v2094_v23 = vrot.slane %v6062_v10, 1 }
 0x1c3   : > { %5378 = vmatmul.mubr.msk.f32.gmra.mrb[54].mxu0 %vm797_vm1, %v6411_v4 }
 0x1c4   : > { %5380 = vmatprep.mubr.msk.f32.mxu0 %vm797_vm1, %v1781_v34  ;;  %5386 = vmatmul.mubr.msk.f32.vlgmr.msra.gmra.mrb[46].mxu1 %vm797_vm1, %v6069_v24  ;;  %v2096_v24 = vrot.slane %v6089_v45, 1 }
 0x1c5   : > { %5436 = vmatpush3.msk.msra.mxu1 %vm935_vm2, %v4672_v37  ;;  %5388 = vmatprep.mubr.msk.f32.mxu1 %vm797_vm1, %v6110_v15  ;;  %v2254_v15 = vrot.slane %v6089_v45, 2 }
 0x1c7   : > { %5381 = vmatmul.mubr.msk.f32.gmra.mrb[56].mxu0 %vm797_vm1, %v1783_v11 }
 0x1c8   : > { %5389 = vmatmul.mubr.msk.f32.gmra.mrb[48].mxu1 %vm797_vm1, %v6112_v52  ;;  %5411 = vmatprep.mubr.msk.f32.mxu0 %vm797_vm1, %v6125_v54 }
 0x1c9   : > { %5391 = vmatprep.mubr.msk.f32.mxu1 %vm797_vm1, %v6100_v50  ;;  %v2095_v50 = vsel %vm869_vm3, %v1624_v49, %v2094_v23 }
 0x1cb   : > { %5412 = vmatmul.mubr.msk.f32.vlgmr.msra.gmra.mrb[58].mxu0 %vm797_vm1, %v6147_v19 }
 0x1cc   : > { %5392 = vmatmul.mubr.msk.f32.gmra.mrb[50].mxu1 %vm797_vm1, %v6102_v51  ;;  %5414 = vmatprep.mubr.msk.f32.mxu0 %vm797_vm1, %v6177_v63  ;;  %v2252_v51 = vrot.slane %v6062_v10, 2 }
 0x1cd   : > { %5394 = vmatprep.mubr.msk.f32.mxu1 %vm797_vm1, %v6157_v60 }
 0x1ce   : > { %v2253_v52 = vsel %vm1250_vm4, %v1782_v36, %v2252_v51  ;;  %v2255_v54 = vsel %vm1250_vm4, %v2252_v51, %v2254_v15 }
 0x1cf   : > { %5415 = vmatmul.mubr.msk.f32.gmra.mrb[60].mxu0 %vm797_vm1, %v6196_v3 }
 0x1d0   : > { %5395 = vmatmul.mubr.msk.f32.gmra.mrb[52].mxu1 %vm797_vm1, %v6159_v61  ;;  %5417 = vmatprep.mubr.msk.f32.mxu0 %vm797_vm1, %v6212_v7 }
 0x1d1   : > { %5397 = vmatprep.mubr.msk.f32.mxu1 %vm797_vm1, %v6149_v58 }
 0x1d3   : > { %5418 = vmatmul.mubr.msk.f32.gmra.mrb[62].mxu0 %vm797_vm1, %v6224_v9 }
 0x1d4   : > { %5398 = vmatmul.mubr.msk.f32.gmra.mrb[54].mxu1 %vm797_vm1, %v6151_v59  ;;  %5420 = vmatprep.mubr.msk.f32.mxu0 %vm797_vm1, %v6232_v16 }
 0x1d5   : > { %5400 = vmatprep.mubr.msk.f32.mxu1 %vm797_vm1, %v6199_v5 }
 0x1d7   : > { %5421 = vmatmul.mubr.msk.f32.gmra.mrb[64].mxu0 %vm797_vm1, %v6240_v17 }
 0x1d8   : > { %5401 = vmatmul.mubr.msk.f32.gmra.mrb[56].mxu1 %vm797_vm1, %v6201_v6  ;;  %5423 = vmatprep.mubr.msk.f32.mxu0 %vm797_vm1, %v6248_v22 }
 0x1d9   : > { %5403 = vmatprep.mubr.msk.f32.mxu1 %vm797_vm1, %v6187_v1 }
 0x1db   : > { %5424 = vmatmul.mubr.msk.f32.gmra.mrb[66].mxu0 %vm797_vm1, %v6257_v33 }
 0x1dc   : > { %5404 = vmatmul.mubr.msk.f32.gmra.mrb[58].mxu1 %vm797_vm1, %v6191_v2  ;;  %5426 = vmatprep.mubr.msk.f32.mxu0 %vm797_vm1, %v6265_v39 }
 0x1dd   : > { %5406 = vmatprep.mubr.msk.f32.mxu1 %vm797_vm1, %v6052_v20  ;;  %v2097_v20 = vsel %vm869_vm3, %v2094_v23, %v2096_v24 }
 0x1df   : > { %5427 = vmatmul.mubr.msk.f32.gmra.mrb[68].mxu0 %vm797_vm1, %v6276_v41 }
 0x1e0   : > { %5407 = vmatmul.mubr.msk.f32.gmra.mrb[60].mxu1 %vm797_vm1, %v6062_v10  ;;  %5429 = vmatprep.mubr.msk.f32.mxu0 %vm797_vm1, %v1623_v46 }
 0x1e1   : > { %5437 = vmatprep.mubr.msk.f32.mxu1 %vm797_vm1, %v6318_v57 }
 0x1e3   : > { %5430 = vmatmul.mubr.msk.f32.gmra.mrb[70].mxu0 %vm797_vm1, %v1625_v47  ;;  %v2534_v47 = vrot.slane %v6606_v56, 1 }
 0x1e4   : > { %5438 = vmatmul.mubr.msk.f32.vlgmr.msra.gmra.mrb[62].mxu1 %vm797_vm1, %v6326_v0  ;;  %5432 = vmatprep.mubr.msk.f32.mxu0 %vm797_vm1, %v2095_v50 }
 0x1e5   : > { %5440 = vmatprep.mubr.msk.f32.mxu1 %vm797_vm1, %v6337_v8 }
 0x1e7   : > { %5433 = vmatmul.mubr.msk.f32.gmra.mrb[72].mxu0 %vm797_vm1, %v2097_v20 }
 0x1e8   : > { %5441 = vmatmul.mubr.msk.f32.gmra.mrb[64].mxu1 %vm797_vm1, %v6348_v14 }
 0x1e9   : > { %5443 = vmatprep.mubr.msk.f32.mxu1 %vm797_vm1, %v6356_v21  ;;  %v4691_v21 = vld [vmem:[%s7223_s7 + $0x4] sm:$0xf] }
 0x1ea   : > { %5461 = vmatprep.subr.msk.mxu0 %vm935_vm2, %v4691_v21 }
 0x1eb   : > { %5462 = vmatpush3.msk.msra.mxu0 %vm935_vm2, %v4691_v21 }
 0x1ec   : > { %5444 = vmatmul.mubr.msk.f32.gmra.mrb[66].mxu1 %vm797_vm1, %v6364_v25 }
 0x1ed   : > { %5446 = vmatprep.mubr.msk.f32.mxu1 %vm797_vm1, %v6372_v40 }
 0x1f0   : > { %5447 = vmatmul.mubr.msk.f32.gmra.mrb[68].mxu1 %vm797_vm1, %v6380_v42 }
 0x1f1   : > { %5449 = vmatprep.mubr.msk.f32.mxu1 %vm797_vm1, %v6388_v43  ;;  %v2514_v43 = vld [vmem:[%s7223_s7] sm:$0xf] }
 0x1f2   : > { %5487 = vmatprep.subr.msk.mxu1 %vm935_vm2, %v2514_v43 }
 0x1f3   : > { %5488 = vmatpush3.msk.msra.mxu1 %vm935_vm2, %v2514_v43 }
 0x1f4   : > { %5450 = vmatmul.mubr.msk.f32.gmra.mrb[70].mxu1 %vm797_vm1, %v6396_v53 }
 0x1f5   : > { %5452 = vmatprep.mubr.msk.f32.mxu1 %vm797_vm1, %v6404_v18  ;;  %v6611_v18 = vld [vmem:[#allocation2 + $0x8] sm:$0xff] }
 0x1f6   : > { %v2535_v55 = vrot.slane %v6611_v18, 1 }
 0x1f8   : > { %5453 = vmatmul.mubr.msk.f32.gmra.mrb[72].mxu1 %vm797_vm1, %v6411_v4 }
 0x1f9   : > { %5455 = vmatprep.mubr.msk.f32.mxu1 %vm797_vm1, %v1781_v34 }
 0x1fc   : > { %5456 = vmatmul.mubr.msk.f32.gmra.mrb[74].mxu1 %vm797_vm1, %v1783_v11  ;;  %v2536_v11 = vsel %vm869_vm3, %v2534_v47, %v2535_v55 }
 0x1fd   : > { %5458 = vmatprep.mubr.msk.f32.mxu1 %vm797_vm1, %v2253_v52  ;;  %5463 = vmatprep.mubr.msk.f32.mxu0 %vm797_vm1, %v2536_v11 }
 0x200   : > { %5459 = vmatmul.mubr.msk.f32.gmra.mrb[76].mxu1 %vm797_vm1, %v2255_v54 }
 0x201   : > { %5489 = vmatprep.mubr.msk.f32.mxu1 %vm797_vm1, %v6606_v56 }
 0x204   : > { %5490 = vmatmul.mubr.msk.f32.vlgmr.msra.gmra.mrb[78].mxu1 %vm797_vm1, %v6611_v18 }
 0x23a   : > { %v5231_v19 = vpop.f32.mrb[8].mxu0 }
 0x23b   : > { %v1005_v58 = vpop.f32.mrb[9].mxu0  ;;  %v5234_v10 = vpop.f32.mrb[0].mxu1 }
 0x23c   : > { %v1014_v59 = vpop.f32.mrb[1].mxu1 }
 0x23e   : > { %v5257_v60 = vpop.f32.mrb[10].mxu0 }
 0x23f   : > { %v5237_v61 = vpop.f32.mrb[2].mxu1  ;;  %v1177_v63 = vpop.f32.mrb[11].mxu0 }
 0x240   : > { %v1178_v1 = vadd.f32 %v1177_v63, %v1005_v58  ;;  %v1023_v2 = vpop.f32.mrb[3].mxu1 }
 0x242   : > { %v5260_v45 = vpop.f32.mrb[12].mxu0 }
 0x243   : > { %v5240_v3 = vpop.f32.mrb[4].mxu1  ;;  %v1186_v5 = vpop.f32.mrb[13].mxu0 }
 0x244   : > { %v1187_v6 = vadd.f32 %v1186_v5, %v1014_v59  ;;  %v1032_v7 = vpop.f32.mrb[5].mxu1 }
 0x246   : > { %v5263_v9 = vpop.f32.mrb[14].mxu0 }
 0x247   : > { %v5243_v16 = vpop.f32.mrb[6].mxu1  ;;  %v1195_v17 = vpop.f32.mrb[15].mxu0 }
 0x248   : > { %v1196_v22 = vadd.f32 %v1195_v17, %v1023_v2  ;;  %v1041_v33 = vpop.f32.mrb[7].mxu1 }
 0x24a   : > { %v5266_v39 = vpop.f32.mrb[16].mxu0 }
 0x24b   : > { %v5246_v41 = vpop.f32.mrb[8].mxu1  ;;  %v1204_v57 = vpop.f32.mrb[17].mxu0 }
 0x24c   : > { %v1205_v0 = vadd.f32 %v1204_v57, %v1032_v7  ;;  %v1050_v8 = vpop.f32.mrb[9].mxu1 }
 0x24e   : > { %v5269_v14 = vpop.f32.mrb[18].mxu0 }
 0x24f   : > { %v5249_v62 = vpop.f32.mrb[10].mxu1  ;;  %v1213_v25 = vpop.f32.mrb[19].mxu0 }
 0x250   : > { %v1214_v26 = vadd.f32 %v1213_v25, %v1041_v33  ;;  %v1059_v40 = vpop.f32.mrb[11].mxu1 }
 0x252   : > { %v5272_v12 = vpop.f32.mrb[20].mxu0 }
 0x253   : > { %v5252_v42 = vpop.f32.mrb[12].mxu1  ;;  %v1222_v13 = vpop.f32.mrb[21].mxu0 }
 0x254   : > { %v1223_v44 = vadd.f32 %v1222_v13, %v1050_v8  ;;  %v1068_v53 = vpop.f32.mrb[13].mxu1 }
 0x256   : > { %v5275_v4 = vpop.f32.mrb[22].mxu0 }
 0x257   : > { %v1231_v37 = vpop.f32.mrb[23].mxu0  ;;  %v5283_v48 = vpop.f32.mrb[14].mxu1 }
 0x258   : > { %v1232_v49 = vadd.f32 %v1231_v37, %v1059_v40  ;;  %v1385_v46 = vpop.f32.mrb[15].mxu1  ;;  %v2914_v37 = vrot.slane %v6611_v18, 2 }
 0x259   : > { %v1456_v36 = vadd.f32 %v1385_v46, %v1178_v1 }
 0x25a   : > { %v5278_v34 = vpop.f32.mrb[24].mxu0 }
 0x25b   : > { %v1240_v23 = vpop.f32.mrb[25].mxu0  ;;  %v5286_v24 = vpop.f32.mrb[16].mxu1 }
 0x25c   : > { %v1241_v50 = vadd.f32 %v1240_v23, %v1068_v53  ;;  %v1394_v20 = vpop.f32.mrb[17].mxu1 }
 0x25d   : > { %v1457_v51 = vadd.f32 %v1394_v20, %v1187_v6  ;;  %v6624_v6 = vld [vmem:[%s7223_s7 + $0x8] sm:$0xf] }
 0x25e   : > { %v5309_v15 = vpop.f32.mrb[26].mxu0  ;;  %5513 = vmatprep.subr.msk.mxu0 %vm935_vm2, %v6624_v6 }
 0x25f   : > { %v5289_v52 = vpop.f32.mrb[18].mxu1  ;;  %v1540_v54 = vpop.f32.mrb[27].mxu0 }
 0x260   : > { %v1611_v19 = vadd.f32 %v1540_v54, %v1456_v36  ;;  %v1403_v58 = vpop.f32.mrb[19].mxu1 }
 0x261   : > { %v1458_v10 = vadd.f32 %v1403_v58, %v1196_v22 }
 0x262   : > { %v5312_v59 = vpop.f32.mrb[28].mxu0 }
 0x263   : > { %v5292_v60 = vpop.f32.mrb[20].mxu1  ;;  %v1549_v61 = vpop.f32.mrb[29].mxu0 }
 0x264   : > { %v1612_v63 = vadd.f32 %v1549_v61, %v1457_v51  ;;  %v1412_v1 = vpop.f32.mrb[21].mxu1 }
 0x265   : > { %v1459_v2 = vadd.f32 %v1412_v1, %v1205_v0 }
 0x266   : > { %v5315_v45 = vpop.f32.mrb[30].mxu0 }
 0x267   : > { %v5295_v3 = vpop.f32.mrb[22].mxu1  ;;  %v1558_v5 = vpop.f32.mrb[31].mxu0 }
 0x268   : > { %v1613_v7 = vadd.f32 %v1558_v5, %v1458_v10  ;;  %v1421_v9 = vpop.f32.mrb[23].mxu1 }
 0x269   : > { %v1460_v16 = vadd.f32 %v1421_v9, %v1214_v26  ;;  %v4744_v26 = vld [vmem:[%s7223_s7 + $0xc] sm:$0xf] }
 0x26a   : > { %v5318_v17 = vpop.f32.mrb[32].mxu0  ;;  %5539 = vmatprep.subr.msk.mxu1 %vm935_vm2, %v4744_v26 }
 0x26b   : > { %v5298_v33 = vpop.f32.mrb[24].mxu1  ;;  %v1567_v22 = vpop.f32.mrb[33].mxu0  ;;  %5540 = vmatpush3.msk.msra.mxu1 %vm935_vm2, %v4744_v26 }
 0x26c   : > { %v1614_v39 = vadd.f32 %v1567_v22, %v1459_v2  ;;  %v1430_v41 = vpop.f32.mrb[25].mxu1 }
 0x26d   : > { %v1461_v57 = vadd.f32 %v1430_v41, %v1223_v44  ;;  %v2913_v44 = vrot.slane %v6606_v56, 2 }
 0x26e   : > { %v5321_v0 = vpop.f32.mrb[34].mxu0 }
 0x26f   : > { %v5301_v8 = vpop.f32.mrb[26].mxu1  ;;  %v1576_v14 = vpop.f32.mrb[35].mxu0  ;;  %v6638_v36 = vsel %vm1250_vm4, %v2913_v44, %v2914_v37 }
 0x270   : > { %v1615_v21 = vadd.f32 %v1576_v14, %v1460_v16  ;;  %v1439_v62 = vpop.f32.mrb[27].mxu1 }
 0x271   : > { %v1462_v25 = vadd.f32 %v1439_v62, %v1232_v49 }
 0x272   : > { %v5324_v40 = vpop.f32.mrb[36].mxu0 }
 0x273   : > { %v5304_v12 = vpop.f32.mrb[28].mxu1  ;;  %v1585_v42 = vpop.f32.mrb[37].mxu0 }
 0x274   : > { %v1616_v13 = vadd.f32 %v1585_v42, %v1461_v57  ;;  %v1448_v43 = vpop.f32.mrb[29].mxu1 }
 0x275   : > { %v1463_v53 = vadd.f32 %v1448_v43, %v1241_v50 }
 0x276   : > { %v5327_v4 = vpop.f32.mrb[38].mxu0 }
 0x277   : > { %v1594_v48 = vpop.f32.mrb[39].mxu0  ;;  %v5335_v49 = vpop.f32.mrb[30].mxu1 }
 0x278   : > { %v1617_v46 = vadd.f32 %v1594_v48, %v1462_v25  ;;  %v1699_v47 = vpop.f32.mrb[31].mxu1 }
 0x279   : > { %v1770_v34 = vadd.f32 %v1699_v47, %v1611_v19 }
 0x27a   : > { %v5330_v11 = vpop.f32.mrb[40].mxu0 }
 0x27b   : > { %v1603_v23 = vpop.f32.mrb[41].mxu0  ;;  %v5338_v24 = vpop.f32.mrb[32].mxu1 }
 0x27c   : > { %v1618_v20 = vadd.f32 %v1603_v23, %v1463_v53  ;;  %v1708_v51 = vpop.f32.mrb[33].mxu1 }
 0x27d   : > { %v1771_v56 = vadd.f32 %v1708_v51, %v1612_v63 }
 0x27e   : > { %v5361_v50 = vpop.f32.mrb[42].mxu0 }
 0x27f   : > { %v5341_v15 = vpop.f32.mrb[34].mxu1  ;;  %v1857_v52 = vpop.f32.mrb[43].mxu0 }
 0x280   : > { %v1928_v54 = vadd.f32 %v1857_v52, %v1770_v34  ;;  %v1717_v58 = vpop.f32.mrb[35].mxu1 }
 0x281   : > { %v1772_v10 = vadd.f32 %v1717_v58, %v1613_v7 }
 0x282   : > { %v5364_v59 = vpop.f32.mrb[44].mxu0 }
 0x283   : > { %v5344_v60 = vpop.f32.mrb[36].mxu1  ;;  %v1866_v61 = vpop.f32.mrb[45].mxu0 }
 0x284   : > { %v1929_v1 = vadd.f32 %v1866_v61, %v1771_v56  ;;  %v1726_v2 = vpop.f32.mrb[37].mxu1 }
 0x285   : > { %v1773_v45 = vadd.f32 %v1726_v2, %v1614_v39  ;;  %v6643_v39 = vld [vmem:[%s7223_s7 + $0x14] sm:$0xf] }
 0x286   : > { %v5367_v3 = vpop.f32.mrb[46].mxu0  ;;  %5591 = vmatprep.subr.msk.mxu1 %vm935_vm2, %v6643_v39 }
 0x287   : > { %v5347_v19 = vpop.f32.mrb[38].mxu1  ;;  %v1875_v5 = vpop.f32.mrb[47].mxu0 }
 0x288   : > { %v1930_v9 = vadd.f32 %v1875_v5, %v1772_v10  ;;  %v1735_v16 = vpop.f32.mrb[39].mxu1 }
 0x289   : > { %v1774_v17 = vadd.f32 %v1735_v16, %v1615_v21 }
 0x28a   : > { %v5370_v33 = vpop.f32.mrb[48].mxu0 }
 0x28b   : > { %v5350_v63 = vpop.f32.mrb[40].mxu1  ;;  %v1884_v22 = vpop.f32.mrb[49].mxu0 }
 0x28c   : > { %v1931_v41 = vadd.f32 %v1884_v22, %v1773_v45  ;;  %v1744_v57 = vpop.f32.mrb[41].mxu1 }
 0x28d   : > { %v1775_v0 = vadd.f32 %v1744_v57, %v1616_v13 }
 0x28e   : > { %v5373_v8 = vpop.f32.mrb[50].mxu0 }
 0x28f   : > { %v5353_v7 = vpop.f32.mrb[42].mxu1  ;;  %v1893_v14 = vpop.f32.mrb[51].mxu0 }
 0x290   : > { %v1932_v62 = vadd.f32 %v1893_v14, %v1774_v17  ;;  %v1753_v25 = vpop.f32.mrb[43].mxu1 }
 0x291   : > { %v1776_v26 = vadd.f32 %v1753_v25, %v1617_v46 }
 0x292   : > { %v5376_v40 = vpop.f32.mrb[52].mxu0 }
 0x293   : > { %v5356_v21 = vpop.f32.mrb[44].mxu1  ;;  %v1902_v12 = vpop.f32.mrb[53].mxu0 }
 0x294   : > { %v1933_v42 = vadd.f32 %v1902_v12, %v1775_v0  ;;  %v1762_v43 = vpop.f32.mrb[45].mxu1 }
 0x295   : > { %v1777_v13 = vadd.f32 %v1762_v43, %v1618_v20 }
 0x296   : > { %v5379_v44 = vpop.f32.mrb[54].mxu0 }
 0x297   : > { %v1911_v53 = vpop.f32.mrb[55].mxu0  ;;  %v5387_v4 = vpop.f32.mrb[46].mxu1 }
 0x298   : > { %v1934_v48 = vadd.f32 %v1911_v53, %v1776_v26  ;;  %v2012_v49 = vpop.f32.mrb[47].mxu1 }
 0x299   : > { %v2083_v46 = vadd.f32 %v2012_v49, %v1928_v54 }
 0x29a   : > { %v5382_v47 = vpop.f32.mrb[56].mxu0 }
 0x29b   : > { %v1920_v34 = vpop.f32.mrb[57].mxu0  ;;  %v5390_v11 = vpop.f32.mrb[48].mxu1 }
 0x29c   : > { %v1935_v23 = vadd.f32 %v1920_v34, %v1777_v13  ;;  %v2021_v24 = vpop.f32.mrb[49].mxu1 }
 0x29d   : > { %v2084_v51 = vadd.f32 %v2021_v24, %v1929_v1 }
 0x29e   : > { %v5413_v56 = vpop.f32.mrb[58].mxu0 }
 0x29f   : > { %v5393_v50 = vpop.f32.mrb[50].mxu1  ;;  %v2171_v15 = vpop.f32.mrb[59].mxu0 }
 0x2a0   : > { %v2242_v52 = vadd.f32 %v2171_v15, %v2083_v46  ;;  %v2030_v58 = vpop.f32.mrb[51].mxu1 }
 0x2a1   : > { %v2085_v10 = vadd.f32 %v2030_v58, %v1930_v9 }
 0x2a2   : > { %v5416_v59 = vpop.f32.mrb[60].mxu0 }
 0x2a3   : > { %v5396_v20 = vpop.f32.mrb[52].mxu1  ;;  %v2180_v60 = vpop.f32.mrb[61].mxu0 }
 0x2a4   : > { %v2243_v61 = vadd.f32 %v2180_v60, %v2084_v51  ;;  %v2039_v2 = vpop.f32.mrb[53].mxu1 }
 0x2a5   : > { %v2086_v45 = vadd.f32 %v2039_v2, %v1931_v41 }
 0x2a6   : > { %v5419_v3 = vpop.f32.mrb[62].mxu0 }
 0x2a7   : > { %v5399_v54 = vpop.f32.mrb[54].mxu1  ;;  %v2189_v19 = vpop.f32.mrb[63].mxu0 }
 0x2a8   : > { %v2244_v5 = vadd.f32 %v2189_v19, %v2085_v10  ;;  %v2048_v16 = vpop.f32.mrb[55].mxu1 }
 0x2a9   : > { %v2087_v17 = vadd.f32 %v2048_v16, %v1932_v62 }
 0x2aa   : > { %v5422_v33 = vpop.f32.mrb[64].mxu0 }
 0x2ab   : > { %v5402_v1 = vpop.f32.mrb[56].mxu1  ;;  %v2198_v63 = vpop.f32.mrb[65].mxu0 }
 0x2ac   : > { %v2245_v22 = vadd.f32 %v2198_v63, %v2086_v45  ;;  %v2057_v57 = vpop.f32.mrb[57].mxu1 }
 0x2ad   : > { %v2088_v0 = vadd.f32 %v2057_v57, %v1933_v42  ;;  %v6650_v42 = vld [vmem:[%s7222_s6] ss:$0 sm:$0xff] }
 0x2ae   : > { %v5425_v8 = vpop.f32.mrb[66].mxu0 }
 0x2af   : > { %v5405_v9 = vpop.f32.mrb[58].mxu1  ;;  %v2207_v7 = vpop.f32.mrb[67].mxu0 }
 0x2b0   : > { %v2246_v14 = vadd.f32 %v2207_v7, %v2087_v17  ;;  %v2066_v25 = vpop.f32.mrb[59].mxu1 }
 0x2b1   : > { %v2089_v26 = vadd.f32 %v2066_v25, %v1934_v48 }
 0x2b2   : > { %v5428_v40 = vpop.f32.mrb[68].mxu0 }
 0x2b3   : > { %v5408_v41 = vpop.f32.mrb[60].mxu1  ;;  %v2216_v21 = vpop.f32.mrb[69].mxu0 }
 0x2b4   : > { %v2247_v12 = vadd.f32 %v2216_v21, %v2088_v0  ;;  %v2075_v43 = vpop.f32.mrb[61].mxu1 }
 0x2b5   : > { %v2090_v13 = vadd.f32 %v2075_v43, %v1935_v23 }
 0x2b6   : > { %v5431_v44 = vpop.f32.mrb[70].mxu0 }
 0x2b7   : > { %v2225_v62 = vpop.f32.mrb[71].mxu0  ;;  %v5439_v53 = vpop.f32.mrb[62].mxu1 }
 0x2b8   : > { %v2248_v4 = vadd.f32 %v2225_v62, %v2089_v26  ;;  %v2329_v49 = vpop.f32.mrb[63].mxu1 }
 0x2b9   : > { %v2400_v46 = vadd.f32 %v2329_v49, %v2242_v52 }
 0x2ba   : > { %v5434_v47 = vpop.f32.mrb[72].mxu0 }
 0x2bb   : > { %v2415_v48 = vadd.f32 %v6650_v42, %v2400_v46  ;;  %v2234_v34 = vpop.f32.mrb[73].mxu0  ;;  %v5442_v11 = vpop.f32.mrb[64].mxu1 }
 0x2bc   : > { %v2249_v24 = vadd.f32 %v2234_v34, %v2090_v13  ;;  %v2338_v51 = vpop.f32.mrb[65].mxu1 }
 0x2bd   : > { %v2431_v56 = vmul.f32 0.70710677, %v2415_v48  ;;  %v2401_v23 = vadd.f32 %v2338_v51, %v2243_v61  ;;  %v2423_v33 = vmul.f32 0.5, %v2415_v48 }
 0x2bf   : > { %5778 = verf.f32 %v2431_v56  ;;  %v2416_v50 = vadd.f32 %v6650_v42, %v2401_v23  ;;  %v5445_v15 = vpop.f32.mrb[66].mxu1 }
 0x2c0   : > { %v2347_v58 = vpop.f32.mrb[67].mxu1 }
 0x2c1   : > { %v2432_v10 = vmul.f32 0.70710677, %v2416_v50  ;;  %v2402_v59 = vadd.f32 %v2347_v58, %v2244_v5 }
 0x2c3   : > { %5780 = verf.f32 %v2432_v10  ;;  %v2417_v20 = vadd.f32 %v6650_v42, %v2402_v59  ;;  %v5448_v52 = vpop.f32.mrb[68].mxu1  ;;  %v6682_v59 = vld [vmem:[%s7223_s7 + $0x10] sm:$0xf] }
 0x2c4   : > { %v2356_v60 = vpop.f32.mrb[69].mxu1 }
 0x2c5   : > { %v2433_v2 = vmul.f32 0.70710677, %v2417_v20  ;;  %v2403_v45 = vadd.f32 %v2356_v60, %v2245_v22  ;;  %v2424_v22 = vmul.f32 0.5, %v2416_v50  ;;  %v2425_v44 = vmul.f32 0.5, %v2417_v20 }
 0x2c7   : > { %5782 = verf.f32 %v2433_v2  ;;  %v2418_v3 = vadd.f32 %v6650_v42, %v2403_v45  ;;  %v5451_v54 = vpop.f32.mrb[70].mxu1 }
 0x2c8   : > { %v2365_v19 = vpop.f32.mrb[71].mxu1 }
 0x2c9   : > { %v5779_v61 = vpop.eup %5778  ;;  %v2434_v16 = vmul.f32 0.70710677, %v2418_v3  ;;  %v2404_v17 = vadd.f32 %v2365_v19, %v2246_v14 }
 0x2ca   : > { %v2447_v1 = vadd.f32 1.0, %v5779_v61 }
 0x2cb   : > { %5784 = verf.f32 %v2434_v16  ;;  %v2419_v5 = vadd.f32 %v6650_v42, %v2404_v17  ;;  %v5454_v63 = vpop.f32.mrb[72].mxu1 }
 0x2cc   : > { %v2455_v57 = vmul.f32 %v2447_v1, %v2423_v33  ;;  %v2374_v0 = vpop.f32.mrb[73].mxu1 }
 0x2cd   : > { %v5781_v8 = vpop.eup %5780  ;;  %v2435_v9 = vmul.f32 0.70710677, %v2419_v5  ;;  %v2405_v7 = vadd.f32 %v2374_v0, %v2247_v12  ;;  %v2427_v2 = vmul.f32 0.5, %v2419_v5 }
 0x2ce   : > { %2485 = vst.msk [vmem:[#allocation2 + $0x11] sm:$0xff] %vm797_vm1, %v2455_v57  ;;  %v2448_v25 = vadd.f32 1.0, %v5781_v8 }
 0x2cf   : > { %5786 = verf.f32 %v2435_v9  ;;  %v2420_v26 = vadd.f32 %v6650_v42, %v2405_v7  ;;  %v5457_v40 = vpop.f32.mrb[74].mxu1 }
 0x2d0   : > { %v2456_v14 = vmul.f32 %v2448_v25, %v2424_v22  ;;  %v2383_v41 = vpop.f32.mrb[75].mxu1 }
 0x2d1   : > { %v5783_v21 = vpop.eup %5782  ;;  %v2436_v43 = vmul.f32 0.70710677, %v2420_v26  ;;  %v2406_v13 = vadd.f32 %v2383_v41, %v2248_v4  ;;  %v2426_v4 = vmul.f32 0.5, %v2418_v3  ;;  %v2428_v33 = vmul.f32 0.5, %v2420_v26 }
 0x2d2   : > { %2486 = vst.msk [vmem:[#allocation2 + $0x21] sm:$0xff] %vm797_vm1, %v2456_v14  ;;  %v2449_v62 = vadd.f32 1.0, %v5783_v21 }
 0x2d3   : > { %5788 = verf.f32 %v2436_v43  ;;  %v2421_v12 = vadd.f32 %v6650_v42, %v2406_v13  ;;  %v5460_v53 = vpop.f32.mrb[76].mxu1 }
 0x2d4   : > { %v2457_v49 = vmul.f32 %v2449_v62, %v2425_v44  ;;  %v2392_v46 = vpop.f32.mrb[77].mxu1 }
 0x2d5   : > { %v5785_v47 = vpop.eup %5784  ;;  %v2437_v48 = vmul.f32 0.70710677, %v2421_v12  ;;  %v2407_v34 = vadd.f32 %v2392_v46, %v2249_v24  ;;  %v6661_v11 = vld [vmem:[#allocation2 + $0x10] sm:$0xff]  ;;  %v6663_v51 = vld [vmem:[#allocation2 + $0x18] sm:$0xff]  ;;  %v2429_v25 = vmul.f32 0.5, %v2421_v12 }
 0x2d6   : > { %2487 = vst.msk [vmem:[#allocation2 + $0x31] sm:$0xff] %vm797_vm1, %v2457_v49  ;;  %v2450_v56 = vadd.f32 1.0, %v5785_v47  ;;  %v2537_v23 = vrot.slane %v6661_v11, 1  ;;  %5492 = vmatprep.mubr.msk.f32.mxu1 %vm797_vm1, %v6661_v11  ;;  %v2539_v50 = vrot.slane %v6663_v51, 1 }
 0x2d7   : > { %5790 = verf.f32 %v2437_v48  ;;  %v2422_v15 = vadd.f32 %v6650_v42, %v2407_v34  ;;  %5493 = vmatmul.mubr.msk.f32.gmra.mrb[80].mxu1 %vm797_vm1, %v6663_v51 }
 0x2d8   : > { %v2458_v24 = vmul.f32 %v2450_v56, %v2426_v4  ;;  %v2538_v58 = vsel %vm869_vm3, %v2535_v55, %v2537_v23  ;;  %v6677_v10 = vsel %vm869_vm3, %v2537_v23, %v2539_v50 }
 0x2d9   : > { %v5787_v20 = vpop.eup %5786  ;;  %v2438_v52 = vmul.f32 0.70710677, %v2422_v15  ;;  %5464 = vmatmul.mubr.msk.f32.vlgmr.msra.gmra.mrb[74].mxu0 %vm797_vm1, %v2538_v58  ;;  %v6685_v42 = vld [vmem:[#allocation2 + $0x20] sm:$0xff]  ;;  %v6687_v60 = vld [vmem:[#allocation2 + $0x28] sm:$0xff]  ;;  %v2430_v12 = vmul.f32 0.5, %v2422_v15 }
 0x2da   : > { %2488 = vst.msk [vmem:[#allocation2 + $0x41] sm:$0xff] %vm797_vm1, %v2458_v24  ;;  %v2451_v55 = vadd.f32 1.0, %v5787_v20  ;;  %5514 = vmatpush3.msk.msra.mxu0 %vm935_vm2, %v6624_v6  ;;  %5466 = vmatprep.mubr.msk.f32.mxu0 %vm797_vm1, %v6677_v10  ;;  %v2541_v45 = vrot.slane %v6685_v42, 1  ;;  %v2543_v3 = vrot.slane %v6687_v60, 1 }
 0x2db   : > { %5792 = verf.f32 %v2438_v52  ;;  %5495 = vmatprep.mubr.msk.f32.mxu1 %vm797_vm1, %v6685_v42  ;;  %5565 = vmatprep.subr.msk.mxu0 %vm935_vm2, %v6682_v59 }
 0x2dc   : > { %v2459_v54 = vmul.f32 %v2451_v55, %v2427_v2  ;;  %5496 = vmatmul.mubr.msk.f32.gmra.mrb[82].mxu1 %vm797_vm1, %v6687_v60  ;;  %v6703_v6 = vsel %vm869_vm3, %v2539_v50, %v2541_v45  ;;  %v6706_v19 = vsel %vm869_vm3, %v2541_v45, %v2543_v3 }
 0x2dd   : > { %v5789_v61 = vpop.eup %5788  ;;  %5467 = vmatmul.mubr.msk.f32.gmra.mrb[76].mxu0 %vm797_vm1, %v6703_v6  ;;  %v6710_v16 = vld [vmem:[#allocation2 + $0x30] sm:$0xff]  ;;  %v6712_v17 = vld [vmem:[#allocation2 + $0x38] sm:$0xff] }
 0x2de   : > { %2489 = vst.msk [vmem:[#allocation2 + $0x51] sm:$0xff] %vm797_vm1, %v2459_v54  ;;  %v2452_v1 = vadd.f32 1.0, %v5789_v61  ;;  %5469 = vmatprep.mubr.msk.f32.mxu0 %vm797_vm1, %v6706_v19  ;;  %5498 = vmatprep.mubr.msk.f32.mxu1 %vm797_vm1, %v6710_v16  ;;  %v2545_v5 = vrot.slane %v6710_v16, 1  ;;  %v2547_v63 = vrot.slane %v6712_v17, 1  ;;  %v2916_v61 = vrot.slane %v6661_v11, 2 }
 0x2e0   : > { %v2460_v57 = vmul.f32 %v2452_v1, %v2428_v33  ;;  %5499 = vmatmul.mubr.msk.f32.gmra.mrb[84].mxu1 %vm797_vm1, %v6712_v17  ;;  %v6724_v0 = vsel %vm869_vm3, %v2543_v3, %v2545_v5  ;;  %v6727_v8 = vsel %vm869_vm3, %v2545_v5, %v2547_v63  ;;  %v6832_v1 = vld [vmem:[%s7223_s7 + $0x1c] sm:$0xf]  ;;  %v2918_v5 = vrot.slane %v6663_v51, 2 }
 0x2e1   : > { %v5791_v9 = vpop.eup %5790  ;;  %5470 = vmatmul.mubr.msk.f32.gmra.mrb[78].mxu0 %vm797_vm1, %v6724_v0  ;;  %v6731_v7 = vld [vmem:[#allocation2 + $0x40] sm:$0xff]  ;;  %v6733_v22 = vld [vmem:[#allocation2 + $0x48] sm:$0xff] }
 0x2e2   : > { %2490 = vst.msk [vmem:[#allocation2 + $0x61] sm:$0xff] %vm797_vm1, %v2460_v57  ;;  %v2453_v26 = vadd.f32 1.0, %v5791_v9  ;;  %5472 = vmatprep.mubr.msk.f32.mxu0 %vm797_vm1, %v6727_v8  ;;  %5501 = vmatprep.mubr.msk.f32.mxu1 %vm797_vm1, %v6731_v7  ;;  %v2549_v40 = vrot.slane %v6731_v7, 1  ;;  %v2551_v14 = vrot.slane %v6733_v22, 1 }
 0x2e4   : > { %v2461_v41 = vmul.f32 %v2453_v26, %v2429_v25  ;;  %5502 = vmatmul.mubr.msk.f32.gmra.mrb[86].mxu1 %vm797_vm1, %v6733_v22  ;;  %v6745_v21 = vsel %vm869_vm3, %v2547_v63, %v2549_v40  ;;  %v6748_v43 = vsel %vm869_vm3, %v2549_v40, %v2551_v14  ;;  %v6854_v63 = vld [vmem:[%s7223_s7 + $0x18] sm:$0xf]  ;;  %v2928_v25 = vrot.slane %v6731_v7, 2 }
 0x2e5   : > { %v5793_v13 = vpop.eup %5792  ;;  %5473 = vmatmul.mubr.msk.f32.gmra.mrb[80].mxu0 %vm797_vm1, %v6745_v21  ;;  %v6752_v44 = vld [vmem:[#allocation2 + $0x50] sm:$0xff]  ;;  %v6754_v62 = vld [vmem:[#allocation2 + $0x58] sm:$0xff]  ;;  %v2930_v40 = vrot.slane %v6733_v22, 2 }
 0x2e6   : > { %2491 = vst.msk [vmem:[#allocation2 + $0x71] sm:$0xff] %vm797_vm1, %v2461_v41  ;;  %v2454_v53 = vadd.f32 1.0, %v5793_v13  ;;  %5475 = vmatprep.mubr.msk.f32.mxu0 %vm797_vm1, %v6748_v43  ;;  %5504 = vmatprep.mubr.msk.f32.mxu1 %vm797_vm1, %v6752_v44  ;;  %v2553_v49 = vrot.slane %v6752_v44, 1  ;;  %v2555_v46 = vrot.slane %v6754_v62, 1  ;;  %v2932_v41 = vrot.slane %v6752_v44, 2 }
 0x2e7   : > { %v6906_v13 = vsel %vm1250_vm4, %v2928_v25, %v2930_v40 }
 0x2e8   : > { %v2462_v47 = vmul.f32 %v2454_v53, %v2430_v12  ;;  %5505 = vmatmul.mubr.msk.f32.gmra.mrb[88].mxu1 %vm797_vm1, %v6754_v62  ;;  %v6766_v48 = vsel %vm869_vm3, %v2551_v14, %v2553_v49  ;;  %v6769_v34 = vsel %vm869_vm3, %v2553_v49, %v2555_v46  ;;  %v2934_v12 = vrot.slane %v6754_v62, 2 }
 0x2e9   : > { %5476 = vmatmul.mubr.msk.f32.gmra.mrb[82].mxu0 %vm797_vm1, %v6766_v48  ;;  %v6773_v4 = vld [vmem:[#allocation2 + $0x60] sm:$0xff]  ;;  %v6775_v56 = vld [vmem:[#allocation2 + $0x68] sm:$0xff]  ;;  %v6914_v53 = vsel %vm1250_vm4, %v2930_v40, %v2932_v41 }
 0x2ea   : > { %2492 = vst.msk [vmem:[#allocation2 + $0x81] sm:$0xff] %vm797_vm1, %v2462_v47  ;;  %5478 = vmatprep.mubr.msk.f32.mxu0 %vm797_vm1, %v6769_v34  ;;  %5507 = vmatprep.mubr.msk.f32.mxu1 %vm797_vm1, %v6773_v4  ;;  %v2557_v23 = vrot.slane %v6773_v4, 1  ;;  %v2559_v50 = vrot.slane %v6775_v56, 1  ;;  %v2936_v49 = vrot.slane %v6773_v4, 2  ;;  %v2938_v47 = vrot.slane %v6775_v56, 2 }
 0x2ec   : > { %5508 = vmatmul.mubr.msk.f32.gmra.mrb[90].mxu1 %vm797_vm1, %v6775_v56  ;;  %v6787_v15 = vsel %vm869_vm3, %v2555_v46, %v2557_v23  ;;  %v6790_v24 = vsel %vm869_vm3, %v2557_v23, %v2559_v50  ;;  %v6922_v46 = vsel %vm1250_vm4, %v2932_v41, %v2934_v12  ;;  %v6930_v23 = vsel %vm1250_vm4, %v2934_v12, %v2936_v49 }
 0x2ed   : > { %5479 = vmatmul.mubr.msk.f32.gmra.mrb[84].mxu0 %vm797_vm1, %v6787_v15  ;;  %v6794_v58 = vld [vmem:[#allocation2 + $0x70] sm:$0xff]  ;;  %v6796_v20 = vld [vmem:[#allocation2 + $0x78] sm:$0xff] }
 0x2ee   : > { %5481 = vmatprep.mubr.msk.f32.mxu0 %vm797_vm1, %v6790_v24  ;;  %5510 = vmatprep.mubr.msk.f32.mxu1 %vm797_vm1, %v6794_v58  ;;  %v2561_v52 = vrot.slane %v6794_v58, 1  ;;  %v2563_v2 = vrot.slane %v6796_v20, 1 }
 0x2f0   : > { %5511 = vmatmul.mubr.msk.f32.gmra.mrb[92].mxu1 %vm797_vm1, %v6796_v20  ;;  %v6807_v55 = vsel %vm869_vm3, %v2559_v50, %v2561_v52  ;;  %v6810_v45 = vsel %vm869_vm3, %v2561_v52, %v2563_v2  ;;  %v2940_v50 = vrot.slane %v6794_v58, 2  ;;  %v6938_v52 = vsel %vm1250_vm4, %v2936_v49, %v2938_v47 }
 0x2f1   : > { %5541 = vmatprep.mubr.msk.f32.mxu1 %vm797_vm1, %v6661_v11  ;;  %5482 = vmatmul.mubr.msk.f32.gmra.mrb[86].mxu0 %vm797_vm1, %v6807_v55  ;;  %v6816_v3 = vld [vmem:[#allocation2 + $0x80] sm:$0xff]  ;;  %v2917_v11 = vsel %vm1250_vm4, %v2914_v37, %v2916_v61  ;;  %v2924_v37 = vrot.slane %v6710_v16, 2 }
 0x2f2   : > { %5484 = vmatprep.mubr.msk.f32.mxu0 %vm797_vm1, %v6810_v45  ;;  %v2565_v54 = vrot.slane %v6816_v3, 1 }
 0x2f4   : > { %5542 = vmatmul.mubr.msk.f32.vlgmr.msra.gmra.mrb[94].mxu1 %vm797_vm1, %v6663_v51  ;;  %v6827_v33 = vsel %vm869_vm3, %v2563_v2, %v2565_v54  ;;  %v2920_v51 = vrot.slane %v6685_v42, 2  ;;  %v2942_v2 = vrot.slane %v6796_v20, 2 }
 0x2f5   : > { %5544 = vmatprep.mubr.msk.f32.mxu1 %vm797_vm1, %v6685_v42  ;;  %5485 = vmatmul.mubr.msk.f32.gmra.mrb[88].mxu0 %vm797_vm1, %v6827_v33 }
 0x2f6   : > { %5515 = vmatprep.mubr.msk.f32.mxu0 %vm797_vm1, %v6638_v36  ;;  %5592 = vmatpush3.msk.msra.mxu1 %vm935_vm2, %v6643_v39  ;;  %v2919_v36 = vsel %vm1250_vm4, %v2916_v61, %v2918_v5  ;;  %v2922_v39 = vrot.slane %v6687_v60, 2  ;;  %v2921_v18 = vsel %vm1250_vm4, %v2918_v5, %v2920_v51  ;;  %v6943_v61 = vld [vmem:[#allocation2 + $0x88] sm:$0xff]  ;;  %v6948_v5 = vsel %vm1250_vm4, %v2938_v47, %v2940_v50 }
 0x2f7   : > { %5643 = vmatprep.subr.msk.mxu1 %vm935_vm2, %v6832_v1 }
 0x2f8   : > { %5545 = vmatmul.mubr.msk.f32.gmra.mrb[96].mxu1 %vm797_vm1, %v6687_v60  ;;  %v6874_v57 = vsel %vm1250_vm4, %v2920_v51, %v2922_v39  ;;  %v6882_v9 = vsel %vm1250_vm4, %v2922_v39, %v2924_v37  ;;  %v6955_v51 = vsel %vm1250_vm4, %v2940_v50, %v2942_v2 }
 0x2f9   : > { %5547 = vmatprep.mubr.msk.f32.mxu1 %vm797_vm1, %v6710_v16  ;;  %5516 = vmatmul.mubr.msk.f32.vlgmr.msra.gmra.mrb[90].mxu0 %vm797_vm1, %v2917_v11  ;;  %v2944_v11 = vrot.slane %v6816_v3, 2 }
 0x2fa   : > { %5566 = vmatpush3.msk.msra.mxu0 %vm935_vm2, %v6682_v59  ;;  %5518 = vmatprep.mubr.msk.f32.mxu0 %vm797_vm1, %v2919_v36  ;;  %v2926_v59 = vrot.slane %v6712_v17, 2 }
 0x2fb   : > { %5617 = vmatprep.subr.msk.mxu0 %vm935_vm2, %v6854_v63  ;;  %v6961_v39 = vsel %vm1250_vm4, %v2942_v2, %v2944_v11 }
 0x2fc   : > { %5548 = vmatmul.mubr.msk.f32.gmra.mrb[98].mxu1 %vm797_vm1, %v6712_v17  ;;  %v6890_v26 = vsel %vm1250_vm4, %v2924_v37, %v2926_v59  ;;  %v6898_v14 = vsel %vm1250_vm4, %v2926_v59, %v2928_v25  ;;  %v3284_v59 = vrot.slane %v6943_v61, 1 }
 0x2fd   : > { %5550 = vmatprep.mubr.msk.f32.mxu1 %vm797_vm1, %v6731_v7  ;;  %5519 = vmatmul.mubr.msk.f32.gmra.mrb[92].mxu0 %vm797_vm1, %v2921_v18 }
 0x2fe   : > { %5521 = vmatprep.mubr.msk.f32.mxu0 %vm797_vm1, %v6874_v57  ;;  %v3285_v41 = vsel %vm869_vm3, %v2565_v54, %v3284_v59 }
 0x300   : > { %5551 = vmatmul.mubr.msk.f32.gmra.mrb[100].mxu1 %vm797_vm1, %v6733_v22 }
 0x301   : > { %5553 = vmatprep.mubr.msk.f32.mxu1 %vm797_vm1, %v6752_v44  ;;  %5522 = vmatmul.mubr.msk.f32.gmra.mrb[94].mxu0 %vm797_vm1, %v6882_v9 }
 0x302   : > { %5524 = vmatprep.mubr.msk.f32.mxu0 %vm797_vm1, %v6890_v26 }
 0x304   : > { %5554 = vmatmul.mubr.msk.f32.gmra.mrb[102].mxu1 %vm797_vm1, %v6754_v62 }
 0x305   : > { %5556 = vmatprep.mubr.msk.f32.mxu1 %vm797_vm1, %v6773_v4  ;;  %5525 = vmatmul.mubr.msk.f32.gmra.mrb[96].mxu0 %vm797_vm1, %v6898_v14 }
 0x306   : > { %5527 = vmatprep.mubr.msk.f32.mxu0 %vm797_vm1, %v6906_v13 }
 0x308   : > { %5557 = vmatmul.mubr.msk.f32.gmra.mrb[104].mxu1 %vm797_vm1, %v6775_v56 }
 0x309   : > { %5559 = vmatprep.mubr.msk.f32.mxu1 %vm797_vm1, %v6794_v58  ;;  %5528 = vmatmul.mubr.msk.f32.gmra.mrb[98].mxu0 %vm797_vm1, %v6914_v53 }
 0x30a   : > { %5530 = vmatprep.mubr.msk.f32.mxu0 %vm797_vm1, %v6922_v46 }
 0x30c   : > { %5560 = vmatmul.mubr.msk.f32.gmra.mrb[106].mxu1 %vm797_vm1, %v6796_v20 }
 0x30d   : > { %5562 = vmatprep.mubr.msk.f32.mxu1 %vm797_vm1, %v6816_v3  ;;  %5531 = vmatmul.mubr.msk.f32.gmra.mrb[100].mxu0 %vm797_vm1, %v6930_v23 }
 0x30e   : > { %5533 = vmatprep.mubr.msk.f32.mxu0 %vm797_vm1, %v6938_v52 }
 0x310   : > { %5563 = vmatmul.mubr.msk.f32.gmra.mrb[108].mxu1 %vm797_vm1, %v6943_v61 }
 0x311   : > { %5593 = vmatprep.mubr.msk.f32.mxu1 %vm797_vm1, %v2919_v36  ;;  %5534 = vmatmul.mubr.msk.f32.gmra.mrb[102].mxu0 %vm797_vm1, %v6948_v5  ;;  %v4834_v36 = vld [vmem:[%s7223_s7 + $0x20] sm:$0xf] }
 0x312   : > { %5536 = vmatprep.mubr.msk.f32.mxu0 %vm797_vm1, %v6955_v51 }
 0x314   : > { %5594 = vmatmul.mubr.msk.f32.vlgmr.msra.gmra.mrb[110].mxu1 %vm797_vm1, %v2921_v18 }
 0x315   : > { %5596 = vmatprep.mubr.msk.f32.mxu1 %vm797_vm1, %v6874_v57  ;;  %5537 = vmatmul.mubr.msk.f32.gmra.mrb[104].mxu0 %vm797_vm1, %v6961_v39 }
 0x316   : > { %5567 = vmatprep.mubr.msk.f32.mxu0 %vm797_vm1, %v6677_v10  ;;  %5644 = vmatpush3.msk.msra.mxu1 %vm935_vm2, %v6832_v1  ;;  %v3442_v10 = vrot.slane %v6943_v61, 2  ;;  %v5491_v1 = vpop.f32.mrb[78].mxu1 }
 0x318   : > { %5597 = vmatmul.mubr.msk.f32.gmra.mrb[112].mxu1 %vm797_vm1, %v6882_v9  ;;  %v7026_v37 = vsel %vm1250_vm4, %v2944_v11, %v3442_v10 }
 0x319   : > { %5599 = vmatprep.mubr.msk.f32.mxu1 %vm797_vm1, %v6890_v26  ;;  %5568 = vmatmul.mubr.msk.f32.vlgmr.msra.gmra.mrb[106].mxu0 %vm797_vm1, %v6703_v6  ;;  %v7012_v6 = vld [vmem:[#allocation2 + $0x90] sm:$0xff] }
 0x31a   : > { %5618 = vmatpush3.msk.msra.mxu0 %vm935_vm2, %v6854_v63  ;;  %5570 = vmatprep.mubr.msk.f32.mxu0 %vm797_vm1, %v6706_v19  ;;  %v7020_v63 = vpop.f32.mrb[79].mxu1  ;;  %v3444_v18 = vrot.slane %v7012_v6, 2  ;;  %v3286_v40 = vrot.slane %v7012_v6, 1 }
 0x31b   : > { %5669 = vmatprep.subr.msk.mxu0 %vm935_vm2, %v4834_v36 }
 0x31c   : > { %5600 = vmatmul.mubr.msk.f32.gmra.mrb[114].mxu1 %vm797_vm1, %v6898_v14  ;;  %v7038_v25 = vsel %vm1250_vm4, %v3442_v10, %v3444_v18  ;;  %v3287_v12 = vsel %vm869_vm3, %v3284_v59, %v3286_v40 }
 0x31d   : > { %5602 = vmatprep.mubr.msk.f32.mxu1 %vm797_vm1, %v6906_v13  ;;  %5571 = vmatmul.mubr.msk.f32.gmra.mrb[108].mxu0 %vm797_vm1, %v6724_v0 }
 0x31e   : > { %5573 = vmatprep.mubr.msk.f32.mxu0 %vm797_vm1, %v6727_v8 }
 0x320   : > { %5603 = vmatmul.mubr.msk.f32.gmra.mrb[116].mxu1 %vm797_vm1, %v6914_v53 }
 0x321   : > { %5605 = vmatprep.mubr.msk.f32.mxu1 %vm797_vm1, %v6922_v46  ;;  %5574 = vmatmul.mubr.msk.f32.gmra.mrb[110].mxu0 %vm797_vm1, %v6745_v21 }
 0x322   : > { %5576 = vmatprep.mubr.msk.f32.mxu0 %vm797_vm1, %v6748_v43 }
 0x324   : > { %5606 = vmatmul.mubr.msk.f32.gmra.mrb[118].mxu1 %vm797_vm1, %v6930_v23 }
 0x325   : > { %5608 = vmatprep.mubr.msk.f32.mxu1 %vm797_vm1, %v6938_v52  ;;  %5577 = vmatmul.mubr.msk.f32.gmra.mrb[112].mxu0 %vm797_vm1, %v6766_v48 }
 0x326   : > { %5579 = vmatprep.mubr.msk.f32.mxu0 %vm797_vm1, %v6769_v34 }
 0x328   : > { %5609 = vmatmul.mubr.msk.f32.gmra.mrb[120].mxu1 %vm797_vm1, %v6948_v5 }
 0x329   : > { %5611 = vmatprep.mubr.msk.f32.mxu1 %vm797_vm1, %v6955_v51  ;;  %5580 = vmatmul.mubr.msk.f32.gmra.mrb[114].mxu0 %vm797_vm1, %v6787_v15 }
 0x32a   : > { %5582 = vmatprep.mubr.msk.f32.mxu0 %vm797_vm1, %v6790_v24 }
 0x32c   : > { %5612 = vmatmul.mubr.msk.f32.gmra.mrb[122].mxu1 %vm797_vm1, %v6961_v39 }
 0x32d   : > { %5614 = vmatprep.mubr.msk.f32.mxu1 %vm797_vm1, %v7026_v37  ;;  %5583 = vmatmul.mubr.msk.f32.gmra.mrb[116].mxu0 %vm797_vm1, %v6807_v55 }
 0x32e   : > { %5585 = vmatprep.mubr.msk.f32.mxu0 %vm797_vm1, %v6810_v45 }
 0x330   : > { %5615 = vmatmul.mubr.msk.f32.gmra.mrb[124].mxu1 %vm797_vm1, %v7038_v25 }
 0x331   : > { %5645 = vmatprep.mubr.msk.f32.mxu1 %vm797_vm1, %v6706_v19  ;;  %5586 = vmatmul.mubr.msk.f32.gmra.mrb[118].mxu0 %vm797_vm1, %v6827_v33  ;;  %v2513_v19 = vld [vmem:[#allocation2 + $0xa0] sm:$0xff] }
 0x332   : > { %5588 = vmatprep.mubr.msk.f32.mxu0 %vm797_vm1, %v3285_v41 }
 0x334   : > { %5646 = vmatmul.mubr.msk.f32.vlgmr.msra.gmra.mrb[126].mxu1 %vm797_vm1, %v6724_v0 }
 0x335   : > { %5648 = vmatprep.mubr.msk.f32.mxu1 %vm797_vm1, %v6727_v8  ;;  %5589 = vmatmul.mubr.msk.f32.gmra.mrb[120].mxu0 %vm797_vm1, %v3287_v12 }
 0x336   : > { %5619 = vmatprep.mubr.msk.f32.mxu0 %vm797_vm1, %v6685_v42  ;;  %v2512_v42 = vld [vmem:[#allocation2 + $0x98] sm:$0xff] }
 0x337   : > { %v3914_v8 = vrot.slane %v2512_v42, 2 }
 0x338   : > { %5649 = vmatmul.mubr.msk.f32.gmra.mrb[128].mxu1 %vm797_vm1, %v6745_v21 }
 0x339   : > { %5651 = vmatprep.mubr.msk.f32.mxu1 %vm797_vm1, %v6748_v43  ;;  %5620 = vmatmul.mubr.msk.f32.vlgmr.msra.gmra.mrb[122].mxu0 %vm797_vm1, %v6687_v60  ;;  %v3756_v60 = vrot.slane %v2512_v42, 1 }
 0x33a   : > { %5670 = vmatpush3.msk.msra.mxu0 %vm935_vm2, %v4834_v36  ;;  %5622 = vmatprep.mubr.msk.f32.mxu0 %vm797_vm1, %v6710_v16  ;;  %v3758_v16 = vrot.slane %v2513_v19, 1 }
 0x33c   : > { %5652 = vmatmul.mubr.msk.f32.gmra.mrb[130].mxu1 %vm797_vm1, %v6766_v48  ;;  %v3759_v0 = vsel %vm869_vm3, %v3756_v60, %v3758_v16 }
 0x33d   : > { %5654 = vmatprep.mubr.msk.f32.mxu1 %vm797_vm1, %v6769_v34  ;;  %5623 = vmatmul.mubr.msk.f32.gmra.mrb[124].mxu0 %vm797_vm1, %v6712_v17  ;;  %v3757_v17 = vsel %vm869_vm3, %v3286_v40, %v3756_v60 }
 0x33e   : > { %5625 = vmatprep.mubr.msk.f32.mxu0 %vm797_vm1, %v6731_v7  ;;  %v3916_v7 = vrot.slane %v2513_v19, 2 }
 0x340   : > { %5655 = vmatmul.mubr.msk.f32.gmra.mrb[132].mxu1 %vm797_vm1, %v6787_v15  ;;  %v3917_v21 = vsel %vm1250_vm4, %v3914_v8, %v3916_v7 }
 0x341   : > { %5657 = vmatprep.mubr.msk.f32.mxu1 %vm797_vm1, %v6790_v24  ;;  %5626 = vmatmul.mubr.msk.f32.gmra.mrb[126].mxu0 %vm797_vm1, %v6733_v22  ;;  %v3915_v22 = vsel %vm1250_vm4, %v3444_v18, %v3914_v8 }
 0x342   : > { %5628 = vmatprep.mubr.msk.f32.mxu0 %vm797_vm1, %v6752_v44 }
 0x344   : > { %5658 = vmatmul.mubr.msk.f32.gmra.mrb[134].mxu1 %vm797_vm1, %v6807_v55 }
 0x345   : > { %5660 = vmatprep.mubr.msk.f32.mxu1 %vm797_vm1, %v6810_v45  ;;  %5629 = vmatmul.mubr.msk.f32.gmra.mrb[128].mxu0 %vm797_vm1, %v6754_v62 }
 0x346   : > { %5631 = vmatprep.mubr.msk.f32.mxu0 %vm797_vm1, %v6773_v4 }
 0x348   : > { %5661 = vmatmul.mubr.msk.f32.gmra.mrb[136].mxu1 %vm797_vm1, %v6827_v33 }
 0x349   : > { %5663 = vmatprep.mubr.msk.f32.mxu1 %vm797_vm1, %v3285_v41  ;;  %5632 = vmatmul.mubr.msk.f32.gmra.mrb[130].mxu0 %vm797_vm1, %v6775_v56 }
 0x34a   : > { %5634 = vmatprep.mubr.msk.f32.mxu0 %vm797_vm1, %v6794_v58 }
 0x34c   : > { %5664 = vmatmul.mubr.msk.f32.gmra.mrb[138].mxu1 %vm797_vm1, %v3287_v12 }
 0x34d   : > { %5635 = vmatmul.mubr.msk.f32.gmra.mrb[132].mxu0 %vm797_vm1, %v6796_v20  ;;  %5666 = vmatprep.mubr.msk.f32.mxu1 %vm797_vm1, %v3757_v17 }
 0x34e   : > { %5637 = vmatprep.mubr.msk.f32.mxu0 %vm797_vm1, %v6816_v3 }
 0x350   : > { %5667 = vmatmul.mubr.msk.f32.gmra.mrb[140].mxu1 %vm797_vm1, %v3759_v0 }
 0x351   : > { %5638 = vmatmul.mubr.msk.f32.gmra.mrb[134].mxu0 %vm797_vm1, %v6943_v61 }
 0x352   : > { %5640 = vmatprep.mubr.msk.f32.mxu0 %vm797_vm1, %v7012_v6 }
 0x355   : > { %5641 = vmatmul.mubr.msk.f32.gmra.mrb[136].mxu0 %vm797_vm1, %v2512_v42 }
 0x356   : > { %5671 = vmatprep.mubr.msk.f32.mxu0 %vm797_vm1, %v6874_v57 }
 0x359   : > { %5672 = vmatmul.mubr.msk.f32.vlgmr.msra.gmra.mrb[138].mxu0 %vm797_vm1, %v6882_v9 }
 0x35a   : > { %5674 = vmatprep.mubr.msk.f32.mxu0 %vm797_vm1, %v6890_v26 }
 0x35d   : > { %5675 = vmatmul.mubr.msk.f32.gmra.mrb[140].mxu0 %vm797_vm1, %v6898_v14 }
 0x35e   : > { %5677 = vmatprep.mubr.msk.f32.mxu0 %vm797_vm1, %v6906_v13 }
 0x361   : > { %5678 = vmatmul.mubr.msk.f32.gmra.mrb[142].mxu0 %vm797_vm1, %v6914_v53 }
 0x362   : > { %5680 = vmatprep.mubr.msk.f32.mxu0 %vm797_vm1, %v6922_v46 }
 0x365   : > { %5681 = vmatmul.mubr.msk.f32.gmra.mrb[144].mxu0 %vm797_vm1, %v6930_v23  ;;  %v4141_v23 = vld [vmem:[%s7225_s9] sm:$0xf] }
 0x366   : > { %5683 = vmatprep.mubr.msk.f32.mxu0 %vm797_vm1, %v6938_v52  ;;  %5695 = vmatprep.subr.msk.mxu1 %vm935_vm2, %v4141_v23 }
 0x367   : > { %5696 = vmatpush3.msk.msra.mxu1 %vm935_vm2, %v4141_v23 }
 0x369   : > { %5684 = vmatmul.mubr.msk.f32.gmra.mrb[146].mxu0 %vm797_vm1, %v6948_v5 }
 0x36a   : > { %5686 = vmatprep.mubr.msk.f32.mxu0 %vm797_vm1, %v6955_v51 }
 0x36d   : > { %5687 = vmatmul.mubr.msk.f32.gmra.mrb[148].mxu0 %vm797_vm1, %v6961_v39 }
 0x36e   : > { %5689 = vmatprep.mubr.msk.f32.mxu0 %vm797_vm1, %v7026_v37 }
 0x371   : > { %5690 = vmatmul.mubr.msk.f32.gmra.mrb[150].mxu0 %vm797_vm1, %v7038_v25 }
 0x372   : > { %5692 = vmatprep.mubr.msk.f32.mxu0 %vm797_vm1, %v3915_v22 }
 0x375   : > { %5693 = vmatmul.mubr.msk.f32.gmra.mrb[152].mxu0 %vm797_vm1, %v3917_v21 }
 0x3aa   : > { %v5494_v43 = vpop.f32.mrb[80].mxu1 }
 0x3ab   : > { %v2849_v44 = vpop.f32.mrb[81].mxu1 }
 0x3ac   : > { %v5465_v62 = vpop.f32.mrb[74].mxu0 }
 0x3ad   : > { %v2668_v48 = vpop.f32.mrb[75].mxu0 }
 0x3ae   : > { %v2841_v34 = vadd.f32 %v7020_v63, %v2668_v48 }
 0x3af   : > { %v5497_v4 = vpop.f32.mrb[82].mxu1 }
 0x3b0   : > { %v2858_v56 = vpop.f32.mrb[83].mxu1  ;;  %v5468_v15 = vpop.f32.mrb[76].mxu0 }
 0x3b1   : > { %v2677_v24 = vpop.f32.mrb[77].mxu0 }
 0x3b2   : > { %v2850_v58 = vadd.f32 %v2849_v44, %v2677_v24 }
 0x3b3   : > { %v5500_v20 = vpop.f32.mrb[84].mxu1 }
 0x3b4   : > { %v2867_v55 = vpop.f32.mrb[85].mxu1  ;;  %v5471_v45 = vpop.f32.mrb[78].mxu0 }
 0x3b5   : > { %v2686_v3 = vpop.f32.mrb[79].mxu0 }
 0x3b6   : > { %v2859_v54 = vadd.f32 %v2858_v56, %v2686_v3 }
 0x3b7   : > { %v5503_v33 = vpop.f32.mrb[86].mxu1 }
 0x3b8   : > { %v2876_v57 = vpop.f32.mrb[87].mxu1  ;;  %v5474_v9 = vpop.f32.mrb[80].mxu0 }
 0x3b9   : > { %v2695_v26 = vpop.f32.mrb[81].mxu0 }
 0x3ba   : > { %v2868_v14 = vadd.f32 %v2867_v55, %v2695_v26 }
 0x3bb   : > { %v5506_v13 = vpop.f32.mrb[88].mxu1 }
 0x3bc   : > { %v2885_v53 = vpop.f32.mrb[89].mxu1  ;;  %v5477_v49 = vpop.f32.mrb[82].mxu0 }
 0x3bd   : > { %v2704_v46 = vpop.f32.mrb[83].mxu0 }
 0x3be   : > { %v2877_v47 = vadd.f32 %v2876_v57, %v2704_v46 }
 0x3bf   : > { %v5509_v50 = vpop.f32.mrb[90].mxu1 }
 0x3c0   : > { %v2894_v52 = vpop.f32.mrb[91].mxu1  ;;  %v5480_v2 = vpop.f32.mrb[84].mxu0 }
 0x3c1   : > { %v2713_v61 = vpop.f32.mrb[85].mxu0 }
 0x3c2   : > { %v2886_v5 = vadd.f32 %v2885_v53, %v2713_v61 }
 0x3c3   : > { %v5512_v11 = vpop.f32.mrb[92].mxu1 }
 0x3c4   : > { %v2903_v51 = vpop.f32.mrb[93].mxu1  ;;  %v5483_v39 = vpop.f32.mrb[86].mxu0 }
 0x3c5   : > { %v2722_v36 = vpop.f32.mrb[87].mxu0 }
 0x3c6   : > { %v2895_v10 = vadd.f32 %v2894_v52, %v2722_v36 }
 0x3c7   : > { %v5543_v6 = vpop.f32.mrb[94].mxu1 }
 0x3c8   : > { %v3202_v1 = vpop.f32.mrb[95].mxu1  ;;  %v5486_v63 = vpop.f32.mrb[88].mxu0 }
 0x3c9   : > { %v2731_v18 = vpop.f32.mrb[89].mxu0 }
 0x3ca   : > { %v2904_v37 = vadd.f32 %v2903_v51, %v2731_v18 }
 0x3cb   : > { %v5546_v59 = vpop.f32.mrb[96].mxu1 }
 0x3cc   : > { %v3211_v25 = vpop.f32.mrb[97].mxu1  ;;  %v5517_v40 = vpop.f32.mrb[90].mxu0 }
 0x3cd   : > { %v3047_v41 = vpop.f32.mrb[91].mxu0 }
 0x3ce   : > { %v3118_v12 = vadd.f32 %v3047_v41, %v2841_v34 }
 0x3cf   : > { %v5549_v42 = vpop.f32.mrb[98].mxu1 }
 0x3d0   : > { %v3220_v60 = vpop.f32.mrb[99].mxu1  ;;  %v5520_v19 = vpop.f32.mrb[92].mxu0  ;;  %v3273_v16 = vadd.f32 %v3202_v1, %v3118_v12 }
 0x3d1   : > { %v3056_v17 = vpop.f32.mrb[93].mxu0 }
 0x3d2   : > { %v3119_v0 = vadd.f32 %v3056_v17, %v2850_v58 }
 0x3d3   : > { %v5552_v8 = vpop.f32.mrb[100].mxu1 }
 0x3d4   : > { %v3229_v7 = vpop.f32.mrb[101].mxu1  ;;  %v5523_v22 = vpop.f32.mrb[94].mxu0  ;;  %v3274_v21 = vadd.f32 %v3211_v25, %v3119_v0 }
 0x3d5   : > { %v3065_v43 = vpop.f32.mrb[95].mxu0 }
 0x3d6   : > { %v3120_v44 = vadd.f32 %v3065_v43, %v2859_v54 }
 0x3d7   : > { %v5555_v62 = vpop.f32.mrb[102].mxu1 }
 0x3d8   : > { %v3238_v48 = vpop.f32.mrb[103].mxu1  ;;  %v5526_v4 = vpop.f32.mrb[96].mxu0  ;;  %v3275_v56 = vadd.f32 %v3220_v60, %v3120_v44 }
 0x3d9   : > { %v3074_v15 = vpop.f32.mrb[97].mxu0 }
 0x3da   : > { %v3121_v24 = vadd.f32 %v3074_v15, %v2868_v14 }
 0x3db   : > { %v5558_v20 = vpop.f32.mrb[104].mxu1 }
 0x3dc   : > { %v3247_v34 = vpop.f32.mrb[105].mxu1  ;;  %v5529_v55 = vpop.f32.mrb[98].mxu0  ;;  %v3276_v45 = vadd.f32 %v3229_v7, %v3121_v24 }
 0x3dd   : > { %v3083_v3 = vpop.f32.mrb[99].mxu0 }
 0x3de   : > { %v3122_v33 = vadd.f32 %v3083_v3, %v2877_v47 }
 0x3df   : > { %v5561_v57 = vpop.f32.mrb[106].mxu1 }
 0x3e0   : > { %v3256_v58 = vpop.f32.mrb[107].mxu1  ;;  %v5532_v9 = vpop.f32.mrb[100].mxu0  ;;  %v3277_v26 = vadd.f32 %v3238_v48, %v3122_v33 }
 0x3e1   : > { %v3092_v13 = vpop.f32.mrb[101].mxu0 }
 0x3e2   : > { %v3123_v53 = vadd.f32 %v3092_v13, %v2886_v5 }
 0x3e3   : > { %v5564_v49 = vpop.f32.mrb[108].mxu1 }
 0x3e4   : > { %v3265_v54 = vpop.f32.mrb[109].mxu1  ;;  %v5535_v46 = vpop.f32.mrb[102].mxu0  ;;  %v3278_v23 = vadd.f32 %v3247_v34, %v3123_v53 }
 0x3e5   : > { %v3101_v50 = vpop.f32.mrb[103].mxu0 }
 0x3e6   : > { %v3124_v52 = vadd.f32 %v3101_v50, %v2895_v10 }
 0x3e7   : > { %v5595_v2 = vpop.f32.mrb[110].mxu1 }
 0x3e8   : > { %v3519_v14 = vpop.f32.mrb[111].mxu1  ;;  %v5538_v61 = vpop.f32.mrb[104].mxu0  ;;  %v3279_v11 = vadd.f32 %v3256_v58, %v3124_v52 }
 0x3e9   : > { %v3110_v51 = vpop.f32.mrb[105].mxu0 }
 0x3ea   : > { %v3125_v39 = vadd.f32 %v3110_v51, %v2904_v37 }
 0x3eb   : > { %v5598_v36 = vpop.f32.mrb[112].mxu1 }
 0x3ec   : > { %v3528_v47 = vpop.f32.mrb[113].mxu1  ;;  %v5569_v6 = vpop.f32.mrb[106].mxu0  ;;  %v3280_v1 = vadd.f32 %v3265_v54, %v3125_v39 }
 0x3ed   : > { %v3361_v63 = vpop.f32.mrb[107].mxu0 }
 0x3ee   : > { %v3432_v18 = vadd.f32 %v3361_v63, %v3273_v16 }
 0x3ef   : > { %v5601_v59 = vpop.f32.mrb[114].mxu1 }
 0x3f0   : > { %v3537_v5 = vpop.f32.mrb[115].mxu1  ;;  %v5572_v25 = vpop.f32.mrb[108].mxu0  ;;  %v3590_v40 = vadd.f32 %v3519_v14, %v3432_v18 }
 0x3f1   : > { %v3370_v41 = vpop.f32.mrb[109].mxu0 }
 0x3f2   : > { %v3433_v12 = vadd.f32 %v3370_v41, %v3274_v21 }
 0x3f3   : > { %v5604_v42 = vpop.f32.mrb[116].mxu1 }
 0x3f4   : > { %v3546_v10 = vpop.f32.mrb[117].mxu1  ;;  %v5575_v60 = vpop.f32.mrb[110].mxu0  ;;  %v3591_v19 = vadd.f32 %v3528_v47, %v3433_v12 }
 0x3f5   : > { %v3379_v17 = vpop.f32.mrb[111].mxu0 }
 0x3f6   : > { %v3434_v0 = vadd.f32 %v3379_v17, %v3275_v56 }
 0x3f7   : > { %v5607_v8 = vpop.f32.mrb[118].mxu1 }
 0x3f8   : > { %v3555_v37 = vpop.f32.mrb[119].mxu1  ;;  %v5578_v7 = vpop.f32.mrb[112].mxu0  ;;  %v3592_v22 = vadd.f32 %v3537_v5, %v3434_v0 }
 0x3f9   : > { %v3388_v43 = vpop.f32.mrb[113].mxu0 }
 0x3fa   : > { %v3435_v44 = vadd.f32 %v3388_v43, %v3276_v45 }
 0x3fb   : > { %v5610_v62 = vpop.f32.mrb[120].mxu1 }
 0x3fc   : > { %v3564_v16 = vpop.f32.mrb[121].mxu1  ;;  %v5581_v48 = vpop.f32.mrb[114].mxu0  ;;  %v3593_v4 = vadd.f32 %v3546_v10, %v3435_v44 }
 0x3fd   : > { %v3397_v15 = vpop.f32.mrb[115].mxu0 }
 0x3fe   : > { %v3436_v24 = vadd.f32 %v3397_v15, %v3277_v26 }
 0x3ff   : > { %v5613_v20 = vpop.f32.mrb[122].mxu1 }
 0x400   : > { %v3573_v21 = vpop.f32.mrb[123].mxu1  ;;  %v5584_v34 = vpop.f32.mrb[116].mxu0  ;;  %v3594_v55 = vadd.f32 %v3555_v37, %v3436_v24 }
 0x401   : > { %v3406_v3 = vpop.f32.mrb[117].mxu0 }
 0x402   : > { %v3437_v33 = vadd.f32 %v3406_v3, %v3278_v23 }
 0x403   : > { %v5616_v57 = vpop.f32.mrb[124].mxu1 }
 0x404   : > { %v3582_v56 = vpop.f32.mrb[125].mxu1  ;;  %v5587_v58 = vpop.f32.mrb[118].mxu0  ;;  %v3595_v9 = vadd.f32 %v3564_v16, %v3437_v33 }
 0x405   : > { %v3415_v13 = vpop.f32.mrb[119].mxu0 }
 0x406   : > { %v3438_v53 = vadd.f32 %v3415_v13, %v3279_v11 }
 0x407   : > { %v5647_v49 = vpop.f32.mrb[126].mxu1 }
 0x408   : > { %v3833_v45 = vpop.f32.mrb[127].mxu1  ;;  %v5590_v54 = vpop.f32.mrb[120].mxu0  ;;  %v3596_v46 = vadd.f32 %v3573_v21, %v3438_v53 }
 0x409   : > { %v3424_v50 = vpop.f32.mrb[121].mxu0 }
 0x40a   : > { %v3439_v52 = vadd.f32 %v3424_v50, %v3280_v1 }
 0x40b   : > { %v5650_v2 = vpop.f32.mrb[128].mxu1 }
 0x40c   : > { %v3842_v26 = vpop.f32.mrb[129].mxu1  ;;  %v5621_v14 = vpop.f32.mrb[122].mxu0  ;;  %v3597_v61 = vadd.f32 %v3582_v56, %v3439_v52 }
 0x40d   : > { %v3674_v51 = vpop.f32.mrb[123].mxu0 }
 0x40e   : > { %v3745_v39 = vadd.f32 %v3674_v51, %v3590_v40 }
 0x40f   : > { %v5653_v36 = vpop.f32.mrb[130].mxu1 }
 0x410   : > { %v3851_v23 = vpop.f32.mrb[131].mxu1  ;;  %v5624_v47 = vpop.f32.mrb[124].mxu0  ;;  %v3904_v6 = vadd.f32 %v3833_v45, %v3745_v39 }
 0x411   : > { %v3683_v63 = vpop.f32.mrb[125].mxu0 }
 0x412   : > { %v3746_v18 = vadd.f32 %v3683_v63, %v3591_v19 }
 0x413   : > { %v5656_v59 = vpop.f32.mrb[132].mxu1 }
 0x414   : > { %v3860_v11 = vpop.f32.mrb[133].mxu1  ;;  %v5627_v5 = vpop.f32.mrb[126].mxu0  ;;  %v3905_v25 = vadd.f32 %v3842_v26, %v3746_v18 }
 0x415   : > { %v3692_v41 = vpop.f32.mrb[127].mxu0 }
 0x416   : > { %v3747_v12 = vadd.f32 %v3692_v41, %v3592_v22 }
 0x417   : > { %v5659_v42 = vpop.f32.mrb[134].mxu1 }
 0x418   : > { %v3869_v1 = vpop.f32.mrb[135].mxu1  ;;  %v5630_v10 = vpop.f32.mrb[128].mxu0  ;;  %v3906_v60 = vadd.f32 %v3851_v23, %v3747_v12 }
 0x419   : > { %v3701_v17 = vpop.f32.mrb[129].mxu0 }
 0x41a   : > { %v3748_v0 = vadd.f32 %v3701_v17, %v3593_v4 }
 0x41b   : > { %v5662_v8 = vpop.f32.mrb[136].mxu1 }
 0x41c   : > { %v3878_v40 = vpop.f32.mrb[137].mxu1  ;;  %v5633_v37 = vpop.f32.mrb[130].mxu0  ;;  %v3907_v7 = vadd.f32 %v3860_v11, %v3748_v0 }
 0x41d   : > { %v3710_v43 = vpop.f32.mrb[131].mxu0 }
 0x41e   : > { %v3749_v44 = vadd.f32 %v3710_v43, %v3594_v55  ;;  %v4852_v55 = vld [vmem:[%s7224_s8] ss:$0 sm:$0xff] }
 0x41f   : > { %v5665_v62 = vpop.f32.mrb[138].mxu1 }
 0x420   : > { %v3887_v19 = vpop.f32.mrb[139].mxu1  ;;  %v5636_v16 = vpop.f32.mrb[132].mxu0  ;;  %v3908_v48 = vadd.f32 %v3869_v1, %v3749_v44 }
 0x421   : > { %v3719_v15 = vpop.f32.mrb[133].mxu0 }
 0x422   : > { %v3750_v24 = vadd.f32 %v3719_v15, %v3595_v9 }
 0x423   : > { %v5668_v20 = vpop.f32.mrb[140].mxu1 }
 0x424   : > { %v5639_v22 = vpop.f32.mrb[134].mxu0  ;;  %v3896_v21 = vpop.f32.mrb[141].mxu1  ;;  %v3909_v34 = vadd.f32 %v3878_v40, %v3750_v24 }
 0x425   : > { %v3728_v3 = vpop.f32.mrb[135].mxu0 }
 0x426   : > { %v3751_v33 = vadd.f32 %v3728_v3, %v3596_v46 }
 0x428   : > { %v5642_v57 = vpop.f32.mrb[136].mxu0  ;;  %v3910_v4 = vadd.f32 %v3887_v19, %v3751_v33 }
 0x429   : > { %v3737_v56 = vpop.f32.mrb[137].mxu0 }
 0x42a   : > { %v3752_v58 = vadd.f32 %v3737_v56, %v3597_v61 }
 0x42c   : > { %v3911_v13 = vadd.f32 %v3896_v21, %v3752_v58  ;;  %v5673_v53 = vpop.f32.mrb[138].mxu0 }
 0x42d   : > { %v3991_v49 = vpop.f32.mrb[139].mxu0 }
 0x42e   : > { %v4062_v45 = vadd.f32 %v3991_v49, %v3904_v6 }
 0x430   : > { %v4077_v54 = vadd.f32 %v4852_v55, %v4062_v45  ;;  %v5676_v9 = vpop.f32.mrb[140].mxu0 }
 0x431   : > { %v4000_v50 = vpop.f32.mrb[141].mxu0 }
 0x432   : > { %4085 = vst.msk [vmem:[#allocation3] sm:$0xff] %vm797_vm1, %v4077_v54  ;;  %v4063_v52 = vadd.f32 %v4000_v50, %v3905_v25 }
 0x434   : > { %v4078_v2 = vadd.f32 %v4852_v55, %v4063_v52  ;;  %v5679_v46 = vpop.f32.mrb[142].mxu0 }
 0x435   : > { %v4009_v26 = vpop.f32.mrb[143].mxu0 }
 0x436   : > { %4086 = vst.msk [vmem:[#allocation3 + $0x8] sm:$0xff] %vm797_vm1, %v4078_v2  ;;  %v4064_v14 = vadd.f32 %v4009_v26, %v3906_v60 }
 0x438   : > { %v4079_v61 = vadd.f32 %v4852_v55, %v4064_v14  ;;  %v5682_v51 = vpop.f32.mrb[144].mxu0 }
 0x439   : > { %v4018_v39 = vpop.f32.mrb[145].mxu0  ;;  %v4093_v36 = vld [vmem:[#allocation3] sm:$0xff] }
 0x43a   : > { %4087 = vst.msk [vmem:[#allocation3 + $0x10] sm:$0xff] %vm797_vm1, %v4079_v61  ;;  %v4065_v23 = vadd.f32 %v4018_v39, %v3907_v7  ;;  %v4109_v47 = vmul.f32 0.70710677, %v4093_v36  ;;  %v4101_v43 = vmul.f32 0.5, %v4093_v36 }
 0x43c   : > { %v4080_v6 = vadd.f32 %v4852_v55, %v4065_v23  ;;  %v5685_v63 = vpop.f32.mrb[146].mxu0  ;;  %5794 = verf.f32 %v4109_v47 }
 0x43d   : > { %v4027_v18 = vpop.f32.mrb[147].mxu0  ;;  %v4094_v59 = vld [vmem:[#allocation3 + $0x8] sm:$0xff] }
 0x43e   : > { %4088 = vst.msk [vmem:[#allocation3 + $0x18] sm:$0xff] %vm797_vm1, %v4080_v6  ;;  %v4066_v11 = vadd.f32 %v4027_v18, %v3908_v48  ;;  %v4110_v5 = vmul.f32 0.70710677, %v4094_v59  ;;  %v4102_v21 = vmul.f32 0.5, %v4094_v59 }
 0x440   : > { %v4081_v25 = vadd.f32 %v4852_v55, %v4066_v11  ;;  %v5688_v41 = vpop.f32.mrb[148].mxu0  ;;  %5796 = verf.f32 %v4110_v5 }
 0x441   : > { %v4036_v12 = vpop.f32.mrb[149].mxu0  ;;  %v4095_v42 = vld [vmem:[#allocation3 + $0x10] sm:$0xff] }
 0x442   : > { %4089 = vst.msk [vmem:[#allocation3 + $0x20] sm:$0xff] %vm797_vm1, %v4081_v25  ;;  %v4067_v1 = vadd.f32 %v4036_v12, %v3909_v34  ;;  %v4111_v10 = vmul.f32 0.70710677, %v4095_v42  ;;  %v4103_v58 = vmul.f32 0.5, %v4095_v42  ;;  %v4289_v41 = vld [vmem:[%s7227_s11] sm:$0xff]  ;;  %v4290_v12 = vld [vmem:[%s7227_s11 + $0x8] sm:$0xff] }
 0x443   : > { %v5729_v42 = vpack.c.bf16 %v4290_v12, %v4289_v41 }
 0x444   : > { %v4082_v60 = vadd.f32 %v4852_v55, %v4067_v1  ;;  %v5691_v17 = vpop.f32.mrb[150].mxu0  ;;  %5798 = verf.f32 %v4111_v10  ;;  %v4853_v1 = vld [vmem:[%s7226_s10] ss:$0 sm:$0xff] }
 0x445   : > { %v4045_v0 = vpop.f32.mrb[151].mxu0  ;;  %v4096_v8 = vld [vmem:[#allocation3 + $0x18] sm:$0xff]  ;;  %5730 = vmatprep.subr.bf16.mxu1 %v5729_v42 }
 0x446   : > { %v5795_v40 = vpop.eup %5794  ;;  %4090 = vst.msk [vmem:[#allocation3 + $0x28] sm:$0xff] %vm797_vm1, %v4082_v60  ;;  %v4068_v37 = vadd.f32 %v4045_v0, %v3910_v4  ;;  %v4112_v7 = vmul.f32 0.70710677, %v4096_v8  ;;  %v4104_v9 = vmul.f32 0.5, %v4096_v8 }
 0x447   : > { %v4125_v44 = vadd.f32 1.0, %v5795_v40 }
 0x448   : > { %v4083_v62 = vadd.f32 %v4852_v55, %v4068_v37  ;;  %v5694_v19 = vpop.f32.mrb[152].mxu0  ;;  %5800 = verf.f32 %v4112_v7 }
 0x449   : > { %v4054_v16 = vpop.f32.mrb[153].mxu0  ;;  %v4133_v48 = vmul.f32 %v4125_v44, %v4101_v43  ;;  %v4097_v15 = vld [vmem:[#allocation3 + $0x20] sm:$0xff] }
 0x44a   : > { %v5797_v24 = vpop.eup %5796  ;;  %4091 = vst.msk [vmem:[#allocation3 + $0x30] sm:$0xff] %vm797_vm1, %v4083_v62  ;;  %v4069_v20 = vadd.f32 %v4054_v16, %v3911_v13  ;;  %v4113_v22 = vmul.f32 0.70710677, %v4097_v15  ;;  %v4105_v26 = vmul.f32 0.5, %v4097_v15 }
 0x44b   : > { %5697 = vmatprep.mubr.msk.f32.mxu1 %vm797_vm1, %v4133_v48  ;;  %v4126_v34 = vadd.f32 1.0, %v5797_v24 }
 0x44c   : > { %v4084_v3 = vadd.f32 %v4852_v55, %v4069_v20  ;;  %5802 = verf.f32 %v4113_v22 }
 0x44d   : > { %v4134_v33 = vmul.f32 %v4126_v34, %v4102_v21  ;;  %v4098_v57 = vld [vmem:[#allocation3 + $0x28] sm:$0xff] }
 0x44e   : > { %v5799_v4 = vpop.eup %5798  ;;  %4092 = vst.msk [vmem:[#allocation3 + $0x38] sm:$0xff] %vm797_vm1, %v4084_v3  ;;  %v4114_v56 = vmul.f32 0.70710677, %v4098_v57  ;;  %v4106_v39 = vmul.f32 0.5, %v4098_v57 }
 0x44f   : > { %5698 = vmatmul.mubr.msk.f32.vlgmr.msra.gmra.mrb[142].mxu1 %vm797_vm1, %v4134_v33  ;;  %v4127_v53 = vadd.f32 1.0, %v5799_v4 }
 0x450   : > { %5804 = verf.f32 %v4114_v56  ;;  %5732 = vmatpush3.bf16.msra.mxu1 %v5729_v42 }
 0x451   : > { %v4135_v49 = vmul.f32 %v4127_v53, %v4103_v58  ;;  %v4099_v13 = vld [vmem:[#allocation3 + $0x30] sm:$0xff] }
 0x452   : > { %v5801_v45 = vpop.eup %5800  ;;  %v4115_v54 = vmul.f32 0.70710677, %v4099_v13  ;;  %v4107_v6 = vmul.f32 0.5, %v4099_v13 }
 0x453   : > { %5700 = vmatprep.mubr.msk.f32.mxu1 %vm797_vm1, %v4135_v49  ;;  %v4128_v55 = vadd.f32 1.0, %v5801_v45 }
 0x454   : > { %5806 = verf.f32 %v4115_v54 }
 0x455   : > { %v4136_v50 = vmul.f32 %v4128_v55, %v4104_v9  ;;  %v4100_v52 = vld [vmem:[#allocation3 + $0x38] sm:$0xff] }
 0x456   : > { %v5803_v2 = vpop.eup %5802  ;;  %v4116_v46 = vmul.f32 0.70710677, %v4100_v52  ;;  %v4108_v11 = vmul.f32 0.5, %v4100_v52 }
 0x457   : > { %5701 = vmatmul.mubr.msk.f32.gmra.mrb[144].mxu1 %vm797_vm1, %v4136_v50  ;;  %v4129_v14 = vadd.f32 1.0, %v5803_v2 }
 0x458   : > { %5808 = verf.f32 %v4116_v46 }
 0x459   : > { %v4137_v61 = vmul.f32 %v4129_v14, %v4105_v26 }
 0x45a   : > { %v5805_v51 = vpop.eup %5804 }
 0x45b   : > { %5703 = vmatprep.mubr.msk.f32.mxu1 %vm797_vm1, %v4137_v61  ;;  %v4130_v36 = vadd.f32 1.0, %v5805_v51 }
 0x45d   : > { %v4138_v23 = vmul.f32 %v4130_v36, %v4106_v39 }
 0x45e   : > { %v5807_v47 = vpop.eup %5806 }
 0x45f   : > { %5704 = vmatmul.mubr.msk.f32.gmra.mrb[146].mxu1 %vm797_vm1, %v4138_v23  ;;  %v4131_v63 = vadd.f32 1.0, %v5807_v47 }
 0x461   : > { %v4139_v18 = vmul.f32 %v4131_v63, %v4107_v6 }
 0x462   : > { %v5809_v59 = vpop.eup %5808 }
 0x463   : > { %5706 = vmatprep.mubr.msk.f32.mxu1 %vm797_vm1, %v4139_v18  ;;  %v4132_v5 = vadd.f32 1.0, %v5809_v59 }
 0x465   : > { %v4140_v25 = vmul.f32 %v4132_v5, %v4108_v11 }
 0x467   : > { %5707 = vmatmul.mubr.msk.f32.gmra.mrb[148].mxu1 %vm797_vm1, %v4140_v25 }
 0x522   : > { %v5699_v10 = vpop.f32.mrb[142].mxu1 }
 0x523   : > { %v4248_v60 = vadd.f32 %v5699_v10, %v4853_v1  ;;  %v4242_v17 = vpop.f32.mrb[143].mxu1 }
 0x524   : > { %v4243_v0 = vadd.f32 %v4853_v1, %v4242_v17 }
 0x525   : > { %v4282_v40 = vadd.f32 %v4248_v60, %v5937_v28 }
 0x526   : > { %v4281_v8 = vadd.f32 %v4243_v0, %v5935_v27 }
 0x528   : > { %5713 = vmatprep.mubr.msk.f32.mxu1 %vm477_vm0, %v4281_v8 }
 0x529   : > { %5714 = vmatmul.mubr.msk.f32.vlgmr.msra.gmra.mrb[150].mxu1 %vm477_vm0, %v4282_v40 }
 0x52a   : > { %v5702_v37 = vpop.f32.mrb[144].mxu1 }
 0x52b   : > { %v4258_v7 = vadd.f32 %v5702_v37, %v4853_v1  ;;  %v4252_v43 = vpop.f32.mrb[145].mxu1 }
 0x52c   : > { %v4253_v44 = vadd.f32 %v4853_v1, %v4252_v43 }
 0x52d   : > { %v4284_v19 = vadd.f32 %v4258_v7, %v5941_v30 }
 0x52e   : > { %v4283_v62 = vadd.f32 %v4253_v44, %v5939_v29 }
 0x530   : > { %5716 = vmatprep.mubr.msk.f32.mxu1 %vm477_vm0, %v4283_v62 }
 0x531   : > { %5717 = vmatmul.mubr.msk.f32.gmra.mrb[152].mxu1 %vm477_vm0, %v4284_v19 }
 0x532   : > { %v5705_v16 = vpop.f32.mrb[146].mxu1 }
 0x533   : > { %v4268_v27 = vadd.f32 %v5705_v16, %v4853_v1  ;;  %v4262_v28 = vpop.f32.mrb[147].mxu1 }
 0x534   : > { %v4263_v48 = vadd.f32 %v4853_v1, %v4262_v28 }
 0x535   : > { %v4286_v24 = vadd.f32 %v4268_v27, %v5945_v32 }
 0x536   : > { %v4285_v15 = vadd.f32 %v4263_v48, %v5943_v31  ;;  %v4863_v31 = vld [vmem:[%s7228_s12] ss:$0 sm:$0xff] }
 0x538   : > { %5719 = vmatprep.mubr.msk.f32.mxu1 %vm477_vm0, %v4285_v15 }
 0x539   : > { %5720 = vmatmul.mubr.msk.f32.gmra.mrb[154].mxu1 %vm477_vm0, %v4286_v24 }
 0x53a   : > { %v5708_v29 = vpop.f32.mrb[148].mxu1 }
 0x53b   : > { %v4278_v20 = vadd.f32 %v5708_v29, %v4853_v1  ;;  %v4272_v30 = vpop.f32.mrb[149].mxu1 }
 0x53c   : > { %v4273_v22 = vadd.f32 %v4853_v1, %v4272_v30 }
 0x53d   : > { %v4288_v34 = vadd.f32 %v4278_v20, %v5953_v38 }
 0x53e   : > { %v4287_v21 = vadd.f32 %v4273_v22, %v5949_v35 }
 0x540   : > { %5722 = vmatprep.mubr.msk.f32.mxu1 %vm477_vm0, %v4287_v21 }
 0x541   : > { %5723 = vmatmul.mubr.msk.f32.gmra.mrb[156].mxu1 %vm477_vm0, %v4288_v34 }
 0x5fc   : > { %v5715_v32 = vpop.f32.mrb[150].mxu1 }
 0x5fd   : > { %v4394_v3 = vadd.f32 %v5715_v32, %v4863_v31  ;;  %v4388_v33 = vpop.f32.mrb[151].mxu1 }
 0x5fe   : > { %v4389_v35 = vadd.f32 %v4863_v31, %v4388_v33 }
 0x5ff   : > { %4429 = vst.msk [vmem:[%s468_s22 + $0x8] sm:$0xff] %vm4427_vm5, %v4394_v3 }
 0x600   : > { %4428 = vst.msk [vmem:[%s468_s22] sm:$0xff] %vm4427_vm5, %v4389_v35 }
 0x604   : > { %v5718_v38 = vpop.f32.mrb[152].mxu1 }
 0x605   : > { %v4404_v57 = vadd.f32 %v5718_v38, %v4863_v31  ;;  %v4398_v4 = vpop.f32.mrb[153].mxu1 }
 0x606   : > { %v4399_v56 = vadd.f32 %v4863_v31, %v4398_v4 }
 0x607   : > { %4431 = vst.msk [vmem:[%s468_s22 + $0x18] sm:$0xff] %vm4427_vm5, %v4404_v57 }
 0x608   : > { %4430 = vst.msk [vmem:[%s468_s22 + $0x10] sm:$0xff] %vm4427_vm5, %v4399_v56 }
 0x60c   : > { %v5721_v58 = vpop.f32.mrb[154].mxu1 }
 0x60d   : > { %v4414_v53 = vadd.f32 %v5721_v58, %v4863_v31  ;;  %v4408_v49 = vpop.f32.mrb[155].mxu1 }
 0x60e   : > { %v4409_v13 = vadd.f32 %v4863_v31, %v4408_v49 }
 0x60f   : > { %4433 = vst.msk [vmem:[%s468_s22 + $0x28] sm:$0xff] %vm4427_vm5, %v4414_v53 }
 0x610   : > { %4432 = vst.msk [vmem:[%s468_s22 + $0x20] sm:$0xff] %vm4427_vm5, %v4409_v13 }
 0x614   : > { %v5724_v45 = vpop.f32.mrb[156].mxu1 }
 0x615   : > { %v4424_v54 = vadd.f32 %v5724_v45, %v4863_v31  ;;  %v4418_v9 = vpop.f32.mrb[157].mxu1 }
 0x616   : > { %v4419_v55 = vadd.f32 %v4863_v31, %v4418_v9 }
 0x617   : > { %4435 = vst.msk [vmem:[%s468_s22 + $0x38] sm:$0xff] %vm4427_vm5, %v4424_v54 }
 0x618   : > { %4434 = vst.msk [vmem:[%s468_s22 + $0x30] sm:$0xff] %vm4427_vm5, %v4419_v55 }
 0x619 PF: > { %s23_s25 = sadd.s32 1, %s5816_s25  }
 0x61a   : > { %p20_p4 = scmp.ge.s32.totalorder %s23_s25, 4  }
 0x61c   :  { %22 = sbr.rel (!%p20_p4) target bundleno = 1 (0x1), region = 124 }

// kernel: _lambda_.6
= control target key start
LH: loop header
LB: loop body
LE: loop exit
PB: predicated region body
PF: predicated region fallthrough
CT: control target
= control target key end

     0   :  { %s5848_s21 = smov 0   ;;  %s7193_s0 = inlined_call_operand.vmem [shape: f32[2,16,16], index: 0, kind: input, shape index: {}]   ;;  %s7194_s1 = inlined_call_operand.vmem [shape: f32[2,1,16], index: 1, kind: input, shape index: {}]   ;;  %s7195_s2 = inlined_call_operand.vmem [shape: f32[2,1,16], index: 2, kind: input, shape index: {}]   ;;  %s7196_s3 = inlined_call_operand.vmem [shape: f32[64,16], index: 3, kind: input, shape index: {}]   ;;  %s7197_s4 = inlined_call_operand.vmem [shape: f32[16,4], index: 4, kind: input, shape index: {}]   ;;  %s7198_s5 = inlined_call_operand.vmem [shape: f32[1,4], index: 5, kind: input, shape index: {}]   ;;  %s7199_s6 = inlined_call_operand.vmem [shape: f32[3,3,4,4], index: 6, kind: input, shape index: {}]   ;;  %s7200_s7 = inlined_call_operand.vmem [shape: f32[1,4], index: 7, kind: input, shape index: {}]   ;;  %s7201_s8 = inlined_call_operand.vmem [shape: f32[3,3,4,4], index: 8, kind: input, shape index: {}]   ;;  %s7202_s9 = inlined_call_operand.vmem [shape: f32[1,4], index: 9, kind: input, shape index: {}]   ;;  %s7203_s10 = inlined_call_operand.vmem [shape: f32[4,16], index: 10, kind: input, shape index: {}]   ;;  %s7204_s11 = inlined_call_operand.vmem [shape: f32[1,16], index: 11, kind: input, shape index: {}]   ;;  %s7205_s12 = inlined_call_operand.vmem [shape: f32[2,64,16], index: 12, kind: output, shape index: {}]  }
   0x1 LB: > { %s4474_s22 = sadd.s32 4294967295, %s5780_s21   ;;  %p4478_p0 = scmp.ge.s32.totalorder %s5780_s21, 1  ;;  %s5780_s21 = sphi %s5848_s21, %s22_s21  }
   0x2   : > { %p378_p1 = scmp.lt.s32.totalorder %s5780_s21, 3 }
   0x4   : > { %p379_p2 = pnand %p4478_p0, %p378_p1 }
   0x5   : > { %p426_p3 = scmp.lt.s32.totalorder (!%p379_p2), %s4474_s22, 1  ;;  %v444_v0 = vld [vmem:[%s7196_s3] sm:$0xff] (!%p379_p2)  ;;  %vm452_vm0 = vcmask (!%p379_p2), 130048   ;;  %v445_v5 = vld [vmem:[%s7196_s3 + $0x8] sm:$0xff] (!%p379_p2)  ;;  %v446_v7 = vld [vmem:[%s7196_s3 + $0x10] sm:$0xff] (!%p379_p2)  ;;  %vm901_vm1 = vcmask (!%p379_p2), 31744  }
   0x6   : > { %382 = sbr.rel (%p379_p2) target bundleno = 1570 (0x622), region = 68  ;;  %5179 = vmatprep.mubr.msk.f32.mxu0 (!%p379_p2), %vm452_vm0, %v444_v0  ;;  %v448_v1 = vld [vmem:[%s7196_s3 + $0x20] sm:$0xff] (!%p379_p2)  ;;  %v449_v6 = vld [vmem:[%s7196_s3 + $0x28] sm:$0xff] (!%p379_p2)  ;;  %v450_v8 = vld [vmem:[%s7196_s3 + $0x30] sm:$0xff] (!%p379_p2)  ;;  %vm1039_vm2 = vcmask (!%p379_p2), 1043456   ;;  %vm973_vm3 = vcmask (!%p379_p2), 1046528  }
   0x7   : > { %5185 = vmatprep.mubr.msk.f32.mxu1 (!%p379_p2), %vm452_vm0, %v448_v1  ;;  %v447_v9 = vld [vmem:[%s7196_s3 + $0x18] sm:$0xff] (!%p379_p2)  ;;  %v723_v11 = vld [vmem:[%s7197_s4] sm:$0xff] (!%p379_p2)  ;;  %v724_v12 = vld [vmem:[%s7197_s4 + $0x8] sm:$0xff] (!%p379_p2)  ;;  %vm1354_vm4 = vcmask (!%p379_p2), 1045504  }
   0x8   : > { %v451_v10 = vld [vmem:[%s7196_s3 + $0x38] sm:$0xff] (!%p379_p2)  ;;  %v5693_v13 = vpack.c.bf16 (!%p379_p2), %v724_v12, %v723_v11 }
   0xd   : > { %s7207_s22 = smov (!%p426_p3, %s4474_s22), 1 }
   0xe   : > { %s4838_s27 = sshll.u32 %s7207_s22, 4  ;;  %s433_s15 = scalar_lea.vmem %s7194_s1, %s7207_s22 }
   0xf   : > { %s430_s30 = scalar_lea.vmem %s7193_s0, %s4838_s27  ;;  %s436_s18 = scalar_lea.vmem %s7195_s2, %s7207_s22 }
  0x10   : > { %v442_v2 = vld [vmem:[%s430_s30] sm:$0xff]  ;;  %v443_v3 = vld [vmem:[%s430_s30 + $0x8] sm:$0xff]  ;;  %s4839_s17 = sshll.u32 %s7207_s22, 6 }
  0x11   : > { %v5689_v4 = vpack.c.bf16 %v443_v3, %v442_v2  ;;  %s441_s20 = scalar_lea.vmem %s7205_s12, %s4839_s17 }
  0x13   : > { %5690 = vmatprep.subr.bf16.mxu0 %v5689_v4  ;;  %5697 = vmatprep.subr.bf16.mxu1 %v5689_v4 }
  0x14   : > { %5692 = vmatpush3.bf16.msra.mxu0 %v5689_v4  ;;  %5698 = vmatpush3.bf16.msra.mxu1 %v5689_v4 }
  0x15   : > { %5694 = vmatprep.subr.bf16.mxu1 %v5693_v13 }
  0x17   : > { %5180 = vmatmul.mubr.msk.f32.vlgmr.msra.gmra.mrb[0].mxu0 %vm452_vm0, %v445_v5  ;;  %5186 = vmatmul.mubr.msk.f32.vlgmr.msra.gmra.mrb[0].mxu1 %vm452_vm0, %v449_v6 }
  0x18   : > { %5182 = vmatprep.mubr.msk.f32.mxu0 %vm452_vm0, %v446_v7  ;;  %5188 = vmatprep.mubr.msk.f32.mxu1 %vm452_vm0, %v450_v8 }
  0x19   : > { %5696 = vmatpush3.bf16.msra.mxu1 %v5693_v13 }
  0x1b   : > { %5183 = vmatmul.mubr.msk.f32.gmra.mrb[2].mxu0 %vm452_vm0, %v447_v9  ;;  %5189 = vmatmul.mubr.msk.f32.gmra.mrb[2].mxu1 %vm452_vm0, %v451_v10 }
  0xea   : > { %v5181_v14 = vpop.f32.mrb[0].mxu0  ;;  %v5187_v15 = vpop.f32.mrb[0].mxu1 }
  0xeb   : > { %v583_v16 = vsel %vm452_vm0, %v5181_v14, 0.0  ;;  %v543_v17 = vpop.f32.mrb[1].mxu0  ;;  %v563_v18 = vpop.f32.mrb[1].mxu1  ;;  %v591_v31 = vsel %vm452_vm0, %v5187_v15, 0.0 }
  0xec   : > { %v582_v19 = vsel %vm452_vm0, %v543_v17, 0.0  ;;  %v589_v28 = vsel %vm452_vm0, %v563_v18, 0.0 }
  0xed   : > { %v584_v20 = vadd.f32 %v583_v16, %v582_v19 }
  0xee   : > { %v5184_v21 = vpop.f32.mrb[2].mxu0  ;;  %v5190_v22 = vpop.f32.mrb[2].mxu1 }
  0xef   : > { %v553_v23 = vpop.f32.mrb[3].mxu0  ;;  %v573_v24 = vpop.f32.mrb[3].mxu1  ;;  %v587_v27 = vsel %vm452_vm0, %v5184_v21, 0.0  ;;  %v595_v35 = vsel %vm452_vm0, %v5190_v22, 0.0 }
  0xf0   : > { %v585_v25 = vsel %vm452_vm0, %v553_v23, 0.0  ;;  %v593_v32 = vsel %vm452_vm0, %v573_v24, 0.0 }
  0xf1   : > { %v586_v26 = vadd.f32 %v585_v25, %v584_v20  ;;  %v4491_v20 = vld [vmem:[%s433_s15] ss:$0 sm:$0xff] }
  0xf3   : > { %v588_v29 = vadd.f32 %v587_v27, %v586_v26  ;;  %v4492_v26 = vld [vmem:[%s436_s18] ss:$0 sm:$0xff] }
  0xf5   : > { %v590_v30 = vadd.f32 %v589_v28, %v588_v29 }
  0xf7   : > { %v592_v33 = vadd.f32 %v591_v31, %v590_v30 }
  0xf9   : > { %v594_v34 = vadd.f32 %v593_v32, %v592_v33 }
  0xfb   : > { %v596_v36 = vadd.f32 %v595_v35, %v594_v34 }
  0xfd   : > { %v597_v37 = vrot.slane %v596_v36, 4 }
  0xff   : > { %v598_v38 = vadd.f32 %v597_v37, %v596_v36 }
 0x101   : > { %v599_v39 = vrot.slane %v598_v38, 2 }
 0x103   : > { %v600_v40 = vadd.f32 %v599_v39, %v598_v38 }
 0x105   : > { %v601_v41 = vrot.slane %v600_v40, 1 }
 0x107   : > { %v602_v42 = vadd.f32 %v601_v41, %v600_v40 }
 0x109   : > { %v604_v43 = vmul.f32 0.015625, %v602_v42 }
 0x10b   : > { %v605_v44 = vsub.f32 %v543_v17, %v604_v43  ;;  %v606_v45 = vsub.f32 %v5181_v14, %v604_v43  ;;  %v607_v46 = vsub.f32 %v553_v23, %v604_v43  ;;  %v608_v47 = vsub.f32 %v5184_v21, %v604_v43 }
 0x10c   : > { %v609_v48 = vsub.f32 %v563_v18, %v604_v43  ;;  %v610_v49 = vsub.f32 %v5187_v15, %v604_v43  ;;  %v611_v50 = vsub.f32 %v573_v24, %v604_v43  ;;  %v612_v51 = vsub.f32 %v5190_v22, %v604_v43 }
 0x10d   : > { %v613_v52 = vmul.f32 %v605_v44, %v605_v44  ;;  %v614_v53 = vmul.f32 %v606_v45, %v606_v45  ;;  %v615_v54 = vmul.f32 %v607_v46, %v607_v46  ;;  %v616_v55 = vmul.f32 %v608_v47, %v608_v47 }
 0x10e   : > { %v617_v59 = vmul.f32 %v609_v48, %v609_v48  ;;  %v618_v62 = vmul.f32 %v610_v49, %v610_v49  ;;  %v619_v1 = vmul.f32 %v611_v50, %v611_v50  ;;  %v620_v4 = vmul.f32 %v612_v51, %v612_v51 }
 0x10f   : > { %v621_v56 = vsel %vm452_vm0, %v613_v52, 0.0  ;;  %v622_v57 = vsel %vm452_vm0, %v614_v53, 0.0  ;;  %v624_v60 = vsel %vm452_vm0, %v615_v54, 0.0  ;;  %v626_v63 = vsel %vm452_vm0, %v616_v55, 0.0 }
 0x110   : > { %v623_v58 = vadd.f32 %v622_v57, %v621_v56  ;;  %v628_v2 = vsel %vm452_vm0, %v617_v59, 0.0  ;;  %v630_v5 = vsel %vm452_vm0, %v618_v62, 0.0  ;;  %v632_v7 = vsel %vm452_vm0, %v619_v1, 0.0 }
 0x111   : > { %v634_v9 = vsel %vm452_vm0, %v620_v4, 0.0 }
 0x112   : > { %v625_v61 = vadd.f32 %v624_v60, %v623_v58 }
 0x114   : > { %v627_v0 = vadd.f32 %v626_v63, %v625_v61 }
 0x116   : > { %v629_v3 = vadd.f32 %v628_v2, %v627_v0 }
 0x118   : > { %v631_v6 = vadd.f32 %v630_v5, %v629_v3 }
 0x11a   : > { %v633_v8 = vadd.f32 %v632_v7, %v631_v6 }
 0x11c   : > { %v635_v10 = vadd.f32 %v634_v9, %v633_v8 }
 0x11e   : > { %v636_v11 = vrot.slane %v635_v10, 4 }
 0x120   : > { %v637_v12 = vadd.f32 %v636_v11, %v635_v10 }
 0x122   : > { %v638_v13 = vrot.slane %v637_v12, 2 }
 0x124   : > { %v639_v14 = vadd.f32 %v638_v13, %v637_v12 }
 0x126   : > { %v640_v15 = vrot.slane %v639_v14, 1 }
 0x128   : > { %v641_v16 = vadd.f32 %v640_v15, %v639_v14 }
 0x12a   : > { %v642_v17 = vmul.f32 0.015625, %v641_v16 }
 0x12c   : > { %v644_v18 = vadd.f32 1e-05, %v642_v17 }
 0x12e   : > { %5708 = vrsqrt.f32 %v644_v18 }
 0x138   : > { %v5709_v19 = vpop.eup %5708 }
 0x139   : > { %v647_v21 = vmul.f32 %v5709_v19, %v606_v45  ;;  %v650_v22 = vmul.f32 %v5709_v19, %v609_v48  ;;  %v651_v23 = vmul.f32 %v5709_v19, %v610_v49  ;;  %v652_v24 = vmul.f32 %v5709_v19, %v611_v50 }
 0x13a   : > { %v653_v25 = vmul.f32 %v5709_v19, %v612_v51  ;;  %v646_v27 = vmul.f32 %v5709_v19, %v605_v44  ;;  %v648_v28 = vmul.f32 %v5709_v19, %v607_v46  ;;  %v649_v29 = vmul.f32 %v5709_v19, %v608_v47 }
 0x13b   : > { %v661_v30 = vmul.f32 %v4491_v20, %v647_v21  ;;  %v664_v31 = vmul.f32 %v4491_v20, %v650_v22  ;;  %v665_v32 = vmul.f32 %v4491_v20, %v651_v23  ;;  %v666_v33 = vmul.f32 %v4491_v20, %v652_v24  ;;  %v953_v23 = vld [vmem:[%s7199_s6] sm:$0xf] }
 0x13c   : > { %v660_v34 = vmul.f32 %v4491_v20, %v646_v27  ;;  %v662_v35 = vmul.f32 %v4491_v20, %v648_v28  ;;  %v663_v36 = vmul.f32 %v4491_v20, %v649_v29  ;;  %v667_v44 = vmul.f32 %v4491_v20, %v653_v25  ;;  %5233 = vmatprep.subr.msk.mxu1 %vm1039_vm2, %v953_v23  ;;  %v6028_v29 = vld [vmem:[%s7199_s6 + $0x8] sm:$0xf] }
 0x13d   : > { %v5924_v37 = vadd.f32 %v4492_v26, %v661_v30  ;;  %v5926_v38 = vadd.f32 %v4492_v26, %v664_v31  ;;  %v5935_v43 = vadd.f32 %v4492_v26, %v665_v32  ;;  %v5937_v45 = vadd.f32 %v4492_v26, %v666_v33  ;;  %v4555_v32 = vld [vmem:[%s7199_s6 + $0xc] sm:$0xf] }
 0x13e   : > { %v5928_v39 = vadd.f32 %v4492_v26, %v660_v34  ;;  %v5930_v40 = vadd.f32 %v4492_v26, %v662_v35  ;;  %v5932_v41 = vadd.f32 %v4492_v26, %v663_v36  ;;  %v5944_v51 = vadd.f32 %v4492_v26, %v667_v44  ;;  %v4502_v26 = vld [vmem:[%s7199_s6 + $0x4] sm:$0xf]  ;;  %v6055_v36 = vld [vmem:[%s7199_s6 + $0x14] sm:$0xf] }
 0x13f   : > { %v692_v42 = vmul.f32 0.70710677, %v5924_v37  ;;  %v695_v49 = vmul.f32 0.70710677, %v5926_v38  ;;  %v696_v50 = vmul.f32 0.70710677, %v5935_v43  ;;  %5207 = vmatprep.subr.msk.mxu0 %vm1039_vm2, %v4502_v26 }
 0x140   : > { %v691_v46 = vmul.f32 0.70710677, %v5928_v39  ;;  %v693_v47 = vmul.f32 0.70710677, %v5930_v40  ;;  %v694_v48 = vmul.f32 0.70710677, %v5932_v41  ;;  %5208 = vmatpush3.msk.msra.mxu0 %vm1039_vm2, %v4502_v26 }
 0x141   : > { %5710 = verf.f32 %v692_v42  ;;  %v697_v52 = vmul.f32 0.70710677, %v5937_v45  ;;  %v698_v53 = vmul.f32 0.70710677, %v5944_v51  ;;  %v684_v56 = vmul.f32 0.5, %v5924_v37  ;;  %5259 = vmatprep.subr.msk.mxu0 %vm1039_vm2, %v6028_v29 }
 0x142   : > { %5712 = verf.f32 %v691_v46  ;;  %v683_v59 = vmul.f32 0.5, %v5928_v39  ;;  %v685_v2 = vmul.f32 0.5, %v5930_v40  ;;  %v686_v8 = vmul.f32 0.5, %v5932_v41  ;;  %v4493_v42 = vld [vmem:[%s7198_s5] ss:$0 sm:$0xff] }
 0x143   : > { %5714 = verf.f32 %v693_v47  ;;  %v687_v9 = vmul.f32 0.5, %v5926_v38  ;;  %v688_v15 = vmul.f32 0.5, %v5935_v43  ;;  %v689_v16 = vmul.f32 0.5, %v5937_v45 }
 0x144   : > { %5716 = verf.f32 %v694_v48  ;;  %v690_v20 = vmul.f32 0.5, %v5944_v51  ;;  %v5782_v22 = vmov 0.0  }
 0x145   : > { %5718 = verf.f32 %v695_v49  ;;  %906 = vst.msk [vmem:[#allocation2 + $0x20] sm:$0xff] %vm901_vm1, %v5782_v22  ;;  %907 = vst.msk [vmem:[#allocation2 + $0x28] sm:$0xff] %vm901_vm1, %v5782_v22 }
 0x146   : > { %5720 = verf.f32 %v696_v50  ;;  %902 = vst.msk [vmem:[#allocation2] sm:$0xff] %vm901_vm1, %v5782_v22  ;;  %903 = vst.msk [vmem:[#allocation2 + $0x8] sm:$0xff] %vm901_vm1, %v5782_v22 }
 0x147   : > { %5722 = verf.f32 %v697_v52  ;;  %904 = vst.msk [vmem:[#allocation2 + $0x10] sm:$0xff] %vm901_vm1, %v5782_v22  ;;  %905 = vst.msk [vmem:[#allocation2 + $0x18] sm:$0xff] %vm901_vm1, %v5782_v22 }
 0x148   : > { %5724 = verf.f32 %v698_v53  ;;  %908 = vst.msk [vmem:[#allocation2 + $0x30] sm:$0xff] %vm901_vm1, %v5782_v22  ;;  %909 = vst.msk [vmem:[#allocation2 + $0x38] sm:$0xff] %vm901_vm1, %v5782_v22 }
 0x149   : > { %910 = vst.msk [vmem:[#allocation2 + $0x40] sm:$0xff] %vm901_vm1, %v5782_v22  ;;  %911 = vst.msk [vmem:[#allocation2 + $0x48] sm:$0xff] %vm901_vm1, %v5782_v22 }
 0x14a   : > { %912 = vst.msk [vmem:[#allocation2 + $0x50] sm:$0xff] %vm901_vm1, %v5782_v22  ;;  %913 = vst.msk [vmem:[#allocation2 + $0x58] sm:$0xff] %vm901_vm1, %v5782_v22 }
 0x14b   : > { %v5711_v54 = vpop.eup %5710  ;;  %914 = vst.msk [vmem:[#allocation2 + $0x60] sm:$0xff] %vm901_vm1, %v5782_v22  ;;  %915 = vst.msk [vmem:[#allocation2 + $0x68] sm:$0xff] %vm901_vm1, %v5782_v22 }
 0x14c   : > { %v5713_v55 = vpop.eup %5712  ;;  %v708_v57 = vadd.f32 1.0, %v5711_v54  ;;  %916 = vst.msk [vmem:[#allocation2 + $0x70] sm:$0xff] %vm901_vm1, %v5782_v22  ;;  %917 = vst.msk [vmem:[#allocation2 + $0x78] sm:$0xff] %vm901_vm1, %v5782_v22 }
 0x14d   : > { %v5715_v58 = vpop.eup %5714  ;;  %v707_v60 = vadd.f32 1.0, %v5713_v55  ;;  %918 = vst.msk [vmem:[#allocation2 + $0x80] sm:$0xff] %vm901_vm1, %v5782_v22  ;;  %919 = vst.msk [vmem:[#allocation2 + $0x88] sm:$0xff] %vm901_vm1, %v5782_v22  ;;  %v932_v24 = vld [vmem:[#allocation2] sm:$0xff]  ;;  %v6014_v25 = vld [vmem:[#allocation2 + $0x8] sm:$0xff] }
 0x14e   : > { %v5717_v61 = vpop.eup %5716  ;;  %v716_v62 = vmul.f32 %v708_v57, %v684_v56  ;;  %v709_v63 = vadd.f32 1.0, %v5715_v58  ;;  %920 = vst.msk [vmem:[#allocation2 + $0x90] sm:$0xff] %vm901_vm1, %v5782_v22  ;;  %921 = vst.msk [vmem:[#allocation2 + $0x98] sm:$0xff] %vm901_vm1, %v5782_v22  ;;  %v974_v27 = vrot.slane %v932_v24, 1  ;;  %v975_v28 = vrot.slane %v6014_v25, 1 }
 0x14f   : > { %v5719_v0 = vpop.eup %5718  ;;  %v715_v1 = vmul.f32 %v707_v60, %v683_v59  ;;  %v710_v3 = vadd.f32 1.0, %v5717_v61  ;;  %922 = vst.msk [vmem:[#allocation2 + $0xa0] sm:$0xff] %vm901_vm1, %v5782_v22  ;;  %2567 = vst.msk [vmem:[#allocation2] sm:$0xff] %vm901_vm1, %v5782_v22  ;;  %v1355_v33 = vrot.slane %v932_v24, 2  ;;  %v1356_v34 = vrot.slane %v6014_v25, 2 }
 0x150   : > { %v5721_v4 = vpop.eup %5720  ;;  %v717_v5 = vmul.f32 %v709_v63, %v685_v2  ;;  %v711_v6 = vadd.f32 1.0, %v5719_v0  ;;  %2568 = vst.msk [vmem:[#allocation2 + $0x8] sm:$0xff] %vm901_vm1, %v5782_v22  ;;  %v976_v30 = vsel %vm973_vm3, %v974_v27, %v975_v28 }
 0x151   : > { %5195 = vmatprep.mubr.msk.f32.mxu1 %vm452_vm0, %v715_v1  ;;  %v5723_v7 = vpop.eup %5722  ;;  %v718_v10 = vmul.f32 %v710_v3, %v686_v8  ;;  %v712_v11 = vadd.f32 1.0, %v5721_v4  ;;  %5209 = vmatprep.mubr.msk.f32.mxu0 %vm901_vm1, %v976_v30  ;;  %v6050_v35 = vsel %vm1354_vm4, %v1355_v33, %v1356_v34 }
 0x152   : > { %5196 = vmatmul.mubr.msk.f32.vlgmr.msra.gmra.mrb[4].mxu1 %vm452_vm0, %v716_v62  ;;  %v5725_v12 = vpop.eup %5724  ;;  %v719_v13 = vmul.f32 %v711_v6, %v687_v9  ;;  %v713_v14 = vadd.f32 1.0, %v5723_v7 }
 0x153   : > { %5198 = vmatprep.mubr.msk.f32.mxu1 %vm452_vm0, %v717_v5  ;;  %v720_v17 = vmul.f32 %v712_v11, %v688_v15  ;;  %v714_v18 = vadd.f32 1.0, %v5725_v12  ;;  %5234 = vmatpush3.msk.msra.mxu1 %vm1039_vm2, %v953_v23 }
 0x154   : > { %v721_v19 = vmul.f32 %v713_v14, %v689_v16  ;;  %5285 = vmatprep.subr.msk.mxu1 %vm1039_vm2, %v4555_v32 }
 0x155   : > { %v722_v21 = vmul.f32 %v714_v18, %v690_v20  ;;  %v6037_v31 = vld [vmem:[#allocation2 + $0x90] sm:$0xff]  ;;  %v6066_v33 = vld [vmem:[#allocation2 + $0x98] sm:$0xff] }
 0x156   : > { %5199 = vmatmul.mubr.msk.f32.gmra.mrb[6].mxu1 %vm452_vm0, %v718_v10  ;;  %2585 = vst.msk [vmem:[#allocation2 + $0x90] sm:$0xff] %vm901_vm1, %v5782_v22  ;;  %2586 = vst.msk [vmem:[#allocation2 + $0x98] sm:$0xff] %vm901_vm1, %v5782_v22 }
 0x157   : > { %5201 = vmatprep.mubr.msk.f32.mxu1 %vm452_vm0, %v719_v13 }
 0x15a   : > { %5202 = vmatmul.mubr.msk.f32.gmra.mrb[8].mxu1 %vm452_vm0, %v720_v17 }
 0x15b   : > { %5204 = vmatprep.mubr.msk.f32.mxu1 %vm452_vm0, %v721_v19 }
 0x15e   : > { %5205 = vmatmul.mubr.msk.f32.gmra.mrb[10].mxu1 %vm452_vm0, %v722_v21 }
 0x15f   : > { %5235 = vmatprep.mubr.msk.f32.mxu1 %vm901_vm1, %v932_v24 }
 0x162   : > { %5236 = vmatmul.mubr.msk.f32.vlgmr.msra.gmra.mrb[12].mxu1 %vm901_vm1, %v6014_v25 }
 0x163   : > { %5286 = vmatpush3.msk.msra.mxu1 %vm1039_vm2, %v4555_v32 }
 0x164   : > { %5337 = vmatprep.subr.msk.mxu1 %vm1039_vm2, %v6055_v36 }
 0x225   : > { %v5197_v44 = vpop.f32.mrb[4].mxu1 }
 0x226   : > { %v828_v46 = vadd.f32 %v5197_v44, %v4493_v42  ;;  %v822_v47 = vpop.f32.mrb[5].mxu1 }
 0x227   : > { %v823_v48 = vadd.f32 %v4493_v42, %v822_v47 }
 0x228   : > { %v870_v49 = vmul.f32 0.70710677, %v828_v46  ;;  %v862_v7 = vmul.f32 0.5, %v828_v46 }
 0x229   : > { %v869_v50 = vmul.f32 0.70710677, %v823_v48  ;;  %v5200_v52 = vpop.f32.mrb[6].mxu1  ;;  %v861_v10 = vmul.f32 0.5, %v823_v48 }
 0x22a   : > { %5726 = verf.f32 %v870_v49  ;;  %v838_v53 = vadd.f32 %v5200_v52, %v4493_v42  ;;  %v832_v54 = vpop.f32.mrb[7].mxu1 }
 0x22b   : > { %5728 = verf.f32 %v869_v50  ;;  %v833_v55 = vadd.f32 %v4493_v42, %v832_v54 }
 0x22c   : > { %v872_v56 = vmul.f32 0.70710677, %v838_v53  ;;  %v864_v16 = vmul.f32 0.5, %v838_v53 }
 0x22d   : > { %v871_v57 = vmul.f32 0.70710677, %v833_v55  ;;  %v5203_v58 = vpop.f32.mrb[8].mxu1  ;;  %v863_v18 = vmul.f32 0.5, %v833_v55 }
 0x22e   : > { %5730 = verf.f32 %v872_v56  ;;  %v848_v59 = vadd.f32 %v5203_v58, %v4493_v42  ;;  %v842_v60 = vpop.f32.mrb[9].mxu1 }
 0x22f   : > { %5732 = verf.f32 %v871_v57  ;;  %v843_v61 = vadd.f32 %v4493_v42, %v842_v60 }
 0x230   : > { %v874_v62 = vmul.f32 0.70710677, %v848_v59  ;;  %v866_v26 = vmul.f32 0.5, %v848_v59  ;;  %v6092_v59 = vld [vmem:[#allocation2 + $0xa0] sm:$0xff] }
 0x231   : > { %v873_v63 = vmul.f32 0.70710677, %v843_v61  ;;  %v5206_v0 = vpop.f32.mrb[10].mxu1  ;;  %v865_v30 = vmul.f32 0.5, %v843_v61  ;;  %2587 = vst.msk [vmem:[#allocation2 + $0xa0] sm:$0xff] %vm901_vm1, %v5782_v22 }
 0x232   : > { %5734 = verf.f32 %v874_v62  ;;  %v858_v1 = vadd.f32 %v5206_v0, %v4493_v42  ;;  %v852_v2 = vpop.f32.mrb[11].mxu1 }
 0x233   : > { %5736 = verf.f32 %v873_v63  ;;  %v853_v3 = vadd.f32 %v4493_v42, %v852_v2 }
 0x234   : > { %v5727_v4 = vpop.eup %5726  ;;  %v876_v5 = vmul.f32 0.70710677, %v858_v1  ;;  %v868_v50 = vmul.f32 0.5, %v858_v1 }
 0x235   : > { %v5729_v6 = vpop.eup %5728  ;;  %v886_v8 = vadd.f32 1.0, %v5727_v4  ;;  %v875_v9 = vmul.f32 0.70710677, %v853_v3  ;;  %v867_v55 = vmul.f32 0.5, %v853_v3  ;;  %v6114_v3 = vld [vmem:[%s7199_s6 + $0x10] sm:$0xf] }
 0x236   : > { %v885_v11 = vadd.f32 1.0, %v5729_v6  ;;  %5738 = verf.f32 %v876_v5 }
 0x237   : > { %v894_v12 = vmul.f32 %v886_v8, %v862_v7  ;;  %5740 = verf.f32 %v875_v9 }
 0x238   : > { %v5731_v13 = vpop.eup %5730  ;;  %v893_v14 = vmul.f32 %v885_v11, %v861_v10 }
 0x239   : > { %v5733_v15 = vpop.eup %5732  ;;  %925 = vst.msk [vmem:[#allocation2 + $0x21] sm:$0xff] %vm901_vm1, %v894_v12  ;;  %v888_v17 = vadd.f32 1.0, %v5731_v13 }
 0x23a   : > { %924 = vst.msk [vmem:[#allocation2 + $0x11] sm:$0xff] %vm901_vm1, %v893_v14  ;;  %v887_v19 = vadd.f32 1.0, %v5733_v15 }
 0x23b   : > { %v896_v20 = vmul.f32 %v888_v17, %v864_v16 }
 0x23c   : > { %v5735_v21 = vpop.eup %5734  ;;  %v895_v23 = vmul.f32 %v887_v19, %v863_v18 }
 0x23d   : > { %v5737_v24 = vpop.eup %5736  ;;  %927 = vst.msk [vmem:[#allocation2 + $0x41] sm:$0xff] %vm901_vm1, %v896_v20  ;;  %v890_v27 = vadd.f32 1.0, %v5735_v21 }
 0x23e   : > { %926 = vst.msk [vmem:[#allocation2 + $0x31] sm:$0xff] %vm901_vm1, %v895_v23  ;;  %v889_v32 = vadd.f32 1.0, %v5737_v24 }
 0x23f   : > { %v898_v42 = vmul.f32 %v890_v27, %v866_v26 }
 0x240   : > { %v5739_v44 = vpop.eup %5738  ;;  %v897_v46 = vmul.f32 %v889_v32, %v865_v30  ;;  %v6070_v47 = vld [vmem:[#allocation2 + $0x20] sm:$0xff]  ;;  %v6072_v48 = vld [vmem:[#allocation2 + $0x28] sm:$0xff] }
 0x241   : > { %v5741_v49 = vpop.eup %5740  ;;  %929 = vst.msk [vmem:[#allocation2 + $0x61] sm:$0xff] %vm901_vm1, %v898_v42  ;;  %v892_v52 = vadd.f32 1.0, %v5739_v44  ;;  %v6075_v53 = vld [vmem:[#allocation2 + $0x10] sm:$0xff]  ;;  %v6077_v54 = vld [vmem:[#allocation2 + $0x18] sm:$0xff]  ;;  %2571 = vst.msk [vmem:[#allocation2 + $0x20] sm:$0xff] %vm901_vm1, %v5782_v22  ;;  %v981_v0 = vrot.slane %v6070_v47, 1 }
 0x242   : > { %2572 = vst.msk [vmem:[#allocation2 + $0x28] sm:$0xff] %vm901_vm1, %v5782_v22  ;;  %928 = vst.msk [vmem:[#allocation2 + $0x51] sm:$0xff] %vm901_vm1, %v897_v46  ;;  %v891_v56 = vadd.f32 1.0, %v5741_v49  ;;  %v977_v57 = vrot.slane %v6075_v53, 1  ;;  %5238 = vmatprep.mubr.msk.f32.mxu1 %vm901_vm1, %v6075_v53  ;;  %v979_v58 = vrot.slane %v6077_v54, 1 }
 0x243   : > { %2569 = vst.msk [vmem:[#allocation2 + $0x10] sm:$0xff] %vm901_vm1, %v5782_v22  ;;  %2570 = vst.msk [vmem:[#allocation2 + $0x18] sm:$0xff] %vm901_vm1, %v5782_v22  ;;  %v900_v60 = vmul.f32 %v892_v52, %v868_v50  ;;  %5239 = vmatmul.mubr.msk.f32.gmra.mrb[14].mxu1 %vm901_vm1, %v6077_v54 }
 0x244   : > { %v899_v61 = vmul.f32 %v891_v56, %v867_v55  ;;  %5241 = vmatprep.mubr.msk.f32.mxu1 %vm901_vm1, %v6070_v47  ;;  %v978_v62 = vsel %vm973_vm3, %v975_v28, %v977_v57  ;;  %v6104_v63 = vsel %vm973_vm3, %v977_v57, %v979_v58  ;;  %v6107_v1 = vld [vmem:[#allocation2 + $0x40] sm:$0xff]  ;;  %v6109_v2 = vld [vmem:[#allocation2 + $0x48] sm:$0xff]  ;;  %v983_v28 = vrot.slane %v6072_v48, 1  ;;  %v6268_v56 = vld [vmem:[%s7199_s6 + $0x1c] sm:$0xf] }
 0x245   : > { %931 = vst.msk [vmem:[#allocation2 + $0x81] sm:$0xff] %vm901_vm1, %v900_v60  ;;  %5210 = vmatmul.mubr.msk.f32.vlgmr.msra.gmra.mrb[4].mxu0 %vm901_vm1, %v978_v62  ;;  %v6118_v4 = vld [vmem:[#allocation2 + $0x30] sm:$0xff]  ;;  %v6121_v5 = vld [vmem:[#allocation2 + $0x38] sm:$0xff]  ;;  %2575 = vst.msk [vmem:[#allocation2 + $0x40] sm:$0xff] %vm901_vm1, %v5782_v22  ;;  %v989_v14 = vrot.slane %v6107_v1, 1  ;;  %v991_v18 = vrot.slane %v6109_v2, 1 }
 0x246   : > { %2576 = vst.msk [vmem:[#allocation2 + $0x48] sm:$0xff] %vm901_vm1, %v5782_v22  ;;  %930 = vst.msk [vmem:[#allocation2 + $0x71] sm:$0xff] %vm901_vm1, %v899_v61  ;;  %5260 = vmatpush3.msk.msra.mxu0 %vm1039_vm2, %v6028_v29  ;;  %5212 = vmatprep.mubr.msk.f32.mxu0 %vm901_vm1, %v6104_v63  ;;  %v6143_v29 = vsel %vm973_vm3, %v979_v58, %v981_v0  ;;  %v985_v6 = vrot.slane %v6118_v4, 1  ;;  %v6153_v9 = vsel %vm973_vm3, %v981_v0, %v983_v28 }
 0x247   : > { %2573 = vst.msk [vmem:[#allocation2 + $0x30] sm:$0xff] %vm901_vm1, %v5782_v22  ;;  %2574 = vst.msk [vmem:[#allocation2 + $0x38] sm:$0xff] %vm901_vm1, %v5782_v22  ;;  %5242 = vmatmul.mubr.msk.f32.gmra.mrb[16].mxu1 %vm901_vm1, %v6072_v48  ;;  %5311 = vmatprep.subr.msk.mxu0 %vm1039_vm2, %v6114_v3  ;;  %v987_v10 = vrot.slane %v6121_v5, 1  ;;  %v6213_v24 = vsel %vm973_vm3, %v989_v14, %v991_v18  ;;  %v1358_v57 = vrot.slane %v6075_v53, 2  ;;  %v1360_v60 = vrot.slane %v6077_v54, 2 }
 0x248   : > { %5244 = vmatprep.mubr.msk.f32.mxu1 %vm901_vm1, %v6118_v4  ;;  %v6146_v7 = vld [vmem:[#allocation2 + $0x60] sm:$0xff]  ;;  %v6148_v8 = vld [vmem:[#allocation2 + $0x68] sm:$0xff]  ;;  %v6175_v13 = vsel %vm973_vm3, %v983_v28, %v985_v6  ;;  %v1364_v61 = vrot.slane %v6072_v48, 2  ;;  %v1368_v0 = vrot.slane %v6121_v5, 2  ;;  %v1370_v28 = vrot.slane %v6107_v1, 2 }
 0x249   : > { %5213 = vmatmul.mubr.msk.f32.gmra.mrb[6].mxu0 %vm901_vm1, %v6143_v29  ;;  %v6156_v11 = vld [vmem:[#allocation2 + $0x50] sm:$0xff]  ;;  %v6158_v12 = vld [vmem:[#allocation2 + $0x58] sm:$0xff]  ;;  %2579 = vst.msk [vmem:[#allocation2 + $0x60] sm:$0xff] %vm901_vm1, %v5782_v22  ;;  %2580 = vst.msk [vmem:[#allocation2 + $0x68] sm:$0xff] %vm901_vm1, %v5782_v22  ;;  %v6185_v17 = vsel %vm973_vm3, %v985_v6, %v987_v10  ;;  %v6207_v21 = vsel %vm973_vm3, %v987_v10, %v989_v14  ;;  %v997_v27 = vrot.slane %v6146_v7, 1  ;;  %v999_v32 = vrot.slane %v6148_v8, 1 }
 0x24a   : > { %5215 = vmatprep.mubr.msk.f32.mxu0 %vm901_vm1, %v6153_v9  ;;  %2577 = vst.msk [vmem:[#allocation2 + $0x50] sm:$0xff] %vm901_vm1, %v5782_v22  ;;  %2578 = vst.msk [vmem:[#allocation2 + $0x58] sm:$0xff] %vm901_vm1, %v5782_v22  ;;  %v993_v23 = vrot.slane %v6156_v11, 1  ;;  %v995_v26 = vrot.slane %v6158_v12, 1  ;;  %v1372_v10 = vrot.slane %v6109_v2, 2  ;;  %v6344_v14 = vsel %vm1354_vm4, %v1368_v0, %v1370_v28 }
 0x24b   : > { %5245 = vmatmul.mubr.msk.f32.gmra.mrb[18].mxu1 %vm901_vm1, %v6121_v5  ;;  %v6245_v46 = vsel %vm973_vm3, %v997_v27, %v999_v32 }
 0x24c   : > { %5247 = vmatprep.mubr.msk.f32.mxu1 %vm901_vm1, %v6107_v1  ;;  %v6178_v15 = vld [vmem:[#allocation2 + $0x80] sm:$0xff]  ;;  %v6180_v16 = vld [vmem:[#allocation2 + $0x88] sm:$0xff]  ;;  %v6229_v30 = vsel %vm973_vm3, %v993_v23, %v995_v26  ;;  %v6239_v42 = vsel %vm973_vm3, %v995_v26, %v997_v27  ;;  %v1376_v26 = vrot.slane %v6158_v12, 2 }
 0x24d   : > { %5216 = vmatmul.mubr.msk.f32.gmra.mrb[8].mxu0 %vm901_vm1, %v6175_v13  ;;  %v6188_v19 = vld [vmem:[#allocation2 + $0x70] sm:$0xff]  ;;  %v6190_v20 = vld [vmem:[#allocation2 + $0x78] sm:$0xff]  ;;  %2583 = vst.msk [vmem:[#allocation2 + $0x80] sm:$0xff] %vm901_vm1, %v5782_v22  ;;  %2584 = vst.msk [vmem:[#allocation2 + $0x88] sm:$0xff] %vm901_vm1, %v5782_v22  ;;  %v1005_v52 = vrot.slane %v6178_v15, 1 }
 0x24e   : > { %5218 = vmatprep.mubr.msk.f32.mxu0 %vm901_vm1, %v6185_v17  ;;  %2581 = vst.msk [vmem:[#allocation2 + $0x70] sm:$0xff] %vm901_vm1, %v5782_v22  ;;  %2582 = vst.msk [vmem:[#allocation2 + $0x78] sm:$0xff] %vm901_vm1, %v5782_v22  ;;  %v6223_v22 = vsel %vm973_vm3, %v991_v18, %v993_v23  ;;  %v1001_v44 = vrot.slane %v6188_v19, 1  ;;  %v1003_v49 = vrot.slane %v6190_v20, 1  ;;  %v1374_v18 = vrot.slane %v6156_v11, 2 }
 0x24f   : > { %5248 = vmatmul.mubr.msk.f32.gmra.mrb[20].mxu1 %vm901_vm1, %v6109_v2  ;;  %v6350_v23 = vsel %vm1354_vm4, %v1370_v28, %v1372_v10  ;;  %v1726_v28 = vrot.slane %v6180_v16, 1 }
 0x250   : > { %5250 = vmatprep.mubr.msk.f32.mxu1 %vm901_vm1, %v6156_v11  ;;  %v6255_v50 = vsel %vm973_vm3, %v999_v32, %v1001_v44  ;;  %v6261_v55 = vsel %vm973_vm3, %v1001_v44, %v1003_v49  ;;  %v6278_v58 = vsel %vm973_vm3, %v1003_v49, %v1005_v52  ;;  %v6360_v27 = vsel %vm1354_vm4, %v1372_v10, %v1374_v18 }
 0x251   : > { %5219 = vmatmul.mubr.msk.f32.gmra.mrb[10].mxu0 %vm901_vm1, %v6207_v21  ;;  %v1378_v32 = vrot.slane %v6146_v7, 2  ;;  %v6366_v44 = vsel %vm1354_vm4, %v1374_v18, %v1376_v26  ;;  %v1380_v49 = vrot.slane %v6148_v8, 2 }
 0x252   : > { %5221 = vmatprep.mubr.msk.f32.mxu0 %vm901_vm1, %v6213_v24 }
 0x253   : > { %5251 = vmatmul.mubr.msk.f32.gmra.mrb[22].mxu1 %vm901_vm1, %v6158_v12 }
 0x254   : > { %5253 = vmatprep.mubr.msk.f32.mxu1 %vm901_vm1, %v6146_v7 }
 0x255   : > { %5222 = vmatmul.mubr.msk.f32.gmra.mrb[12].mxu0 %vm901_vm1, %v6223_v22 }
 0x256   : > { %5224 = vmatprep.mubr.msk.f32.mxu0 %vm901_vm1, %v6229_v30 }
 0x257   : > { %5254 = vmatmul.mubr.msk.f32.gmra.mrb[24].mxu1 %vm901_vm1, %v6148_v8 }
 0x258   : > { %5256 = vmatprep.mubr.msk.f32.mxu1 %vm901_vm1, %v6188_v19 }
 0x259   : > { %5225 = vmatmul.mubr.msk.f32.gmra.mrb[14].mxu0 %vm901_vm1, %v6239_v42 }
 0x25a   : > { %5227 = vmatprep.mubr.msk.f32.mxu0 %vm901_vm1, %v6245_v46 }
 0x25b   : > { %5257 = vmatmul.mubr.msk.f32.gmra.mrb[26].mxu1 %vm901_vm1, %v6190_v20 }
 0x25c   : > { %5287 = vmatprep.mubr.msk.f32.mxu1 %vm901_vm1, %v6075_v53  ;;  %v1362_v53 = vrot.slane %v6070_v47, 2 }
 0x25d   : > { %5228 = vmatmul.mubr.msk.f32.gmra.mrb[16].mxu0 %vm901_vm1, %v6255_v50 }
 0x25e   : > { %5230 = vmatprep.mubr.msk.f32.mxu0 %vm901_vm1, %v6261_v55  ;;  %v1363_v25 = vsel %vm1354_vm4, %v1360_v60, %v1362_v53  ;;  %v6318_v62 = vsel %vm1354_vm4, %v1362_v53, %v1364_v61  ;;  %v1384_v53 = vrot.slane %v6190_v20, 2 }
 0x25f   : > { %5288 = vmatmul.mubr.msk.f32.vlgmr.msra.gmra.mrb[28].mxu1 %vm901_vm1, %v6077_v54  ;;  %v6300_v54 = vld [vmem:[%s7199_s6 + $0x18] sm:$0xf] }
 0x260   : > { %5290 = vmatprep.mubr.msk.f32.mxu1 %vm901_vm1, %v6070_v47  ;;  %5338 = vmatpush3.msk.msra.mxu1 %vm1039_vm2, %v6055_v36  ;;  %v1359_v36 = vsel %vm1354_vm4, %v1356_v34, %v1358_v57  ;;  %v1366_v34 = vrot.slane %v6118_v4, 2 }
 0x261   : > { %5231 = vmatmul.mubr.msk.f32.gmra.mrb[18].mxu0 %vm901_vm1, %v6278_v58  ;;  %5389 = vmatprep.subr.msk.mxu1 %vm1039_vm2, %v6268_v56 }
 0x262   : > { %5261 = vmatprep.mubr.msk.f32.mxu0 %vm901_vm1, %v6050_v35  ;;  %v1361_v35 = vsel %vm1354_vm4, %v1358_v57, %v1360_v60  ;;  %v6334_v6 = vsel %vm1354_vm4, %v1366_v34, %v1368_v0  ;;  %v6376_v57 = vsel %vm1354_vm4, %v1376_v26, %v1378_v32  ;;  %v1382_v60 = vrot.slane %v6188_v19, 2 }
 0x263   : > { %5291 = vmatmul.mubr.msk.f32.gmra.mrb[30].mxu1 %vm901_vm1, %v6072_v48  ;;  %v1728_v26 = vrot.slane %v6037_v31, 1 }
 0x264   : > { %5293 = vmatprep.mubr.msk.f32.mxu1 %vm901_vm1, %v6118_v4  ;;  %v6397_v0 = vsel %vm1354_vm4, %v1382_v60, %v1384_v53 }
 0x265   : > { %5262 = vmatmul.mubr.msk.f32.vlgmr.msra.gmra.mrb[20].mxu0 %vm901_vm1, %v1359_v36  ;;  %v6382_v36 = vsel %vm1354_vm4, %v1378_v32, %v1380_v49  ;;  %v1727_v32 = vsel %vm973_vm3, %v1005_v52, %v1726_v28 }
 0x266   : > { %5312 = vmatpush3.msk.msra.mxu0 %vm1039_vm2, %v6114_v3  ;;  %5264 = vmatprep.mubr.msk.f32.mxu0 %vm901_vm1, %v1361_v35  ;;  %v6328_v3 = vsel %vm1354_vm4, %v1364_v61, %v1366_v34  ;;  %v6391_v61 = vsel %vm1354_vm4, %v1380_v49, %v1382_v60  ;;  %v1386_v34 = vrot.slane %v6178_v15, 2  ;;  %v1729_v49 = vsel %vm973_vm3, %v1726_v28, %v1728_v26 }
 0x267   : > { %5294 = vmatmul.mubr.msk.f32.gmra.mrb[32].mxu1 %vm901_vm1, %v6121_v5  ;;  %5363 = vmatprep.subr.msk.mxu0 %vm1039_vm2, %v6300_v54 }
 0x268   : > { %5296 = vmatprep.mubr.msk.f32.mxu1 %vm901_vm1, %v6107_v1 }
 0x269   : > { %5265 = vmatmul.mubr.msk.f32.gmra.mrb[22].mxu0 %vm901_vm1, %v1363_v25 }
 0x26a   : > { %5267 = vmatprep.mubr.msk.f32.mxu0 %vm901_vm1, %v6318_v62 }
 0x26b   : > { %5297 = vmatmul.mubr.msk.f32.gmra.mrb[34].mxu1 %vm901_vm1, %v6109_v2 }
 0x26c   : > { %5299 = vmatprep.mubr.msk.f32.mxu1 %vm901_vm1, %v6156_v11 }
 0x26d   : > { %5268 = vmatmul.mubr.msk.f32.gmra.mrb[24].mxu0 %vm901_vm1, %v6328_v3 }
 0x26e   : > { %5270 = vmatprep.mubr.msk.f32.mxu0 %vm901_vm1, %v6334_v6 }
 0x26f   : > { %5300 = vmatmul.mubr.msk.f32.gmra.mrb[36].mxu1 %vm901_vm1, %v6158_v12 }
 0x270   : > { %5302 = vmatprep.mubr.msk.f32.mxu1 %vm901_vm1, %v6146_v7 }
 0x271   : > { %5271 = vmatmul.mubr.msk.f32.gmra.mrb[26].mxu0 %vm901_vm1, %v6344_v14 }
 0x272   : > { %5273 = vmatprep.mubr.msk.f32.mxu0 %vm901_vm1, %v6350_v23 }
 0x273   : > { %5303 = vmatmul.mubr.msk.f32.gmra.mrb[38].mxu1 %vm901_vm1, %v6148_v8 }
 0x274   : > { %5305 = vmatprep.mubr.msk.f32.mxu1 %vm901_vm1, %v6188_v19 }
 0x275   : > { %5274 = vmatmul.mubr.msk.f32.gmra.mrb[28].mxu0 %vm901_vm1, %v6360_v27 }
 0x276   : > { %5276 = vmatprep.mubr.msk.f32.mxu0 %vm901_vm1, %v6366_v44 }
 0x277   : > { %5306 = vmatmul.mubr.msk.f32.gmra.mrb[40].mxu1 %vm901_vm1, %v6190_v20 }
 0x278   : > { %5308 = vmatprep.mubr.msk.f32.mxu1 %vm901_vm1, %v6178_v15 }
 0x279   : > { %5277 = vmatmul.mubr.msk.f32.gmra.mrb[30].mxu0 %vm901_vm1, %v6376_v57 }
 0x27a   : > { %5279 = vmatprep.mubr.msk.f32.mxu0 %vm901_vm1, %v6382_v36 }
 0x27b   : > { %5309 = vmatmul.mubr.msk.f32.gmra.mrb[42].mxu1 %vm901_vm1, %v6180_v16 }
 0x27c   : > { %5339 = vmatprep.mubr.msk.f32.mxu1 %vm901_vm1, %v1361_v35  ;;  %v6405_v35 = vsel %vm1354_vm4, %v1384_v53, %v1386_v34  ;;  %v4664_v53 = vld [vmem:[%s7201_s8 + $0x4] sm:$0xf] }
 0x27d   : > { %5280 = vmatmul.mubr.msk.f32.gmra.mrb[32].mxu0 %vm901_vm1, %v6391_v61 }
 0x27e   : > { %5282 = vmatprep.mubr.msk.f32.mxu0 %vm901_vm1, %v6397_v0 }
 0x27f   : > { %5340 = vmatmul.mubr.msk.f32.vlgmr.msra.gmra.mrb[44].mxu1 %vm901_vm1, %v1363_v25  ;;  %v4645_v25 = vld [vmem:[%s7199_s6 + $0x20] sm:$0xf] }
 0x280   : > { %5342 = vmatprep.mubr.msk.f32.mxu1 %vm901_vm1, %v6318_v62  ;;  %5390 = vmatpush3.msk.msra.mxu1 %vm1039_vm2, %v6268_v56 }
 0x281   : > { %5283 = vmatmul.mubr.msk.f32.gmra.mrb[34].mxu0 %vm901_vm1, %v6405_v35  ;;  %5441 = vmatprep.subr.msk.mxu1 %vm1039_vm2, %v4664_v53 }
 0x282   : > { %5313 = vmatprep.mubr.msk.f32.mxu0 %vm901_vm1, %v6104_v63  ;;  %v1884_v63 = vrot.slane %v6180_v16, 2 }
 0x283   : > { %5343 = vmatmul.mubr.msk.f32.gmra.mrb[46].mxu1 %vm901_vm1, %v6328_v3 }
 0x284   : > { %5345 = vmatprep.mubr.msk.f32.mxu1 %vm901_vm1, %v6334_v6  ;;  %v6464_v56 = vsel %vm1354_vm4, %v1386_v34, %v1884_v63 }
 0x285   : > { %5314 = vmatmul.mubr.msk.f32.vlgmr.msra.gmra.mrb[36].mxu0 %vm901_vm1, %v6143_v29  ;;  %v1886_v29 = vrot.slane %v6037_v31, 2 }
 0x286   : > { %5364 = vmatpush3.msk.msra.mxu0 %vm1039_vm2, %v6300_v54  ;;  %5316 = vmatprep.mubr.msk.f32.mxu0 %vm901_vm1, %v6153_v9  ;;  %v5237_v54 = vpop.f32.mrb[12].mxu1 }
 0x287   : > { %5346 = vmatmul.mubr.msk.f32.gmra.mrb[48].mxu1 %vm901_vm1, %v6344_v14  ;;  %5415 = vmatprep.subr.msk.mxu0 %vm1039_vm2, %v4645_v25  ;;  %v6471_v10 = vpop.f32.mrb[13].mxu1  ;;  %v1887_v18 = vsel %vm1354_vm4, %v1884_v63, %v1886_v29 }
 0x288   : > { %5348 = vmatprep.mubr.msk.f32.mxu1 %vm901_vm1, %v6350_v23 }
 0x289   : > { %5317 = vmatmul.mubr.msk.f32.gmra.mrb[38].mxu0 %vm901_vm1, %v6175_v13 }
 0x28a   : > { %5319 = vmatprep.mubr.msk.f32.mxu0 %vm901_vm1, %v6185_v17 }
 0x28b   : > { %5349 = vmatmul.mubr.msk.f32.gmra.mrb[50].mxu1 %vm901_vm1, %v6360_v27 }
 0x28c   : > { %5351 = vmatprep.mubr.msk.f32.mxu1 %vm901_vm1, %v6366_v44 }
 0x28d   : > { %5320 = vmatmul.mubr.msk.f32.gmra.mrb[40].mxu0 %vm901_vm1, %v6207_v21 }
 0x28e   : > { %5322 = vmatprep.mubr.msk.f32.mxu0 %vm901_vm1, %v6213_v24 }
 0x28f   : > { %5352 = vmatmul.mubr.msk.f32.gmra.mrb[52].mxu1 %vm901_vm1, %v6376_v57 }
 0x290   : > { %5354 = vmatprep.mubr.msk.f32.mxu1 %vm901_vm1, %v6382_v36 }
 0x291   : > { %5323 = vmatmul.mubr.msk.f32.gmra.mrb[42].mxu0 %vm901_vm1, %v6223_v22 }
 0x292   : > { %5325 = vmatprep.mubr.msk.f32.mxu0 %vm901_vm1, %v6229_v30 }
 0x293   : > { %5355 = vmatmul.mubr.msk.f32.gmra.mrb[54].mxu1 %vm901_vm1, %v6391_v61 }
 0x294   : > { %5357 = vmatprep.mubr.msk.f32.mxu1 %vm901_vm1, %v6397_v0 }
 0x295   : > { %5326 = vmatmul.mubr.msk.f32.gmra.mrb[44].mxu0 %vm901_vm1, %v6239_v42 }
 0x296   : > { %5328 = vmatprep.mubr.msk.f32.mxu0 %vm901_vm1, %v6245_v46 }
 0x297   : > { %5358 = vmatmul.mubr.msk.f32.gmra.mrb[56].mxu1 %vm901_vm1, %v6405_v35 }
 0x298   : > { %5360 = vmatprep.mubr.msk.f32.mxu1 %vm901_vm1, %v6464_v56 }
 0x299   : > { %5329 = vmatmul.mubr.msk.f32.gmra.mrb[46].mxu0 %vm901_vm1, %v6255_v50 }
 0x29a   : > { %5331 = vmatprep.mubr.msk.f32.mxu0 %vm901_vm1, %v6261_v55 }
 0x29b   : > { %5361 = vmatmul.mubr.msk.f32.gmra.mrb[58].mxu1 %vm901_vm1, %v1887_v18 }
 0x29c   : > { %5391 = vmatprep.mubr.msk.f32.mxu1 %vm901_vm1, %v6153_v9 }
 0x29d   : > { %5332 = vmatmul.mubr.msk.f32.gmra.mrb[48].mxu0 %vm901_vm1, %v6278_v58 }
 0x29e   : > { %5334 = vmatprep.mubr.msk.f32.mxu0 %vm901_vm1, %v1727_v32 }
 0x29f   : > { %5392 = vmatmul.mubr.msk.f32.vlgmr.msra.gmra.mrb[60].mxu1 %vm901_vm1, %v6175_v13 }
 0x2a0   : > { %5394 = vmatprep.mubr.msk.f32.mxu1 %vm901_vm1, %v6185_v17  ;;  %5442 = vmatpush3.msk.msra.mxu1 %vm1039_vm2, %v4664_v53 }
 0x2a1   : > { %5335 = vmatmul.mubr.msk.f32.gmra.mrb[50].mxu0 %vm901_vm1, %v1729_v49 }
 0x2a2   : > { %5365 = vmatprep.mubr.msk.f32.mxu0 %vm901_vm1, %v6070_v47  ;;  %v2198_v47 = vrot.slane %v6066_v33, 1 }
 0x2a3   : > { %5395 = vmatmul.mubr.msk.f32.gmra.mrb[62].mxu1 %vm901_vm1, %v6207_v21 }
 0x2a4   : > { %5397 = vmatprep.mubr.msk.f32.mxu1 %vm901_vm1, %v6213_v24 }
 0x2a5   : > { %5366 = vmatmul.mubr.msk.f32.vlgmr.msra.gmra.mrb[52].mxu0 %vm901_vm1, %v6072_v48  ;;  %v2200_v48 = vrot.slane %v6092_v59, 1 }
 0x2a6   : > { %5416 = vmatpush3.msk.msra.mxu0 %vm1039_vm2, %v4645_v25  ;;  %5368 = vmatprep.mubr.msk.f32.mxu0 %vm901_vm1, %v6118_v4  ;;  %v2356_v4 = vrot.slane %v6066_v33, 2 }
 0x2a7   : > { %5398 = vmatmul.mubr.msk.f32.gmra.mrb[64].mxu1 %vm901_vm1, %v6223_v22 }
 0x2a8   : > { %5400 = vmatprep.mubr.msk.f32.mxu1 %vm901_vm1, %v6229_v30 }
 0x2a9   : > { %5369 = vmatmul.mubr.msk.f32.gmra.mrb[54].mxu0 %vm901_vm1, %v6121_v5  ;;  %v2358_v5 = vrot.slane %v6092_v59, 2 }
 0x2aa   : > { %5371 = vmatprep.mubr.msk.f32.mxu0 %vm901_vm1, %v6107_v1  ;;  %v2199_v1 = vsel %vm973_vm3, %v1728_v26, %v2198_v47  ;;  %v6600_v26 = vld [vmem:[#allocation2] sm:$0xff] }
 0x2ab   : > { %5401 = vmatmul.mubr.msk.f32.gmra.mrb[66].mxu1 %vm901_vm1, %v6239_v42 }
 0x2ac   : > { %5403 = vmatprep.mubr.msk.f32.mxu1 %vm901_vm1, %v6245_v46 }
 0x2ad   : > { %5372 = vmatmul.mubr.msk.f32.gmra.mrb[56].mxu0 %vm901_vm1, %v6109_v2  ;;  %v2201_v2 = vsel %vm973_vm3, %v2198_v47, %v2200_v48 }
 0x2ae   : > { %5374 = vmatprep.mubr.msk.f32.mxu0 %vm901_vm1, %v6156_v11 }
 0x2af   : > { %5404 = vmatmul.mubr.msk.f32.gmra.mrb[68].mxu1 %vm901_vm1, %v6255_v50 }
 0x2b0   : > { %5406 = vmatprep.mubr.msk.f32.mxu1 %vm901_vm1, %v6261_v55 }
 0x2b1   : > { %5375 = vmatmul.mubr.msk.f32.gmra.mrb[58].mxu0 %vm901_vm1, %v6158_v12 }
 0x2b2   : > { %5377 = vmatprep.mubr.msk.f32.mxu0 %vm901_vm1, %v6146_v7  ;;  %v2357_v7 = vsel %vm1354_vm4, %v1886_v29, %v2356_v4 }
 0x2b3   : > { %5407 = vmatmul.mubr.msk.f32.gmra.mrb[70].mxu1 %vm901_vm1, %v6278_v58 }
 0x2b4   : > { %5409 = vmatprep.mubr.msk.f32.mxu1 %vm901_vm1, %v1727_v32 }
 0x2b5   : > { %5378 = vmatmul.mubr.msk.f32.gmra.mrb[60].mxu0 %vm901_vm1, %v6148_v8  ;;  %v2359_v8 = vsel %vm1354_vm4, %v2356_v4, %v2358_v5  ;;  %v2638_v5 = vrot.slane %v6600_v26, 1 }
 0x2b6   : > { %5380 = vmatprep.mubr.msk.f32.mxu0 %vm901_vm1, %v6188_v19 }
 0x2b7   : > { %5410 = vmatmul.mubr.msk.f32.gmra.mrb[72].mxu1 %vm901_vm1, %v1729_v49  ;;  %v6605_v49 = vld [vmem:[#allocation2 + $0x8] sm:$0xff] }
 0x2b8   : > { %5412 = vmatprep.mubr.msk.f32.mxu1 %vm901_vm1, %v2199_v1 }
 0x2b9   : > { %5381 = vmatmul.mubr.msk.f32.gmra.mrb[62].mxu0 %vm901_vm1, %v6190_v20 }
 0x2ba   : > { %5383 = vmatprep.mubr.msk.f32.mxu0 %vm901_vm1, %v6178_v15 }
 0x2bb   : > { %5413 = vmatmul.mubr.msk.f32.gmra.mrb[74].mxu1 %vm901_vm1, %v2201_v2 }
 0x2bd   : > { %5384 = vmatmul.mubr.msk.f32.gmra.mrb[64].mxu0 %vm901_vm1, %v6180_v16 }
 0x2be   : > { %5386 = vmatprep.mubr.msk.f32.mxu0 %vm901_vm1, %v6037_v31 }
 0x2c1   : > { %5387 = vmatmul.mubr.msk.f32.gmra.mrb[66].mxu0 %vm901_vm1, %v6066_v33 }
 0x2c2   : > { %5417 = vmatprep.mubr.msk.f32.mxu0 %vm901_vm1, %v6318_v62 }
 0x2c5   : > { %5418 = vmatmul.mubr.msk.f32.vlgmr.msra.gmra.mrb[68].mxu0 %vm901_vm1, %v6328_v3 }
 0x2c6   : > { %5420 = vmatprep.mubr.msk.f32.mxu0 %vm901_vm1, %v6334_v6 }
 0x2c9   : > { %5421 = vmatmul.mubr.msk.f32.gmra.mrb[70].mxu0 %vm901_vm1, %v6344_v14 }
 0x2ca   : > { %5423 = vmatprep.mubr.msk.f32.mxu0 %vm901_vm1, %v6350_v23 }
 0x2cd   : > { %5424 = vmatmul.mubr.msk.f32.gmra.mrb[72].mxu0 %vm901_vm1, %v6360_v27 }
 0x2ce   : > { %5426 = vmatprep.mubr.msk.f32.mxu0 %vm901_vm1, %v6366_v44 }
 0x2d1   : > { %5427 = vmatmul.mubr.msk.f32.gmra.mrb[74].mxu0 %vm901_vm1, %v6376_v57 }
 0x2d2   : > { %5429 = vmatprep.mubr.msk.f32.mxu0 %vm901_vm1, %v6382_v36 }
 0x2d5   : > { %5430 = vmatmul.mubr.msk.f32.gmra.mrb[76].mxu0 %vm901_vm1, %v6391_v61 }
 0x2d6   : > { %5432 = vmatprep.mubr.msk.f32.mxu0 %vm901_vm1, %v6397_v0 }
 0x2d9   : > { %5433 = vmatmul.mubr.msk.f32.gmra.mrb[78].mxu0 %vm901_vm1, %v6405_v35 }
 0x2da   : > { %5435 = vmatprep.mubr.msk.f32.mxu0 %vm901_vm1, %v6464_v56 }
 0x2dd   : > { %5436 = vmatmul.mubr.msk.f32.gmra.mrb[80].mxu0 %vm901_vm1, %v1887_v18 }
 0x2de   : > { %5438 = vmatprep.mubr.msk.f32.mxu0 %vm901_vm1, %v2357_v7  ;;  %v2639_v7 = vrot.slane %v6605_v49, 1 }
 0x2e1   : > { %5439 = vmatmul.mubr.msk.f32.gmra.mrb[82].mxu0 %vm901_vm1, %v2359_v8 }
 0x2e2   : > { %5469 = vmatprep.mubr.msk.f32.mxu0 %vm901_vm1, %v6600_v26 }
 0x316   : > { %v5240_v33 = vpop.f32.mrb[14].mxu1 }
 0x317   : > { %v1290_v9 = vpop.f32.mrb[15].mxu1 }
 0x318   : > { %v5211_v11 = vpop.f32.mrb[4].mxu0 }
 0x319   : > { %v1109_v12 = vpop.f32.mrb[5].mxu0  ;;  %v2640_v11 = vsel %vm973_vm3, %v2638_v5, %v2639_v7 }
 0x31a   : > { %v1282_v13 = vadd.f32 %v6471_v10, %v1109_v12  ;;  %v5243_v15 = vpop.f32.mrb[16].mxu1  ;;  %v2618_v10 = vld [vmem:[%s7201_s8] sm:$0xf]  ;;  %5443 = vmatprep.mubr.msk.f32.mxu1 %vm901_vm1, %v2640_v11 }
 0x31b   : > { %v1299_v59 = vpop.f32.mrb[17].mxu1  ;;  %5467 = vmatprep.subr.msk.mxu0 %vm1039_vm2, %v2618_v10 }
 0x31c   : > { %v5214_v16 = vpop.f32.mrb[6].mxu0  ;;  %5468 = vmatpush3.msk.msra.mxu0 %vm1039_vm2, %v2618_v10 }
 0x31d   : > { %v1118_v31 = vpop.f32.mrb[7].mxu0  ;;  %5470 = vmatmul.mubr.msk.f32.vlgmr.msra.gmra.mrb[84].mxu0 %vm901_vm1, %v6605_v49 }
 0x31e   : > { %v1291_v17 = vadd.f32 %v1290_v9, %v1118_v31  ;;  %v5246_v19 = vpop.f32.mrb[18].mxu1 }
 0x31f   : > { %v1308_v20 = vpop.f32.mrb[19].mxu1 }
 0x320   : > { %v5217_v21 = vpop.f32.mrb[8].mxu0 }
 0x321   : > { %v1127_v24 = vpop.f32.mrb[9].mxu0 }
 0x322   : > { %v1300_v22 = vadd.f32 %v1299_v59, %v1127_v24  ;;  %v5249_v30 = vpop.f32.mrb[20].mxu1 }
 0x323   : > { %v1317_v42 = vpop.f32.mrb[21].mxu1 }
 0x324   : > { %v5220_v46 = vpop.f32.mrb[10].mxu0 }
 0x325   : > { %v1136_v50 = vpop.f32.mrb[11].mxu0 }
 0x326   : > { %v1309_v52 = vadd.f32 %v1308_v20, %v1136_v50  ;;  %v5252_v55 = vpop.f32.mrb[22].mxu1 }
 0x327   : > { %v1326_v58 = vpop.f32.mrb[23].mxu1 }
 0x328   : > { %v5223_v62 = vpop.f32.mrb[12].mxu0 }
 0x329   : > { %v1145_v3 = vpop.f32.mrb[13].mxu0 }
 0x32a   : > { %v1318_v6 = vadd.f32 %v1317_v42, %v1145_v3  ;;  %v5255_v14 = vpop.f32.mrb[24].mxu1 }
 0x32b   : > { %v1335_v23 = vpop.f32.mrb[25].mxu1  ;;  %v6618_v14 = vld [vmem:[%s7201_s8 + $0x8] sm:$0xf] }
 0x32c   : > { %v5226_v27 = vpop.f32.mrb[14].mxu0  ;;  %5493 = vmatprep.subr.msk.mxu1 %vm1039_vm2, %v6618_v14 }
 0x32d   : > { %v1154_v44 = vpop.f32.mrb[15].mxu0 }
 0x32e   : > { %v1327_v57 = vadd.f32 %v1326_v58, %v1154_v44  ;;  %v5258_v60 = vpop.f32.mrb[26].mxu1 }
 0x32f   : > { %v1344_v36 = vpop.f32.mrb[27].mxu1 }
 0x330   : > { %v5229_v61 = vpop.f32.mrb[16].mxu0 }
 0x331   : > { %v1163_v34 = vpop.f32.mrb[17].mxu0 }
 0x332   : > { %v1336_v0 = vadd.f32 %v1335_v23, %v1163_v34  ;;  %v5289_v35 = vpop.f32.mrb[28].mxu1 }
 0x333   : > { %v1644_v25 = vpop.f32.mrb[29].mxu1  ;;  %v4717_v35 = vld [vmem:[%s7201_s8 + $0xc] sm:$0xf] }
 0x334   : > { %v5232_v63 = vpop.f32.mrb[18].mxu0  ;;  %5519 = vmatprep.subr.msk.mxu0 %vm1039_vm2, %v4717_v35 }
 0x335   : > { %v1172_v29 = vpop.f32.mrb[19].mxu0  ;;  %5520 = vmatpush3.msk.msra.mxu0 %vm1039_vm2, %v4717_v35 }
 0x336   : > { %v6594_v56 = vadd.f32 %v1344_v36, %v1172_v29  ;;  %v5292_v54 = vpop.f32.mrb[30].mxu1 }
 0x337   : > { %v1653_v28 = vpop.f32.mrb[31].mxu1 }
 0x338   : > { %v5263_v18 = vpop.f32.mrb[20].mxu0 }
 0x339   : > { %v1489_v32 = vpop.f32.mrb[21].mxu0 }
 0x33a   : > { %v1560_v47 = vadd.f32 %v1489_v32, %v1282_v13  ;;  %v5295_v48 = vpop.f32.mrb[32].mxu1 }
 0x33b   : > { %v1662_v1 = vpop.f32.mrb[33].mxu1 }
 0x33c   : > { %v5266_v2 = vpop.f32.mrb[22].mxu0  ;;  %v1715_v4 = vadd.f32 %v1644_v25, %v1560_v47 }
 0x33d   : > { %v1498_v8 = vpop.f32.mrb[23].mxu0 }
 0x33e   : > { %v1561_v33 = vadd.f32 %v1498_v8, %v1291_v17  ;;  %v5298_v9 = vpop.f32.mrb[34].mxu1 }
 0x33f   : > { %v1671_v12 = vpop.f32.mrb[35].mxu1 }
 0x340   : > { %v5269_v13 = vpop.f32.mrb[24].mxu0  ;;  %v1716_v15 = vadd.f32 %v1653_v28, %v1561_v33 }
 0x341   : > { %v1507_v59 = vpop.f32.mrb[25].mxu0 }
 0x342   : > { %v1562_v16 = vadd.f32 %v1507_v59, %v1300_v22  ;;  %v5301_v31 = vpop.f32.mrb[36].mxu1 }
 0x343   : > { %v1680_v19 = vpop.f32.mrb[37].mxu1 }
 0x344   : > { %v5272_v20 = vpop.f32.mrb[26].mxu0  ;;  %v1717_v21 = vadd.f32 %v1662_v1, %v1562_v16 }
 0x345   : > { %v1516_v24 = vpop.f32.mrb[27].mxu0 }
 0x346   : > { %v1563_v30 = vadd.f32 %v1516_v24, %v1309_v52  ;;  %v5304_v42 = vpop.f32.mrb[38].mxu1 }
 0x347   : > { %v1689_v17 = vpop.f32.mrb[39].mxu1 }
 0x348   : > { %v5275_v46 = vpop.f32.mrb[28].mxu0  ;;  %v1718_v50 = vadd.f32 %v1671_v12, %v1563_v30 }
 0x349   : > { %v1525_v55 = vpop.f32.mrb[29].mxu0 }
 0x34a   : > { %v1564_v58 = vadd.f32 %v1525_v55, %v1318_v6  ;;  %v5307_v62 = vpop.f32.mrb[40].mxu1 }
 0x34b   : > { %v1698_v3 = vpop.f32.mrb[41].mxu1 }
 0x34c   : > { %v5278_v22 = vpop.f32.mrb[30].mxu0  ;;  %v1719_v23 = vadd.f32 %v1680_v19, %v1564_v58 }
 0x34d   : > { %v1534_v27 = vpop.f32.mrb[31].mxu0 }
 0x34e   : > { %v1565_v52 = vadd.f32 %v1534_v27, %v1327_v57  ;;  %v5310_v44 = vpop.f32.mrb[42].mxu1  ;;  %v3017_v57 = vrot.slane %v6600_v26, 2 }
 0x34f   : > { %v1707_v60 = vpop.f32.mrb[43].mxu1 }
 0x350   : > { %v5281_v36 = vpop.f32.mrb[32].mxu0  ;;  %v1720_v53 = vadd.f32 %v1689_v17, %v1565_v52 }
 0x351   : > { %v1543_v61 = vpop.f32.mrb[33].mxu0 }
 0x352   : > { %v1566_v6 = vadd.f32 %v1543_v61, %v1336_v0  ;;  %v5341_v34 = vpop.f32.mrb[44].mxu1  ;;  %v3018_v0 = vrot.slane %v6605_v49, 2 }
 0x353   : > { %v1961_v25 = vpop.f32.mrb[45].mxu1 }
 0x354   : > { %v5284_v63 = vpop.f32.mrb[34].mxu0  ;;  %v1721_v29 = vadd.f32 %v1698_v3, %v1566_v6  ;;  %v6633_v1 = vsel %vm1354_vm4, %v3017_v57, %v3018_v0 }
 0x355   : > { %v1552_v54 = vpop.f32.mrb[35].mxu0 }
 0x356   : > { %v1567_v28 = vadd.f32 %v1552_v54, %v6594_v56  ;;  %v5344_v10 = vpop.f32.mrb[46].mxu1 }
 0x357   : > { %v1970_v18 = vpop.f32.mrb[47].mxu1 }
 0x358   : > { %v5315_v32 = vpop.f32.mrb[36].mxu0  ;;  %v1722_v47 = vadd.f32 %v1707_v60, %v1567_v28 }
 0x359   : > { %v1803_v48 = vpop.f32.mrb[37].mxu0 }
 0x35a   : > { %v1874_v2 = vadd.f32 %v1803_v48, %v1715_v4  ;;  %v5347_v5 = vpop.f32.mrb[48].mxu1 }
 0x35b   : > { %v1979_v8 = vpop.f32.mrb[49].mxu1 }
 0x35c   : > { %v5318_v33 = vpop.f32.mrb[38].mxu0  ;;  %v2032_v9 = vadd.f32 %v1961_v25, %v1874_v2 }
 0x35d   : > { %v1812_v26 = vpop.f32.mrb[39].mxu0 }
 0x35e   : > { %v1875_v11 = vadd.f32 %v1812_v26, %v1716_v15  ;;  %v5350_v56 = vpop.f32.mrb[50].mxu1 }
 0x35f   : > { %v1988_v12 = vpop.f32.mrb[51].mxu1 }
 0x360   : > { %v5321_v13 = vpop.f32.mrb[40].mxu0  ;;  %v2033_v59 = vadd.f32 %v1970_v18, %v1875_v11 }
 0x361   : > { %v1821_v16 = vpop.f32.mrb[41].mxu0 }
 0x362   : > { %v1876_v31 = vadd.f32 %v1821_v16, %v1717_v21  ;;  %v5353_v19 = vpop.f32.mrb[52].mxu1 }
 0x363   : > { %v1997_v20 = vpop.f32.mrb[53].mxu1 }
 0x364   : > { %v5324_v24 = vpop.f32.mrb[42].mxu0  ;;  %v2034_v30 = vadd.f32 %v1979_v8, %v1876_v31 }
 0x365   : > { %v1830_v42 = vpop.f32.mrb[43].mxu0 }
 0x366   : > { %v1877_v17 = vadd.f32 %v1830_v42, %v1718_v50  ;;  %v5356_v46 = vpop.f32.mrb[54].mxu1  ;;  %v6638_v50 = vld [vmem:[%s7201_s8 + $0x14] sm:$0xf] }
 0x367   : > { %v2006_v4 = vpop.f32.mrb[55].mxu1  ;;  %5571 = vmatprep.subr.msk.mxu0 %vm1039_vm2, %v6638_v50 }
 0x368   : > { %v5327_v55 = vpop.f32.mrb[44].mxu0  ;;  %v2035_v58 = vadd.f32 %v1988_v12, %v1877_v17 }
 0x369   : > { %v1839_v62 = vpop.f32.mrb[45].mxu0 }
 0x36a   : > { %v1878_v3 = vadd.f32 %v1839_v62, %v1719_v23  ;;  %v5359_v22 = vpop.f32.mrb[56].mxu1 }
 0x36b   : > { %v2015_v15 = vpop.f32.mrb[57].mxu1 }
 0x36c   : > { %v5330_v27 = vpop.f32.mrb[46].mxu0  ;;  %v2036_v52 = vadd.f32 %v1997_v20, %v1878_v3 }
 0x36d   : > { %v1848_v44 = vpop.f32.mrb[47].mxu0 }
 0x36e   : > { %v1879_v60 = vadd.f32 %v1848_v44, %v1720_v53  ;;  %v5362_v36 = vpop.f32.mrb[58].mxu1 }
 0x36f   : > { %v2024_v21 = vpop.f32.mrb[59].mxu1 }
 0x370   : > { %v5333_v61 = vpop.f32.mrb[48].mxu0  ;;  %v2037_v6 = vadd.f32 %v2006_v4, %v1879_v60 }
 0x371   : > { %v1857_v34 = vpop.f32.mrb[49].mxu0 }
 0x372   : > { %v1880_v35 = vadd.f32 %v1857_v34, %v1721_v29  ;;  %v5393_v25 = vpop.f32.mrb[60].mxu1 }
 0x373   : > { %v2275_v63 = vpop.f32.mrb[61].mxu1 }
 0x374   : > { %v5336_v23 = vpop.f32.mrb[50].mxu0  ;;  %v2038_v54 = vadd.f32 %v2015_v15, %v1880_v35 }
 0x375   : > { %v1866_v57 = vpop.f32.mrb[51].mxu0 }
 0x376   : > { %v1881_v53 = vadd.f32 %v1866_v57, %v1722_v47  ;;  %v5396_v28 = vpop.f32.mrb[62].mxu1 }
 0x377   : > { %v2284_v10 = vpop.f32.mrb[63].mxu1 }
 0x378   : > { %v5367_v18 = vpop.f32.mrb[52].mxu0  ;;  %v2039_v32 = vadd.f32 %v2024_v21, %v1881_v53 }
 0x379   : > { %v2116_v48 = vpop.f32.mrb[53].mxu0 }
 0x37a   : > { %v2187_v29 = vadd.f32 %v2116_v48, %v2032_v9  ;;  %v5399_v2 = vpop.f32.mrb[64].mxu1 }
 0x37b   : > { %v2293_v5 = vpop.f32.mrb[65].mxu1 }
 0x37c   : > { %v5370_v8 = vpop.f32.mrb[54].mxu0  ;;  %v2346_v33 = vadd.f32 %v2275_v63, %v2187_v29 }
 0x37d   : > { %v2125_v26 = vpop.f32.mrb[55].mxu0 }
 0x37e   : > { %v2188_v11 = vadd.f32 %v2125_v26, %v2033_v59  ;;  %v5402_v56 = vpop.f32.mrb[66].mxu1 }
 0x37f   : > { %v2302_v12 = vpop.f32.mrb[67].mxu1 }
 0x380   : > { %v5373_v13 = vpop.f32.mrb[56].mxu0  ;;  %v2347_v16 = vadd.f32 %v2284_v10, %v2188_v11 }
 0x381   : > { %v2134_v31 = vpop.f32.mrb[57].mxu0 }
 0x382   : > { %v2189_v19 = vadd.f32 %v2134_v31, %v2034_v30  ;;  %v5405_v20 = vpop.f32.mrb[68].mxu1 }
 0x383   : > { %v2311_v47 = vpop.f32.mrb[69].mxu1 }
 0x384   : > { %v5376_v24 = vpop.f32.mrb[58].mxu0  ;;  %v2348_v42 = vadd.f32 %v2293_v5, %v2189_v19 }
 0x385   : > { %v2143_v17 = vpop.f32.mrb[59].mxu0 }
 0x386   : > { %v2190_v46 = vadd.f32 %v2143_v17, %v2035_v58  ;;  %v5408_v4 = vpop.f32.mrb[70].mxu1 }
 0x387   : > { %v2320_v9 = vpop.f32.mrb[71].mxu1 }
 0x388   : > { %v5379_v55 = vpop.f32.mrb[60].mxu0  ;;  %v2349_v62 = vadd.f32 %v2302_v12, %v2190_v46 }
 0x389   : > { %v2152_v3 = vpop.f32.mrb[61].mxu0 }
 0x38a   : > { %v2191_v22 = vadd.f32 %v2152_v3, %v2036_v52  ;;  %v5411_v15 = vpop.f32.mrb[72].mxu1  ;;  %v6645_v52 = vld [vmem:[%s7200_s7] ss:$0 sm:$0xff] }
 0x38b   : > { %v2329_v59 = vpop.f32.mrb[73].mxu1 }
 0x38c   : > { %v5382_v27 = vpop.f32.mrb[62].mxu0  ;;  %v2350_v44 = vadd.f32 %v2311_v47, %v2191_v22 }
 0x38d   : > { %v2161_v60 = vpop.f32.mrb[63].mxu0 }
 0x38e   : > { %v2192_v36 = vadd.f32 %v2161_v60, %v2037_v6  ;;  %v5414_v21 = vpop.f32.mrb[74].mxu1 }
 0x38f   : > { %v2338_v30 = vpop.f32.mrb[75].mxu1 }
 0x390   : > { %v5385_v61 = vpop.f32.mrb[64].mxu0  ;;  %v2351_v34 = vadd.f32 %v2320_v9, %v2192_v36 }
 0x391   : > { %v2170_v35 = vpop.f32.mrb[65].mxu0 }
 0x392   : > { %v2193_v25 = vadd.f32 %v2170_v35, %v2038_v54 }
 0x394   : > { %v5388_v63 = vpop.f32.mrb[66].mxu0  ;;  %v2352_v58 = vadd.f32 %v2329_v59, %v2193_v25 }
 0x395   : > { %v2179_v23 = vpop.f32.mrb[67].mxu0 }
 0x396   : > { %v2194_v57 = vadd.f32 %v2179_v23, %v2039_v32 }
 0x398   : > { %v2353_v53 = vadd.f32 %v2338_v30, %v2194_v57  ;;  %v5419_v28 = vpop.f32.mrb[68].mxu0 }
 0x399   : > { %v2433_v10 = vpop.f32.mrb[69].mxu0 }
 0x39a   : > { %v2504_v18 = vadd.f32 %v2433_v10, %v2346_v33 }
 0x39c   : > { %v2519_v6 = vadd.f32 %v6645_v52, %v2504_v18  ;;  %v5422_v48 = vpop.f32.mrb[70].mxu0 }
 0x39d   : > { %v2442_v29 = vpop.f32.mrb[71].mxu0 }
 0x39e   : > { %v2535_v2 = vmul.f32 0.70710677, %v2519_v6  ;;  %v2505_v5 = vadd.f32 %v2442_v29, %v2347_v16  ;;  %v2527_v46 = vmul.f32 0.5, %v2519_v6 }
 0x3a0   : > { %5742 = verf.f32 %v2535_v2  ;;  %v2520_v54 = vadd.f32 %v6645_v52, %v2505_v5  ;;  %v5425_v8 = vpop.f32.mrb[72].mxu0 }
 0x3a1   : > { %v2451_v32 = vpop.f32.mrb[73].mxu0 }
 0x3a2   : > { %v2536_v26 = vmul.f32 0.70710677, %v2520_v54  ;;  %v2506_v11 = vadd.f32 %v2451_v32, %v2348_v42 }
 0x3a4   : > { %5744 = verf.f32 %v2536_v26  ;;  %v2521_v56 = vadd.f32 %v6645_v52, %v2506_v11  ;;  %v5428_v12 = vpop.f32.mrb[74].mxu0  ;;  %v6677_v11 = vld [vmem:[%s7201_s8 + $0x10] sm:$0xf] }
 0x3a5   : > { %v2460_v13 = vpop.f32.mrb[75].mxu0 }
 0x3a6   : > { %v2537_v31 = vmul.f32 0.70710677, %v2521_v56  ;;  %v2507_v33 = vadd.f32 %v2460_v13, %v2349_v62  ;;  %v2528_v62 = vmul.f32 0.5, %v2520_v54  ;;  %v2529_v25 = vmul.f32 0.5, %v2521_v56 }
 0x3a8   : > { %5746 = verf.f32 %v2537_v31  ;;  %v2522_v19 = vadd.f32 %v6645_v52, %v2507_v33  ;;  %v5431_v20 = vpop.f32.mrb[76].mxu0 }
 0x3a9   : > { %v2469_v47 = vpop.f32.mrb[77].mxu0 }
 0x3aa   : > { %v5743_v16 = vpop.eup %5742  ;;  %v2538_v24 = vmul.f32 0.70710677, %v2522_v19  ;;  %v2508_v17 = vadd.f32 %v2469_v47, %v2350_v44 }
 0x3ab   : > { %v2551_v4 = vadd.f32 1.0, %v5743_v16 }
 0x3ac   : > { %5748 = verf.f32 %v2538_v24  ;;  %v2523_v42 = vadd.f32 %v6645_v52, %v2508_v17  ;;  %v5434_v9 = vpop.f32.mrb[78].mxu0 }
 0x3ad   : > { %v2559_v55 = vmul.f32 %v2551_v4, %v2527_v46  ;;  %v2478_v3 = vpop.f32.mrb[79].mxu0 }
 0x3ae   : > { %v5745_v22 = vpop.eup %5744  ;;  %v2539_v15 = vmul.f32 0.70710677, %v2523_v42  ;;  %v2509_v59 = vadd.f32 %v2478_v3, %v2351_v34  ;;  %v2531_v31 = vmul.f32 0.5, %v2523_v42 }
 0x3af   : > { %2589 = vst.msk [vmem:[#allocation2 + $0x11] sm:$0xff] %vm901_vm1, %v2559_v55  ;;  %v2552_v27 = vadd.f32 1.0, %v5745_v22 }
 0x3b0   : > { %5750 = verf.f32 %v2539_v15  ;;  %v2524_v60 = vadd.f32 %v6645_v52, %v2509_v59  ;;  %v5437_v36 = vpop.f32.mrb[80].mxu0 }
 0x3b1   : > { %v2560_v44 = vmul.f32 %v2552_v27, %v2528_v62  ;;  %v2487_v21 = vpop.f32.mrb[81].mxu0 }
 0x3b2   : > { %v5747_v30 = vpop.eup %5746  ;;  %v2540_v61 = vmul.f32 0.70710677, %v2524_v60  ;;  %v2510_v35 = vadd.f32 %v2487_v21, %v2352_v58  ;;  %v2530_v58 = vmul.f32 0.5, %v2522_v19  ;;  %v2532_v46 = vmul.f32 0.5, %v2524_v60 }
 0x3b3   : > { %2590 = vst.msk [vmem:[#allocation2 + $0x21] sm:$0xff] %vm901_vm1, %v2560_v44  ;;  %v2553_v63 = vadd.f32 1.0, %v5747_v30 }
 0x3b4   : > { %5752 = verf.f32 %v2540_v61  ;;  %v2525_v34 = vadd.f32 %v6645_v52, %v2510_v35  ;;  %v5440_v23 = vpop.f32.mrb[82].mxu0 }
 0x3b5   : > { %v2561_v57 = vmul.f32 %v2553_v63, %v2529_v25  ;;  %v2496_v28 = vpop.f32.mrb[83].mxu0 }
 0x3b6   : > { %v5749_v10 = vpop.eup %5748  ;;  %v2541_v18 = vmul.f32 0.70710677, %v2525_v34  ;;  %v2511_v6 = vadd.f32 %v2496_v28, %v2353_v53  ;;  %v6656_v48 = vld [vmem:[#allocation2 + $0x10] sm:$0xff]  ;;  %v6658_v29 = vld [vmem:[#allocation2 + $0x18] sm:$0xff]  ;;  %v2533_v27 = vmul.f32 0.5, %v2525_v34 }
 0x3b7   : > { %2591 = vst.msk [vmem:[#allocation2 + $0x31] sm:$0xff] %vm901_vm1, %v2561_v57  ;;  %v2554_v2 = vadd.f32 1.0, %v5749_v10  ;;  %v2641_v5 = vrot.slane %v6656_v48, 1  ;;  %5472 = vmatprep.mubr.msk.f32.mxu0 %vm901_vm1, %v6656_v48  ;;  %v2643_v54 = vrot.slane %v6658_v29, 1 }
 0x3b8   : > { %5754 = verf.f32 %v2541_v18  ;;  %v2526_v8 = vadd.f32 %v6645_v52, %v2511_v6  ;;  %5473 = vmatmul.mubr.msk.f32.gmra.mrb[86].mxu0 %vm901_vm1, %v6658_v29 }
 0x3b9   : > { %v2562_v53 = vmul.f32 %v2554_v2, %v2530_v58  ;;  %v2642_v32 = vsel %vm973_vm3, %v2639_v7, %v2641_v5  ;;  %v6672_v26 = vsel %vm973_vm3, %v2641_v5, %v2643_v54 }
 0x3ba   : > { %v5751_v56 = vpop.eup %5750  ;;  %v2542_v12 = vmul.f32 0.70710677, %v2526_v8  ;;  %5444 = vmatmul.mubr.msk.f32.vlgmr.msra.gmra.mrb[76].mxu1 %vm901_vm1, %v2642_v32  ;;  %v6680_v52 = vld [vmem:[#allocation2 + $0x20] sm:$0xff]  ;;  %v6682_v13 = vld [vmem:[#allocation2 + $0x28] sm:$0xff]  ;;  %v2534_v34 = vmul.f32 0.5, %v2526_v8 }
 0x3bb   : > { %2592 = vst.msk [vmem:[#allocation2 + $0x41] sm:$0xff] %vm901_vm1, %v2562_v53  ;;  %v2555_v7 = vadd.f32 1.0, %v5751_v56  ;;  %5494 = vmatpush3.msk.msra.mxu1 %vm1039_vm2, %v6618_v14  ;;  %5446 = vmatprep.mubr.msk.f32.mxu1 %vm901_vm1, %v6672_v26  ;;  %v2645_v33 = vrot.slane %v6680_v52, 1  ;;  %v2647_v19 = vrot.slane %v6682_v13, 1 }
 0x3bc   : > { %5756 = verf.f32 %v2542_v12  ;;  %5475 = vmatprep.mubr.msk.f32.mxu0 %vm901_vm1, %v6680_v52  ;;  %5545 = vmatprep.subr.msk.mxu1 %vm1039_vm2, %v6677_v11 }
 0x3bd   : > { %v2563_v20 = vmul.f32 %v2555_v7, %v2531_v31  ;;  %5476 = vmatmul.mubr.msk.f32.gmra.mrb[88].mxu0 %vm901_vm1, %v6682_v13  ;;  %v6698_v14 = vsel %vm973_vm3, %v2643_v54, %v2645_v33  ;;  %v6701_v47 = vsel %vm973_vm3, %v2645_v33, %v2647_v19 }
 0x3be   : > { %v5753_v16 = vpop.eup %5752  ;;  %5447 = vmatmul.mubr.msk.f32.gmra.mrb[78].mxu1 %vm901_vm1, %v6698_v14  ;;  %v6705_v24 = vld [vmem:[#allocation2 + $0x30] sm:$0xff]  ;;  %v6707_v17 = vld [vmem:[#allocation2 + $0x38] sm:$0xff] }
 0x3bf   : > { %2593 = vst.msk [vmem:[#allocation2 + $0x51] sm:$0xff] %vm901_vm1, %v2563_v20  ;;  %v2556_v4 = vadd.f32 1.0, %v5753_v16  ;;  %5449 = vmatprep.mubr.msk.f32.mxu1 %vm901_vm1, %v6701_v47  ;;  %5478 = vmatprep.mubr.msk.f32.mxu0 %vm901_vm1, %v6705_v24  ;;  %v2649_v42 = vrot.slane %v6705_v24, 1  ;;  %v2651_v9 = vrot.slane %v6707_v17, 1  ;;  %v3020_v16 = vrot.slane %v6656_v48, 2 }
 0x3c1   : > { %v2564_v55 = vmul.f32 %v2556_v4, %v2532_v46  ;;  %5479 = vmatmul.mubr.msk.f32.gmra.mrb[90].mxu0 %vm901_vm1, %v6707_v17  ;;  %v6719_v3 = vsel %vm973_vm3, %v2647_v19, %v2649_v42  ;;  %v6722_v22 = vsel %vm973_vm3, %v2649_v42, %v2651_v9  ;;  %v6827_v4 = vld [vmem:[%s7201_s8 + $0x1c] sm:$0xf]  ;;  %v3022_v42 = vrot.slane %v6658_v29, 2 }
 0x3c2   : > { %v5755_v15 = vpop.eup %5754  ;;  %5450 = vmatmul.mubr.msk.f32.gmra.mrb[80].mxu1 %vm901_vm1, %v6719_v3  ;;  %v6726_v59 = vld [vmem:[#allocation2 + $0x40] sm:$0xff]  ;;  %v6728_v62 = vld [vmem:[#allocation2 + $0x48] sm:$0xff] }
 0x3c3   : > { %2594 = vst.msk [vmem:[#allocation2 + $0x61] sm:$0xff] %vm901_vm1, %v2564_v55  ;;  %v2557_v60 = vadd.f32 1.0, %v5755_v15  ;;  %5452 = vmatprep.mubr.msk.f32.mxu1 %vm901_vm1, %v6722_v22  ;;  %5481 = vmatprep.mubr.msk.f32.mxu0 %vm901_vm1, %v6726_v59  ;;  %v2653_v36 = vrot.slane %v6726_v59, 1  ;;  %v2655_v44 = vrot.slane %v6728_v62, 1 }
 0x3c5   : > { %v2565_v21 = vmul.f32 %v2557_v60, %v2533_v27  ;;  %5482 = vmatmul.mubr.msk.f32.gmra.mrb[92].mxu0 %vm901_vm1, %v6728_v62  ;;  %v6740_v30 = vsel %vm973_vm3, %v2651_v9, %v2653_v36  ;;  %v6743_v61 = vsel %vm973_vm3, %v2653_v36, %v2655_v44  ;;  %v6849_v9 = vld [vmem:[%s7201_s8 + $0x18] sm:$0xf]  ;;  %v3032_v27 = vrot.slane %v6726_v59, 2 }
 0x3c6   : > { %v5757_v35 = vpop.eup %5756  ;;  %5453 = vmatmul.mubr.msk.f32.gmra.mrb[82].mxu1 %vm901_vm1, %v6740_v30  ;;  %v6747_v25 = vld [vmem:[#allocation2 + $0x50] sm:$0xff]  ;;  %v6749_v63 = vld [vmem:[#allocation2 + $0x58] sm:$0xff]  ;;  %v3034_v36 = vrot.slane %v6728_v62, 2 }
 0x3c7   : > { %2595 = vst.msk [vmem:[#allocation2 + $0x71] sm:$0xff] %vm901_vm1, %v2565_v21  ;;  %v2558_v23 = vadd.f32 1.0, %v5757_v35  ;;  %5455 = vmatprep.mubr.msk.f32.mxu1 %vm901_vm1, %v6743_v61  ;;  %5484 = vmatprep.mubr.msk.f32.mxu0 %vm901_vm1, %v6747_v25  ;;  %v2657_v57 = vrot.slane %v6747_v25, 1  ;;  %v2659_v28 = vrot.slane %v6749_v63, 1  ;;  %v3036_v21 = vrot.slane %v6747_v25, 2 }
 0x3c8   : > { %v6901_v35 = vsel %vm1354_vm4, %v3032_v27, %v3034_v36 }
 0x3c9   : > { %v2566_v10 = vmul.f32 %v2558_v23, %v2534_v34  ;;  %5485 = vmatmul.mubr.msk.f32.gmra.mrb[94].mxu0 %vm901_vm1, %v6749_v63  ;;  %v6761_v18 = vsel %vm973_vm3, %v2655_v44, %v2657_v57  ;;  %v6764_v6 = vsel %vm973_vm3, %v2657_v57, %v2659_v28  ;;  %v3038_v34 = vrot.slane %v6749_v63, 2 }
 0x3ca   : > { %5456 = vmatmul.mubr.msk.f32.gmra.mrb[84].mxu1 %vm901_vm1, %v6761_v18  ;;  %v6768_v58 = vld [vmem:[#allocation2 + $0x60] sm:$0xff]  ;;  %v6770_v2 = vld [vmem:[#allocation2 + $0x68] sm:$0xff]  ;;  %v6909_v23 = vsel %vm1354_vm4, %v3034_v36, %v3036_v21 }
 0x3cb   : > { %2596 = vst.msk [vmem:[#allocation2 + $0x81] sm:$0xff] %vm901_vm1, %v2566_v10  ;;  %5458 = vmatprep.mubr.msk.f32.mxu1 %vm901_vm1, %v6764_v6  ;;  %5487 = vmatprep.mubr.msk.f32.mxu0 %vm901_vm1, %v6768_v58  ;;  %v2661_v5 = vrot.slane %v6768_v58, 1  ;;  %v2663_v54 = vrot.slane %v6770_v2, 1  ;;  %v3040_v57 = vrot.slane %v6768_v58, 2  ;;  %v3042_v10 = vrot.slane %v6770_v2, 2 }
 0x3cd   : > { %5488 = vmatmul.mubr.msk.f32.gmra.mrb[96].mxu0 %vm901_vm1, %v6770_v2  ;;  %v6782_v8 = vsel %vm973_vm3, %v2659_v28, %v2661_v5  ;;  %v6785_v53 = vsel %vm973_vm3, %v2661_v5, %v2663_v54  ;;  %v6917_v28 = vsel %vm1354_vm4, %v3036_v21, %v3038_v34  ;;  %v6925_v5 = vsel %vm1354_vm4, %v3038_v34, %v3040_v57 }
 0x3ce   : > { %5459 = vmatmul.mubr.msk.f32.gmra.mrb[86].mxu1 %vm901_vm1, %v6782_v8  ;;  %v6789_v32 = vld [vmem:[#allocation2 + $0x70] sm:$0xff]  ;;  %v6791_v56 = vld [vmem:[#allocation2 + $0x78] sm:$0xff] }
 0x3cf   : > { %5461 = vmatprep.mubr.msk.f32.mxu1 %vm901_vm1, %v6785_v53  ;;  %5490 = vmatprep.mubr.msk.f32.mxu0 %vm901_vm1, %v6789_v32  ;;  %v2665_v12 = vrot.slane %v6789_v32, 1  ;;  %v2667_v31 = vrot.slane %v6791_v56, 1 }
 0x3d1   : > { %5491 = vmatmul.mubr.msk.f32.gmra.mrb[98].mxu0 %vm901_vm1, %v6791_v56  ;;  %v6802_v7 = vsel %vm973_vm3, %v2663_v54, %v2665_v12  ;;  %v6805_v33 = vsel %vm973_vm3, %v2665_v12, %v2667_v31  ;;  %v3044_v54 = vrot.slane %v6789_v32, 2  ;;  %v6933_v12 = vsel %vm1354_vm4, %v3040_v57, %v3042_v10 }
 0x3d2   : > { %5521 = vmatprep.mubr.msk.f32.mxu0 %vm901_vm1, %v6656_v48  ;;  %5462 = vmatmul.mubr.msk.f32.gmra.mrb[88].mxu1 %vm901_vm1, %v6802_v7  ;;  %v6811_v19 = vld [vmem:[#allocation2 + $0x80] sm:$0xff]  ;;  %v3021_v48 = vsel %vm1354_vm4, %v3018_v0, %v3020_v16  ;;  %v3028_v0 = vrot.slane %v6705_v24, 2 }
 0x3d3   : > { %5464 = vmatprep.mubr.msk.f32.mxu1 %vm901_vm1, %v6805_v33  ;;  %v2669_v20 = vrot.slane %v6811_v19, 1 }
 0x3d5   : > { %5522 = vmatmul.mubr.msk.f32.vlgmr.msra.gmra.mrb[100].mxu0 %vm901_vm1, %v6658_v29  ;;  %v6822_v46 = vsel %vm973_vm3, %v2667_v31, %v2669_v20  ;;  %v3024_v29 = vrot.slane %v6680_v52, 2  ;;  %v3046_v31 = vrot.slane %v6791_v56, 2 }
 0x3d6   : > { %5524 = vmatprep.mubr.msk.f32.mxu0 %vm901_vm1, %v6680_v52  ;;  %5465 = vmatmul.mubr.msk.f32.gmra.mrb[90].mxu1 %vm901_vm1, %v6822_v46 }
 0x3d7   : > { %5495 = vmatprep.mubr.msk.f32.mxu1 %vm901_vm1, %v6633_v1  ;;  %5572 = vmatpush3.msk.msra.mxu0 %vm1039_vm2, %v6638_v50  ;;  %v3023_v1 = vsel %vm1354_vm4, %v3020_v16, %v3022_v42  ;;  %v3026_v50 = vrot.slane %v6682_v13, 2  ;;  %v3025_v49 = vsel %vm1354_vm4, %v3022_v42, %v3024_v29  ;;  %v6938_v16 = vld [vmem:[#allocation2 + $0x88] sm:$0xff]  ;;  %v6943_v42 = vsel %vm1354_vm4, %v3042_v10, %v3044_v54 }
 0x3d8   : > { %5623 = vmatprep.subr.msk.mxu0 %vm1039_vm2, %v6827_v4 }
 0x3d9   : > { %5525 = vmatmul.mubr.msk.f32.gmra.mrb[102].mxu0 %vm901_vm1, %v6682_v13  ;;  %v6869_v55 = vsel %vm1354_vm4, %v3024_v29, %v3026_v50  ;;  %v6877_v15 = vsel %vm1354_vm4, %v3026_v50, %v3028_v0  ;;  %v6950_v29 = vsel %vm1354_vm4, %v3044_v54, %v3046_v31 }
 0x3da   : > { %5527 = vmatprep.mubr.msk.f32.mxu0 %vm901_vm1, %v6705_v24  ;;  %5496 = vmatmul.mubr.msk.f32.vlgmr.msra.gmra.mrb[92].mxu1 %vm901_vm1, %v3021_v48  ;;  %v3048_v48 = vrot.slane %v6811_v19, 2 }
 0x3db   : > { %5546 = vmatpush3.msk.msra.mxu1 %vm1039_vm2, %v6677_v11  ;;  %5498 = vmatprep.mubr.msk.f32.mxu1 %vm901_vm1, %v3023_v1  ;;  %v3030_v11 = vrot.slane %v6707_v17, 2 }
 0x3dc   : > { %5597 = vmatprep.subr.msk.mxu1 %vm1039_vm2, %v6849_v9  ;;  %v6956_v50 = vsel %vm1354_vm4, %v3046_v31, %v3048_v48 }
 0x3dd   : > { %5528 = vmatmul.mubr.msk.f32.gmra.mrb[104].mxu0 %vm901_vm1, %v6707_v17  ;;  %v6885_v60 = vsel %vm1354_vm4, %v3028_v0, %v3030_v11  ;;  %v6893_v44 = vsel %vm1354_vm4, %v3030_v11, %v3032_v27  ;;  %v3388_v0 = vrot.slane %v6938_v16, 1 }
 0x3de   : > { %5530 = vmatprep.mubr.msk.f32.mxu0 %vm901_vm1, %v6726_v59  ;;  %5499 = vmatmul.mubr.msk.f32.gmra.mrb[94].mxu1 %vm901_vm1, %v3025_v49 }
 0x3df   : > { %5501 = vmatprep.mubr.msk.f32.mxu1 %vm901_vm1, %v6869_v55  ;;  %v3389_v21 = vsel %vm973_vm3, %v2669_v20, %v3388_v0 }
 0x3e1   : > { %5531 = vmatmul.mubr.msk.f32.gmra.mrb[106].mxu0 %vm901_vm1, %v6728_v62 }
 0x3e2   : > { %5533 = vmatprep.mubr.msk.f32.mxu0 %vm901_vm1, %v6747_v25  ;;  %5502 = vmatmul.mubr.msk.f32.gmra.mrb[96].mxu1 %vm901_vm1, %v6877_v15 }
 0x3e3   : > { %5504 = vmatprep.mubr.msk.f32.mxu1 %vm901_vm1, %v6885_v60 }
 0x3e5   : > { %5534 = vmatmul.mubr.msk.f32.gmra.mrb[108].mxu0 %vm901_vm1, %v6749_v63 }
 0x3e6   : > { %5536 = vmatprep.mubr.msk.f32.mxu0 %vm901_vm1, %v6768_v58  ;;  %5505 = vmatmul.mubr.msk.f32.gmra.mrb[98].mxu1 %vm901_vm1, %v6893_v44 }
 0x3e7   : > { %5507 = vmatprep.mubr.msk.f32.mxu1 %vm901_vm1, %v6901_v35 }
 0x3e9   : > { %5537 = vmatmul.mubr.msk.f32.gmra.mrb[110].mxu0 %vm901_vm1, %v6770_v2 }
 0x3ea   : > { %5539 = vmatprep.mubr.msk.f32.mxu0 %vm901_vm1, %v6789_v32  ;;  %5508 = vmatmul.mubr.msk.f32.gmra.mrb[100].mxu1 %vm901_vm1, %v6909_v23 }
 0x3eb   : > { %5510 = vmatprep.mubr.msk.f32.mxu1 %vm901_vm1, %v6917_v28 }
 0x3ed   : > { %5540 = vmatmul.mubr.msk.f32.gmra.mrb[112].mxu0 %vm901_vm1, %v6791_v56 }
 0x3ee   : > { %5542 = vmatprep.mubr.msk.f32.mxu0 %vm901_vm1, %v6811_v19  ;;  %5511 = vmatmul.mubr.msk.f32.gmra.mrb[102].mxu1 %vm901_vm1, %v6925_v5 }
 0x3ef   : > { %5513 = vmatprep.mubr.msk.f32.mxu1 %vm901_vm1, %v6933_v12 }
 0x3f1   : > { %5543 = vmatmul.mubr.msk.f32.gmra.mrb[114].mxu0 %vm901_vm1, %v6938_v16 }
 0x3f2   : > { %5573 = vmatprep.mubr.msk.f32.mxu0 %vm901_vm1, %v3023_v1  ;;  %5514 = vmatmul.mubr.msk.f32.gmra.mrb[104].mxu1 %vm901_vm1, %v6943_v42  ;;  %v4807_v1 = vld [vmem:[%s7201_s8 + $0x20] sm:$0xf] }
 0x3f3   : > { %5516 = vmatprep.mubr.msk.f32.mxu1 %vm901_vm1, %v6950_v29 }
 0x3f5   : > { %5574 = vmatmul.mubr.msk.f32.vlgmr.msra.gmra.mrb[116].mxu0 %vm901_vm1, %v3025_v49  ;;  %v5471_v49 = vpop.f32.mrb[84].mxu0 }
 0x3f6   : > { %5576 = vmatprep.mubr.msk.f32.mxu0 %vm901_vm1, %v6869_v55  ;;  %5517 = vmatmul.mubr.msk.f32.gmra.mrb[106].mxu1 %vm901_vm1, %v6956_v50  ;;  %v7026_v11 = vpop.f32.mrb[85].mxu0 }
 0x3f7   : > { %5547 = vmatprep.mubr.msk.f32.mxu1 %vm901_vm1, %v6672_v26  ;;  %5624 = vmatpush3.msk.msra.mxu0 %vm1039_vm2, %v6827_v4  ;;  %v3546_v26 = vrot.slane %v6938_v16, 2 }
 0x3f9   : > { %5577 = vmatmul.mubr.msk.f32.gmra.mrb[118].mxu0 %vm901_vm1, %v6877_v15 }
 0x3fa   : > { %5579 = vmatprep.mubr.msk.f32.mxu0 %vm901_vm1, %v6885_v60  ;;  %5548 = vmatmul.mubr.msk.f32.vlgmr.msra.gmra.mrb[108].mxu1 %vm901_vm1, %v6698_v14  ;;  %v7007_v14 = vld [vmem:[#allocation2 + $0x90] sm:$0xff] }
 0x3fb   : > { %5598 = vmatpush3.msk.msra.mxu1 %vm1039_vm2, %v6849_v9  ;;  %5550 = vmatprep.mubr.msk.f32.mxu1 %vm901_vm1, %v6701_v47  ;;  %v3548_v4 = vrot.slane %v7007_v14, 2  ;;  %v7019_v9 = vsel %vm1354_vm4, %v3048_v48, %v3546_v26  ;;  %v3390_v36 = vrot.slane %v7007_v14, 1 }
 0x3fc   : > { %5649 = vmatprep.subr.msk.mxu1 %vm1039_vm2, %v4807_v1 }
 0x3fd   : > { %5580 = vmatmul.mubr.msk.f32.gmra.mrb[120].mxu0 %vm901_vm1, %v6893_v44  ;;  %v7033_v27 = vsel %vm1354_vm4, %v3546_v26, %v3548_v4  ;;  %v3391_v34 = vsel %vm973_vm3, %v3388_v0, %v3390_v36 }
 0x3fe   : > { %5582 = vmatprep.mubr.msk.f32.mxu0 %vm901_vm1, %v6901_v35  ;;  %5551 = vmatmul.mubr.msk.f32.gmra.mrb[110].mxu1 %vm901_vm1, %v6719_v3 }
 0x3ff   : > { %5553 = vmatprep.mubr.msk.f32.mxu1 %vm901_vm1, %v6722_v22 }
 0x401   : > { %5583 = vmatmul.mubr.msk.f32.gmra.mrb[122].mxu0 %vm901_vm1, %v6909_v23 }
 0x402   : > { %5585 = vmatprep.mubr.msk.f32.mxu0 %vm901_vm1, %v6917_v28  ;;  %5554 = vmatmul.mubr.msk.f32.gmra.mrb[112].mxu1 %vm901_vm1, %v6740_v30 }
 0x403   : > { %5556 = vmatprep.mubr.msk.f32.mxu1 %vm901_vm1, %v6743_v61 }
 0x405   : > { %5586 = vmatmul.mubr.msk.f32.gmra.mrb[124].mxu0 %vm901_vm1, %v6925_v5 }
 0x406   : > { %5588 = vmatprep.mubr.msk.f32.mxu0 %vm901_vm1, %v6933_v12  ;;  %5557 = vmatmul.mubr.msk.f32.gmra.mrb[114].mxu1 %vm901_vm1, %v6761_v18 }
 0x407   : > { %5559 = vmatprep.mubr.msk.f32.mxu1 %vm901_vm1, %v6764_v6 }
 0x409   : > { %5589 = vmatmul.mubr.msk.f32.gmra.mrb[126].mxu0 %vm901_vm1, %v6943_v42 }
 0x40a   : > { %5591 = vmatprep.mubr.msk.f32.mxu0 %vm901_vm1, %v6950_v29  ;;  %5560 = vmatmul.mubr.msk.f32.gmra.mrb[116].mxu1 %vm901_vm1, %v6782_v8 }
 0x40b   : > { %5562 = vmatprep.mubr.msk.f32.mxu1 %vm901_vm1, %v6785_v53 }
 0x40d   : > { %5592 = vmatmul.mubr.msk.f32.gmra.mrb[128].mxu0 %vm901_vm1, %v6956_v50 }
 0x40e   : > { %5594 = vmatprep.mubr.msk.f32.mxu0 %vm901_vm1, %v7019_v9  ;;  %5563 = vmatmul.mubr.msk.f32.gmra.mrb[118].mxu1 %vm901_vm1, %v6802_v7 }
 0x40f   : > { %5565 = vmatprep.mubr.msk.f32.mxu1 %vm901_vm1, %v6805_v33 }
 0x411   : > { %5595 = vmatmul.mubr.msk.f32.gmra.mrb[130].mxu0 %vm901_vm1, %v7033_v27 }
 0x412   : > { %5625 = vmatprep.mubr.msk.f32.mxu0 %vm901_vm1, %v6701_v47  ;;  %5566 = vmatmul.mubr.msk.f32.gmra.mrb[120].mxu1 %vm901_vm1, %v6822_v46  ;;  %v2617_v47 = vld [vmem:[#allocation2 + $0xa0] sm:$0xff] }
 0x413   : > { %5568 = vmatprep.mubr.msk.f32.mxu1 %vm901_vm1, %v3389_v21 }
 0x415   : > { %5626 = vmatmul.mubr.msk.f32.vlgmr.msra.gmra.mrb[132].mxu0 %vm901_vm1, %v6719_v3 }
 0x416   : > { %5628 = vmatprep.mubr.msk.f32.mxu0 %vm901_vm1, %v6722_v22  ;;  %5569 = vmatmul.mubr.msk.f32.gmra.mrb[122].mxu1 %vm901_vm1, %v3391_v34 }
 0x417   : > { %5599 = vmatprep.mubr.msk.f32.mxu1 %vm901_vm1, %v6680_v52  ;;  %v2616_v52 = vld [vmem:[#allocation2 + $0x98] sm:$0xff] }
 0x418   : > { %v4018_v22 = vrot.slane %v2616_v52, 2 }
 0x419   : > { %5629 = vmatmul.mubr.msk.f32.gmra.mrb[134].mxu0 %vm901_vm1, %v6740_v30 }
 0x41a   : > { %5631 = vmatprep.mubr.msk.f32.mxu0 %vm901_vm1, %v6743_v61  ;;  %5600 = vmatmul.mubr.msk.f32.vlgmr.msra.gmra.mrb[124].mxu1 %vm901_vm1, %v6682_v13  ;;  %v3860_v13 = vrot.slane %v2616_v52, 1 }
 0x41b   : > { %5650 = vmatpush3.msk.msra.mxu1 %vm1039_vm2, %v4807_v1  ;;  %5602 = vmatprep.mubr.msk.f32.mxu1 %vm901_vm1, %v6705_v24  ;;  %v3862_v24 = vrot.slane %v2617_v47, 1 }
 0x41d   : > { %5632 = vmatmul.mubr.msk.f32.gmra.mrb[136].mxu0 %vm901_vm1, %v6761_v18  ;;  %v3863_v3 = vsel %vm973_vm3, %v3860_v13, %v3862_v24 }
 0x41e   : > { %5634 = vmatprep.mubr.msk.f32.mxu0 %vm901_vm1, %v6764_v6  ;;  %5603 = vmatmul.mubr.msk.f32.gmra.mrb[126].mxu1 %vm901_vm1, %v6707_v17  ;;  %v3861_v17 = vsel %vm973_vm3, %v3390_v36, %v3860_v13 }
 0x41f   : > { %5605 = vmatprep.mubr.msk.f32.mxu1 %vm901_vm1, %v6726_v59  ;;  %v4020_v59 = vrot.slane %v2617_v47, 2 }
 0x421   : > { %5635 = vmatmul.mubr.msk.f32.gmra.mrb[138].mxu0 %vm901_vm1, %v6782_v8  ;;  %v4021_v30 = vsel %vm1354_vm4, %v4018_v22, %v4020_v59 }
 0x422   : > { %5637 = vmatprep.mubr.msk.f32.mxu0 %vm901_vm1, %v6785_v53  ;;  %5606 = vmatmul.mubr.msk.f32.gmra.mrb[128].mxu1 %vm901_vm1, %v6728_v62  ;;  %v4019_v62 = vsel %vm1354_vm4, %v3548_v4, %v4018_v22 }
 0x423   : > { %5608 = vmatprep.mubr.msk.f32.mxu1 %vm901_vm1, %v6747_v25 }
 0x425   : > { %5638 = vmatmul.mubr.msk.f32.gmra.mrb[140].mxu0 %vm901_vm1, %v6802_v7 }
 0x426   : > { %5640 = vmatprep.mubr.msk.f32.mxu0 %vm901_vm1, %v6805_v33  ;;  %5609 = vmatmul.mubr.msk.f32.gmra.mrb[130].mxu1 %vm901_vm1, %v6749_v63 }
 0x427   : > { %5611 = vmatprep.mubr.msk.f32.mxu1 %vm901_vm1, %v6768_v58 }
 0x429   : > { %5641 = vmatmul.mubr.msk.f32.gmra.mrb[142].mxu0 %vm901_vm1, %v6822_v46 }
 0x42a   : > { %5643 = vmatprep.mubr.msk.f32.mxu0 %vm901_vm1, %v3389_v21  ;;  %5612 = vmatmul.mubr.msk.f32.gmra.mrb[132].mxu1 %vm901_vm1, %v6770_v2 }
 0x42b   : > { %5614 = vmatprep.mubr.msk.f32.mxu1 %vm901_vm1, %v6789_v32 }
 0x42d   : > { %5644 = vmatmul.mubr.msk.f32.gmra.mrb[144].mxu0 %vm901_vm1, %v3391_v34 }
 0x42e   : > { %5615 = vmatmul.mubr.msk.f32.gmra.mrb[134].mxu1 %vm901_vm1, %v6791_v56  ;;  %5646 = vmatprep.mubr.msk.f32.mxu0 %vm901_vm1, %v3861_v17 }
 0x42f   : > { %5617 = vmatprep.mubr.msk.f32.mxu1 %vm901_vm1, %v6811_v19 }
 0x431   : > { %5647 = vmatmul.mubr.msk.f32.gmra.mrb[146].mxu0 %vm901_vm1, %v3863_v3 }
 0x432   : > { %5618 = vmatmul.mubr.msk.f32.gmra.mrb[136].mxu1 %vm901_vm1, %v6938_v16 }
 0x433   : > { %5620 = vmatprep.mubr.msk.f32.mxu1 %vm901_vm1, %v7007_v14 }
 0x436   : > { %5621 = vmatmul.mubr.msk.f32.gmra.mrb[138].mxu1 %vm901_vm1, %v2616_v52 }
 0x437   : > { %5651 = vmatprep.mubr.msk.f32.mxu1 %vm901_vm1, %v6869_v55 }
 0x43a   : > { %5652 = vmatmul.mubr.msk.f32.vlgmr.msra.gmra.mrb[140].mxu1 %vm901_vm1, %v6877_v15 }
 0x43b   : > { %5654 = vmatprep.mubr.msk.f32.mxu1 %vm901_vm1, %v6885_v60 }
 0x43e   : > { %5655 = vmatmul.mubr.msk.f32.gmra.mrb[142].mxu1 %vm901_vm1, %v6893_v44 }
 0x43f   : > { %5657 = vmatprep.mubr.msk.f32.mxu1 %vm901_vm1, %v6901_v35 }
 0x442   : > { %5658 = vmatmul.mubr.msk.f32.gmra.mrb[144].mxu1 %vm901_vm1, %v6909_v23 }
 0x443   : > { %5660 = vmatprep.mubr.msk.f32.mxu1 %vm901_vm1, %v6917_v28 }
 0x446   : > { %5661 = vmatmul.mubr.msk.f32.gmra.mrb[146].mxu1 %vm901_vm1, %v6925_v5  ;;  %v4245_v5 = vld [vmem:[%s7203_s10] sm:$0xf] }
 0x447   : > { %5663 = vmatprep.mubr.msk.f32.mxu1 %vm901_vm1, %v6933_v12  ;;  %5675 = vmatprep.subr.msk.mxu0 %vm1039_vm2, %v4245_v5 }
 0x448   : > { %5676 = vmatpush3.msk.msra.mxu0 %vm1039_vm2, %v4245_v5 }
 0x44a   : > { %5664 = vmatmul.mubr.msk.f32.gmra.mrb[148].mxu1 %vm901_vm1, %v6943_v42 }
 0x44b   : > { %5666 = vmatprep.mubr.msk.f32.mxu1 %vm901_vm1, %v6950_v29 }
 0x44e   : > { %5667 = vmatmul.mubr.msk.f32.gmra.mrb[150].mxu1 %vm901_vm1, %v6956_v50 }
 0x44f   : > { %5669 = vmatprep.mubr.msk.f32.mxu1 %vm901_vm1, %v7019_v9 }
 0x452   : > { %5670 = vmatmul.mubr.msk.f32.gmra.mrb[152].mxu1 %vm901_vm1, %v7033_v27 }
 0x453   : > { %5672 = vmatprep.mubr.msk.f32.mxu1 %vm901_vm1, %v4019_v62 }
 0x456   : > { %5673 = vmatmul.mubr.msk.f32.gmra.mrb[154].mxu1 %vm901_vm1, %v4021_v30 }
 0x48b   : > { %v5474_v61 = vpop.f32.mrb[86].mxu0 }
 0x48c   : > { %v2953_v25 = vpop.f32.mrb[87].mxu0 }
 0x48d   : > { %v5445_v63 = vpop.f32.mrb[76].mxu1 }
 0x48e   : > { %v2772_v18 = vpop.f32.mrb[77].mxu1 }
 0x48f   : > { %v2945_v6 = vadd.f32 %v7026_v11, %v2772_v18 }
 0x490   : > { %v5477_v58 = vpop.f32.mrb[88].mxu0 }
 0x491   : > { %v2962_v2 = vpop.f32.mrb[89].mxu0  ;;  %v5448_v8 = vpop.f32.mrb[78].mxu1 }
 0x492   : > { %v2781_v53 = vpop.f32.mrb[79].mxu1 }
 0x493   : > { %v2954_v32 = vadd.f32 %v2953_v25, %v2781_v53 }
 0x494   : > { %v5480_v56 = vpop.f32.mrb[90].mxu0 }
 0x495   : > { %v2971_v7 = vpop.f32.mrb[91].mxu0  ;;  %v5451_v33 = vpop.f32.mrb[80].mxu1 }
 0x496   : > { %v2790_v19 = vpop.f32.mrb[81].mxu1 }
 0x497   : > { %v2963_v20 = vadd.f32 %v2962_v2, %v2790_v19 }
 0x498   : > { %v5483_v46 = vpop.f32.mrb[92].mxu0 }
 0x499   : > { %v2980_v55 = vpop.f32.mrb[93].mxu0  ;;  %v5454_v15 = vpop.f32.mrb[82].mxu1 }
 0x49a   : > { %v2799_v60 = vpop.f32.mrb[83].mxu1 }
 0x49b   : > { %v2972_v44 = vadd.f32 %v2971_v7, %v2799_v60 }
 0x49c   : > { %v5486_v35 = vpop.f32.mrb[94].mxu0 }
 0x49d   : > { %v2989_v23 = vpop.f32.mrb[95].mxu0  ;;  %v5457_v57 = vpop.f32.mrb[84].mxu1 }
 0x49e   : > { %v2808_v28 = vpop.f32.mrb[85].mxu1 }
 0x49f   : > { %v2981_v10 = vadd.f32 %v2980_v55, %v2808_v28 }
 0x4a0   : > { %v5489_v54 = vpop.f32.mrb[96].mxu0 }
 0x4a1   : > { %v2998_v12 = vpop.f32.mrb[97].mxu0  ;;  %v5460_v31 = vpop.f32.mrb[86].mxu1 }
 0x4a2   : > { %v2817_v16 = vpop.f32.mrb[87].mxu1 }
 0x4a3   : > { %v2990_v42 = vadd.f32 %v2989_v23, %v2817_v16 }
 0x4a4   : > { %v5492_v48 = vpop.f32.mrb[98].mxu0 }
 0x4a5   : > { %v3007_v29 = vpop.f32.mrb[99].mxu0  ;;  %v5463_v50 = vpop.f32.mrb[88].mxu1 }
 0x4a6   : > { %v2826_v1 = vpop.f32.mrb[89].mxu1 }
 0x4a7   : > { %v2999_v26 = vadd.f32 %v2998_v12, %v2826_v1 }
 0x4a8   : > { %v5523_v14 = vpop.f32.mrb[100].mxu0 }
 0x4a9   : > { %v3306_v4 = vpop.f32.mrb[101].mxu0  ;;  %v5466_v9 = vpop.f32.mrb[90].mxu1 }
 0x4aa   : > { %v2835_v49 = vpop.f32.mrb[91].mxu1 }
 0x4ab   : > { %v3008_v0 = vadd.f32 %v3007_v29, %v2835_v49 }
 0x4ac   : > { %v5526_v11 = vpop.f32.mrb[102].mxu0 }
 0x4ad   : > { %v3315_v27 = vpop.f32.mrb[103].mxu0  ;;  %v5497_v36 = vpop.f32.mrb[92].mxu1 }
 0x4ae   : > { %v3151_v21 = vpop.f32.mrb[93].mxu1 }
 0x4af   : > { %v3222_v34 = vadd.f32 %v3151_v21, %v2945_v6 }
 0x4b0   : > { %v5529_v52 = vpop.f32.mrb[104].mxu0 }
 0x4b1   : > { %v3324_v13 = vpop.f32.mrb[105].mxu0  ;;  %v5500_v47 = vpop.f32.mrb[94].mxu1  ;;  %v3377_v24 = vadd.f32 %v3306_v4, %v3222_v34 }
 0x4b2   : > { %v3160_v17 = vpop.f32.mrb[95].mxu1 }
 0x4b3   : > { %v3223_v3 = vadd.f32 %v3160_v17, %v2954_v32 }
 0x4b4   : > { %v5532_v22 = vpop.f32.mrb[106].mxu0 }
 0x4b5   : > { %v3333_v59 = vpop.f32.mrb[107].mxu0  ;;  %v5503_v62 = vpop.f32.mrb[96].mxu1  ;;  %v3378_v30 = vadd.f32 %v3315_v27, %v3223_v3 }
 0x4b6   : > { %v3169_v61 = vpop.f32.mrb[97].mxu1 }
 0x4b7   : > { %v3224_v25 = vadd.f32 %v3169_v61, %v2963_v20 }
 0x4b8   : > { %v5535_v63 = vpop.f32.mrb[108].mxu0 }
 0x4b9   : > { %v3342_v18 = vpop.f32.mrb[109].mxu0  ;;  %v5506_v58 = vpop.f32.mrb[98].mxu1  ;;  %v3379_v2 = vadd.f32 %v3324_v13, %v3224_v25 }
 0x4ba   : > { %v3178_v8 = vpop.f32.mrb[99].mxu1 }
 0x4bb   : > { %v3225_v53 = vadd.f32 %v3178_v8, %v2972_v44 }
 0x4bc   : > { %v5538_v56 = vpop.f32.mrb[110].mxu0 }
 0x4bd   : > { %v3351_v6 = vpop.f32.mrb[111].mxu0  ;;  %v5509_v7 = vpop.f32.mrb[100].mxu1  ;;  %v3380_v33 = vadd.f32 %v3333_v59, %v3225_v53 }
 0x4be   : > { %v3187_v19 = vpop.f32.mrb[101].mxu1 }
 0x4bf   : > { %v3226_v46 = vadd.f32 %v3187_v19, %v2981_v10 }
 0x4c0   : > { %v5541_v55 = vpop.f32.mrb[112].mxu0 }
 0x4c1   : > { %v3360_v32 = vpop.f32.mrb[113].mxu0  ;;  %v5512_v15 = vpop.f32.mrb[102].mxu1  ;;  %v3381_v60 = vadd.f32 %v3342_v18, %v3226_v46 }
 0x4c2   : > { %v3196_v35 = vpop.f32.mrb[103].mxu1 }
 0x4c3   : > { %v3227_v23 = vadd.f32 %v3196_v35, %v2990_v42 }
 0x4c4   : > { %v5544_v57 = vpop.f32.mrb[114].mxu0 }
 0x4c5   : > { %v3369_v20 = vpop.f32.mrb[115].mxu0  ;;  %v5515_v28 = vpop.f32.mrb[104].mxu1  ;;  %v3382_v5 = vadd.f32 %v3351_v6, %v3227_v23 }
 0x4c6   : > { %v3205_v54 = vpop.f32.mrb[105].mxu1 }
 0x4c7   : > { %v3228_v12 = vadd.f32 %v3205_v54, %v2999_v26 }
 0x4c8   : > { %v5575_v31 = vpop.f32.mrb[116].mxu0 }
 0x4c9   : > { %v3623_v44 = vpop.f32.mrb[117].mxu0  ;;  %v5518_v16 = vpop.f32.mrb[106].mxu1  ;;  %v3383_v48 = vadd.f32 %v3360_v32, %v3228_v12 }
 0x4ca   : > { %v3214_v29 = vpop.f32.mrb[107].mxu1 }
 0x4cb   : > { %v3229_v50 = vadd.f32 %v3214_v29, %v3008_v0 }
 0x4cc   : > { %v5578_v1 = vpop.f32.mrb[118].mxu0 }
 0x4cd   : > { %v3632_v10 = vpop.f32.mrb[119].mxu0  ;;  %v5549_v14 = vpop.f32.mrb[108].mxu1  ;;  %v3384_v4 = vadd.f32 %v3369_v20, %v3229_v50 }
 0x4ce   : > { %v3465_v9 = vpop.f32.mrb[109].mxu1 }
 0x4cf   : > { %v3536_v49 = vadd.f32 %v3465_v9, %v3377_v24 }
 0x4d0   : > { %v5581_v11 = vpop.f32.mrb[120].mxu0 }
 0x4d1   : > { %v3641_v42 = vpop.f32.mrb[121].mxu0  ;;  %v5552_v27 = vpop.f32.mrb[110].mxu1  ;;  %v3694_v36 = vadd.f32 %v3623_v44, %v3536_v49 }
 0x4d2   : > { %v3474_v21 = vpop.f32.mrb[111].mxu1 }
 0x4d3   : > { %v3537_v34 = vadd.f32 %v3474_v21, %v3378_v30 }
 0x4d4   : > { %v5584_v52 = vpop.f32.mrb[122].mxu0 }
 0x4d5   : > { %v3650_v26 = vpop.f32.mrb[123].mxu0  ;;  %v5555_v13 = vpop.f32.mrb[112].mxu1  ;;  %v3695_v47 = vadd.f32 %v3632_v10, %v3537_v34 }
 0x4d6   : > { %v3483_v17 = vpop.f32.mrb[113].mxu1 }
 0x4d7   : > { %v3538_v3 = vadd.f32 %v3483_v17, %v3379_v2 }
 0x4d8   : > { %v5587_v22 = vpop.f32.mrb[124].mxu0 }
 0x4d9   : > { %v3659_v0 = vpop.f32.mrb[125].mxu0  ;;  %v5558_v59 = vpop.f32.mrb[114].mxu1  ;;  %v3696_v62 = vadd.f32 %v3641_v42, %v3538_v3 }
 0x4da   : > { %v3492_v61 = vpop.f32.mrb[115].mxu1 }
 0x4db   : > { %v3539_v25 = vadd.f32 %v3492_v61, %v3380_v33 }
 0x4dc   : > { %v5590_v63 = vpop.f32.mrb[126].mxu0 }
 0x4dd   : > { %v3668_v24 = vpop.f32.mrb[127].mxu0  ;;  %v5561_v18 = vpop.f32.mrb[116].mxu1  ;;  %v3697_v58 = vadd.f32 %v3650_v26, %v3539_v25 }
 0x4de   : > { %v3501_v8 = vpop.f32.mrb[117].mxu1 }
 0x4df   : > { %v3540_v53 = vadd.f32 %v3501_v8, %v3381_v60 }
 0x4e0   : > { %v5593_v56 = vpop.f32.mrb[128].mxu0 }
 0x4e1   : > { %v3677_v30 = vpop.f32.mrb[129].mxu0  ;;  %v5564_v6 = vpop.f32.mrb[118].mxu1  ;;  %v3698_v7 = vadd.f32 %v3659_v0, %v3540_v53 }
 0x4e2   : > { %v3510_v19 = vpop.f32.mrb[119].mxu1 }
 0x4e3   : > { %v3541_v46 = vadd.f32 %v3510_v19, %v3382_v5 }
 0x4e4   : > { %v5596_v55 = vpop.f32.mrb[130].mxu0 }
 0x4e5   : > { %v3686_v2 = vpop.f32.mrb[131].mxu0  ;;  %v5567_v32 = vpop.f32.mrb[120].mxu1  ;;  %v3699_v15 = vadd.f32 %v3668_v24, %v3541_v46 }
 0x4e6   : > { %v3519_v35 = vpop.f32.mrb[121].mxu1 }
 0x4e7   : > { %v3542_v23 = vadd.f32 %v3519_v35, %v3383_v48 }
 0x4e8   : > { %v5627_v57 = vpop.f32.mrb[132].mxu0 }
 0x4e9   : > { %v3937_v33 = vpop.f32.mrb[133].mxu0  ;;  %v5570_v20 = vpop.f32.mrb[122].mxu1  ;;  %v3700_v28 = vadd.f32 %v3677_v30, %v3542_v23 }
 0x4ea   : > { %v3528_v54 = vpop.f32.mrb[123].mxu1 }
 0x4eb   : > { %v3543_v12 = vadd.f32 %v3528_v54, %v3384_v4 }
 0x4ec   : > { %v5630_v31 = vpop.f32.mrb[134].mxu0 }
 0x4ed   : > { %v3946_v60 = vpop.f32.mrb[135].mxu0  ;;  %v5601_v44 = vpop.f32.mrb[124].mxu1  ;;  %v3701_v16 = vadd.f32 %v3686_v2, %v3543_v12 }
 0x4ee   : > { %v3778_v29 = vpop.f32.mrb[125].mxu1 }
 0x4ef   : > { %v3849_v50 = vadd.f32 %v3778_v29, %v3694_v36 }
 0x4f0   : > { %v5633_v1 = vpop.f32.mrb[136].mxu0 }
 0x4f1   : > { %v3955_v5 = vpop.f32.mrb[137].mxu0  ;;  %v5604_v10 = vpop.f32.mrb[126].mxu1  ;;  %v4008_v14 = vadd.f32 %v3937_v33, %v3849_v50 }
 0x4f2   : > { %v3787_v9 = vpop.f32.mrb[127].mxu1 }
 0x4f3   : > { %v3850_v49 = vadd.f32 %v3787_v9, %v3695_v47 }
 0x4f4   : > { %v5636_v11 = vpop.f32.mrb[138].mxu0 }
 0x4f5   : > { %v3964_v48 = vpop.f32.mrb[139].mxu0  ;;  %v5607_v42 = vpop.f32.mrb[128].mxu1  ;;  %v4009_v27 = vadd.f32 %v3946_v60, %v3850_v49 }
 0x4f6   : > { %v3796_v21 = vpop.f32.mrb[129].mxu1 }
 0x4f7   : > { %v3851_v34 = vadd.f32 %v3796_v21, %v3696_v62 }
 0x4f8   : > { %v5639_v52 = vpop.f32.mrb[140].mxu0 }
 0x4f9   : > { %v3973_v4 = vpop.f32.mrb[141].mxu0  ;;  %v5610_v26 = vpop.f32.mrb[130].mxu1  ;;  %v4010_v13 = vadd.f32 %v3955_v5, %v3851_v34 }
 0x4fa   : > { %v3805_v17 = vpop.f32.mrb[131].mxu1 }
 0x4fb   : > { %v3852_v3 = vadd.f32 %v3805_v17, %v3697_v58 }
 0x4fc   : > { %v5642_v22 = vpop.f32.mrb[142].mxu0 }
 0x4fd   : > { %v3982_v36 = vpop.f32.mrb[143].mxu0  ;;  %v5613_v0 = vpop.f32.mrb[132].mxu1  ;;  %v4011_v59 = vadd.f32 %v3964_v48, %v3852_v3 }
 0x4fe   : > { %v3814_v61 = vpop.f32.mrb[133].mxu1 }
 0x4ff   : > { %v3853_v25 = vadd.f32 %v3814_v61, %v3698_v7  ;;  %v4825_v7 = vld [vmem:[%s7202_s9] ss:$0 sm:$0xff] }
 0x500   : > { %v5645_v63 = vpop.f32.mrb[144].mxu0 }
 0x501   : > { %v3991_v47 = vpop.f32.mrb[145].mxu0  ;;  %v5616_v24 = vpop.f32.mrb[134].mxu1  ;;  %v4012_v18 = vadd.f32 %v3973_v4, %v3853_v25 }
 0x502   : > { %v3823_v8 = vpop.f32.mrb[135].mxu1 }
 0x503   : > { %v3854_v53 = vadd.f32 %v3823_v8, %v3699_v15 }
 0x504   : > { %v5648_v56 = vpop.f32.mrb[146].mxu0 }
 0x505   : > { %v5619_v62 = vpop.f32.mrb[136].mxu1  ;;  %v4000_v30 = vpop.f32.mrb[147].mxu0  ;;  %v4013_v6 = vadd.f32 %v3982_v36, %v3854_v53 }
 0x506   : > { %v3832_v19 = vpop.f32.mrb[137].mxu1 }
 0x507   : > { %v3855_v46 = vadd.f32 %v3832_v19, %v3700_v28 }
 0x509   : > { %v5622_v55 = vpop.f32.mrb[138].mxu1  ;;  %v4014_v58 = vadd.f32 %v3991_v47, %v3855_v46 }
 0x50a   : > { %v3841_v2 = vpop.f32.mrb[139].mxu1 }
 0x50b   : > { %v3856_v32 = vadd.f32 %v3841_v2, %v3701_v16 }
 0x50d   : > { %v4015_v35 = vadd.f32 %v4000_v30, %v3856_v32  ;;  %v5653_v23 = vpop.f32.mrb[140].mxu1 }
 0x50e   : > { %v4095_v57 = vpop.f32.mrb[141].mxu1 }
 0x50f   : > { %v4166_v33 = vadd.f32 %v4095_v57, %v4008_v14 }
 0x511   : > { %v4181_v20 = vadd.f32 %v4825_v7, %v4166_v33  ;;  %v5656_v15 = vpop.f32.mrb[142].mxu1 }
 0x512   : > { %v4104_v54 = vpop.f32.mrb[143].mxu1 }
 0x513   : > { %4189 = vst.msk [vmem:[#allocation3] sm:$0xff] %vm901_vm1, %v4181_v20  ;;  %v4167_v12 = vadd.f32 %v4104_v54, %v4009_v27 }
 0x515   : > { %v4182_v31 = vadd.f32 %v4825_v7, %v4167_v12  ;;  %v5659_v28 = vpop.f32.mrb[144].mxu1 }
 0x516   : > { %v4113_v60 = vpop.f32.mrb[145].mxu1 }
 0x517   : > { %4190 = vst.msk [vmem:[#allocation3 + $0x8] sm:$0xff] %vm901_vm1, %v4182_v31  ;;  %v4168_v44 = vadd.f32 %v4113_v60, %v4010_v13 }
 0x519   : > { %v4183_v16 = vadd.f32 %v4825_v7, %v4168_v44  ;;  %v5662_v29 = vpop.f32.mrb[146].mxu1 }
 0x51a   : > { %v4122_v50 = vpop.f32.mrb[147].mxu1  ;;  %v4197_v1 = vld [vmem:[#allocation3] sm:$0xff] }
 0x51b   : > { %4191 = vst.msk [vmem:[#allocation3 + $0x10] sm:$0xff] %vm901_vm1, %v4183_v16  ;;  %v4169_v5 = vadd.f32 %v4122_v50, %v4011_v59  ;;  %v4213_v10 = vmul.f32 0.70710677, %v4197_v1  ;;  %v4205_v61 = vmul.f32 0.5, %v4197_v1 }
 0x51d   : > { %v4184_v14 = vadd.f32 %v4825_v7, %v4169_v5  ;;  %v5665_v9 = vpop.f32.mrb[148].mxu1  ;;  %5758 = verf.f32 %v4213_v10 }
 0x51e   : > { %v4131_v49 = vpop.f32.mrb[149].mxu1  ;;  %v4198_v11 = vld [vmem:[#allocation3 + $0x8] sm:$0xff] }
 0x51f   : > { %4192 = vst.msk [vmem:[#allocation3 + $0x18] sm:$0xff] %vm901_vm1, %v4184_v14  ;;  %v4170_v48 = vadd.f32 %v4131_v49, %v4012_v18  ;;  %v4214_v42 = vmul.f32 0.70710677, %v4198_v11  ;;  %v4206_v30 = vmul.f32 0.5, %v4198_v11 }
 0x521   : > { %v4185_v27 = vadd.f32 %v4825_v7, %v4170_v48  ;;  %v5668_v21 = vpop.f32.mrb[150].mxu1  ;;  %5760 = verf.f32 %v4214_v42 }
 0x522   : > { %v4140_v34 = vpop.f32.mrb[151].mxu1  ;;  %v4199_v52 = vld [vmem:[#allocation3 + $0x10] sm:$0xff] }
 0x523   : > { %4193 = vst.msk [vmem:[#allocation3 + $0x20] sm:$0xff] %vm901_vm1, %v4185_v27  ;;  %v4171_v4 = vadd.f32 %v4140_v34, %v4013_v6  ;;  %v4215_v26 = vmul.f32 0.70710677, %v4199_v52  ;;  %v4207_v32 = vmul.f32 0.5, %v4199_v52  ;;  %v4826_v21 = vld [vmem:[%s7204_s11] ss:$0 sm:$0xff] }
 0x525   : > { %v4186_v13 = vadd.f32 %v4825_v7, %v4171_v4  ;;  %v5671_v17 = vpop.f32.mrb[152].mxu1  ;;  %5762 = verf.f32 %v4215_v26 }
 0x526   : > { %v4149_v3 = vpop.f32.mrb[153].mxu1  ;;  %v4200_v22 = vld [vmem:[#allocation3 + $0x18] sm:$0xff] }
 0x527   : > { %v5759_v36 = vpop.eup %5758  ;;  %4194 = vst.msk [vmem:[#allocation3 + $0x28] sm:$0xff] %vm901_vm1, %v4186_v13  ;;  %v4172_v0 = vadd.f32 %v4149_v3, %v4014_v58  ;;  %v4216_v59 = vmul.f32 0.70710677, %v4200_v22  ;;  %v4208_v15 = vmul.f32 0.5, %v4200_v22 }
 0x528   : > { %v4229_v25 = vadd.f32 1.0, %v5759_v36 }
 0x529   : > { %v4187_v63 = vadd.f32 %v4825_v7, %v4172_v0  ;;  %v5674_v47 = vpop.f32.mrb[154].mxu1  ;;  %5764 = verf.f32 %v4216_v59 }
 0x52a   : > { %v4158_v24 = vpop.f32.mrb[155].mxu1  ;;  %v4237_v18 = vmul.f32 %v4229_v25, %v4205_v61  ;;  %v4201_v8 = vld [vmem:[#allocation3 + $0x20] sm:$0xff] }
 0x52b   : > { %v5761_v53 = vpop.eup %5760  ;;  %4195 = vst.msk [vmem:[#allocation3 + $0x30] sm:$0xff] %vm901_vm1, %v4187_v63  ;;  %v4173_v56 = vadd.f32 %v4158_v24, %v4015_v35  ;;  %v4217_v62 = vmul.f32 0.70710677, %v4201_v8  ;;  %v4209_v60 = vmul.f32 0.5, %v4201_v8 }
 0x52c   : > { %5677 = vmatprep.mubr.msk.f32.mxu0 %vm901_vm1, %v4237_v18  ;;  %v4230_v6 = vadd.f32 1.0, %v5761_v53 }
 0x52d   : > { %v4188_v19 = vadd.f32 %v4825_v7, %v4173_v56  ;;  %5766 = verf.f32 %v4217_v62 }
 0x52e   : > { %v4238_v46 = vmul.f32 %v4230_v6, %v4206_v30  ;;  %v4202_v55 = vld [vmem:[#allocation3 + $0x28] sm:$0xff] }
 0x52f   : > { %v5763_v58 = vpop.eup %5762  ;;  %4196 = vst.msk [vmem:[#allocation3 + $0x38] sm:$0xff] %vm901_vm1, %v4188_v19  ;;  %v4218_v2 = vmul.f32 0.70710677, %v4202_v55  ;;  %v4210_v50 = vmul.f32 0.5, %v4202_v55 }
 0x530   : > { %5678 = vmatmul.mubr.msk.f32.vlgmr.msra.gmra.mrb[148].mxu0 %vm901_vm1, %v4238_v46  ;;  %v4231_v23 = vadd.f32 1.0, %v5763_v58 }
 0x531   : > { %5768 = verf.f32 %v4218_v2 }
 0x532   : > { %v4239_v57 = vmul.f32 %v4231_v23, %v4207_v32  ;;  %v4203_v35 = vld [vmem:[#allocation3 + $0x30] sm:$0xff] }
 0x533   : > { %v5765_v33 = vpop.eup %5764  ;;  %v4219_v20 = vmul.f32 0.70710677, %v4203_v35  ;;  %v4211_v14 = vmul.f32 0.5, %v4203_v35 }
 0x534   : > { %5680 = vmatprep.mubr.msk.f32.mxu0 %vm901_vm1, %v4239_v57  ;;  %v4232_v7 = vadd.f32 1.0, %v5765_v33 }
 0x535   : > { %5770 = verf.f32 %v4219_v20 }
 0x536   : > { %v4240_v54 = vmul.f32 %v4232_v7, %v4208_v15  ;;  %v4204_v12 = vld [vmem:[#allocation3 + $0x38] sm:$0xff] }
 0x537   : > { %v5767_v31 = vpop.eup %5766  ;;  %v4220_v28 = vmul.f32 0.70710677, %v4204_v12  ;;  %v4212_v48 = vmul.f32 0.5, %v4204_v12 }
 0x538   : > { %5681 = vmatmul.mubr.msk.f32.gmra.mrb[150].mxu0 %vm901_vm1, %v4240_v54  ;;  %v4233_v44 = vadd.f32 1.0, %v5767_v31 }
 0x539   : > { %5772 = verf.f32 %v4220_v28 }
 0x53a   : > { %v4241_v16 = vmul.f32 %v4233_v44, %v4209_v60 }
 0x53b   : > { %v5769_v29 = vpop.eup %5768 }
 0x53c   : > { %5683 = vmatprep.mubr.msk.f32.mxu0 %vm901_vm1, %v4241_v16  ;;  %v4234_v1 = vadd.f32 1.0, %v5769_v29 }
 0x53e   : > { %v4242_v5 = vmul.f32 %v4234_v1, %v4210_v50 }
 0x53f   : > { %v5771_v10 = vpop.eup %5770 }
 0x540   : > { %5684 = vmatmul.mubr.msk.f32.gmra.mrb[152].mxu0 %vm901_vm1, %v4242_v5  ;;  %v4235_v9 = vadd.f32 1.0, %v5771_v10 }
 0x542   : > { %v4243_v49 = vmul.f32 %v4235_v9, %v4211_v14 }
 0x543   : > { %v5773_v11 = vpop.eup %5772 }
 0x544   : > { %5686 = vmatprep.mubr.msk.f32.mxu0 %vm901_vm1, %v4243_v49  ;;  %v4236_v42 = vadd.f32 1.0, %v5773_v11 }
 0x546   : > { %v4244_v27 = vmul.f32 %v4236_v42, %v4212_v48 }
 0x548   : > { %5687 = vmatmul.mubr.msk.f32.gmra.mrb[154].mxu0 %vm901_vm1, %v4244_v27 }
 0x603   : > { %v5679_v34 = vpop.f32.mrb[148].mxu0 }
 0x604   : > { %v4352_v52 = vadd.f32 %v5679_v34, %v4826_v21  ;;  %v4346_v4 = vpop.f32.mrb[149].mxu0 }
 0x605   : > { %v4347_v26 = vadd.f32 %v4826_v21, %v4346_v4 }
 0x606   : > { %v4386_v13 = vadd.f32 %v4352_v52, %v5924_v37 }
 0x607   : > { %v4385_v17 = vadd.f32 %v4347_v26, %v5928_v39 }
 0x608   : > { %4394 = vst.msk [vmem:[%s441_s20 + $0x8] sm:$0xff] %vm452_vm0, %v4386_v13 }
 0x609   : > { %4393 = vst.msk [vmem:[%s441_s20] sm:$0xff] %vm452_vm0, %v4385_v17 }
 0x60b   : > { %v5682_v3 = vpop.f32.mrb[150].mxu0 }
 0x60c   : > { %v4362_v22 = vadd.f32 %v5682_v3, %v4826_v21  ;;  %v4356_v36 = vpop.f32.mrb[151].mxu0 }
 0x60d   : > { %v4357_v0 = vadd.f32 %v4826_v21, %v4356_v36 }
 0x60e   : > { %v4388_v59 = vadd.f32 %v4362_v22, %v5932_v41 }
 0x60f   : > { %v4387_v61 = vadd.f32 %v4357_v0, %v5930_v40 }
 0x610   : > { %4396 = vst.msk [vmem:[%s441_s20 + $0x18] sm:$0xff] %vm452_vm0, %v4388_v59 }
 0x611   : > { %4395 = vst.msk [vmem:[%s441_s20 + $0x10] sm:$0xff] %vm452_vm0, %v4387_v61 }
 0x613   : > { %v5685_v25 = vpop.f32.mrb[152].mxu0 }
 0x614   : > { %v4372_v37 = vadd.f32 %v5685_v25, %v4826_v21  ;;  %v4366_v63 = vpop.f32.mrb[153].mxu0 }
 0x615   : > { %v4367_v39 = vadd.f32 %v4826_v21, %v4366_v63 }
 0x616   : > { %v4390_v47 = vadd.f32 %v4372_v37, %v5935_v43 }
 0x617   : > { %v4389_v24 = vadd.f32 %v4367_v39, %v5926_v38 }
 0x618   : > { %4398 = vst.msk [vmem:[%s441_s20 + $0x28] sm:$0xff] %vm452_vm0, %v4390_v47 }
 0x619   : > { %4397 = vst.msk [vmem:[%s441_s20 + $0x20] sm:$0xff] %vm452_vm0, %v4389_v24 }
 0x61b   : > { %v5688_v18 = vpop.f32.mrb[154].mxu0 }
 0x61c   : > { %v4382_v41 = vadd.f32 %v5688_v18, %v4826_v21  ;;  %v4376_v8 = vpop.f32.mrb[155].mxu0 }
 0x61d   : > { %v4377_v40 = vadd.f32 %v4826_v21, %v4376_v8 }
 0x61e   : > { %v4392_v53 = vadd.f32 %v4382_v41, %v5944_v51 }
 0x61f   : > { %v4391_v56 = vadd.f32 %v4377_v40, %v5937_v45 }
 0x620   : > { %4400 = vst.msk [vmem:[%s441_s20 + $0x38] sm:$0xff] %vm452_vm0, %v4392_v53 }
 0x621   : > { %4399 = vst.msk [vmem:[%s441_s20 + $0x30] sm:$0xff] %vm452_vm0, %v4391_v56 }
 0x622 PF: > { %s22_s21 = sadd.s32 1, %s5780_s21  }
 0x623   : > { %p19_p4 = scmp.ge.s32.totalorder %s22_s21, 4  }
 0x625   :  { %21 = sbr.rel (!%p19_p4) target bundleno = 1 (0x1), region = 120 }

</bundles_post_ra>
